<compile_context>
chip_gen: v5e
topology: v5e:2x2
jax: 0.10.0
libtpu: 0.0.40
codegen_flags: <defaults>
</compile_context>

<pallas_src>
import functools

import jax
import jax.numpy as jnp
from jax import lax
from jax.experimental import pallas as pl
from jax.experimental.pallas import tpu as pltpu


def _round_up(x, m):
    return (x + m - 1) // m * m


def _double_conv_kernel(x_ref, w1_ref, b1_ref, w2_ref, b2_ref, o_ref, mid_ref,
                        *, H, W, P):
    """One image per grid step (shift-and-matmul direct 3x3 conv, twice).

    Layouts (channels on lanes, flattened padded (h, w) on the sublane/M axis):
      x_ref  : ((H+3)*Wp, Ci) bf16  zero-padded input image, row-major flat
      w1_ref : (9, Ci, Co)    bf16  conv1 tap weights, BN1 scale folded in
      b1_ref : (1, Co)        f32   BN1 bias
      w2_ref : (9, Co, Co)    bf16  conv2 tap weights, BN2 scale folded in
      b2_ref : (1, Co)        f32   BN2 bias
      o_ref  : (H*Wp, Co)     f32   output; columns w >= W of each image row
                                    are don't-care and sliced off by the wrapper
      mid_ref: (P + H*Wp + P, Co) bf16 scratch; the padded conv1 activation
               starts at sublane offset P (P = Wp+1 rounded up to 16 so the
               bulk store is sublane-tile aligned).
    """
    Wp = W + 2
    M = H * Wp
    Co = o_ref.shape[-1]

    # ---- conv1: 9 shifted ref slices x dense (Ci, Co) tap weights on the MXU --
    acc = jnp.zeros((M, Co), jnp.float32)
    for dy in range(3):
        for dx in range(3):
            off = dy * Wp + dx
            acc += jnp.dot(x_ref[off:off + M, :], w1_ref[dy * 3 + dx],
                           preferred_element_type=jnp.float32)

    # BN1 (scale pre-folded into w1) + ReLU; zero the two width-pad columns
    # (w in {W, W+1}) so they land as the zero padding of the intermediate.
    col = lax.broadcasted_iota(jnp.int32, (M, 1), 0) % Wp
    y1 = jnp.where(col < W, jnp.maximum(acc + b1_ref[...], 0.0), 0.0)

    # Rewrite the WHOLE scratch every step (no cross-iteration dependence, so
    # the "parallel" grid axis is safe on multi-TC chips): zero the leading and
    # trailing pad bands, then store the interior at the aligned offset P.
    mid_ref[0:P, :] = jnp.zeros((P, Co), mid_ref.dtype)
    mid_ref[P + M:P + M + P, :] = jnp.zeros((P, Co), mid_ref.dtype)
    mid_ref[P:P + M, :] = y1.astype(mid_ref.dtype)

    # ---- conv2: same shift-and-matmul against the padded intermediate ----
    base = P - (Wp + 1)   # physical offset of logical padded flat index 0
    acc = jnp.zeros((M, Co), jnp.float32)
    for dy in range(3):
        for dx in range(3):
            off = base + dy * Wp + dx
            acc += jnp.dot(mid_ref[off:off + M, :], w2_ref[dy * 3 + dx],
                           preferred_element_type=jnp.float32)

    # BN2 (scale pre-folded) + ReLU.
    o_ref[...] = jnp.maximum(acc + b2_ref[...], 0.0)


def double_conv(x_nhwc, w1_hwio, scale1, bias1, w2_hwio, scale2, bias2,
                mxu_dtype=jnp.bfloat16):
    """x_nhwc: (N, H, W, Cin) f32; w: HWIO f32; scale/bias: folded BN (Cout,).

    Returns (N, H, W, Cout) f32.
    """
    N, H, W, Ci = x_nhwc.shape
    Co = w1_hwio.shape[-1]
    Wp = W + 2
    M = H * Wp
    Lx = (H + 3) * Wp            # 1 top + H interior + 2 bottom pad rows
    P = _round_up(Wp + 1, 16)    # leading pad of the intermediate scratch
    Lmid = P + M + P

    # Zero pad once in HBM (1 row top, 2 rows bottom so every shifted slice is
    # in bounds; 1 column each side), flatten (h, w) onto the sublane/M axis,
    # cast the MXU operand to bf16 once.
    x_pad = jnp.pad(x_nhwc, ((0, 0), (1, 2), (1, 1), (0, 0)))
    x_flat = x_pad.reshape(N, Lx, Ci).astype(mxu_dtype)

    # Fold the BN scale into the conv weights in f32, then cast once to bf16.
    w1_taps = (w1_hwio * scale1.reshape(1, 1, 1, Co)).reshape(9, Ci, Co)
    w2_taps = (w2_hwio * scale2.reshape(1, 1, 1, Co)).reshape(9, Co, Co)
    w1_taps = w1_taps.astype(mxu_dtype)
    w2_taps = w2_taps.astype(mxu_dtype)
    b1 = bias1.reshape(1, Co).astype(jnp.float32)
    b2 = bias2.reshape(1, Co).astype(jnp.float32)

    grid_spec = pltpu.PrefetchScalarGridSpec(
        num_scalar_prefetch=0,
        grid=(N,),
        in_specs=[
            pl.BlockSpec((None, Lx, Ci), lambda n: (n, 0, 0)),
            pl.BlockSpec((9, Ci, Co), lambda n: (0, 0, 0)),
            pl.BlockSpec((1, Co), lambda n: (0, 0)),
            pl.BlockSpec((9, Co, Co), lambda n: (0, 0, 0)),
            pl.BlockSpec((1, Co), lambda n: (0, 0)),
        ],
        out_specs=pl.BlockSpec((None, M, Co), lambda n: (n, 0, 0)),
        scratch_shapes=[pltpu.VMEM((Lmid, Co), mxu_dtype)],
    )

    itemsize = jnp.dtype(mxu_dtype).itemsize
    flops = 2 * N * 9 * M * (Ci * Co + Co * Co)
    bytes_accessed = (N * Lx * Ci * itemsize
                      + (w1_taps.size + w2_taps.size) * itemsize
                      + (b1.size + b2.size) * 4
                      + N * M * Co * 4)
    cost = pl.CostEstimate(flops=flops, transcendentals=0,
                           bytes_accessed=bytes_accessed)

    out_flat = pl.pallas_call(
        functools.partial(_double_conv_kernel, H=H, W=W, P=P),
        out_shape=jax.ShapeDtypeStruct((N, M, Co), jnp.float32),
        grid_spec=grid_spec,
        compiler_params=pltpu.CompilerParams(
            dimension_semantics=("parallel",)),
        cost_estimate=cost,
    )(x_flat, w1_taps, b1, w2_taps, b2)

    # Drop the two width-pad columns carried through the flattened layout.
    return out_flat.reshape(N, H, Wp, Co)[:, :, :W, :]


def reference_double_conv(x_nhwc, w1_eff, b1, w2_eff, b2, mirror_bf16=True):
    """Pure-JAX reference using the BN-folded weights.

    mirror_bf16=True replicates the kernel's bf16 operand / bf16 intermediate
    rounding (f32 accumulation), so the comparison can be tight.
    """
    dn = ("NHWC", "HWIO", "NHWC")
    op_dtype = jnp.bfloat16 if mirror_bf16 else jnp.float32

    def conv(v, w):
        v = v.astype(op_dtype).astype(jnp.float32)
        w = w.astype(op_dtype).astype(jnp.float32)
        return lax.conv_general_dilated(v, w, (1, 1), "SAME",
                                        dimension_numbers=dn,
                                        preferred_element_type=jnp.float32)

    y = jnp.maximum(conv(x_nhwc, w1_eff) + b1.reshape(1, 1, 1, -1), 0.0)
    if mirror_bf16:
        y = y.astype(jnp.bfloat16).astype(jnp.float32)
    return jnp.maximum(conv(y, w2_eff) + b2.reshape(1, 1, 1, -1), 0.0)


if __name__ == "__main__":
    N, Cin, Cout, H, W = 2, 4, 8, 16, 16
    eps = 1e-5  # PyTorch BatchNorm2d default

    key = jax.random.PRNGKey(0)
    kx, kw1, kw2, kg1, kb1, km1, kv1, kg2, kb2, km2, kv2 = jax.random.split(key, 11)

    # Input in PyTorch NCHW, converted to NHWC at the wrapper boundary.
    x_nchw = jax.random.normal(kx, (N, Cin, H, W), jnp.float32)
    x_nhwc = jnp.transpose(x_nchw, (0, 2, 3, 1))

    # Conv weights in PyTorch OIHW layout, converted to HWIO.
    w1_oihw = jax.random.normal(kw1, (Cout, Cin, 3, 3), jnp.float32) * 0.2
    w2_oihw = jax.random.normal(kw2, (Cout, Cout, 3, 3), jnp.float32) * 0.2
    w1 = jnp.transpose(w1_oihw, (2, 3, 1, 0))  # HWIO
    w2 = jnp.transpose(w2_oihw, (2, 3, 1, 0))  # HWIO

    # Deterministic BatchNorm parameters (inference mode), folded to scale/bias.
    gamma1 = 1.0 + 0.1 * jax.random.normal(kg1, (Cout,), jnp.float32)
    beta1 = 0.1 * jax.random.normal(kb1, (Cout,), jnp.float32)
    mean1 = 0.1 * jax.random.normal(km1, (Cout,), jnp.float32)
    var1 = jnp.abs(jax.random.normal(kv1, (Cout,), jnp.float32)) + 0.5
    gamma2 = 1.0 + 0.1 * jax.random.normal(kg2, (Cout,), jnp.float32)
    beta2 = 0.1 * jax.random.normal(kb2, (Cout,), jnp.float32)
    mean2 = 0.1 * jax.random.normal(km2, (Cout,), jnp.float32)
    var2 = jnp.abs(jax.random.normal(kv2, (Cout,), jnp.float32)) + 0.5

    scale1 = gamma1 / jnp.sqrt(var1 + eps)
    bias1 = beta1 - mean1 * scale1
    scale2 = gamma2 / jnp.sqrt(var2 + eps)
    bias2 = beta2 - mean2 * scale2

    out = double_conv(x_nhwc, w1, scale1, bias1, w2, scale2, bias2)
    out = jax.block_until_ready(out)
    assert out.shape == (N, H, W, Cout)

    # BN-folded weights for the references (fold done in f32, same as wrapper).
    w1_eff = w1 * scale1.reshape(1, 1, 1, -1)
    w2_eff = w2 * scale2.reshape(1, 1, 1, -1)

    # Tight check against a reference that mirrors the kernel's bf16 rounding:
    # only f32 accumulation-order differences (plus rare 1-ulp bf16 flips of
    # the intermediate) remain, so real layout/index/scale bugs are caught.
    ref_bf16 = reference_double_conv(x_nhwc, w1_eff, bias1, w2_eff, bias2,
                                     mirror_bf16=True)
    max_err = float(jnp.max(jnp.abs(out - ref_bf16)))
    assert max_err < 2e-2, f"max |err| vs bf16-mirrored reference = {max_err}"

    # Looser sanity check against the full-f32 reference (covers the bf16
    # operand/intermediate quantization of the kernel).
    ref_f32 = reference_double_conv(x_nhwc, w1_eff, bias1, w2_eff, bias2,
                                    mirror_bf16=False)
    assert jnp.allclose(out, ref_f32, rtol=1e-1, atol=1e-1), \
        "mismatch vs f32 reference"

    print("KERNEL_OK")
</pallas_src>

<mosaic_0001>
module attributes {stable_mosaic.version = 11 : i64} {
  func.func @_double_conv_kernel(%arg0: i32, %arg1: memref<1x342x4xbf16, #tpu.memory_space<vmem>>, %arg2: memref<9x4x8xbf16, #tpu.memory_space<vmem>>, %arg3: memref<1x8xf32, #tpu.memory_space<vmem>>, %arg4: memref<9x8x8xbf16, #tpu.memory_space<vmem>>, %arg5: memref<1x8xf32, #tpu.memory_space<vmem>>, %arg6: memref<1x288x8xf32, #tpu.memory_space<vmem>>, %arg7: memref<352x8xbf16, #tpu.memory_space<vmem>>) attributes {dimension_semantics = [#tpu.dimension_semantics<parallel>], iteration_bounds = array<i64: 2>, scalar_prefetch = 0 : i64, scratch_operands = 1 : i64, tpu.core_type = #tpu.core_type<tc>, window_params = [{transform_indices = @transform_0, window_bounds = array<i64: 1, 342, 4>}, {pipeline_mode = #tpu.pipeline_mode<synchronous>, transform_indices = @transform_1, window_bounds = array<i64: 9, 4, 8>}, {pipeline_mode = #tpu.pipeline_mode<synchronous>, transform_indices = @transform_2, window_bounds = array<i64: 1, 8>}, {pipeline_mode = #tpu.pipeline_mode<synchronous>, transform_indices = @transform_3, window_bounds = array<i64: 9, 8, 8>}, {pipeline_mode = #tpu.pipeline_mode<synchronous>, transform_indices = @transform_4, window_bounds = array<i64: 1, 8>}, {transform_indices = @transform_5, window_bounds = array<i64: 1, 288, 8>}]} {
    %cst = arith.constant 0.000000e+00 : f32
    %0 = vector.broadcast %cst : f32 to vector<288x8xf32>
    %c0 = arith.constant 0 : index
    %c0_0 = arith.constant 0 : index
    %c0_1 = arith.constant 0 : index
    %1 = vector.load %arg1[%c0, %c0_0, %c0_1] : memref<1x342x4xbf16, #tpu.memory_space<vmem>>, vector<1x288x4xbf16>
    %2 = vector.shape_cast %1 : vector<1x288x4xbf16> to vector<288x4xbf16>
    %c0_2 = arith.constant 0 : index
    %c0_3 = arith.constant 0 : index
    %c0_4 = arith.constant 0 : index
    %3 = vector.load %arg2[%c0_2, %c0_3, %c0_4] : memref<9x4x8xbf16, #tpu.memory_space<vmem>>, vector<1x4x8xbf16>
    %4 = vector.shape_cast %3 : vector<1x4x8xbf16> to vector<4x8xbf16>
    %cst_5 = arith.constant dense<0.000000e+00> : vector<288x8xf32>
    %5 = tpu.matmul %2, %4, %cst_5 {dimension_numbers = #tpu.dot_dimension_numbers<[1], [0], [0], [1], [0, 0, 1, 1], [], []>} : vector<288x4xbf16>, vector<4x8xbf16>, vector<288x8xf32> -> vector<288x8xf32>
    %6 = arith.addf %0, %5 : vector<288x8xf32>
    %c0_6 = arith.constant 0 : index
    %c1 = arith.constant 1 : index
    %c0_7 = arith.constant 0 : index
    %7 = vector.load %arg1[%c0_6, %c1, %c0_7] : memref<1x342x4xbf16, #tpu.memory_space<vmem>>, vector<1x288x4xbf16>
    %8 = vector.shape_cast %7 : vector<1x288x4xbf16> to vector<288x4xbf16>
    %c1_8 = arith.constant 1 : index
    %c0_9 = arith.constant 0 : index
    %c0_10 = arith.constant 0 : index
    %9 = vector.load %arg2[%c1_8, %c0_9, %c0_10] : memref<9x4x8xbf16, #tpu.memory_space<vmem>>, vector<1x4x8xbf16>
    %10 = vector.shape_cast %9 : vector<1x4x8xbf16> to vector<4x8xbf16>
    %cst_11 = arith.constant dense<0.000000e+00> : vector<288x8xf32>
    %11 = tpu.matmul %8, %10, %cst_11 {dimension_numbers = #tpu.dot_dimension_numbers<[1], [0], [0], [1], [0, 0, 1, 1], [], []>} : vector<288x4xbf16>, vector<4x8xbf16>, vector<288x8xf32> -> vector<288x8xf32>
    %12 = arith.addf %6, %11 : vector<288x8xf32>
    %c0_12 = arith.constant 0 : index
    %c2 = arith.constant 2 : index
    %c0_13 = arith.constant 0 : index
    %13 = vector.load %arg1[%c0_12, %c2, %c0_13] : memref<1x342x4xbf16, #tpu.memory_space<vmem>>, vector<1x288x4xbf16>
    %14 = vector.shape_cast %13 : vector<1x288x4xbf16> to vector<288x4xbf16>
    %c2_14 = arith.constant 2 : index
    %c0_15 = arith.constant 0 : index
    %c0_16 = arith.constant 0 : index
    %15 = vector.load %arg2[%c2_14, %c0_15, %c0_16] : memref<9x4x8xbf16, #tpu.memory_space<vmem>>, vector<1x4x8xbf16>
    %16 = vector.shape_cast %15 : vector<1x4x8xbf16> to vector<4x8xbf16>
    %cst_17 = arith.constant dense<0.000000e+00> : vector<288x8xf32>
    %17 = tpu.matmul %14, %16, %cst_17 {dimension_numbers = #tpu.dot_dimension_numbers<[1], [0], [0], [1], [0, 0, 1, 1], [], []>} : vector<288x4xbf16>, vector<4x8xbf16>, vector<288x8xf32> -> vector<288x8xf32>
    %18 = arith.addf %12, %17 : vector<288x8xf32>
    %c0_18 = arith.constant 0 : index
    %c18 = arith.constant 18 : index
    %c0_19 = arith.constant 0 : index
    %19 = vector.load %arg1[%c0_18, %c18, %c0_19] : memref<1x342x4xbf16, #tpu.memory_space<vmem>>, vector<1x288x4xbf16>
    %20 = vector.shape_cast %19 : vector<1x288x4xbf16> to vector<288x4xbf16>
    %c3 = arith.constant 3 : index
    %c0_20 = arith.constant 0 : index
    %c0_21 = arith.constant 0 : index
    %21 = vector.load %arg2[%c3, %c0_20, %c0_21] : memref<9x4x8xbf16, #tpu.memory_space<vmem>>, vector<1x4x8xbf16>
    %22 = vector.shape_cast %21 : vector<1x4x8xbf16> to vector<4x8xbf16>
    %cst_22 = arith.constant dense<0.000000e+00> : vector<288x8xf32>
    %23 = tpu.matmul %20, %22, %cst_22 {dimension_numbers = #tpu.dot_dimension_numbers<[1], [0], [0], [1], [0, 0, 1, 1], [], []>} : vector<288x4xbf16>, vector<4x8xbf16>, vector<288x8xf32> -> vector<288x8xf32>
    %24 = arith.addf %18, %23 : vector<288x8xf32>
    %c0_23 = arith.constant 0 : index
    %c19 = arith.constant 19 : index
    %c0_24 = arith.constant 0 : index
    %25 = vector.load %arg1[%c0_23, %c19, %c0_24] : memref<1x342x4xbf16, #tpu.memory_space<vmem>>, vector<1x288x4xbf16>
    %26 = vector.shape_cast %25 : vector<1x288x4xbf16> to vector<288x4xbf16>
    %c4 = arith.constant 4 : index
    %c0_25 = arith.constant 0 : index
    %c0_26 = arith.constant 0 : index
    %27 = vector.load %arg2[%c4, %c0_25, %c0_26] : memref<9x4x8xbf16, #tpu.memory_space<vmem>>, vector<1x4x8xbf16>
    %28 = vector.shape_cast %27 : vector<1x4x8xbf16> to vector<4x8xbf16>
    %cst_27 = arith.constant dense<0.000000e+00> : vector<288x8xf32>
    %29 = tpu.matmul %26, %28, %cst_27 {dimension_numbers = #tpu.dot_dimension_numbers<[1], [0], [0], [1], [0, 0, 1, 1], [], []>} : vector<288x4xbf16>, vector<4x8xbf16>, vector<288x8xf32> -> vector<288x8xf32>
    %30 = arith.addf %24, %29 : vector<288x8xf32>
    %c0_28 = arith.constant 0 : index
    %c20 = arith.constant 20 : index
    %c0_29 = arith.constant 0 : index
    %31 = vector.load %arg1[%c0_28, %c20, %c0_29] : memref<1x342x4xbf16, #tpu.memory_space<vmem>>, vector<1x288x4xbf16>
    %32 = vector.shape_cast %31 : vector<1x288x4xbf16> to vector<288x4xbf16>
    %c5 = arith.constant 5 : index
    %c0_30 = arith.constant 0 : index
    %c0_31 = arith.constant 0 : index
    %33 = vector.load %arg2[%c5, %c0_30, %c0_31] : memref<9x4x8xbf16, #tpu.memory_space<vmem>>, vector<1x4x8xbf16>
    %34 = vector.shape_cast %33 : vector<1x4x8xbf16> to vector<4x8xbf16>
    %cst_32 = arith.constant dense<0.000000e+00> : vector<288x8xf32>
    %35 = tpu.matmul %32, %34, %cst_32 {dimension_numbers = #tpu.dot_dimension_numbers<[1], [0], [0], [1], [0, 0, 1, 1], [], []>} : vector<288x4xbf16>, vector<4x8xbf16>, vector<288x8xf32> -> vector<288x8xf32>
    %36 = arith.addf %30, %35 : vector<288x8xf32>
    %c0_33 = arith.constant 0 : index
    %c36 = arith.constant 36 : index
    %c0_34 = arith.constant 0 : index
    %37 = vector.load %arg1[%c0_33, %c36, %c0_34] : memref<1x342x4xbf16, #tpu.memory_space<vmem>>, vector<1x288x4xbf16>
    %38 = vector.shape_cast %37 : vector<1x288x4xbf16> to vector<288x4xbf16>
    %c6 = arith.constant 6 : index
    %c0_35 = arith.constant 0 : index
    %c0_36 = arith.constant 0 : index
    %39 = vector.load %arg2[%c6, %c0_35, %c0_36] : memref<9x4x8xbf16, #tpu.memory_space<vmem>>, vector<1x4x8xbf16>
    %40 = vector.shape_cast %39 : vector<1x4x8xbf16> to vector<4x8xbf16>
    %cst_37 = arith.constant dense<0.000000e+00> : vector<288x8xf32>
    %41 = tpu.matmul %38, %40, %cst_37 {dimension_numbers = #tpu.dot_dimension_numbers<[1], [0], [0], [1], [0, 0, 1, 1], [], []>} : vector<288x4xbf16>, vector<4x8xbf16>, vector<288x8xf32> -> vector<288x8xf32>
    %42 = arith.addf %36, %41 : vector<288x8xf32>
    %c0_38 = arith.constant 0 : index
    %c37 = arith.constant 37 : index
    %c0_39 = arith.constant 0 : index
    %43 = vector.load %arg1[%c0_38, %c37, %c0_39] : memref<1x342x4xbf16, #tpu.memory_space<vmem>>, vector<1x288x4xbf16>
    %44 = vector.shape_cast %43 : vector<1x288x4xbf16> to vector<288x4xbf16>
    %c7 = arith.constant 7 : index
    %c0_40 = arith.constant 0 : index
    %c0_41 = arith.constant 0 : index
    %45 = vector.load %arg2[%c7, %c0_40, %c0_41] : memref<9x4x8xbf16, #tpu.memory_space<vmem>>, vector<1x4x8xbf16>
    %46 = vector.shape_cast %45 : vector<1x4x8xbf16> to vector<4x8xbf16>
    %cst_42 = arith.constant dense<0.000000e+00> : vector<288x8xf32>
    %47 = tpu.matmul %44, %46, %cst_42 {dimension_numbers = #tpu.dot_dimension_numbers<[1], [0], [0], [1], [0, 0, 1, 1], [], []>} : vector<288x4xbf16>, vector<4x8xbf16>, vector<288x8xf32> -> vector<288x8xf32>
    %48 = arith.addf %42, %47 : vector<288x8xf32>
    %c0_43 = arith.constant 0 : index
    %c38 = arith.constant 38 : index
    %c0_44 = arith.constant 0 : index
    %49 = vector.load %arg1[%c0_43, %c38, %c0_44] : memref<1x342x4xbf16, #tpu.memory_space<vmem>>, vector<1x288x4xbf16>
    %50 = vector.shape_cast %49 : vector<1x288x4xbf16> to vector<288x4xbf16>
    %c8 = arith.constant 8 : index
    %c0_45 = arith.constant 0 : index
    %c0_46 = arith.constant 0 : index
    %51 = vector.load %arg2[%c8, %c0_45, %c0_46] : memref<9x4x8xbf16, #tpu.memory_space<vmem>>, vector<1x4x8xbf16>
    %52 = vector.shape_cast %51 : vector<1x4x8xbf16> to vector<4x8xbf16>
    %cst_47 = arith.constant dense<0.000000e+00> : vector<288x8xf32>
    %53 = tpu.matmul %50, %52, %cst_47 {dimension_numbers = #tpu.dot_dimension_numbers<[1], [0], [0], [1], [0, 0, 1, 1], [], []>} : vector<288x4xbf16>, vector<4x8xbf16>, vector<288x8xf32> -> vector<288x8xf32>
    %54 = arith.addf %48, %53 : vector<288x8xf32>
    %55 = tpu.iota {dimensions = array<i32: 0>} : vector<288x1xi32>
    %c18_i32 = arith.constant 18 : i32
    %c0_i32 = arith.constant 0 : i32
    %56 = arith.cmpi eq, %c18_i32, %c0_i32 : i32
    %c1_i32 = arith.constant 1 : i32
    %57 = arith.select %56, %c1_i32, %c18_i32 : i32
    %58 = vector.broadcast %57 : i32 to vector<288x1xi32>
    %59 = arith.remsi %55, %58 : vector<288x1xi32>
    %c0_i32_48 = arith.constant 0 : i32
    %60 = vector.broadcast %c0_i32_48 : i32 to vector<288x1xi32>
    %61 = arith.cmpi ne, %59, %60 : vector<288x1xi32>
    %c0_i32_49 = arith.constant 0 : i32
    %62 = vector.broadcast %c0_i32_49 : i32 to vector<288x1xi32>
    %63 = arith.cmpi slt, %59, %62 : vector<288x1xi32>
    %c0_i32_50 = arith.constant 0 : i32
    %64 = arith.cmpi slt, %57, %c0_i32_50 : i32
    %65 = vector.broadcast %64 : i1 to vector<288x1xi1>
    %66 = vector.broadcast %65 : vector<288x1xi1> to vector<288x1xi1>
    %67 = arith.xori %63, %66 : vector<288x1xi1>
    %68 = arith.andi %67, %61 : vector<288x1xi1>
    %69 = vector.broadcast %57 : i32 to vector<288x1xi32>
    %70 = arith.addi %59, %69 : vector<288x1xi32>
    %71 = arith.select %68, %70, %59 : vector<288x1xi1>, vector<288x1xi32>
    %c16_i32 = arith.constant 16 : i32
    %72 = vector.broadcast %c16_i32 : i32 to vector<288x1xi32>
    %73 = arith.cmpi slt, %71, %72 : vector<288x1xi32>
    %c0_51 = arith.constant 0 : index
    %c0_52 = arith.constant 0 : index
    %74 = vector.load %arg3[%c0_51, %c0_52] : memref<1x8xf32, #tpu.memory_space<vmem>>, vector<1x8xf32>
    %75 = vector.broadcast %74 : vector<1x8xf32> to vector<288x8xf32>
    %76 = arith.addf %54, %75 : vector<288x8xf32>
    %cst_53 = arith.constant 0.000000e+00 : f32
    %77 = vector.broadcast %cst_53 : f32 to vector<288x8xf32>
    %78 = arith.maximumf %76, %77 : vector<288x8xf32>
    %cst_54 = arith.constant 0.000000e+00 : f32
    %79 = vector.shape_cast %73 : vector<288x1xi1> to vector<288x1xi1>
    %80 = vector.broadcast %79 : vector<288x1xi1> to vector<288x8xi1>
    %81 = vector.broadcast %cst_54 : f32 to vector<288x8xf32>
    %82 = arith.select %80, %78, %81 : vector<288x8xi1>, vector<288x8xf32>
    %cst_55 = arith.constant 0.000000e+00 : bf16
    %83 = vector.broadcast %cst_55 : bf16 to vector<32x8xbf16>
    %c0_56 = arith.constant 0 : index
    %c0_57 = arith.constant 0 : index
    %84 = vector.load %arg7[%c0_56, %c0_57] : memref<352x8xbf16, #tpu.memory_space<vmem>>, vector<32x8xbf16>
    tpu.vector_store %arg7[%c0_56, %c0_57], %83 {strides = array<i32>} : memref<352x8xbf16, #tpu.memory_space<vmem>>, vector<32x8xbf16>,
    %cst_58 = arith.constant 0.000000e+00 : bf16
    %85 = vector.broadcast %cst_58 : bf16 to vector<32x8xbf16>
    %c320 = arith.constant 320 : index
    %c0_59 = arith.constant 0 : index
    %86 = vector.load %arg7[%c320, %c0_59] : memref<352x8xbf16, #tpu.memory_space<vmem>>, vector<32x8xbf16>
    tpu.vector_store %arg7[%c320, %c0_59], %85 {strides = array<i32>} : memref<352x8xbf16, #tpu.memory_space<vmem>>, vector<32x8xbf16>,
    %87 = arith.truncf %82 : vector<288x8xf32> to vector<288x8xbf16>
    %c32 = arith.constant 32 : index
    %c0_60 = arith.constant 0 : index
    %88 = vector.load %arg7[%c32, %c0_60] : memref<352x8xbf16, #tpu.memory_space<vmem>>, vector<288x8xbf16>
    tpu.vector_store %arg7[%c32, %c0_60], %87 {strides = array<i32>} : memref<352x8xbf16, #tpu.memory_space<vmem>>, vector<288x8xbf16>,
    %cst_61 = arith.constant 0.000000e+00 : f32
    %89 = vector.broadcast %cst_61 : f32 to vector<288x8xf32>
    %c13 = arith.constant 13 : index
    %c0_62 = arith.constant 0 : index
    %90 = vector.load %arg7[%c13, %c0_62] : memref<352x8xbf16, #tpu.memory_space<vmem>>, vector<288x8xbf16>
    %c0_63 = arith.constant 0 : index
    %c0_64 = arith.constant 0 : index
    %c0_65 = arith.constant 0 : index
    %91 = vector.load %arg4[%c0_63, %c0_64, %c0_65] : memref<9x8x8xbf16, #tpu.memory_space<vmem>>, vector<1x8x8xbf16>
    %92 = vector.shape_cast %91 : vector<1x8x8xbf16> to vector<8x8xbf16>
    %cst_66 = arith.constant dense<0.000000e+00> : vector<288x8xf32>
    %93 = tpu.matmul %90, %92, %cst_66 {dimension_numbers = #tpu.dot_dimension_numbers<[1], [0], [0], [1], [0, 0, 1, 1], [], []>} : vector<288x8xbf16>, vector<8x8xbf16>, vector<288x8xf32> -> vector<288x8xf32>
    %94 = arith.addf %89, %93 : vector<288x8xf32>
    %c14 = arith.constant 14 : index
    %c0_67 = arith.constant 0 : index
    %95 = vector.load %arg7[%c14, %c0_67] : memref<352x8xbf16, #tpu.memory_space<vmem>>, vector<288x8xbf16>
    %c1_68 = arith.constant 1 : index
    %c0_69 = arith.constant 0 : index
    %c0_70 = arith.constant 0 : index
    %96 = vector.load %arg4[%c1_68, %c0_69, %c0_70] : memref<9x8x8xbf16, #tpu.memory_space<vmem>>, vector<1x8x8xbf16>
    %97 = vector.shape_cast %96 : vector<1x8x8xbf16> to vector<8x8xbf16>
    %cst_71 = arith.constant dense<0.000000e+00> : vector<288x8xf32>
    %98 = tpu.matmul %95, %97, %cst_71 {dimension_numbers = #tpu.dot_dimension_numbers<[1], [0], [0], [1], [0, 0, 1, 1], [], []>} : vector<288x8xbf16>, vector<8x8xbf16>, vector<288x8xf32> -> vector<288x8xf32>
    %99 = arith.addf %94, %98 : vector<288x8xf32>
    %c15 = arith.constant 15 : index
    %c0_72 = arith.constant 0 : index
    %100 = vector.load %arg7[%c15, %c0_72] : memref<352x8xbf16, #tpu.memory_space<vmem>>, vector<288x8xbf16>
    %c2_73 = arith.constant 2 : index
    %c0_74 = arith.constant 0 : index
    %c0_75 = arith.constant 0 : index
    %101 = vector.load %arg4[%c2_73, %c0_74, %c0_75] : memref<9x8x8xbf16, #tpu.memory_space<vmem>>, vector<1x8x8xbf16>
    %102 = vector.shape_cast %101 : vector<1x8x8xbf16> to vector<8x8xbf16>
    %cst_76 = arith.constant dense<0.000000e+00> : vector<288x8xf32>
    %103 = tpu.matmul %100, %102, %cst_76 {dimension_numbers = #tpu.dot_dimension_numbers<[1], [0], [0], [1], [0, 0, 1, 1], [], []>} : vector<288x8xbf16>, vector<8x8xbf16>, vector<288x8xf32> -> vector<288x8xf32>
    %104 = arith.addf %99, %103 : vector<288x8xf32>
    %c31 = arith.constant 31 : index
    %c0_77 = arith.constant 0 : index
    %105 = vector.load %arg7[%c31, %c0_77] : memref<352x8xbf16, #tpu.memory_space<vmem>>, vector<288x8xbf16>
    %c3_78 = arith.constant 3 : index
    %c0_79 = arith.constant 0 : index
    %c0_80 = arith.constant 0 : index
    %106 = vector.load %arg4[%c3_78, %c0_79, %c0_80] : memref<9x8x8xbf16, #tpu.memory_space<vmem>>, vector<1x8x8xbf16>
    %107 = vector.shape_cast %106 : vector<1x8x8xbf16> to vector<8x8xbf16>
    %cst_81 = arith.constant dense<0.000000e+00> : vector<288x8xf32>
    %108 = tpu.matmul %105, %107, %cst_81 {dimension_numbers = #tpu.dot_dimension_numbers<[1], [0], [0], [1], [0, 0, 1, 1], [], []>} : vector<288x8xbf16>, vector<8x8xbf16>, vector<288x8xf32> -> vector<288x8xf32>
    %109 = arith.addf %104, %108 : vector<288x8xf32>
    %c32_82 = arith.constant 32 : index
    %c0_83 = arith.constant 0 : index
    %110 = vector.load %arg7[%c32_82, %c0_83] : memref<352x8xbf16, #tpu.memory_space<vmem>>, vector<288x8xbf16>
    %c4_84 = arith.constant 4 : index
    %c0_85 = arith.constant 0 : index
    %c0_86 = arith.constant 0 : index
    %111 = vector.load %arg4[%c4_84, %c0_85, %c0_86] : memref<9x8x8xbf16, #tpu.memory_space<vmem>>, vector<1x8x8xbf16>
    %112 = vector.shape_cast %111 : vector<1x8x8xbf16> to vector<8x8xbf16>
    %cst_87 = arith.constant dense<0.000000e+00> : vector<288x8xf32>
    %113 = tpu.matmul %110, %112, %cst_87 {dimension_numbers = #tpu.dot_dimension_numbers<[1], [0], [0], [1], [0, 0, 1, 1], [], []>} : vector<288x8xbf16>, vector<8x8xbf16>, vector<288x8xf32> -> vector<288x8xf32>
    %114 = arith.addf %109, %113 : vector<288x8xf32>
    %c33 = arith.constant 33 : index
    %c0_88 = arith.constant 0 : index
    %115 = vector.load %arg7[%c33, %c0_88] : memref<352x8xbf16, #tpu.memory_space<vmem>>, vector<288x8xbf16>
    %c5_89 = arith.constant 5 : index
    %c0_90 = arith.constant 0 : index
    %c0_91 = arith.constant 0 : index
    %116 = vector.load %arg4[%c5_89, %c0_90, %c0_91] : memref<9x8x8xbf16, #tpu.memory_space<vmem>>, vector<1x8x8xbf16>
    %117 = vector.shape_cast %116 : vector<1x8x8xbf16> to vector<8x8xbf16>
    %cst_92 = arith.constant dense<0.000000e+00> : vector<288x8xf32>
    %118 = tpu.matmul %115, %117, %cst_92 {dimension_numbers = #tpu.dot_dimension_numbers<[1], [0], [0], [1], [0, 0, 1, 1], [], []>} : vector<288x8xbf16>, vector<8x8xbf16>, vector<288x8xf32> -> vector<288x8xf32>
    %119 = arith.addf %114, %118 : vector<288x8xf32>
    %c49 = arith.constant 49 : index
    %c0_93 = arith.constant 0 : index
    %120 = vector.load %arg7[%c49, %c0_93] : memref<352x8xbf16, #tpu.memory_space<vmem>>, vector<288x8xbf16>
    %c6_94 = arith.constant 6 : index
    %c0_95 = arith.constant 0 : index
    %c0_96 = arith.constant 0 : index
    %121 = vector.load %arg4[%c6_94, %c0_95, %c0_96] : memref<9x8x8xbf16, #tpu.memory_space<vmem>>, vector<1x8x8xbf16>
    %122 = vector.shape_cast %121 : vector<1x8x8xbf16> to vector<8x8xbf16>
    %cst_97 = arith.constant dense<0.000000e+00> : vector<288x8xf32>
    %123 = tpu.matmul %120, %122, %cst_97 {dimension_numbers = #tpu.dot_dimension_numbers<[1], [0], [0], [1], [0, 0, 1, 1], [], []>} : vector<288x8xbf16>, vector<8x8xbf16>, vector<288x8xf32> -> vector<288x8xf32>
    %124 = arith.addf %119, %123 : vector<288x8xf32>
    %c50 = arith.constant 50 : index
    %c0_98 = arith.constant 0 : index
    %125 = vector.load %arg7[%c50, %c0_98] : memref<352x8xbf16, #tpu.memory_space<vmem>>, vector<288x8xbf16>
    %c7_99 = arith.constant 7 : index
    %c0_100 = arith.constant 0 : index
    %c0_101 = arith.constant 0 : index
    %126 = vector.load %arg4[%c7_99, %c0_100, %c0_101] : memref<9x8x8xbf16, #tpu.memory_space<vmem>>, vector<1x8x8xbf16>
    %127 = vector.shape_cast %126 : vector<1x8x8xbf16> to vector<8x8xbf16>
    %cst_102 = arith.constant dense<0.000000e+00> : vector<288x8xf32>
    %128 = tpu.matmul %125, %127, %cst_102 {dimension_numbers = #tpu.dot_dimension_numbers<[1], [0], [0], [1], [0, 0, 1, 1], [], []>} : vector<288x8xbf16>, vector<8x8xbf16>, vector<288x8xf32> -> vector<288x8xf32>
    %129 = arith.addf %124, %128 : vector<288x8xf32>
    %c51 = arith.constant 51 : index
    %c0_103 = arith.constant 0 : index
    %130 = vector.load %arg7[%c51, %c0_103] : memref<352x8xbf16, #tpu.memory_space<vmem>>, vector<288x8xbf16>
    %c8_104 = arith.constant 8 : index
    %c0_105 = arith.constant 0 : index
    %c0_106 = arith.constant 0 : index
    %131 = vector.load %arg4[%c8_104, %c0_105, %c0_106] : memref<9x8x8xbf16, #tpu.memory_space<vmem>>, vector<1x8x8xbf16>
    %132 = vector.shape_cast %131 : vector<1x8x8xbf16> to vector<8x8xbf16>
    %cst_107 = arith.constant dense<0.000000e+00> : vector<288x8xf32>
    %133 = tpu.matmul %130, %132, %cst_107 {dimension_numbers = #tpu.dot_dimension_numbers<[1], [0], [0], [1], [0, 0, 1, 1], [], []>} : vector<288x8xbf16>, vector<8x8xbf16>, vector<288x8xf32> -> vector<288x8xf32>
    %134 = arith.addf %129, %133 : vector<288x8xf32>
    %c0_108 = arith.constant 0 : index
    %c0_109 = arith.constant 0 : index
    %135 = vector.load %arg5[%c0_108, %c0_109] : memref<1x8xf32, #tpu.memory_space<vmem>>, vector<1x8xf32>
    %136 = vector.broadcast %135 : vector<1x8xf32> to vector<288x8xf32>
    %137 = arith.addf %134, %136 : vector<288x8xf32>
    %cst_110 = arith.constant 0.000000e+00 : f32
    %138 = vector.broadcast %cst_110 : f32 to vector<288x8xf32>
    %139 = arith.maximumf %137, %138 : vector<288x8xf32>
    %c0_111 = arith.constant 0 : index
    %c0_112 = arith.constant 0 : index
    %c0_113 = arith.constant 0 : index
    %140 = vector.load %arg6[%c0_111, %c0_112, %c0_113] : memref<1x288x8xf32, #tpu.memory_space<vmem>>, vector<1x288x8xf32>
    %141 = vector.shape_cast %140 : vector<1x288x8xf32> to vector<288x8xf32>
    %142 = vector.shape_cast %139 : vector<288x8xf32> to vector<1x288x8xf32>
    tpu.vector_store %arg6[%c0_111, %c0_112, %c0_113], %142 {strides = array<i32>} : memref<1x288x8xf32, #tpu.memory_space<vmem>>, vector<1x288x8xf32>,
    return
  }
  func.func @transform_0(%arg0: i32) -> (i32, i32, i32) {
    %c0_i32 = arith.constant 0 : i32
    %c0_i32_0 = arith.constant 0 : i32
    %c0_i32_1 = arith.constant 0 : i32
    return %arg0, %c0_i32, %c0_i32_0 : i32, i32, i32
  }
  func.func @transform_1(%arg0: i32) -> (i32, i32, i32) {
    %c0_i32 = arith.constant 0 : i32
    %c0_i32_0 = arith.constant 0 : i32
    %c0_i32_1 = arith.constant 0 : i32
    %c0_i32_2 = arith.constant 0 : i32
    return %c0_i32, %c0_i32_0, %c0_i32_1 : i32, i32, i32
  }
  func.func @transform_2(%arg0: i32) -> (i32, i32) {
    %c0_i32 = arith.constant 0 : i32
    %c0_i32_0 = arith.constant 0 : i32
    %c0_i32_1 = arith.constant 0 : i32
    return %c0_i32, %c0_i32_0 : i32, i32
  }
  func.func @transform_3(%arg0: i32) -> (i32, i32, i32) {
    %c0_i32 = arith.constant 0 : i32
    %c0_i32_0 = arith.constant 0 : i32
    %c0_i32_1 = arith.constant 0 : i32
    %c0_i32_2 = arith.constant 0 : i32
    return %c0_i32, %c0_i32_0, %c0_i32_1 : i32, i32, i32
  }
  func.func @transform_4(%arg0: i32) -> (i32, i32) {
    %c0_i32 = arith.constant 0 : i32
    %c0_i32_0 = arith.constant 0 : i32
    %c0_i32_1 = arith.constant 0 : i32
    return %c0_i32, %c0_i32_0 : i32, i32
  }
  func.func @transform_5(%arg0: i32) -> (i32, i32, i32) {
    %c0_i32 = arith.constant 0 : i32
    %c0_i32_0 = arith.constant 0 : i32
    %c0_i32_1 = arith.constant 0 : i32
    return %arg0, %c0_i32, %c0_i32_0 : i32, i32, i32
  }
}

</mosaic_0001>

<bundles_post_ra>
// kernel: tpu_custom_call.1
= control target key start
LH: loop header
LB: loop body
LE: loop exit
PB: predicated region body
PF: predicated region fallthrough
CT: control target
= control target key end

     0   :  { %s8980_s18 = smov 0   ;;  %s12422_s0 = inlined_call_operand.vmem [shape: bf16[2,342,4], index: 0, kind: input, shape index: {}]   ;;  %s12423_s1 = inlined_call_operand.vmem [shape: bf16[9,4,8], index: 1, kind: input, shape index: {}]   ;;  %s12424_s2 = inlined_call_operand.vmem [shape: f32[1,8], index: 2, kind: input, shape index: {}]   ;;  %s12425_s3 = inlined_call_operand.vmem [shape: bf16[9,8,8], index: 3, kind: input, shape index: {}]   ;;  %s12426_s4 = inlined_call_operand.vmem [shape: f32[1,8], index: 4, kind: input, shape index: {}]   ;;  %s12427_s5 = inlined_call_operand.vmem [shape: f32[2,288,8], index: 5, kind: output, shape index: {}]  }
   0x1 LB: > { %s7811_s19 = sadd.s32 4294967295, %s8947_s18   ;;  %p7815_p0 = scmp.ge.s32.totalorder %s8947_s18, 1  ;;  %s8947_s18 = sphi %s8980_s18, %s15_s18  }
   0x2   : > { %p187_p1 = scmp.lt.s32.totalorder %s8947_s18, 3 }
   0x4   : > { %p188_p2 = pnand %p7815_p0, %p187_p1 }
   0x6   : > { %191 = sbr.rel (%p188_p2) target bundleno = 1672 (0x688), region = 40 }
   0xb   : > { %v262_v0 = vld [vmem:[%s12423_s1] sm:$0x3]  ;;  %vm563_vm0 = vcmask 1041408   ;;  %p215_p3 = scmp.lt.s32.totalorder %s7811_s19, 1  ;;  %v7818_v2 = vld [vmem:[%s12423_s1 + $0x2] sm:$0x3] }
   0xc   : > { %v703_v1 = vsel %vm563_vm0, %v262_v0, 0  ;;  %v565_v3 = vsel %vm563_vm0, %v7818_v2, 0  ;;  %v7923_v4 = vld [vmem:[%s12423_s1 + $0x4] sm:$0x3]  ;;  %v7942_v5 = vld [vmem:[%s12423_s1 + $0x6] sm:$0x3] }
   0xd   : > { %8870 = vmatpush.bf16.msra.mxu3 %v703_v1  ;;  %s12770_s19 = smov (!%p215_p3, %s7811_s19), 1  ;;  %712 = vmatpush.bf16.msra.mxu1 %v703_v1  ;;  %v903_v6 = vsel %vm563_vm0, %v7923_v4, 0  ;;  %v1264_v7 = vsel %vm563_vm0, %v7942_v5, 0  ;;  %v8029_v8 = vld [vmem:[%s12423_s1 + $0x8] sm:$0x3]  ;;  %vm508_vm1 = vcmask 31744  }
   0xe   : > { %574 = vmatpush.bf16.msra.mxu0 %v565_v3  ;;  %8869 = vmatpush.bf16.msra.mxu2 %v565_v3  ;;  %s8906_s30 = smul.u32 172, %s12770_s19  ;;  %v1633_v9 = vsel %vm563_vm0, %v8029_v8, 0  ;;  %vm359_vm2 = vsmask.f32 7424  ;;  %vm1776_vm3 = vcmask 1045504   ;;  %vm810_vm4 = vcmask 1046528  }
   0xf   : > { %vm1407_vm5 = vsmask.f32 6400  ;;  %vm4760_vm6 = vcmask 1043456   ;;  %vm2373_vm7 = vsmask.f32 5376  ;;  %vm2742_vm8 = vcmask 1044480  }
  0x10   : > { %s9014_s8 = scalar_lea.vmem %s12422_s0, %s8906_s30  ;;  %vm4453_vm13 = vcmask 60416   ;;  %s8907_s24 = smul.u32 288, %s12770_s19 }
  0x11   : > { %1273 = vmatpush.bf16.msrb.mxu3 %v1264_v7  ;;  %v9017_v10 = vld [vmem:[%s9014_s8 + $0x48] sm:$0xff]  ;;  %v8676_v11 = vld [vmem:[%s9014_s8] sm:$0xff]   ;;  %v9024_v15 = vld [vmem:[%s9014_s8 + $0x50] sm:$0xff] }
  0x12   : > { %912 = vmatpush.bf16.msrb.mxu2 %v903_v6  ;;  %1642 = vmatpush.bf16.msrb.mxu0 %v1633_v9  ;;  %v9021_v12 = vld [vmem:[%s9014_s8 + $0x8] sm:$0xff]  ;;  %v361_v13 = vshrl.u32 %v8676_v11, 16  ;;  %v363_v14 = vshll.u32 %v8676_v11, 16  ;;  %v432_v17 = vshll.u32 %v9017_v10, 16  ;;  %v436_v18 = vshrl.u32 %v9017_v10, 16  ;;  %v9041_v28 = vld [vmem:[%s9014_s8 + $0x10] sm:$0xff]  ;;  %s12245_s27 = scalar_lea.vmem %s12427_s5, %s8907_s24 }
  0x13   : > { %7905 = vmatmul.msk.bf16.vlgmr.msra.gmra.mxu1 %vm508_vm1, %v8676_v11  ;;  %7914 = vmatmul.msk.bf16.vlgmr.msra.gmra.mxu3 %vm508_vm1, %v9017_v10  ;;  %v368_v16 = vshll.u32 %v9021_v12, 16  ;;  %v440_v20 = vshll.u32 %v9024_v15, 16  ;;  %v9044_v29 = vld [vmem:[%s9014_s8 + $0x58] sm:$0xff]  ;;  %v372_v30 = vshrl.u32 %v9021_v12, 16  ;;  %v376_v31 = vshll.u32 %v9041_v28, 16  ;;  %v9062_v41 = vld [vmem:[%s9014_s8 + $0x60] sm:$0xff] }
  0x14   : > { %v365_v19 = vrot.slane %v363_v14, 1  ;;  %v9033_v22 = vrot.slane %v432_v17, 1  ;;  %v444_v32 = vshrl.u32 %v9024_v15, 16  ;;  %v448_v33 = vshll.u32 %v9044_v29, 16  ;;  %v9059_v40 = vld [vmem:[%s9014_s8 + $0x18] sm:$0xff]  ;;  %v9077_v52 = vld [vmem:[%s9014_s8 + $0x20] sm:$0xff] }
  0x15   : > { %v370_v21 = vrot.slane %v368_v16, 1  ;;  %v442_v24 = vrot.slane %v440_v20, 1  ;;  %v378_v35 = vrot.slane %v376_v31, 1  ;;  %v380_v42 = vshrl.u32 %v9041_v28, 16  ;;  %v8584_v53 = vld [vmem:[%s9014_s8 + $0x68] sm:$0xff]  ;;  %v8585_v1 = vld [vmem:[%s9014_s8 + $0x70] sm:$0xff] }
  0x16   : > { %v366_v23 = vor.u32 %v365_v19, %v361_v13  ;;  %v438_v25 = vor.u32 %v436_v18, %v9033_v22  ;;  %v450_v37 = vrot.slane %v448_v33, 1  ;;  %v384_v43 = vshll.u32 %v9059_v40, 16  ;;  %v9092_v0 = vld [vmem:[%s9014_s8 + $0x28] sm:$0xff]  ;;  %v9105_v14 = vld [vmem:[%s9014_s8 + $0x30] sm:$0xff]  ;;  %v8586_v16 = vld [vmem:[%s9014_s8 + $0x78] sm:$0xff] }
  0x17   : > { %v374_v34 = vor.u32 %v372_v30, %v370_v21  ;;  %v446_v36 = vor.u32 %v444_v32, %v442_v24  ;;  %v452_v44 = vshrl.u32 %v9044_v29, 16  ;;  %v456_v45 = vshll.u32 %v9062_v41, 16  ;;  %v9118_v30 = vld [vmem:[%s9014_s8 + $0x38] sm:$0xff]  ;;  %v8587_v31 = vld [vmem:[%s9014_s8 + $0x80] sm:$0xff] }
  0x18   : > { %v371_v26 = vsel %vm359_vm2, %v366_v23, %v370_v21  ;;  %v443_v27 = vsel %vm359_vm2, %v438_v25, %v442_v24  ;;  %v382_v46 = vor.u32 %v380_v42, %v378_v35  ;;  %v386_v47 = vrot.slane %v384_v43, 1 }
  0x19   : > { %7887 = vmatmul.msk.bf16.vlgmr.msra.gmra.mxu0 %vm508_vm1, %v371_v26  ;;  %7896 = vmatmul.msk.bf16.vlgmr.msra.gmra.mxu2 %vm508_vm1, %v443_v27  ;;  %v379_v38 = vsel %vm359_vm2, %v374_v34, %v378_v35  ;;  %v451_v39 = vsel %vm359_vm2, %v446_v36, %v450_v37  ;;  %v454_v48 = vor.u32 %v452_v44, %v450_v37  ;;  %v458_v49 = vrot.slane %v456_v45, 1  ;;  %v9131_v44 = vld [vmem:[%s9014_s8 + $0x40] sm:$0xff]  ;;  %v8588_v45 = vld [vmem:[%s9014_s8 + $0x88] sm:$0xff] }
  0x1a   : > { %v387_v50 = vsel %vm359_vm2, %v382_v46, %v386_v47  ;;  %v388_v54 = vshrl.u32 %v9059_v40, 16  ;;  %v392_v55 = vshll.u32 %v9077_v52, 16  ;;  %v460_v56 = vshrl.u32 %v9062_v41, 16 }
  0x1b   : > { %v459_v51 = vsel %vm359_vm2, %v454_v48, %v458_v49  ;;  %v464_v57 = vshll.u32 %v8584_v53, 16  ;;  %v396_v2 = vshrl.u32 %v9077_v52, 16  ;;  %v400_v3 = vshll.u32 %v9092_v0, 16 }
  0x1c   : > { %v390_v58 = vor.u32 %v388_v54, %v386_v47  ;;  %v394_v59 = vrot.slane %v392_v55, 1  ;;  %v462_v60 = vor.u32 %v460_v56, %v458_v49  ;;  %v468_v4 = vshrl.u32 %v8584_v53, 16  ;;  %v263_v55 = vld [vmem:[%s9014_s8 + $0x90] sm:$0x1] }
  0x1d   : > { %v466_v61 = vrot.slane %v464_v57, 1  ;;  %v472_v5 = vshll.u32 %v8585_v1, 16  ;;  %v402_v7 = vrot.slane %v400_v3, 1  ;;  %v404_v17 = vshrl.u32 %v9092_v0, 16 }
  0x1e   : > { %v395_v62 = vsel %vm359_vm2, %v390_v58, %v394_v59  ;;  %v398_v6 = vor.u32 %v396_v2, %v394_v59  ;;  %v408_v18 = vshll.u32 %v9105_v14, 16  ;;  %v476_v19 = vshrl.u32 %v8585_v1, 16  ;;  %v8067_v59 = vld [vmem:[%s12423_s1 + $0xc] sm:$0x3] }
  0x1f   : > { %v467_v63 = vsel %vm359_vm2, %v462_v60, %v466_v61  ;;  %v470_v8 = vor.u32 %v468_v4, %v466_v61  ;;  %v474_v9 = vrot.slane %v472_v5, 1  ;;  %v480_v20 = vshll.u32 %v8586_v16, 16  ;;  %v8154_v60 = vld [vmem:[%s12423_s1 + $0xe] sm:$0x3]  ;;  %v1040_v5 = vld [vmem:[%s9014_s8 + $0x8] sm:$0xe] }
  0x20   : > { %v403_v11 = vsel %vm359_vm2, %v398_v6, %v402_v7  ;;  %v406_v21 = vor.u32 %v404_v17, %v402_v7  ;;  %v410_v23 = vrot.slane %v408_v18, 1  ;;  %v412_v32 = vshrl.u32 %v9105_v14, 16  ;;  %v1041_v6 = vld [vmem:[%s9014_s8 + $0xc] sm:$0xf]  ;;  %v1770_v7 = vld [vmem:[%s9014_s8 + $0x8] sm:$0xc] }
  0x21   : > { %v475_v13 = vsel %vm359_vm2, %v470_v8, %v474_v9  ;;  %v478_v24 = vor.u32 %v476_v19, %v474_v9  ;;  %v482_v25 = vrot.slane %v480_v20, 1  ;;  %v416_v33 = vshll.u32 %v9118_v30, 16  ;;  %v8048_v8 = vld [vmem:[%s12423_s1 + $0xa] sm:$0x3]  ;;  %v8173_v19 = vld [vmem:[%s12423_s1 + $0x10] sm:$0x3] }
  0x22   : > { %v411_v26 = vsel %vm359_vm2, %v406_v21, %v410_v23  ;;  %v484_v34 = vshrl.u32 %v8586_v16, 16  ;;  %v488_v35 = vshll.u32 %v8587_v31, 16  ;;  %v414_v36 = vor.u32 %v412_v32, %v410_v23 }
  0x23   : > { %7906 = vmatmul.msk.bf16.gmra.mxu1 %vm508_vm1, %v9021_v12  ;;  %7915 = vmatmul.msk.bf16.gmra.mxu3 %vm508_vm1, %v9024_v15  ;;  %v483_v27 = vsel %vm359_vm2, %v478_v24, %v482_v25  ;;  %v418_v37 = vrot.slane %v416_v33, 1  ;;  %v420_v46 = vshrl.u32 %v9118_v30, 16  ;;  %v424_v47 = vshll.u32 %v9131_v44, 16 }
  0x24   : > { %v492_v48 = vshrl.u32 %v8587_v31, 16  ;;  %v496_v49 = vshll.u32 %v8588_v45, 16  ;;  %v339_v58 = vunpack.c.l.b16 %v263_v55  ;;  %v500_v2 = vshrl.u32 %v8588_v45, 16 }
  0x25   : > { %v419_v42 = vsel %vm359_vm2, %v414_v36, %v418_v37  ;;  %v1116_v17 = vunpack.c.l.b16 %v1040_v5  ;;  %v1117_v18 = vunpack.c.l.b16 %v1041_v6  ;;  %v1774_v20 = vunpack.c.l.b16 %v1770_v7 }
  0x26   : > { %v498_v54 = vrot.slane %v496_v49, 1  ;;  %v9150_v61 = vpack.c.b16 %v339_v58, %v339_v58  ;;  %v2835_v21 = vsel %vm563_vm0, %v8173_v19, 0 }
  0x27   : > { %2844 = vmatpush.bf16.msra.mxu0 %v2835_v21  ;;  %v1153_v32 = vpack.c.b16 %v1117_v18, %v1116_v17  ;;  %v1775_v33 = vpack.c.b16 %v1117_v18, %v1774_v20 }
  0x28   : > { %v504_v4 = vshll.u32 %v9150_v61, 16 }
  0x29   : > { %7888 = vmatmul.msk.bf16.gmra.mxu0 %vm508_vm1, %v379_v38  ;;  %7897 = vmatmul.msk.bf16.gmra.mxu2 %vm508_vm1, %v451_v39  ;;  %v486_v38 = vor.u32 %v484_v34, %v482_v25  ;;  %v490_v39 = vrot.slane %v488_v35, 1  ;;  %v8589_v34 = vld [vmem:[%s9014_s8 + $0x10] sm:$0xff]  ;;  %v1409_v35 = vshrl.u32 %v1153_v32, 16  ;;  %v1412_v36 = vshll.u32 %v1153_v32, 16 }
  0x2b   : > { %v491_v43 = vsel %vm359_vm2, %v486_v38, %v490_v39  ;;  %v1420_v38 = vshll.u32 %v8589_v34, 16 }
  0x2d   : > { %v1422_v55 = vrot.slane %v1420_v38, 2 }
  0x33   : > { %7907 = vmatmul.msk.bf16.gmra.mxu1 %vm508_vm1, %v9041_v28  ;;  %7916 = vmatmul.msk.bf16.gmra.mxu3 %vm508_vm1, %v9044_v29 }
  0x39   : > { %7889 = vmatmul.msk.bf16.gmra.mxu0 %vm508_vm1, %v387_v50  ;;  %7898 = vmatmul.msk.bf16.gmra.mxu2 %vm508_vm1, %v459_v51  ;;  %v422_v50 = vor.u32 %v420_v46, %v418_v37  ;;  %v426_v51 = vrot.slane %v424_v47, 1  ;;  %v1417_v37 = vshrl.u32 %v8589_v34, 16  ;;  %v8756_v46 = vld [vmem:[%s9014_s8] sm:$0xe] }
  0x3b   : > { %v427_v56 = vsel %vm359_vm2, %v422_v50, %v426_v51 }
  0x43   : > { %7908 = vmatmul.msk.bf16.gmra.mxu1 %vm508_vm1, %v9059_v40  ;;  %7917 = vmatmul.msk.bf16.gmra.mxu3 %vm508_vm1, %v9062_v41 }
  0x49   : > { %7890 = vmatmul.msk.bf16.gmra.mxu0 %vm508_vm1, %v395_v62  ;;  %7899 = vmatmul.msk.bf16.gmra.mxu2 %vm508_vm1, %v467_v63  ;;  %v2230_v62 = vsel %vm563_vm0, %v8067_v59, 0  ;;  %v2599_v63 = vsel %vm563_vm0, %v8154_v60, 0 }
  0x4a   : > { %2239 = vmatpush.bf16.msra.mxu2 %v2230_v62  ;;  %2608 = vmatpush.bf16.msra.mxu3 %v2599_v63 }
  0x53   : > { %7909 = vmatmul.msk.bf16.gmra.mxu1 %vm508_vm1, %v9077_v52  ;;  %7918 = vmatmul.msk.bf16.gmra.mxu3 %vm508_vm1, %v8584_v53  ;;  %v494_v53 = vor.u32 %v492_v48, %v490_v39  ;;  %v1172_v39 = vrot.slane %v1153_v32, 1  ;;  %v1411_v48 = vrot.slane %v1409_v35, 1  ;;  %v814_v35 = vrot.slane %v9041_v28, 1 }
  0x55   : > { %v499_v57 = vsel %vm359_vm2, %v494_v53, %v498_v54  ;;  %v1414_v53 = vrot.slane %v1412_v36, 2 }
  0x57   : > { %v1415_v62 = vor.u32 %v1414_v53, %v1411_v48 }
  0x59   : > { %7891 = vmatmul.msk.bf16.gmra.mxu0 %vm508_vm1, %v403_v11  ;;  %7900 = vmatmul.msk.bf16.gmra.mxu2 %vm508_vm1, %v475_v13  ;;  %v502_v11 = vor.u32 %v500_v2, %v498_v54  ;;  %v1869_v13 = vsel %vm563_vm0, %v8048_v8, 0  ;;  %v1419_v54 = vrot.slane %v1417_v37, 1  ;;  %v812_v2 = vrot.slane %v9021_v12, 1 }
  0x5a   : > { %1878 = vmatpush.bf16.msrb.mxu1 %v1869_v13  ;;  %v8590_v13 = vld [vmem:[%s9014_s8 + $0x18] sm:$0xff] }
  0x5b   : > { %v1423_v63 = vor.u32 %v1422_v55, %v1419_v54  ;;  %v1429_v17 = vshll.u32 %v8590_v13, 16  ;;  %v1780_v12 = vrot.slane %v8590_v13, 2  ;;  %v1175_v18 = vrot.slane %v8590_v13, 1 }
  0x5d   : > { %v1424_v7 = vsel %vm1407_vm5, %v1415_v62, %v1423_v63 }
  0x63   : > { %7910 = vmatmul.msk.bf16.gmra.mxu1 %vm508_vm1, %v9092_v0  ;;  %7919 = vmatmul.msk.bf16.gmra.mxu3 %vm508_vm1, %v8585_v1  ;;  %v428_v1 = vshrl.u32 %v9131_v44, 16 }
  0x65   : > { %v430_v9 = vor.u32 %v428_v1, %v426_v51 }
  0x67   : > { %v435_v25 = vsel %vm359_vm2, %v430_v9, %v9033_v22  ;;  %v1777_v22 = vrot.slane %v1775_v33, 2 }
  0x69   : > { %7892 = vmatmul.msk.bf16.gmra.mxu0 %vm508_vm1, %v411_v26  ;;  %7901 = vmatmul.msk.bf16.gmra.mxu2 %vm508_vm1, %v483_v27 }
  0x73   : > { %7911 = vmatmul.msk.bf16.gmra.mxu1 %vm508_vm1, %v9105_v14  ;;  %7920 = vmatmul.msk.bf16.gmra.mxu3 %vm508_vm1, %v8586_v16  ;;  %v506_v16 = vrot.slane %v504_v4, 1 }
  0x75   : > { %v507_v27 = vsel %vm359_vm2, %v502_v11, %v506_v16  ;;  %v1426_v16 = vshrl.u32 %v8590_v13, 16 }
  0x79   : > { %7893 = vmatmul.msk.bf16.gmra.mxu0 %vm508_vm1, %v419_v42  ;;  %7902 = vmatmul.msk.bf16.gmra.mxu2 %vm508_vm1, %v491_v43  ;;  %v1778_v42 = vrot.slane %v8589_v34, 2  ;;  %v1173_v43 = vrot.slane %v8589_v34, 1 }
  0x7b   : > { %v1779_v59 = vsel %vm1776_vm3, %v1777_v22, %v1778_v42  ;;  %v1174_v60 = vsel %vm810_vm4, %v1172_v39, %v1173_v43  ;;  %v1781_v32 = vsel %vm1776_vm3, %v1778_v42, %v1780_v12  ;;  %v1176_v33 = vsel %vm810_vm4, %v1173_v43, %v1175_v18  ;;  %v8591_v43 = vld [vmem:[%s9014_s8 + $0x20] sm:$0xff] }
  0x7c   : > { %v815_v42 = vsel %vm810_vm4, %v812_v2, %v814_v35  ;;  %v1438_v48 = vshll.u32 %v8591_v43, 16  ;;  %v1782_v28 = vrot.slane %v8591_v43, 2 }
  0x7e   : > { %v1783_v62 = vsel %vm1776_vm3, %v1780_v12, %v1782_v28 }
  0x83   : > { %7912 = vmatmul.msk.bf16.gmra.mxu1 %vm508_vm1, %v9118_v30  ;;  %7921 = vmatmul.msk.bf16.gmra.mxu3 %vm508_vm1, %v8587_v31 }
  0x89   : > { %7894 = vmatmul.msk.bf16.gmra.mxu0 %vm508_vm1, %v427_v56  ;;  %7903 = vmatmul.msk.bf16.gmra.mxu2 %vm508_vm1, %v499_v57 }
  0x90   : > { %v714_v3 = vpop.f32.mrf.mxu1 }
  0x93   : > { %7913 = vmatmul.msk.bf16.gmra.mxu1 %vm508_vm1, %v9131_v44  ;;  %7922 = vmatmul.msk.bf16.gmra.mxu3 %vm508_vm1, %v8588_v45  ;;  %v8755_v45 = vld [vmem:[%s9014_s8] sm:$0xf0] }
  0x94   : > { %v8757_v58 = vor.u32 %v8756_v46, %v8755_v45 }
  0x96   : > { %v576_v23 = vpop.f32.mrf.mxu0  ;;  %v759_v24 = vpop.f32.mrf.mxu3  ;;  %v811_v1 = vrot.slane %v8757_v58, 1  ;;  %v1440_v58 = vrot.slane %v1438_v48, 2 }
  0x97   : > { %v9172_v26 = vadd.f32 %v714_v3, %v576_v23 }
  0x98   : > { %v716_v31 = vpop.f32.mrf.mxu1  ;;  %v813_v9 = vsel %vm810_vm4, %v811_v1, %v812_v2  ;;  %v816_v2 = vrot.slane %v9059_v40, 1 }
  0x99   : > { %7895 = vmatmul.msk.bf16.gmra.mxu0 %vm508_vm1, %v435_v25  ;;  %7904 = vmatmul.msk.bf16.gmra.mxu2 %vm508_vm1, %v507_v27  ;;  %v1431_v25 = vrot.slane %v1429_v17, 2  ;;  %v8592_v17 = vld [vmem:[%s9014_s8 + $0x28] sm:$0xff] }
  0x9a   : > { %v817_v13 = vsel %vm810_vm4, %v814_v35, %v816_v2  ;;  %v1444_v12 = vshrl.u32 %v8592_v17, 16  ;;  %v1784_v40 = vrot.slane %v8592_v17, 2 }
  0x9c   : > { %v621_v47 = vpop.f32.mrf.mxu2  ;;  %v1785_v35 = vsel %vm1776_vm3, %v1782_v28, %v1784_v40 }
  0x9d   : > { %v9180_v50 = vadd.f32 %v759_v24, %v621_v47  ;;  %v1428_v24 = vrot.slane %v1426_v16, 1  ;;  %v1435_v47 = vshrl.u32 %v8591_v43, 16 }
  0x9e   : > { %v578_v49 = vpop.f32.mrf.mxu0  ;;  %v761_v51 = vpop.f32.mrf.mxu3 }
  0x9f   : > { %v9182_v56 = vadd.f32 %v716_v31, %v578_v49  ;;  %v1432_v34 = vor.u32 %v1431_v25, %v1428_v24  ;;  %v1177_v49 = vrot.slane %v8591_v43, 1 }
  0xa0   : > { %v719_v57 = vpop.f32.mrf.mxu1 }
  0xa1   : > { %v1433_v22 = vsel %vm1407_vm5, %v1423_v63, %v1432_v34  ;;  %v1178_v63 = vsel %vm810_vm4, %v1175_v18, %v1177_v49  ;;  %v1447_v18 = vshll.u32 %v8592_v17, 16 }
  0xa3   : > { %8049 = vmatmul.msk.bf16.vlgmr.msrb.gmra.mxu1 %vm508_vm1, %v1779_v59  ;;  %8011 = vmatmul.msk.bf16.vlgmr.msrb.gmra.mxu3 %vm508_vm1, %v1174_v60 }
  0xa4   : > { %v623_v3 = vpop.f32.mrf.mxu2 }
  0xa5   : > { %v9189_v5 = vadd.f32 %v761_v51, %v623_v3 }
  0xa6   : > { %v581_v4 = vpop.f32.mrf.mxu0  ;;  %v764_v6 = vpop.f32.mrf.mxu3 }
  0xa7   : > { %v9192_v8 = vadd.f32 %v719_v57, %v581_v4  ;;  %v1437_v57 = vrot.slane %v1435_v47, 1 }
  0xa8   : > { %v721_v11 = vpop.f32.mrf.mxu1 }
  0xa9   : > { %8030 = vmatmul.msk.bf16.vlgmr.msrb.gmra.mxu0 %vm508_vm1, %v1424_v7  ;;  %7924 = vmatmul.msk.bf16.vlgmr.msrb.gmra.mxu2 %vm508_vm1, %v813_v9  ;;  %v1441_v1 = vor.u32 %v1440_v58, %v1437_v57 }
  0xab   : > { %v1442_v9 = vsel %vm1407_vm5, %v1432_v34, %v1441_v1 }
  0xac   : > { %v626_v19 = vpop.f32.mrf.mxu2 }
  0xad   : > { %v9198_v21 = vadd.f32 %v764_v6, %v626_v19  ;;  %v1179_v19 = vrot.slane %v8592_v17, 1 }
  0xae   : > { %v583_v20 = vpop.f32.mrf.mxu0  ;;  %v766_v23 = vpop.f32.mrf.mxu3 }
  0xaf   : > { %v9200_v27 = vadd.f32 %v721_v11, %v583_v20 }
  0xb0   : > { %v724_v31 = vpop.f32.mrf.mxu1 }
  0xb3   : > { %8050 = vmatmul.msk.bf16.gmra.mxu1 %vm508_vm1, %v1781_v32  ;;  %8012 = vmatmul.msk.bf16.gmra.mxu3 %vm508_vm1, %v1176_v33  ;;  %v1449_v32 = vrot.slane %v1447_v18, 2 }
  0xb4   : > { %v628_v36 = vpop.f32.mrf.mxu2 }
  0xb5   : > { %v9207_v38 = vadd.f32 %v766_v23, %v628_v36  ;;  %v1180_v36 = vsel %vm810_vm4, %v1177_v49, %v1179_v19  ;;  %v8593_v49 = vld [vmem:[%s9014_s8 + $0x30] sm:$0xff] }
  0xb6   : > { %v586_v37 = vpop.f32.mrf.mxu0  ;;  %v769_v39 = vpop.f32.mrf.mxu3  ;;  %v1181_v57 = vrot.slane %v8593_v49, 1 }
  0xb7   : > { %v9210_v45 = vadd.f32 %v724_v31, %v586_v37  ;;  %v1446_v31 = vrot.slane %v1444_v12, 1 }
  0xb8   : > { %v726_v46 = vpop.f32.mrf.mxu1 }
  0xb9   : > { %8031 = vmatmul.msk.bf16.gmra.mxu0 %vm508_vm1, %v1433_v22  ;;  %7925 = vmatmul.msk.bf16.gmra.mxu2 %vm508_vm1, %v815_v42  ;;  %v1450_v37 = vor.u32 %v1449_v32, %v1446_v31 }
  0xbb   : > { %v1451_v47 = vsel %vm1407_vm5, %v1441_v1, %v1450_v37 }
  0xbc   : > { %v631_v51 = vpop.f32.mrf.mxu2 }
  0xbd   : > { %v9216_v54 = vadd.f32 %v769_v39, %v631_v51  ;;  %v818_v39 = vrot.slane %v9077_v52, 1  ;;  %v1786_v52 = vrot.slane %v8593_v49, 2 }
  0xbe   : > { %v588_v53 = vpop.f32.mrf.mxu0  ;;  %v771_v55 = vpop.f32.mrf.mxu3 }
  0xbf   : > { %v9218_v59 = vadd.f32 %v726_v46, %v588_v53  ;;  %v819_v28 = vsel %vm810_vm4, %v816_v2, %v818_v39  ;;  %v1453_v53 = vshrl.u32 %v8593_v49, 16 }
  0xc0   : > { %v729_v60 = vpop.f32.mrf.mxu1 }
  0xc1   : > { %v1455_v1 = vrot.slane %v1453_v53, 1 }
  0xc3   : > { %8051 = vmatmul.msk.bf16.gmra.mxu1 %vm508_vm1, %v1783_v62  ;;  %8013 = vmatmul.msk.bf16.gmra.mxu3 %vm508_vm1, %v1178_v63 }
  0xc4   : > { %v633_v3 = vpop.f32.mrf.mxu2 }
  0xc5   : > { %v9225_v6 = vadd.f32 %v771_v55, %v633_v3  ;;  %v1456_v55 = vshll.u32 %v8593_v49, 16 }
  0xc6   : > { %v591_v4 = vpop.f32.mrf.mxu0  ;;  %v774_v7 = vpop.f32.mrf.mxu3 }
  0xc7   : > { %v9228_v11 = vadd.f32 %v729_v60, %v591_v4  ;;  %v1458_v3 = vrot.slane %v1456_v55, 2  ;;  %v822_v55 = vrot.slane %v9105_v14, 1 }
  0xc8   : > { %v731_v16 = vpop.f32.mrf.mxu1 }
  0xc9   : > { %8032 = vmatmul.msk.bf16.gmra.mxu0 %vm508_vm1, %v1442_v9  ;;  %7926 = vmatmul.msk.bf16.gmra.mxu2 %vm508_vm1, %v817_v13  ;;  %v1182_v9 = vsel %vm810_vm4, %v1179_v19, %v1181_v57  ;;  %v1459_v13 = vor.u32 %v1458_v3, %v1455_v1  ;;  %v8594_v19 = vld [vmem:[%s9014_s8 + $0x38] sm:$0xff] }
  0xca   : > { %v1462_v32 = vshrl.u32 %v8594_v19, 16 }
  0xcc   : > { %v636_v20 = vpop.f32.mrf.mxu2 }
  0xcd   : > { %v9234_v24 = vadd.f32 %v774_v7, %v636_v20  ;;  %v1787_v7 = vsel %vm1776_vm3, %v1784_v40, %v1786_v52 }
  0xce   : > { %v593_v23 = vpop.f32.mrf.mxu0  ;;  %v776_v25 = vpop.f32.mrf.mxu3 }
  0xcf   : > { %v9236_v33 = vadd.f32 %v731_v16, %v593_v23  ;;  %v820_v16 = vrot.slane %v9092_v0, 1  ;;  %v1460_v23 = vsel %vm1407_vm5, %v1450_v37, %v1459_v13  ;;  %v1788_v0 = vrot.slane %v8594_v19, 2 }
  0xd0   : > { %v734_v34 = vpop.f32.mrf.mxu1  ;;  %v1464_v37 = vrot.slane %v1462_v32, 1 }
  0xd1   : > { %v821_v40 = vsel %vm810_vm4, %v818_v39, %v820_v16 }
  0xd3   : > { %8052 = vmatmul.msk.bf16.gmra.mxu1 %vm508_vm1, %v1785_v35  ;;  %8014 = vmatmul.msk.bf16.gmra.mxu3 %vm508_vm1, %v1180_v36  ;;  %v1183_v35 = vrot.slane %v8594_v19, 1 }
  0xd4   : > { %v638_v22 = vpop.f32.mrf.mxu2 }
  0xd5   : > { %v9243_v46 = vadd.f32 %v776_v25, %v638_v22  ;;  %v1184_v49 = vsel %vm810_vm4, %v1181_v57, %v1183_v35  ;;  %v8595_v57 = vld [vmem:[%s9014_s8 + $0x40] sm:$0xff] }
  0xd6   : > { %v596_v42 = vpop.f32.mrf.mxu0  ;;  %v779_v43 = vpop.f32.mrf.mxu3  ;;  %v1790_v14 = vrot.slane %v8595_v57, 2 }
  0xd7   : > { %v9246_v48 = vadd.f32 %v734_v34, %v596_v42  ;;  %v1465_v34 = vshll.u32 %v8594_v19, 16 }
  0xd8   : > { %v736_v51 = vpop.f32.mrf.mxu1 }
  0xd9   : > { %8033 = vmatmul.msk.bf16.gmra.mxu0 %vm508_vm1, %v1451_v47  ;;  %7927 = vmatmul.msk.bf16.gmra.mxu2 %vm508_vm1, %v819_v28  ;;  %v1467_v47 = vrot.slane %v1465_v34, 2  ;;  %v1791_v34 = vsel %vm1776_vm3, %v1788_v0, %v1790_v14 }
  0xdb   : > { %v1468_v53 = vor.u32 %v1467_v47, %v1464_v37 }
  0xdc   : > { %v641_v58 = vpop.f32.mrf.mxu2 }
  0xdd   : > { %v9252_v62 = vadd.f32 %v779_v43, %v641_v58  ;;  %v1469_v3 = vsel %vm1407_vm5, %v1459_v13, %v1468_v53 }
  0xde   : > { %v598_v60 = vpop.f32.mrf.mxu0  ;;  %v781_v63 = vpop.f32.mrf.mxu3 }
  0xdf   : > { %v9254_v4 = vadd.f32 %v736_v51, %v598_v60  ;;  %v1789_v51 = vsel %vm1776_vm3, %v1786_v52, %v1788_v0  ;;  %v823_v52 = vsel %vm810_vm4, %v820_v16, %v822_v55 }
  0xe0   : > { %v739_v2 = vpop.f32.mrf.mxu1 }
  0xe3   : > { %8053 = vmatmul.msk.bf16.gmra.mxu1 %vm508_vm1, %v1787_v7  ;;  %8015 = vmatmul.msk.bf16.gmra.mxu3 %vm508_vm1, %v1182_v9  ;;  %v1471_v9 = vshrl.u32 %v8595_v57, 16 }
  0xe4   : > { %v643_v17 = vpop.f32.mrf.mxu2 }
  0xe5   : > { %v9261_v18 = vadd.f32 %v781_v63, %v643_v17  ;;  %v1474_v17 = vshll.u32 %v8595_v57, 16  ;;  %v1473_v13 = vrot.slane %v1471_v9, 1 }
  0xe6   : > { %v601_v12 = vpop.f32.mrf.mxu0  ;;  %v784_v20 = vpop.f32.mrf.mxu3 }
  0xe7   : > { %v9264_v25 = vadd.f32 %v739_v2, %v601_v12  ;;  %v1185_v12 = vrot.slane %v8595_v57, 1  ;;  %v1476_v19 = vrot.slane %v1474_v17, 2 }
  0xe8   : > { %v741_v31 = vpop.f32.mrf.mxu1 }
  0xe9   : > { %8034 = vmatmul.msk.bf16.gmra.mxu0 %vm508_vm1, %v1460_v23  ;;  %7928 = vmatmul.msk.bf16.gmra.mxu2 %vm508_vm1, %v821_v40 }
  0xec   : > { %v646_v36 = vpop.f32.mrf.mxu2 }
  0xed   : > { %v9270_v42 = vadd.f32 %v784_v20, %v646_v36  ;;  %v1186_v36 = vsel %vm810_vm4, %v1183_v35, %v1185_v12  ;;  %v8596_v35 = vld [vmem:[%s9014_s8 + $0x48] sm:$0xff] }
  0xee   : > { %v603_v22 = vpop.f32.mrf.mxu0  ;;  %v786_v43 = vpop.f32.mrf.mxu3 }
  0xef   : > { %v9272_v28 = vadd.f32 %v741_v31, %v603_v22  ;;  %v1477_v22 = vor.u32 %v1476_v19, %v1473_v13 }
  0xf0   : > { %v744_v39 = vpop.f32.mrf.mxu1 }
  0xf3   : > { %8054 = vmatmul.msk.bf16.gmra.mxu1 %vm508_vm1, %v1789_v51  ;;  %8016 = vmatmul.msk.bf16.gmra.mxu3 %vm508_vm1, %v1184_v49  ;;  %v1478_v49 = vsel %vm1407_vm5, %v1468_v53, %v1477_v22 }
  0xf4   : > { %v648_v58 = vpop.f32.mrf.mxu2 }
  0xf5   : > { %v9279_v63 = vadd.f32 %v786_v43, %v648_v58  ;;  %v824_v43 = vrot.slane %v9118_v30, 1  ;;  %v1792_v30 = vrot.slane %v8596_v35, 2 }
  0xf6   : > { %v606_v60 = vpop.f32.mrf.mxu0  ;;  %v789_v1 = vpop.f32.mrf.mxu3 }
  0xf7   : > { %v9282_v2 = vadd.f32 %v744_v39, %v606_v60  ;;  %v825_v0 = vsel %vm810_vm4, %v822_v55, %v824_v43 }
  0xf8   : > { %v746_v7 = vpop.f32.mrf.mxu1 }
  0xf9   : > { %8035 = vmatmul.msk.bf16.gmra.mxu0 %vm508_vm1, %v1469_v3  ;;  %7929 = vmatmul.msk.bf16.gmra.mxu2 %vm508_vm1, %v823_v52  ;;  %v1483_v3 = vshll.u32 %v8596_v35, 16  ;;  %v1187_v52 = vrot.slane %v8596_v35, 1 }
  0xfb   : > { %v1188_v13 = vsel %vm810_vm4, %v1185_v12, %v1187_v52  ;;  %v8597_v12 = vld [vmem:[%s9014_s8 + $0x50] sm:$0xff] }
  0xfc   : > { %v651_v20 = vpop.f32.mrf.mxu2 }
  0xfd   : > { %v9288_v40 = vadd.f32 %v789_v1, %v651_v20  ;;  %v1480_v1 = vshrl.u32 %v8596_v35, 16  ;;  %v1485_v20 = vrot.slane %v1483_v3, 2  ;;  %v1492_v35 = vshll.u32 %v8597_v12, 16 }
  0xfe   : > { %v608_v23 = vpop.f32.mrf.mxu0  ;;  %v791_v31 = vpop.f32.mrf.mxu3 }
  0xff   : > { %v9290_v32 = vadd.f32 %v746_v7, %v608_v23  ;;  %v1482_v53 = vrot.slane %v1480_v1, 1  ;;  %v1189_v1 = vrot.slane %v8597_v12, 1 }
 0x100   : > { %v749_v16 = vpop.f32.mrf.mxu1 }
 0x101   : > { %v1486_v19 = vor.u32 %v1485_v20, %v1482_v53  ;;  %v1494_v53 = vrot.slane %v1492_v35, 2 }
 0x103   : > { %8055 = vmatmul.msk.bf16.gmra.mxu1 %vm508_vm1, %v1791_v34  ;;  %8017 = vmatmul.msk.bf16.gmra.mxu3 %vm508_vm1, %v1186_v36 }
 0x104   : > { %v653_v37 = vpop.f32.mrf.mxu2 }
 0x105   : > { %v9297_v39 = vadd.f32 %v791_v31, %v653_v37  ;;  %v1793_v31 = vsel %vm1776_vm3, %v1790_v14, %v1792_v30 }
 0x106   : > { %v611_v47 = vpop.f32.mrf.mxu0  ;;  %v794_v51 = vpop.f32.mrf.mxu3 }
 0x107   : > { %v9300_v58 = vadd.f32 %v749_v16, %v611_v47  ;;  %v826_v16 = vrot.slane %v9131_v44, 1  ;;  %v1794_v44 = vrot.slane %v8597_v12, 2 }
 0x108   : > { %v751_v60 = vpop.f32.mrf.mxu1 }
 0x109   : > { %8036 = vmatmul.msk.bf16.gmra.mxu0 %vm508_vm1, %v1478_v49  ;;  %7930 = vmatmul.msk.bf16.gmra.mxu2 %vm508_vm1, %v825_v0  ;;  %v827_v14 = vsel %vm810_vm4, %v824_v43, %v826_v16 }
 0x10c   : > { %v656_v7 = vpop.f32.mrf.mxu2 }
 0x10d   : > { %v9306_v9 = vadd.f32 %v794_v51, %v656_v7  ;;  %v1487_v51 = vsel %vm1407_vm5, %v1477_v22, %v1486_v19 }
 0x10e   : > { %v613_v57 = vpop.f32.mrf.mxu0  ;;  %v796_v17 = vpop.f32.mrf.mxu3 }
 0x10f   : > { %v9308_v23 = vadd.f32 %v751_v60, %v613_v57  ;;  %v1489_v60 = vshrl.u32 %v8597_v12, 16 }
 0x110   : > { %v754_v55 = vpop.f32.mrf.mxu1 }
 0x111   : > { %v1491_v22 = vrot.slane %v1489_v60, 1 }
 0x113   : > { %8056 = vmatmul.msk.bf16.gmra.mxu1 %vm508_vm1, %v1793_v31  ;;  %8018 = vmatmul.msk.bf16.gmra.mxu3 %vm508_vm1, %v1188_v13  ;;  %v1190_v31 = vsel %vm810_vm4, %v1187_v52, %v1189_v1  ;;  %v1495_v13 = vor.u32 %v1494_v53, %v1491_v22  ;;  %v8192_v52 = vld [vmem:[%s12425_s3 + $0x4] sm:$0xf] }
 0x114   : > { %v658_v34 = vpop.f32.mrf.mxu2 }
 0x115   : > { %v9315_v37 = vadd.f32 %v796_v17, %v658_v34  ;;  %v828_v34 = vrot.slane %v9017_v10, 1 }
 0x116   : > { %v616_v36 = vpop.f32.mrf.mxu0  ;;  %v799_v47 = vpop.f32.mrf.mxu3 }
 0x117   : > { %12475 = vst [vmem:[#allocation3_spill] sm:$0xff] %v9315_v37  ;;  %v9318_v49 = vadd.f32 %v754_v55, %v616_v36  ;;  %v1795_v55 = vsel %vm1776_vm3, %v1792_v30, %v1794_v44  ;;  %v829_v12 = vsel %vm810_vm4, %v826_v16, %v828_v34  ;;  %v8598_v30 = vld [vmem:[%s9014_s8 + $0x58] sm:$0xff] }
 0x118   : > { %v756_v0 = vpop.f32.mrf.mxu1  ;;  %v1498_v10 = vshrl.u32 %v8598_v30, 16  ;;  %v1501_v35 = vshll.u32 %v8598_v30, 16 }
 0x119   : > { %8037 = vmatmul.msk.bf16.gmra.mxu0 %vm508_vm1, %v1487_v51  ;;  %7931 = vmatmul.msk.bf16.gmra.mxu2 %vm508_vm1, %v827_v14 }
 0x11c   : > { %v661_v3 = vpop.f32.mrf.mxu2 }
 0x11d   : > { %v9324_v57 = vadd.f32 %v799_v47, %v661_v3  ;;  %v4762_v3 = vsel %vm4760_vm6, %v8192_v52, 0 }
 0x11e   : > { %v618_v7 = vpop.f32.mrf.mxu0  ;;  %v801_v17 = vpop.f32.mrf.mxu3  ;;  %4771 = vmatpush.bf16.msra.mxu1 %v4762_v3 }
 0x11f   : > { %12476 = vst [vmem:[#allocation4_spill] sm:$0xff] %v9324_v57  ;;  %v9326_v20 = vadd.f32 %v756_v0, %v618_v7  ;;  %v1496_v0 = vsel %vm1407_vm5, %v1486_v19, %v1495_v13  ;;  %v1796_v7 = vrot.slane %v8598_v30, 2  ;;  %v1191_v19 = vrot.slane %v8598_v30, 1 }
 0x120   : > { %v1880_v43 = vpop.f32.mrf.mxu1  ;;  %v830_v30 = vrot.slane %v9024_v15, 1 }
 0x123   : > { %8057 = vmatmul.msk.bf16.gmra.mxu1 %vm508_vm1, %v1795_v55  ;;  %8019 = vmatmul.msk.bf16.gmra.mxu3 %vm508_vm1, %v1190_v31  ;;  %v1500_v55 = vrot.slane %v1498_v10, 1  ;;  %v1503_v31 = vrot.slane %v1501_v35, 2 }
 0x124   : > { %v663_v36 = vpop.f32.mrf.mxu2 }
 0x125   : > { %v9333_v47 = vadd.f32 %v801_v17, %v663_v36  ;;  %v1504_v37 = vor.u32 %v1503_v31, %v1500_v55 }
 0x126   : > { %v1644_v51 = vpop.f32.mrf.mxu0  ;;  %v1275_v14 = vpop.f32.mrf.mxu3 }
 0x127   : > { %12477 = vst [vmem:[#allocation5_spill] sm:$0xff] %v9333_v47 }
 0x128   : > { %v1882_v60 = vpop.f32.mrf.mxu1 }
 0x129   : > { %8038 = vmatmul.msk.bf16.gmra.mxu0 %vm508_vm1, %v1496_v0  ;;  %7932 = vmatmul.msk.bf16.gmra.mxu2 %vm508_vm1, %v829_v12  ;;  %v1797_v0 = vsel %vm1776_vm3, %v1794_v44, %v1796_v7  ;;  %v1192_v12 = vsel %vm810_vm4, %v1189_v1, %v1191_v19  ;;  %v1505_v44 = vsel %vm1407_vm5, %v1495_v13, %v1504_v37 }
 0x12c   : > { %v914_v17 = vpop.f32.mrf.mxu2 }
 0x12d   : > { %v1004_v16 = vadd.f32 %v914_v17, %v9172_v26 }
 0x12e   : > { %v1646_v22 = vpop.f32.mrf.mxu0  ;;  %v1277_v53 = vpop.f32.mrf.mxu3 }
 0x12f   : > { %v1365_v47 = vadd.f32 %v1275_v14, %v1004_v16  ;;  %v831_v14 = vsel %vm810_vm4, %v828_v34, %v830_v30 }
 0x130   : > { %v1885_v36 = vpop.f32.mrf.mxu1 }
 0x131   : > { %v1734_v57 = vadd.f32 %v1644_v51, %v1365_v47  ;;  %v8599_v51 = vld [vmem:[%s9014_s8 + $0x60] sm:$0xff] }
 0x132   : > { %v1507_v15 = vshrl.u32 %v8599_v51, 16 }
 0x133   : > { %8058 = vmatmul.msk.bf16.gmra.mxu1 %vm508_vm1, %v1797_v0  ;;  %8020 = vmatmul.msk.bf16.gmra.mxu3 %vm508_vm1, %v1192_v12  ;;  %v9350_v26 = vadd.f32 %v1880_v43, %v1734_v57  ;;  %v1510_v57 = vshll.u32 %v8599_v51, 16  ;;  %v1798_v43 = vrot.slane %v8599_v51, 2 }
 0x134   : > { %v916_v52 = vpop.f32.mrf.mxu2  ;;  %v1509_v34 = vrot.slane %v1507_v15, 1 }
 0x135   : > { %v1005_v10 = vadd.f32 %v916_v52, %v9182_v56  ;;  %v1193_v56 = vrot.slane %v8599_v51, 1  ;;  %v1512_v12 = vrot.slane %v1510_v57, 2  ;;  %v1799_v52 = vsel %vm1776_vm3, %v1796_v7, %v1798_v43  ;;  %v8600_v57 = vld [vmem:[%s9014_s8 + $0x68] sm:$0xff] }
 0x136   : > { %v1649_v35 = vpop.f32.mrf.mxu0  ;;  %v1280_v3 = vpop.f32.mrf.mxu3 }
 0x137   : > { %v1366_v47 = vadd.f32 %v1277_v53, %v1005_v10 }
 0x138   : > { %v1887_v1 = vpop.f32.mrf.mxu1 }
 0x139   : > { %8039 = vmatmul.msk.bf16.gmra.mxu0 %vm508_vm1, %v1505_v44  ;;  %7933 = vmatmul.msk.bf16.gmra.mxu2 %vm508_vm1, %v831_v14  ;;  %v1735_v17 = vadd.f32 %v1646_v22, %v1366_v47  ;;  %v1194_v22 = vsel %vm810_vm4, %v1191_v19, %v1193_v56  ;;  %v1513_v14 = vor.u32 %v1512_v12, %v1509_v34 }
 0x13b   : > { %v9358_v16 = vadd.f32 %v1882_v60, %v1735_v17  ;;  %v832_v60 = vrot.slane %v9044_v29, 1  ;;  %v1514_v7 = vsel %vm1407_vm5, %v1504_v37, %v1513_v14  ;;  %v1516_v29 = vshrl.u32 %v8600_v57, 16 }
 0x13c   : > { %v919_v55 = vpop.f32.mrf.mxu2 }
 0x13d   : > { %v1006_v31 = vadd.f32 %v919_v55, %v9192_v8 }
 0x13e   : > { %v1651_v13 = vpop.f32.mrf.mxu0  ;;  %v1282_v0 = vpop.f32.mrf.mxu3 }
 0x13f   : > { %v1367_v10 = vadd.f32 %v1280_v3, %v1006_v31  ;;  %v833_v3 = vsel %vm810_vm4, %v830_v30, %v832_v60  ;;  %v1800_v31 = vrot.slane %v8600_v57, 2  ;;  %v1518_v30 = vrot.slane %v1516_v29, 1  ;;  %v8601_v29 = vld [vmem:[%s9014_s8 + $0x70] sm:$0xff] }
 0x140   : > { %v1890_v53 = vpop.f32.mrf.mxu1 }
 0x141   : > { %v1736_v44 = vadd.f32 %v1649_v35, %v1367_v10 }
 0x143   : > { %8059 = vmatmul.msk.bf16.gmra.mxu1 %vm508_vm1, %v1799_v52  ;;  %8021 = vmatmul.msk.bf16.gmra.mxu3 %vm508_vm1, %v1194_v22  ;;  %v9366_v8 = vadd.f32 %v1885_v36, %v1736_v44  ;;  %v1519_v36 = vshll.u32 %v8600_v57, 16  ;;  %v1801_v44 = vsel %vm1776_vm3, %v1798_v43, %v1800_v31 }
 0x144   : > { %v921_v47 = vpop.f32.mrf.mxu2 }
 0x145   : > { %v1007_v51 = vadd.f32 %v921_v47, %v9200_v27  ;;  %v1195_v27 = vrot.slane %v8600_v57, 1  ;;  %v1521_v22 = vrot.slane %v1519_v36, 2 }
 0x146   : > { %v1654_v17 = vpop.f32.mrf.mxu0  ;;  %v1285_v15 = vpop.f32.mrf.mxu3 }
 0x147   : > { %v1368_v35 = vadd.f32 %v1282_v0, %v1007_v51 }
 0x148   : > { %v1892_v19 = vpop.f32.mrf.mxu1 }
 0x149   : > { %8040 = vmatmul.msk.bf16.gmra.mxu0 %vm508_vm1, %v1514_v7  ;;  %7934 = vmatmul.msk.bf16.gmra.mxu2 %vm508_vm1, %v833_v3  ;;  %v1737_v55 = vadd.f32 %v1651_v13, %v1368_v35  ;;  %v1196_v13 = vsel %vm810_vm4, %v1193_v56, %v1195_v27  ;;  %v1522_v7 = vor.u32 %v1521_v22, %v1518_v30 }
 0x14b   : > { %v9374_v34 = vadd.f32 %v1887_v1, %v1737_v55  ;;  %v834_v1 = vrot.slane %v9062_v41, 1  ;;  %v1523_v43 = vsel %vm1407_vm5, %v1513_v14, %v1522_v7  ;;  %v1525_v41 = vshrl.u32 %v8601_v29, 16 }
 0x14c   : > { %v924_v12 = vpop.f32.mrf.mxu2 }
 0x14d   : > { %v1008_v52 = vadd.f32 %v924_v12, %v9210_v45  ;;  %v1802_v12 = vrot.slane %v8601_v29, 2 }
 0x14e   : > { %v1656_v37 = vpop.f32.mrf.mxu0  ;;  %v1287_v10 = vpop.f32.mrf.mxu3 }
 0x14f   : > { %v1369_v47 = vadd.f32 %v1285_v15, %v1008_v52  ;;  %v835_v15 = vsel %vm810_vm4, %v832_v60, %v834_v1 }
 0x150   : > { %v1895_v0 = vpop.f32.mrf.mxu1 }
 0x151   : > { %v1738_v51 = vadd.f32 %v1654_v17, %v1369_v47 }
 0x153   : > { %8060 = vmatmul.msk.bf16.gmra.mxu1 %vm508_vm1, %v1801_v44  ;;  %8022 = vmatmul.msk.bf16.gmra.mxu3 %vm508_vm1, %v1196_v13  ;;  %v9382_v45 = vadd.f32 %v1890_v53, %v1738_v51  ;;  %v1528_v53 = vshll.u32 %v8601_v29, 16  ;;  %v1527_v44 = vrot.slane %v1525_v41, 1  ;;  %v1803_v13 = vsel %vm1776_vm3, %v1800_v31, %v1802_v12  ;;  %v8602_v41 = vld [vmem:[%s9014_s8 + $0x78] sm:$0xff] }
 0x154   : > { %v926_v3 = vpop.f32.mrf.mxu2 }
 0x155   : > { %v1009_v35 = vadd.f32 %v926_v3, %v9218_v59  ;;  %v1197_v59 = vrot.slane %v8601_v29, 1 }
 0x156   : > { %v1659_v57 = vpop.f32.mrf.mxu0  ;;  %v1290_v55 = vpop.f32.mrf.mxu3 }
 0x157   : > { %v1370_v17 = vadd.f32 %v1287_v10, %v1009_v35  ;;  %v1530_v10 = vrot.slane %v1528_v53, 2 }
 0x158   : > { %v1897_v56 = vpop.f32.mrf.mxu1 }
 0x159   : > { %8041 = vmatmul.msk.bf16.gmra.mxu0 %vm508_vm1, %v1523_v43  ;;  %7935 = vmatmul.msk.bf16.gmra.mxu2 %vm508_vm1, %v835_v15  ;;  %v1739_v36 = vadd.f32 %v1656_v37, %v1370_v17  ;;  %v1198_v37 = vsel %vm810_vm4, %v1195_v27, %v1197_v59  ;;  %v1531_v35 = vor.u32 %v1530_v10, %v1527_v44 }
 0x15b   : > { %v9390_v52 = vadd.f32 %v1892_v19, %v1739_v36  ;;  %v8919_v19 = vld [vmem:[%s9014_s8 + $0x68] sm:$0xff]  ;;  %v1532_v31 = vsel %vm1407_vm5, %v1522_v7, %v1531_v35 }
 0x15c   : > { %v929_v30 = vpop.f32.mrf.mxu2  ;;  %v836_v43 = vrot.slane %v8919_v19, 1 }
 0x15d   : > { %v1010_v14 = vadd.f32 %v929_v30, %v9228_v11  ;;  %v1534_v30 = vshrl.u32 %v8602_v41, 16 }
 0x15e   : > { %v1661_v22 = vpop.f32.mrf.mxu0  ;;  %v1292_v60 = vpop.f32.mrf.mxu3  ;;  %v837_v27 = vsel %vm810_vm4, %v834_v1, %v836_v43 }
 0x15f   : > { %v1371_v51 = vadd.f32 %v1290_v55, %v1010_v14  ;;  %v1804_v14 = vrot.slane %v8602_v41, 2 }
 0x160   : > { %v1900_v47 = vpop.f32.mrf.mxu1 }
 0x161   : > { %v1740_v3 = vadd.f32 %v1659_v57, %v1371_v51  ;;  %v1536_v51 = vrot.slane %v1534_v30, 1  ;;  %v8603_v30 = vld [vmem:[%s9014_s8 + $0x80] sm:$0xff] }
 0x163   : > { %8061 = vmatmul.msk.bf16.gmra.mxu1 %vm508_vm1, %v1803_v13  ;;  %8023 = vmatmul.msk.bf16.gmra.mxu3 %vm508_vm1, %v1198_v37  ;;  %v9398_v11 = vadd.f32 %v1895_v0, %v1740_v3  ;;  %v1537_v0 = vshll.u32 %v8602_v41, 16  ;;  %v1805_v3 = vsel %vm1776_vm3, %v1802_v12, %v1804_v14 }
 0x164   : > { %v931_v15 = vpop.f32.mrf.mxu2 }
 0x165   : > { %v1011_v17 = vadd.f32 %v931_v15, %v9236_v33  ;;  %v1199_v33 = vrot.slane %v8602_v41, 1 }
 0x166   : > { %v1664_v29 = vpop.f32.mrf.mxu0  ;;  %v1295_v36 = vpop.f32.mrf.mxu3 }
 0x167   : > { %v1372_v57 = vadd.f32 %v1292_v60, %v1011_v17  ;;  %v1539_v60 = vrot.slane %v1537_v0, 2 }
 0x168   : > { %v1902_v55 = vpop.f32.mrf.mxu1 }
 0x169   : > { %8042 = vmatmul.msk.bf16.gmra.mxu0 %vm508_vm1, %v1532_v31  ;;  %7936 = vmatmul.msk.bf16.gmra.mxu2 %vm508_vm1, %v837_v27  ;;  %v1741_v53 = vadd.f32 %v1661_v22, %v1372_v57  ;;  %v1200_v22 = vsel %vm810_vm4, %v1197_v59, %v1199_v33  ;;  %v1540_v17 = vor.u32 %v1539_v60, %v1536_v51 }
 0x16b   : > { %v9406_v44 = vadd.f32 %v1897_v56, %v1741_v53  ;;  %v8920_v56 = vld [vmem:[%s9014_s8 + $0x70] sm:$0xff]  ;;  %v1541_v12 = vsel %vm1407_vm5, %v1531_v35, %v1540_v17 }
 0x16c   : > { %v934_v10 = vpop.f32.mrf.mxu2  ;;  %v838_v31 = vrot.slane %v8920_v56, 1 }
 0x16d   : > { %v1012_v7 = vadd.f32 %v934_v10, %v9246_v48  ;;  %v1543_v10 = vshrl.u32 %v8603_v30, 16 }
 0x16e   : > { %v1666_v13 = vpop.f32.mrf.mxu0  ;;  %v1297_v1 = vpop.f32.mrf.mxu3  ;;  %v839_v59 = vsel %vm810_vm4, %v836_v43, %v838_v31 }
 0x16f   : > { %v1373_v19 = vadd.f32 %v1295_v36, %v1012_v7  ;;  %v1806_v7 = vrot.slane %v8603_v30, 2 }
 0x170   : > { %v1905_v37 = vpop.f32.mrf.mxu1 }
 0x171   : > { %v1742_v15 = vadd.f32 %v1664_v29, %v1373_v19  ;;  %v1545_v19 = vrot.slane %v1543_v10, 1  ;;  %v8604_v10 = vld [vmem:[%s9014_s8 + $0x88] sm:$0xff] }
 0x173   : > { %8062 = vmatmul.msk.bf16.gmra.mxu1 %vm508_vm1, %v1805_v3  ;;  %8024 = vmatmul.msk.bf16.gmra.mxu3 %vm508_vm1, %v1200_v22  ;;  %v9414_v48 = vadd.f32 %v1900_v47, %v1742_v15  ;;  %v1546_v47 = vshll.u32 %v8603_v30, 16  ;;  %v1807_v15 = vsel %vm1776_vm3, %v1804_v14, %v1806_v7 }
 0x174   : > { %v936_v27 = vpop.f32.mrf.mxu2 }
 0x175   : > { %v1013_v57 = vadd.f32 %v936_v27, %v9254_v4  ;;  %v1201_v4 = vrot.slane %v8603_v30, 1 }
 0x176   : > { %v1669_v41 = vpop.f32.mrf.mxu0  ;;  %v1300_v53 = vpop.f32.mrf.mxu3 }
 0x177   : > { %v1374_v29 = vadd.f32 %v1297_v1, %v1013_v57  ;;  %v1548_v1 = vrot.slane %v1546_v47, 2 }
 0x178   : > { %v1907_v36 = vpop.f32.mrf.mxu1 }
 0x179   : > { %8043 = vmatmul.msk.bf16.gmra.mxu0 %vm508_vm1, %v1541_v12  ;;  %7937 = vmatmul.msk.bf16.gmra.mxu2 %vm508_vm1, %v839_v59  ;;  %v1743_v0 = vadd.f32 %v1666_v13, %v1374_v29  ;;  %v1202_v13 = vsel %vm810_vm4, %v1199_v33, %v1201_v4  ;;  %v1549_v57 = vor.u32 %v1548_v1, %v1545_v19 }
 0x17b   : > { %v9422_v51 = vadd.f32 %v1902_v55, %v1743_v0  ;;  %v8921_v55 = vld [vmem:[%s9014_s8 + $0x78] sm:$0xff]  ;;  %v1550_v14 = vsel %vm1407_vm5, %v1540_v17, %v1549_v57 }
 0x17c   : > { %v939_v60 = vpop.f32.mrf.mxu2  ;;  %v840_v12 = vrot.slane %v8921_v55, 1 }
 0x17d   : > { %v1014_v35 = vadd.f32 %v939_v60, %v9264_v25  ;;  %v1555_v60 = vshll.u32 %v8604_v10, 16 }
 0x17e   : > { %v1671_v3 = vpop.f32.mrf.mxu0  ;;  %v1302_v43 = vpop.f32.mrf.mxu3  ;;  %v841_v33 = vsel %vm810_vm4, %v838_v31, %v840_v12 }
 0x17f   : > { %v1375_v56 = vadd.f32 %v1300_v53, %v1014_v35  ;;  %v1808_v35 = vrot.slane %v8604_v10, 2 }
 0x180   : > { %v1910_v22 = vpop.f32.mrf.mxu1 }
 0x181   : > { %v1744_v27 = vadd.f32 %v1669_v41, %v1375_v56 }
 0x183   : > { %8063 = vmatmul.msk.bf16.gmra.mxu1 %vm508_vm1, %v1807_v15  ;;  %8025 = vmatmul.msk.bf16.gmra.mxu3 %vm508_vm1, %v1202_v13  ;;  %v9430_v25 = vadd.f32 %v1905_v37, %v1744_v27  ;;  %v1552_v37 = vshrl.u32 %v8604_v10, 16  ;;  %v1809_v27 = vsel %vm1776_vm3, %v1806_v7, %v1808_v35 }
 0x184   : > { %v941_v59 = vpop.f32.mrf.mxu2 }
 0x185   : > { %v1015_v29 = vadd.f32 %v941_v59, %v9272_v28  ;;  %v1203_v28 = vrot.slane %v8604_v10, 1  ;;  %v1554_v56 = vrot.slane %v1552_v37, 1  ;;  %v8605_v37 = vld [vmem:[%s9014_s8 + $0x90] sm:$0xff] }
 0x186   : > { %v1674_v30 = vpop.f32.mrf.mxu0  ;;  %v1305_v0 = vpop.f32.mrf.mxu3 }
 0x187   : > { %v1376_v41 = vadd.f32 %v1302_v43, %v1015_v29  ;;  %v1557_v43 = vrot.slane %v1555_v60, 2  ;;  %v1561_v60 = vshrl.u32 %v8605_v37, 16 }
 0x188   : > { %v9435_v53 = vpop.f32.mrf.mxu1 }
 0x189   : > { %8044 = vmatmul.msk.bf16.gmra.mxu0 %vm508_vm1, %v1550_v14  ;;  %7938 = vmatmul.msk.bf16.gmra.mxu2 %vm508_vm1, %v841_v33  ;;  %v1745_v47 = vadd.f32 %v1671_v3, %v1376_v41  ;;  %v1204_v3 = vsel %vm810_vm4, %v1201_v4, %v1203_v28  ;;  %v1558_v29 = vor.u32 %v1557_v43, %v1554_v56 }
 0x18b   : > { %v9440_v19 = vadd.f32 %v1907_v36, %v1745_v47  ;;  %v8922_v36 = vld [vmem:[%s9014_s8 + $0x80] sm:$0xff]  ;;  %v1559_v7 = vsel %vm1407_vm5, %v1549_v57, %v1558_v29 }
 0x18c   : > { %v944_v1 = vpop.f32.mrf.mxu2  ;;  %v842_v14 = vrot.slane %v8922_v36, 1 }
 0x18d   : > { %v1016_v17 = vadd.f32 %v944_v1, %v9282_v2  ;;  %v1810_v1 = vrot.slane %v8605_v37, 2 }
 0x18e   : > { %v1676_v31 = vpop.f32.mrf.mxu0  ;;  %v1307_v15 = vpop.f32.mrf.mxu3  ;;  %v843_v4 = vsel %vm810_vm4, %v840_v12, %v842_v14 }
 0x18f   : > { %v1377_v55 = vadd.f32 %v1305_v0, %v1016_v17  ;;  %v1205_v17 = vrot.slane %v8605_v37, 1 }
 0x190   : > { %v1915_v13 = vpop.f32.mrf.mxu1 }
 0x191   : > { %v1746_v59 = vadd.f32 %v1674_v30, %v1377_v55 }
 0x193   : > { %8064 = vmatmul.msk.bf16.gmra.mxu1 %vm508_vm1, %v1809_v27  ;;  %8026 = vmatmul.msk.bf16.gmra.mxu3 %vm508_vm1, %v1204_v3  ;;  %v9448_v2 = vadd.f32 %v1910_v22, %v1746_v59  ;;  %v1811_v3 = vsel %vm1776_vm3, %v1808_v35, %v1810_v1  ;;  %v1401_v59 = vld [vmem:[%s9014_s8 + $0x98] sm:$0x3] }
 0x194   : > { %v946_v33 = vpop.f32.mrf.mxu2 }
 0x195   : > { %12478 = vst [vmem:[#allocation6_spill] sm:$0xff] %v9448_v2  ;;  %v1017_v41 = vadd.f32 %v946_v33, %v9290_v32  ;;  %v1564_v32 = vshll.u32 %v8605_v37, 16  ;;  %v1076_v33 = vld [vmem:[%s9014_s8 + $0x98] sm:$0x1] }
 0x196   : > { %v1679_v10 = vpop.f32.mrf.mxu0  ;;  %v1310_v47 = vpop.f32.mrf.mxu3  ;;  %v9485_v2 = vld [vmem:[%s9014_s8 + $0x18] sm:$0xff] }
 0x197   : > { %v1378_v30 = vadd.f32 %v1307_v15, %v1017_v41  ;;  %v1563_v15 = vrot.slane %v1561_v60, 1  ;;  %v1566_v27 = vrot.slane %v1564_v32, 2  ;;  %v1152_v60 = vunpack.c.l.b16 %v1076_v33 }
 0x198   : > { %v9453_v0 = vpop.f32.mrf.mxu1 }
 0x199   : > { %8045 = vmatmul.msk.bf16.gmra.mxu0 %vm508_vm1, %v1559_v7  ;;  %7939 = vmatmul.msk.bf16.gmra.mxu2 %vm508_vm1, %v843_v4  ;;  %v9458_v22 = vadd.f32 %v1676_v31, %v1378_v30  ;;  %v1206_v31 = vsel %vm810_vm4, %v1203_v28, %v1205_v17  ;;  %v1567_v7 = vor.u32 %v1566_v27, %v1563_v15  ;;  %v1405_v4 = vunpack.c.l.b16 %v1401_v59  ;;  %v2006_v59 = vld [vmem:[%s9014_s8 + $0x10] sm:$0xc] }
 0x19a   : > { %v2082_v33 = vunpack.c.l.b16 %v2006_v59 }
 0x19c   : > { %v949_v56 = vpop.f32.mrf.mxu2 }
 0x19d   : > { %v1018_v57 = vadd.f32 %v949_v56, %v9300_v58  ;;  %v8923_v58 = vld [vmem:[%s9014_s8 + $0x88] sm:$0xff]  ;;  %v1406_v56 = vpack.c.b16 %v1405_v4, %v1405_v4 }
 0x19e   : > { %v1681_v12 = vpop.f32.mrf.mxu0  ;;  %v1312_v43 = vpop.f32.mrf.mxu3  ;;  %v844_v30 = vrot.slane %v8923_v58, 1 }
 0x19f   : > { %v1379_v36 = vadd.f32 %v1310_v47, %v1018_v57 }
 0x1a0   : > { %v1920_v55 = vpop.f32.mrf.mxu1  ;;  %v845_v57 = vsel %vm810_vm4, %v842_v14, %v844_v30 }
 0x1a1   : > { %v1748_v41 = vadd.f32 %v1679_v10, %v1379_v36  ;;  %v1568_v10 = vsel %vm1407_vm5, %v1558_v29, %v1567_v7  ;;  %v2007_v36 = vld [vmem:[%s9014_s8 + $0x14] sm:$0xf] }
 0x1a2   : > { %v2083_v29 = vunpack.c.l.b16 %v2007_v36 }
 0x1a3   : > { %8065 = vmatmul.msk.bf16.gmra.mxu1 %vm508_vm1, %v1811_v3  ;;  %8027 = vmatmul.msk.bf16.gmra.mxu3 %vm508_vm1, %v1206_v31  ;;  %v9468_v37 = vadd.f32 %v1915_v13, %v1748_v41  ;;  %v1171_v3 = vpack.c.b16 %v1152_v60, %v1152_v60  ;;  %v1573_v31 = vshll.u32 %v1406_v56, 16  ;;  %v1812_v41 = vrot.slane %v1406_v56, 2 }
 0x1a4   : > { %v951_v35 = vpop.f32.mrf.mxu2 }
 0x1a5   : > { %12479 = vst [vmem:[#allocation7_spill] sm:$0xff] %v9468_v37  ;;  %v1019_v47 = vadd.f32 %v951_v35, %v9308_v23  ;;  %v1570_v23 = vshrl.u32 %v1406_v56, 16  ;;  %v1207_v4 = vrot.slane %v1171_v3, 1 }
 0x1a6   : > { %v1684_v32 = vpop.f32.mrf.mxu0  ;;  %v1315_v28 = vpop.f32.mrf.mxu3 }
 0x1a7   : > { %v1380_v27 = vadd.f32 %v1312_v43, %v1019_v47  ;;  %v1572_v35 = vrot.slane %v1570_v23, 1  ;;  %v1575_v47 = vrot.slane %v1573_v31, 2 }
 0x1a8   : > { %v9473_v15 = vpop.f32.mrf.mxu1 }
 0x1a9   : > { %8046 = vmatmul.msk.bf16.gmra.mxu0 %vm508_vm1, %v1568_v10  ;;  %7940 = vmatmul.msk.bf16.gmra.mxu2 %vm508_vm1, %v845_v57  ;;  %v9479_v13 = vadd.f32 %v1681_v12, %v1380_v27  ;;  %v2119_v10 = vpack.c.b16 %v2083_v29, %v2082_v33  ;;  %v1813_v57 = vsel %vm1776_vm3, %v1810_v1, %v1812_v41  ;;  %v2383_v1 = vshrl.u32 %v9485_v2, 16 }
 0x1aa   : > { %v1208_v27 = vsel %vm810_vm4, %v1205_v17, %v1207_v4  ;;  %v1576_v36 = vor.u32 %v1575_v47, %v1572_v35 }
 0x1ab   : > { %v2375_v56 = vshrl.u32 %v2119_v10, 16  ;;  %v2378_v23 = vshll.u32 %v2119_v10, 16  ;;  %v2385_v47 = vrot.slane %v2383_v1, 2 }
 0x1ac   : > { %v954_v14 = vpop.f32.mrf.mxu2  ;;  %v1577_v41 = vsel %vm1407_vm5, %v1567_v7, %v1576_v36 }
 0x1ad   : > { %v1020_v58 = vadd.f32 %v954_v14, %v9318_v49  ;;  %v846_v49 = vrot.slane %v9150_v61, 1  ;;  %v2377_v14 = vrot.slane %v2375_v56, 2  ;;  %v2380_v35 = vrot.slane %v2378_v23, 3 }
 0x1ae   : > { %v1686_v43 = vpop.f32.mrf.mxu0  ;;  %v1317_v60 = vpop.f32.mrf.mxu3 }
 0x1af   : > { %v1381_v12 = vadd.f32 %v1315_v28, %v1020_v58  ;;  %v2386_v28 = vshll.u32 %v9485_v2, 16  ;;  %v847_v4 = vsel %vm810_vm4, %v844_v30, %v846_v49  ;;  %v2736_v58 = vld [vmem:[%s9014_s8 + $0x10] sm:$0x8] }
 0x1b0   : > { %v1925_v37 = vpop.f32.mrf.mxu1 }
 0x1b1   : > { %v1750_v59 = vadd.f32 %v1684_v32, %v1381_v12  ;;  %v2740_v12 = vunpack.c.l.b16 %v2736_v58 }
 0x1b3   : > { %8066 = vmatmul.msk.bf16.gmra.mxu1 %vm508_vm1, %v1813_v57  ;;  %8028 = vmatmul.msk.bf16.gmra.mxu3 %vm508_vm1, %v1208_v27  ;;  %v9490_v3 = vadd.f32 %v1920_v55, %v1750_v59  ;;  %v2388_v57 = vrot.slane %v2386_v28, 3  ;;  %v2381_v27 = vor.u32 %v2380_v35, %v2377_v14  ;;  %v9507_v28 = vld [vmem:[%s9014_s8 + $0x20] sm:$0xff] }
 0x1b4   : > { %v956_v17 = vpop.f32.mrf.mxu2 }
 0x1b5   : > { %v1021_v31 = vadd.f32 %v956_v17, %v9326_v20  ;;  %v2389_v7 = vor.u32 %v2388_v57, %v2385_v47 }
 0x1b6   : > { %v1689_v32 = vpop.f32.mrf.mxu0  ;;  %v1320_v33 = vpop.f32.mrf.mxu3 }
 0x1b7   : > { %v1382_v55 = vadd.f32 %v1317_v60, %v1021_v31  ;;  %v2741_v60 = vpack.c.b16 %v2083_v29, %v2740_v12  ;;  %v2390_v1 = vsel %vm2373_vm7, %v2381_v27, %v2389_v7  ;;  %v2392_v29 = vshrl.u32 %v9507_v28, 16 }
 0x1b8   : > { %v9498_v61 = vpop.f32.mrf.mxu1 }
 0x1b9   : > { %8047 = vmatmul.msk.bf16.gmra.mxu0 %vm508_vm1, %v1577_v41  ;;  %7941 = vmatmul.msk.bf16.gmra.mxu2 %vm508_vm1, %v847_v4  ;;  %v9502_v20 = vadd.f32 %v1686_v43, %v1382_v55  ;;  %v2743_v31 = vrot.slane %v2741_v60, 3  ;;  %v2744_v43 = vrot.slane %v9485_v2, 3  ;;  %v2138_v41 = vrot.slane %v2119_v10, 2 }
 0x1ba   : > { %v2139_v4 = vrot.slane %v9485_v2, 2  ;;  %v2394_v2 = vrot.slane %v2392_v29, 2 }
 0x1bb   : > { %v2745_v35 = vsel %vm2742_vm8, %v2743_v31, %v2744_v43  ;;  %v9528_v31 = vld [vmem:[%s9014_s8 + $0x28] sm:$0xff] }
 0x1bc   : > { %v959_v59 = vpop.f32.mrf.mxu2  ;;  %v2140_v47 = vsel %vm1776_vm3, %v2138_v41, %v2139_v4  ;;  %v2746_v41 = vrot.slane %v9507_v28, 3 }
 0x1bd   : > { %v1022_v30 = vadd.f32 %v959_v59, %v9180_v50 }
 0x1be   : > { %v1691_v36 = vpop.f32.mrf.mxu0  ;;  %v1322_v49 = vpop.f32.mrf.mxu3 }
 0x1bf   : > { %v1383_v23 = vadd.f32 %v1320_v33, %v1022_v30  ;;  %v2395_v33 = vshll.u32 %v9507_v28, 16 }
 0x1c0   : > { %v1930_v56 = vpop.f32.mrf.mxu1 }
 0x1c1   : > { %v1752_v17 = vadd.f32 %v1689_v32, %v1383_v23 }
 0x1c3   : > { %8155 = vmatmul.msk.bf16.vlgmr.msra.gmra.mxu3 %vm508_vm1, %v2390_v1  ;;  %v9512_v50 = vadd.f32 %v1925_v37, %v1752_v17  ;;  %v2397_v37 = vrot.slane %v2395_v33, 3  ;;  %v2401_v33 = vshrl.u32 %v9528_v31, 16 }
 0x1c4   : > { %v961_v14 = vpop.f32.mrf.mxu2 }
 0x1c5   : > { %v1023_v58 = vadd.f32 %v961_v14, %v9189_v5  ;;  %v2398_v27 = vor.u32 %v2397_v37, %v2394_v2 }
 0x1c6   : > { %v1694_v55 = vpop.f32.mrf.mxu0  ;;  %v1325_v32 = vpop.f32.mrf.mxu3 }
 0x1c7   : > { %v1384_v10 = vadd.f32 %v1322_v49, %v1023_v58  ;;  %v2399_v17 = vsel %vm2373_vm7, %v2389_v7, %v2398_v27 }
 0x1c8   : > { %v9519_v57 = vpop.f32.mrf.mxu1 }
 0x1c9   : > { %8174 = vmatmul.msk.bf16.vlgmr.msra.gmra.mxu0 %vm508_vm1, %v2745_v35  ;;  %8136 = vmatmul.msk.bf16.vlgmr.msra.gmra.mxu2 %vm508_vm1, %v2140_v47  ;;  %v9523_v12 = vadd.f32 %v1691_v36, %v1384_v10  ;;  %v2141_v36 = vrot.slane %v9507_v28, 2  ;;  %v2747_v35 = vsel %vm2742_vm8, %v2744_v43, %v2746_v41  ;;  %v2403_v28 = vrot.slane %v2401_v33, 2 }
 0x1ca   : > { %v2748_v33 = vrot.slane %v9528_v31, 3 }
 0x1cc   : > { %v964_v5 = vpop.f32.mrf.mxu2 }
 0x1cd   : > { %v1024_v59 = vadd.f32 %v964_v5, %v9198_v21  ;;  %v2404_v21 = vshll.u32 %v9528_v31, 16 }
 0x1ce   : > { %v1696_v30 = vpop.f32.mrf.mxu0  ;;  %v1327_v60 = vpop.f32.mrf.mxu3 }
 0x1cf   : > { %v1385_v1 = vadd.f32 %v1325_v32, %v1024_v59 }
 0x1d0   : > { %v1935_v23 = vpop.f32.mrf.mxu1 }
 0x1d1   : > { %v1754_v49 = vadd.f32 %v1694_v55, %v1385_v1  ;;  %v2142_v55 = vsel %vm1776_vm3, %v2139_v4, %v2141_v36 }
 0x1d3   : > { %8156 = vmatmul.msk.bf16.gmra.mxu3 %vm508_vm1, %v2399_v17  ;;  %v9533_v29 = vadd.f32 %v1930_v56, %v1754_v49  ;;  %v2406_v56 = vrot.slane %v2404_v21, 3  ;;  %v9549_v49 = vld [vmem:[%s9014_s8 + $0x30] sm:$0xff] }
 0x1d4   : > { %v966_v14 = vpop.f32.mrf.mxu2 }
 0x1d5   : > { %12480 = vst [vmem:[#allocation8_spill] sm:$0xff] %v9533_v29  ;;  %v1025_v58 = vadd.f32 %v966_v14, %v9207_v38  ;;  %v2407_v37 = vor.u32 %v2406_v56, %v2403_v28  ;;  %v2410_v14 = vshrl.u32 %v9549_v49, 16 }
 0x1d6   : > { %v1699_v32 = vpop.f32.mrf.mxu0  ;;  %v1330_v7 = vpop.f32.mrf.mxu3 }
 0x1d7   : > { %v1386_v10 = vadd.f32 %v1327_v60, %v1025_v58  ;;  %v2408_v17 = vsel %vm2373_vm7, %v2398_v27, %v2407_v37 }
 0x1d8   : > { %v9540_v47 = vpop.f32.mrf.mxu1 }
 0x1d9   : > { %8175 = vmatmul.msk.bf16.gmra.mxu0 %vm508_vm1, %v2747_v35  ;;  %8137 = vmatmul.msk.bf16.gmra.mxu2 %vm508_vm1, %v2142_v55  ;;  %v9544_v2 = vadd.f32 %v1696_v30, %v1386_v10  ;;  %v2143_v30 = vrot.slane %v9528_v31, 2  ;;  %v2749_v55 = vsel %vm2742_vm8, %v2746_v41, %v2748_v33  ;;  %v2412_v31 = vrot.slane %v2410_v14, 2 }
 0x1dc   : > { %v969_v38 = vpop.f32.mrf.mxu2 }
 0x1dd   : > { %v1026_v5 = vadd.f32 %v969_v38, %v9216_v54  ;;  %v2413_v54 = vshll.u32 %v9549_v49, 16 }
 0x1de   : > { %v1701_v59 = vpop.f32.mrf.mxu0  ;;  %v1332_v43 = vpop.f32.mrf.mxu3 }
 0x1df   : > { %v1387_v4 = vadd.f32 %v1330_v7, %v1026_v5 }
 0x1e0   : > { %v1940_v1 = vpop.f32.mrf.mxu1 }
 0x1e1   : > { %v1756_v60 = vadd.f32 %v1699_v32, %v1387_v4  ;;  %v2144_v32 = vsel %vm1776_vm3, %v2141_v36, %v2143_v30 }
 0x1e3   : > { %8157 = vmatmul.msk.bf16.gmra.mxu3 %vm508_vm1, %v2408_v17  ;;  %v9554_v21 = vadd.f32 %v1935_v23, %v1756_v60  ;;  %v2415_v23 = vrot.slane %v2413_v54, 3  ;;  %v9570_v60 = vld [vmem:[%s9014_s8 + $0x38] sm:$0xff]  ;;  %v2750_v54 = vrot.slane %v9549_v49, 3 }
 0x1e4   : > { %v971_v58 = vpop.f32.mrf.mxu2 }
 0x1e5   : > { %12481 = vst [vmem:[#allocation9_spill] sm:$0xff] %v9554_v21  ;;  %v1027_v7 = vadd.f32 %v971_v58, %v9225_v6  ;;  %v2416_v38 = vor.u32 %v2415_v23, %v2412_v31 }
 0x1e6   : > { %v1704_v35 = vpop.f32.mrf.mxu0  ;;  %v1335_v27 = vpop.f32.mrf.mxu3 }
 0x1e7   : > { %v1388_v28 = vadd.f32 %v1332_v43, %v1027_v7  ;;  %v2417_v36 = vsel %vm2373_vm7, %v2407_v37, %v2416_v38  ;;  %v2419_v7 = vshrl.u32 %v9570_v60, 16 }
 0x1e8   : > { %v9561_v10 = vpop.f32.mrf.mxu1 }
 0x1e9   : > { %8176 = vmatmul.msk.bf16.gmra.mxu0 %vm508_vm1, %v2749_v55  ;;  %8138 = vmatmul.msk.bf16.gmra.mxu2 %vm508_vm1, %v2144_v32  ;;  %v9565_v56 = vadd.f32 %v1701_v59, %v1388_v28  ;;  %v2145_v59 = vrot.slane %v9549_v49, 2  ;;  %v2751_v28 = vsel %vm2742_vm8, %v2748_v33, %v2750_v54  ;;  %v2421_v23 = vrot.slane %v2419_v7, 2 }
 0x1ec   : > { %v974_v6 = vpop.f32.mrf.mxu2 }
 0x1ed   : > { %v1028_v5 = vadd.f32 %v974_v6, %v9234_v24  ;;  %v2422_v24 = vshll.u32 %v9570_v60, 16 }
 0x1ee   : > { %v1706_v4 = vpop.f32.mrf.mxu0  ;;  %v1337_v41 = vpop.f32.mrf.mxu3 }
 0x1ef   : > { %v1389_v17 = vadd.f32 %v1335_v27, %v1028_v5  ;;  %v2424_v6 = vrot.slane %v2422_v24, 3  ;;  %v2752_v24 = vrot.slane %v9570_v60, 3 }
 0x1f0   : > { %v1945_v43 = vpop.f32.mrf.mxu1 }
 0x1f1   : > { %v1758_v14 = vadd.f32 %v1704_v35, %v1389_v17  ;;  %v2146_v35 = vsel %vm1776_vm3, %v2143_v30, %v2145_v59  ;;  %v2425_v5 = vor.u32 %v2424_v6, %v2421_v23 }
 0x1f3   : > { %8158 = vmatmul.msk.bf16.gmra.mxu3 %vm508_vm1, %v2417_v36  ;;  %v9575_v58 = vadd.f32 %v1940_v1, %v1758_v14  ;;  %v2426_v30 = vsel %vm2373_vm7, %v2416_v38, %v2425_v5 }
 0x1f4   : > { %v976_v55 = vpop.f32.mrf.mxu2 }
 0x1f5   : > { %12482 = vst [vmem:[#allocation10_spill] sm:$0xff] %v9575_v58  ;;  %v1029_v27 = vadd.f32 %v976_v55, %v9243_v46 }
 0x1f6   : > { %v1709_v37 = vpop.f32.mrf.mxu0  ;;  %v1340_v32 = vpop.f32.mrf.mxu3 }
 0x1f7   : > { %v1390_v31 = vadd.f32 %v1337_v41, %v1029_v27  ;;  %v9591_v41 = vld [vmem:[%s9014_s8 + $0x40] sm:$0xff] }
 0x1f8   : > { %v9586_v49 = vpop.f32.mrf.mxu1  ;;  %v2428_v27 = vshrl.u32 %v9591_v41, 16 }
 0x1f9   : > { %8177 = vmatmul.msk.bf16.gmra.mxu0 %vm508_vm1, %v2751_v28  ;;  %8139 = vmatmul.msk.bf16.gmra.mxu2 %vm508_vm1, %v2146_v35  ;;  %v9584_v1 = vadd.f32 %v1706_v4, %v1390_v31  ;;  %v2147_v4 = vrot.slane %v9570_v60, 2 }
 0x1fb   : > { %v2148_v23 = vsel %vm1776_vm3, %v2145_v59, %v2147_v4 }
 0x1fc   : > { %v979_v46 = vpop.f32.mrf.mxu2 }
 0x1fd   : > { %v1030_v17 = vadd.f32 %v979_v46, %v9252_v62  ;;  %v2431_v62 = vshll.u32 %v9591_v41, 16  ;;  %v2430_v46 = vrot.slane %v2428_v27, 2 }
 0x1fe   : > { %v1711_v36 = vpop.f32.mrf.mxu0  ;;  %v1342_v33 = vpop.f32.mrf.mxu3 }
 0x1ff   : > { %v1391_v14 = vadd.f32 %v1340_v32, %v1030_v17  ;;  %v2433_v60 = vrot.slane %v2431_v62, 3  ;;  %v12428_v62 = vrot.slane %v9591_v41, 3 }
 0x200   : > { %v1950_v35 = vpop.f32.mrf.mxu1 }
 0x201   : > { %v1760_v7 = vadd.f32 %v1709_v37, %v1391_v14  ;;  %v2753_v37 = vsel %vm2742_vm8, %v2750_v54, %v2752_v24  ;;  %v2434_v17 = vor.u32 %v2433_v60, %v2430_v46 }
 0x203   : > { %8159 = vmatmul.msk.bf16.gmra.mxu3 %vm508_vm1, %v2426_v30  ;;  %v9596_v55 = vadd.f32 %v1945_v43, %v1760_v7  ;;  %v2435_v59 = vsel %vm2373_vm7, %v2425_v5, %v2434_v17 }
 0x204   : > { %v981_v28 = vpop.f32.mrf.mxu2 }
 0x205   : > { %12483 = vst [vmem:[#allocation11_spill] sm:$0xff] %v9596_v55  ;;  %v1031_v32 = vadd.f32 %v981_v28, %v9261_v18 }
 0x206   : > { %v1714_v38 = vpop.f32.mrf.mxu0  ;;  %v1345_v31 = vpop.f32.mrf.mxu3 }
 0x207   : > { %v1392_v6 = vadd.f32 %v1342_v33, %v1031_v32  ;;  %v9612_v33 = vld [vmem:[%s9014_s8 + $0x48] sm:$0xff] }
 0x208   : > { %v9608_v28 = vpop.f32.mrf.mxu1 }
 0x209   : > { %8178 = vmatmul.msk.bf16.gmra.mxu0 %vm508_vm1, %v2753_v37  ;;  %8140 = vmatmul.msk.bf16.gmra.mxu2 %vm508_vm1, %v2148_v23  ;;  %v9605_v43 = vadd.f32 %v1711_v36, %v1392_v6  ;;  %v2149_v36 = vrot.slane %v9591_v41, 2  ;;  %v2440_v37 = vshll.u32 %v9612_v33, 16 }
 0x20b   : > { %v2150_v46 = vsel %vm1776_vm3, %v2147_v4, %v2149_v36 }
 0x20c   : > { %v984_v14 = vpop.f32.mrf.mxu2 }
 0x20d   : > { %v1032_v18 = vadd.f32 %v984_v14, %v9270_v42  ;;  %v2437_v42 = vshrl.u32 %v9612_v33, 16  ;;  %v2442_v14 = vrot.slane %v2440_v37, 3 }
 0x20e   : > { %v1716_v30 = vpop.f32.mrf.mxu0  ;;  %v1347_v7 = vpop.f32.mrf.mxu3 }
 0x20f   : > { %v1393_v54 = vadd.f32 %v1345_v31, %v1032_v18 }
 0x210   : > { %v1955_v18 = vpop.f32.mrf.mxu1 }
 0x211   : > { %v1762_v27 = vadd.f32 %v1714_v38, %v1393_v54  ;;  %v2755_v38 = vsel %vm2742_vm8, %v2752_v24, %v12428_v62  ;;  %v9630_v54 = vld [vmem:[%s9014_s8 + $0x50] sm:$0xff] }
 0x212   : > { %v2446_v62 = vshrl.u32 %v9630_v54, 16  ;;  %v2449_v37 = vshll.u32 %v9630_v54, 16 }
 0x213   : > { %8160 = vmatmul.msk.bf16.gmra.mxu3 %vm508_vm1, %v2435_v59  ;;  %v9617_v32 = vadd.f32 %v1950_v35, %v1762_v27  ;;  %v2439_v35 = vrot.slane %v2437_v42, 2  ;;  %v2972_v59 = vlaneseq }
 0x214   : > { %v986_v23 = vpop.f32.mrf.mxu2 }
 0x215   : > { %12484 = vst [vmem:[#allocation12_spill] sm:$0xff] %v9617_v32  ;;  %v1033_v31 = vadd.f32 %v986_v23, %v9279_v63  ;;  %v2443_v27 = vor.u32 %v2442_v14, %v2439_v35  ;;  %v9635_v23 = vshrl.u32 %v2972_v59, 7  ;;  %v9653_v14 = vadd.f32 %v9473_v15, %v9502_v20 }
 0x216   : > { %v1719_v5 = vpop.f32.mrf.mxu0  ;;  %v1350_v6 = vpop.f32.mrf.mxu3  ;;  %v9657_v59 = vadd.f32 %v9498_v61, %v9523_v12  ;;  %v12429_v15 = vrot.slane %v9612_v33, 2 }
 0x217   : > { %v1394_v60 = vadd.f32 %v1347_v7, %v1033_v31  ;;  %v3012_v31 = vand.u32 65535, %v9635_v23  ;;  %v3013_v35 = vshrl.u32 %v9635_v23, 16 }
 0x218   : > { %v9670_v61 = vpop.f32.mrf.mxu1 }
 0x219   : > { %8179 = vmatmul.msk.bf16.gmra.mxu0 %vm508_vm1, %v2755_v38  ;;  %8141 = vmatmul.msk.bf16.gmra.mxu2 %vm508_vm1, %v2150_v46  ;;  %v9633_v63 = vadd.f32 %v1716_v30, %v1394_v60  ;;  %v9643_v38 = vadd.f32 %v9435_v53, %v9458_v22  ;;  %v9647_v30 = vadd.f32 %v9453_v0, %v9479_v13  ;;  %v12430_v53 = vrot.slane %v9612_v33, 3 }
 0x21a   : > { %v2444_v60 = vsel %vm2373_vm7, %v2434_v17, %v2443_v27  ;;  %v2448_v22 = vrot.slane %v2446_v62, 2  ;;  %v2451_v13 = vrot.slane %v2449_v37, 3  ;;  %v9662_v17 = vadd.f32 %v9519_v57, %v9544_v2  ;;  %v9675_v62 = vld [vmem:[%s9014_s8 + $0x58] sm:$0xff] }
 0x21b   : > { %v9679_v57 = vadd.f32 %v9561_v10, %v9584_v1  ;;  %v12431_v10 = vmov 0  }
 0x21c   : > { %v989_v24 = vpop.f32.mrf.mxu2  ;;  %12485 = vst [vmem:[#allocation13_spill] sm:$0xff] %v9662_v17 }
 0x21d   : > { %v1034_v4 = vadd.f32 %v989_v24, %v9288_v40  ;;  %v3016_v40 = vmul.u32 58254, %v3012_v31  ;;  %v3017_v24 = vmul.u32 14564, %v3013_v35  ;;  %12488 = vst [vmem:[#allocation16_spill] sm:$0xff] %v9679_v57 }
 0x21e   : > { %v1721_v7 = vpop.f32.mrf.mxu0  ;;  %v1352_v42 = vpop.f32.mrf.mxu3 }
 0x21f   : > { %v1395_v46 = vadd.f32 %v1350_v6, %v1034_v4  ;;  %v3015_v6 = vmul.u32 14564, %v3012_v31  ;;  %v9666_v4 = vadd.f32 %v9540_v47, %v9565_v56  ;;  %v3019_v20 = vshll.u32 %v3016_v40, 16 }
 0x220   : > { %v3021_v37 = vshll.u32 %v3017_v24, 16  ;;  %v9682_v56 = vadd.s32 8, %v9635_v23 }
 0x221   : > { %v1764_v0 = vadd.f32 %v1719_v5, %v1395_v46  ;;  %12486 = vst [vmem:[#allocation14_spill] sm:$0xff] %v9666_v4  ;;  %v3018_v5 = vmul.u32 58254, %v3013_v35  ;;  %vm3023_vm9 = vc.u32 %v3015_v6, %v3019_v20  ;;  %v3025_v47 = vadd.s32 %v3019_v20, %v3015_v6 }
 0x222   : > { %v3024_v1 = vsel %vm3023_vm9, 1, %v12431_v10  ;;  %v2152_v6 = vsel %vm1776_vm3, %v2149_v36, %v12429_v15  ;;  %v3041_v20 = vand.u32 65535, %v9682_v56  ;;  %v3042_v36 = vshrl.u32 %v9682_v56, 16 }
 0x223   : > { %8161 = vmatmul.msk.bf16.gmra.mxu3 %vm508_vm1, %v2444_v60  ;;  %v9672_v12 = vadd.f32 %v1955_v18, %v1764_v0  ;;  %v12489_v18 = vrot.slane %v9591_v41, 3  ;;  %v9690_v0 = vor.u32 %v2451_v13, %v2448_v22  ;;  %vm3027_vm10 = vc.u32 %v3025_v47, %v3021_v37  ;;  %v9713_v47 = vld [vmem:[%s9014_s8 + $0x60] sm:$0xff] }
 0x224   : > { %v991_v2 = vpop.f32.mrf.mxu2  ;;  %v3028_v22 = vsel %vm3027_vm10, 1, %v12431_v10  ;;  %v9703_v13 = vadd.f32 %v9586_v49, %v9605_v43  ;;  %v2458_v49 = vshll.u32 %v9675_v62, 16 }
 0x225   : > { %12487 = vst [vmem:[#allocation15_spill] sm:$0xff] %v9672_v12  ;;  %v1035_v31 = vadd.f32 %v991_v2, %v9297_v39  ;;  %v2757_v35 = vsel %vm2742_vm8, %v12489_v18, %v12430_v53  ;;  %v3026_v39 = vadd.s32 %v3024_v1, %v3018_v5  ;;  %v2455_v12 = vshrl.u32 %v9675_v62, 16 }
 0x226   : > { %v1724_v46 = vpop.f32.mrf.mxu0  ;;  %v1355_v60 = vpop.f32.mrf.mxu3  ;;  %v3020_v18 = vshrl.u32 %v3016_v40, 16  ;;  %12490 = vst [vmem:[#allocation17_spill] sm:$0xff] %v9703_v13  ;;  %v3045_v5 = vmul.u32 58254, %v3041_v20  ;;  %v3022_v40 = vshrl.u32 %v3017_v24, 16  ;;  %v3046_v1 = vmul.u32 14564, %v3042_v36 }
 0x227   : > { %v1396_v2 = vadd.f32 %v1352_v42, %v1035_v31  ;;  %v3030_v41 = vadd.s32 %v3028_v22, %v3026_v39  ;;  %v2453_v42 = vsel %vm2373_vm7, %v2443_v27, %v9690_v0  ;;  %v3044_v31 = vmul.u32 14564, %v3041_v20 }
 0x228   : > { %v2758_v39 = vrot.slane %v9630_v54, 3  ;;  %v2153_v22 = vrot.slane %v9630_v54, 2  ;;  %v2457_v15 = vrot.slane %v2455_v12, 2  ;;  %v3050_v10 = vshll.u32 %v3046_v1, 16 }
 0x229   : > { %8180 = vmatmul.msk.bf16.gmra.mxu0 %vm508_vm1, %v2757_v35  ;;  %8142 = vmatmul.msk.bf16.gmra.mxu2 %vm508_vm1, %v2152_v6  ;;  %v9708_v37 = vadd.f32 %v1721_v7, %v1396_v2  ;;  %v3031_v43 = vadd.s32 %v3030_v41, %v3020_v18  ;;  %v3048_v35 = vshll.u32 %v3045_v5, 16  ;;  %v3047_v6 = vmul.u32 58254, %v3042_v36  ;;  %v1960_v2 = vpop.f32.mrf.mxu1 }
 0x22a   : > { %v2464_v18 = vshrl.u32 %v9713_v47, 16  ;;  %v2467_v41 = vshll.u32 %v9713_v47, 16  ;;  %v12491_v13 = vmov 0   ;;  %v2460_v57 = vrot.slane %v2458_v49, 3 }
 0x22b   : > { %v3032_v53 = vadd.s32 %v3031_v43, %v3022_v40  ;;  %vm3052_vm11 = vc.u32 %v3044_v31, %v3048_v35  ;;  %v3054_v27 = vadd.s32 %v3048_v35, %v3044_v31  ;;  %v9723_v12 = vadd.s32 16, %v9635_v23  ;;  %4455 = vst.msk [vmem:[#allocation2 + $0x4] sm:$0xf] %vm4453_vm13, %v12491_v13 }
 0x22c   : > { %v994_v7 = vpop.f32.mrf.mxu2  ;;  %v3053_v55 = vsel %vm3052_vm11, 1, %v12491_v13  ;;  %v3049_v43 = vshrl.u32 %v3045_v5, 16  ;;  %v2461_v5 = vor.u32 %v2460_v57, %v2457_v15  ;;  %4456 = vst.msk [vmem:[#allocation2 + $0x8] sm:$0xf] %vm4453_vm13, %v12491_v13 }
 0x22d   : > { %v1036_v24 = vadd.f32 %v994_v7, %v9306_v9  ;;  %v3055_v54 = vadd.s32 %v3053_v55, %v3047_v6  ;;  %vm3056_vm12 = vc.u32 %v3054_v27, %v3050_v10  ;;  %v3033_v40 = vshrl.u32 %v3032_v53, 4  ;;  %4457 = vst.msk [vmem:[#allocation2 + $0xc] sm:$0xf] %vm4453_vm13, %v12491_v13 }
 0x22e   : > { %v1726_v20 = vpop.f32.mrf.mxu0  ;;  %v1357_v32 = vpop.f32.mrf.mxu3  ;;  %v3057_v31 = vsel %vm3056_vm12, 1, %v12491_v13  ;;  %v12492_v9 = vrot.slane %v9612_v33, 3  ;;  %v3070_v58 = vand.u32 65535, %v9723_v12  ;;  %v3071_v4 = vshrl.u32 %v9723_v12, 16  ;;  %4458 = vst.msk [vmem:[#allocation2 + $0xa0] sm:$0xf] %vm4453_vm13, %v12491_v13 }
 0x22f   : > { %v1397_v36 = vadd.f32 %v1355_v60, %v1036_v24  ;;  %v3059_v7 = vadd.s32 %v3057_v31, %v3055_v54  ;;  %v2466_v55 = vrot.slane %v2464_v18, 2  ;;  %v2469_v10 = vrot.slane %v2467_v41, 3  ;;  %v12496_v41 = vld [vmem:[#allocation3_spill] sm:$0xff]  ;;  %4459 = vst.msk [vmem:[#allocation2 + $0xa4] sm:$0xf] %vm4453_vm13, %v12491_v13 }
 0x230   : > { %v2759_v35 = vsel %vm2742_vm8, %v12492_v9, %v2758_v39  ;;  %v3051_v6 = vshrl.u32 %v3046_v1, 16  ;;  %v12493_v53 = vrot.slane %v9612_v33, 2  ;;  %v3074_v24 = vmul.u32 58254, %v3070_v58  ;;  %4460 = vst.msk [vmem:[#allocation2 + $0xa8] sm:$0xf] %vm4453_vm13, %v12491_v13 }
 0x231   : > { %v1766_v49 = vadd.f32 %v1724_v46, %v1397_v36  ;;  %v3060_v27 = vadd.s32 %v3059_v7, %v3049_v43  ;;  %v12434_v54 = vrot.slane %v9675_v62, 3  ;;  %v3034_v31 = vmul.u32 18, %v3033_v40  ;;  %v9750_v7 = vpop.f32.mrf.mxu1 }
 0x232   : > { %v2154_v60 = vsel %vm1776_vm3, %v12493_v53, %v2153_v22  ;;  %v9738_v9 = vmul.u32 14564, %v3071_v4  ;;  %v9742_v46 = vadd.f32 %v9608_v28, %v9633_v63  ;;  %v3073_v18 = vmul.u32 14564, %v3070_v58  ;;  %12497 = vst [vmem:[#allocation3_spill] sm:$0xff] %v9750_v7 }
 0x233   : > { %8162 = vmatmul.msk.bf16.gmra.mxu3 %vm508_vm1, %v2453_v42  ;;  %v9735_v21 = vadd.f32 %v1960_v2, %v1766_v49  ;;  %v12433_v42 = vrot.slane %v9675_v62, 2  ;;  %v3061_v33 = vadd.s32 %v3060_v27, %v3051_v6  ;;  %v9748_v36 = vor.u32 %v2469_v10, %v2466_v55  ;;  %v9785_v27 = vld [vmem:[%s9014_s8 + $0x68] sm:$0xff] }
 0x234   : > { %12495 = vst [vmem:[#allocation19_spill] sm:$0xff] %v9742_v46  ;;  %v996_v1 = vpop.f32.mrf.mxu2  ;;  %v3076_v43 = vmul.u32 58254, %v3071_v4  ;;  %v3077_v40 = vshll.u32 %v3074_v24, 16  ;;  %v3079_v28 = vshll.u32 %v9738_v9, 16  ;;  %v9754_v63 = vadd.s32 24, %v9635_v23 }
 0x235   : > { %12494 = vst [vmem:[#allocation18_spill] sm:$0xff] %v9735_v21  ;;  %v1037_v15 = vadd.f32 %v996_v1, %v12496_v41  ;;  %v3062_v49 = vshrl.u32 %v3061_v33, 4  ;;  %v2462_v58 = vsel %vm2373_vm7, %v9690_v0, %v2461_v5  ;;  %v9761_v55 = vsel %vm2742_vm8, %v2758_v39, %v12434_v54 }
 0x236   : > { %v9746_v57 = vpop.f32.mrf.mxu0  ;;  %v1360_v2 = vpop.f32.mrf.mxu3  ;;  %v9764_v4 = vsub.s32 %v9635_v23, %v3034_v31  ;;  %v9770_v10 = vsel %vm1776_vm3, %v2153_v22, %v12433_v42  ;;  %vm3081_vm14 = vc.u32 %v3073_v18, %v3077_v40  ;;  %v3083_v0 = vadd.s32 %v3077_v40, %v3073_v18 }
 0x237   : > { %v1398_v6 = vadd.f32 %v1357_v32, %v1037_v15  ;;  %v3063_v32 = vmul.u32 18, %v3062_v49  ;;  %v3078_v53 = vshrl.u32 %v3074_v24, 16  ;;  %v3082_v22 = vsel %vm3081_vm14, 1, %v12491_v13 }
 0x238   : > { %v3084_v31 = vadd.s32 %v3082_v22, %v3076_v43  ;;  %vm3085_vm15 = vc.u32 %v3083_v0, %v3079_v28  ;;  %vm4053_vm0 = vcmp.ne.s32.totalorder %v9764_v4, 0  ;;  %vm4089_vm9 = vcmp.lt.s32.totalorder %v9764_v4, 0  ;;  %v12499_v43 = vld [vmem:[#allocation4_spill] sm:$0xff] }
 0x239   : > { %8181 = vmatmul.msk.bf16.gmra.mxu0 %vm508_vm1, %v2759_v35  ;;  %8143 = vmatmul.msk.bf16.gmra.mxu2 %vm508_vm1, %v2154_v60  ;;  %v9775_v39 = vadd.f32 %v1726_v20, %v1398_v6  ;;  %v9781_v35 = vsel %vm2373_vm7, %v2461_v5, %v9748_v36  ;;  %v3099_v20 = vand.u32 65535, %v9754_v63  ;;  %v3100_v60 = vshrl.u32 %v9754_v63, 16  ;;  %vm9827_vm12 = vmand %vm4089_vm9, %vm4053_vm0 }
 0x23a   : > { %v9796_v5 = vsub.s32 %v9682_v56, %v3063_v32  ;;  %v3086_v24 = vsel %vm3085_vm15, 1, %v12491_v13  ;;  %v9800_v33 = vadd.s32 18, %v9764_v4  ;;  %v3080_v41 = vshrl.u32 %v9738_v9, 16 }
 0x23b   : > { %12498 = vst [vmem:[#allocation20_spill] sm:$0xff] %v9775_v39  ;;  %v3088_v15 = vadd.s32 %v3086_v24, %v3084_v31  ;;  %v2473_v6 = vshrl.u32 %v9785_v27, 16  ;;  %v2476_v32 = vshll.u32 %v9785_v27, 16  ;;  %v3102_v22 = vmul.u32 14564, %v3099_v20  ;;  %v4572_v24 = vld [vmem:[#allocation2 + $0x4] sm:$0x8] }
 0x23c   : > { %v999_v1 = vpop.f32.mrf.mxu2  ;;  %v3103_v42 = vmul.u32 58254, %v3099_v20  ;;  %v3104_v54 = vmul.u32 14564, %v3100_v60  ;;  %vm4054_vm10 = vcmp.ne.s32.totalorder %v9796_v5, 0  ;;  %vm4090_vm11 = vcmp.lt.s32.totalorder %v9796_v5, 0  ;;  %v9819_v39 = vld [vmem:[#allocation2 + $0x8] sm:$0xf] }
 0x23d   : > { %v1038_v40 = vadd.f32 %v999_v1, %v12499_v43  ;;  %v3089_v0 = vadd.s32 %v3088_v15, %v3078_v53  ;;  %v9817_v31 = vadd.s32 18, %v9796_v5  ;;  %v1965_v1 = vpop.f32.mrf.mxu1  ;;  %v3105_v28 = vmul.u32 58254, %v3100_v60  ;;  %12500 = vst [vmem:[#allocation4_spill] sm:$0xff] %v9819_v39  ;;  %v4571_v60 = vld [vmem:[%s12425_s3] sm:$0xf]  ;;  %vm9851_vm0 = vmand %vm4090_vm11, %vm4054_vm10 }
 0x23e   : > { %v9807_v49 = vpop.f32.mrf.mxu0  ;;  %v1362_v56 = vpop.f32.mrf.mxu3  ;;  %v3106_v18 = vshll.u32 %v3103_v42, 16  ;;  %v3108_v7 = vshll.u32 %v3104_v54, 16  ;;  %v2475_v20 = vrot.slane %v2473_v6, 2  ;;  %v2478_v15 = vrot.slane %v2476_v32, 3 }
 0x23f   : > { %v1399_v9 = vadd.f32 %v1360_v2, %v1038_v40  ;;  %v3090_v43 = vadd.s32 %v3089_v0, %v3080_v41  ;;  %v4612_v2 = vunpack.c.l.b16 %v4572_v24  ;;  %v12435_v6 = vunpack.c.l.b16 %v9819_v39 }
 0x240   : > { %vm3110_vm14 = vc.u32 %v3102_v22, %v3106_v18  ;;  %v3107_v46 = vshrl.u32 %v3103_v42, 16  ;;  %v9855_v42 = vor.u32 %v2478_v15, %v2475_v20  ;;  %v12436_v20 = vrot.slane %v9785_v27, 3 }
 0x241   : > { %v1768_v53 = vadd.f32 %v9746_v57, %v1399_v9  ;;  %v3091_v41 = vshrl.u32 %v3090_v43, 4  ;;  %v3112_v57 = vadd.s32 %v3106_v18, %v3102_v22  ;;  %v3111_v0 = vsel %vm3110_vm14, 1, %v12491_v13  ;;  %v12504_v43 = vld [vmem:[#allocation5_spill] sm:$0xff] }
 0x242   : > { %v9840_v9 = vadd.s32 32, %v9635_v23  ;;  %v3113_v17 = vadd.s32 %v3111_v0, %v3105_v28  ;;  %v12507_v28 = vrot.slane %v9713_v47, 3  ;;  %v9867_v40 = vpack.c.b16 %v12435_v6, %v4612_v2 }
 0x243   : > { %8163 = vmatmul.msk.bf16.gmra.mxu3 %vm508_vm1, %v2462_v58  ;;  %v9835_v32 = vadd.f32 %v1965_v1, %v1768_v53  ;;  %v5091_v58 = vsel %vm4760_vm6, %v4571_v60, 0  ;;  %v3092_v21 = vmul.u32 18, %v3091_v41  ;;  %vm3114_vm15 = vc.u32 %v3112_v57, %v3108_v7 }
 0x244   : > { %v1001_v24 = vpop.f32.mrf.mxu2  ;;  %5100 = vmatpush.bf16.msrb.mxu2 %v5091_v58  ;;  %v4197_v1 = vsel %vm9827_vm12, %v9800_v33, %v9764_v4  ;;  %v3115_v7 = vsel %vm3114_vm15, 1, %v12491_v13  ;;  %v12508_v60 = vrot.slane %v9675_v62, 3  ;;  %v3109_v4 = vshrl.u32 %v3104_v54, 16 }
 0x245   : > { %12503 = vst [vmem:[#allocation21_spill] sm:$0xff] %v9835_v32  ;;  %v1039_v29 = vadd.f32 %v1001_v24, %v12504_v43  ;;  %v3117_v33 = vadd.s32 %v3115_v7, %v3113_v17  ;;  %v3128_v15 = vand.u32 65535, %v9840_v9  ;;  %v3129_v58 = vshrl.u32 %v9840_v9, 16  ;;  %v9899_v24 = vld [vmem:[%s9014_s8 + $0x70] sm:$0xff] }
 0x246   : > { %v2846_v18 = vpop.f32.mrf.mxu0  ;;  %v2610_v22 = vpop.f32.mrf.mxu3  ;;  %v9863_v41 = vsel %vm2742_vm8, %v12508_v60, %v12507_v28  ;;  %v4198_v17 = vsel %vm9851_vm0, %v9817_v31, %v9796_v5  ;;  %v12509_v54 = vrot.slane %v9713_v47, 2  ;;  %v12510_v2 = vrot.slane %v9675_v62, 2 }
 0x247   : > { %v1400_v57 = vadd.f32 %v1362_v56, %v1039_v29  ;;  %v9886_v56 = vsub.s32 %v9723_v12, %v3092_v21  ;;  %v3118_v0 = vadd.s32 %v3117_v33, %v3107_v46  ;;  %v9896_v5 = vsel %vm2373_vm7, %v9748_v36, %v9855_v42  ;;  %v8297_v21 = vld [vmem:[%s12425_s3 + $0x8] sm:$0xf] }
 0x248   : > { %v9883_v29 = vsel %vm1776_vm3, %v12510_v2, %v12509_v54  ;;  %v3131_v31 = vmul.u32 14564, %v3128_v15  ;;  %v3132_v62 = vmul.u32 58254, %v3128_v15  ;;  %v5339_v43 = vsel %vm4760_vm6, %v8297_v21, 0 }
 0x249   : > { %8182 = vmatmul.msk.bf16.gmra.mxu0 %vm508_vm1, %v9761_v55  ;;  %8144 = vmatmul.msk.bf16.gmra.mxu2 %vm508_vm1, %v9770_v10  ;;  %v9891_v55 = vadd.f32 %v9807_v49, %v1400_v57  ;;  %v3119_v12 = vadd.s32 %v3118_v0, %v3109_v4  ;;  %v3133_v49 = vmul.u32 14564, %v3129_v58  ;;  %v12512_v36 = vmov %v12507_v28 }
 0x24a   : > { %v9912_v53 = vsel %vm2742_vm8, %v12512_v36, %v12436_v20  ;;  %v3134_v7 = vmul.u32 58254, %v3129_v58  ;;  %v3135_v28 = vshll.u32 %v3132_v62, 16  ;;  %vm9914_vm9 = vcmp.lt.s32.totalorder %v4197_v1, 16  ;;  %5348 = vmatpush.bf16.msrb.mxu3 %v5339_v43 }
 0x24b   : > { %12511 = vst [vmem:[#allocation5_spill] sm:$0xff] %v9891_v55  ;;  %vm4055_vm10 = vcmp.ne.s32.totalorder %v9886_v56, 0  ;;  %vm4091_vm11 = vcmp.lt.s32.totalorder %v9886_v56, 0  ;;  %v3120_v4 = vshrl.u32 %v3119_v12, 4  ;;  %v3137_v57 = vshll.u32 %v3133_v49, 16 }
 0x24c   : > { %v2241_v60 = vpop.f32.mrf.mxu2  ;;  %vm3139_vm12 = vc.u32 %v3131_v31, %v3135_v28  ;;  %v3141_v0 = vadd.s32 %v3135_v28, %v3131_v31  ;;  %v2482_v58 = vshrl.u32 %v9899_v24, 16  ;;  %v2485_v36 = vshll.u32 %v9899_v24, 16  ;;  %v9930_v12 = vld [vmem:[%s12424_s2] ss:$0 sm:$0xff] }
 0x24d   : > { %v2331_v15 = vadd.f32 %v2241_v60, %v9350_v26  ;;  %v3121_v21 = vmul.u32 18, %v3120_v4  ;;  %v3140_v1 = vsel %vm3139_vm12, 1, %v12491_v13  ;;  %v9925_v6 = vadd.s32 40, %v9635_v23 }
 0x24e   : > { %v2848_v54 = vpop.f32.mrf.mxu0  ;;  %v2612_v2 = vpop.f32.mrf.mxu3  ;;  %v3136_v26 = vshrl.u32 %v3132_v62, 16  ;;  %v3142_v43 = vadd.s32 %v3140_v1, %v3134_v7  ;;  %vm3143_vm14 = vc.u32 %v3141_v0, %v3137_v57  ;;  %v9933_v31 = vadd.s32 18, %v9886_v56 }
 0x24f   : > { %v2700_v20 = vadd.f32 %v2610_v22, %v2331_v15  ;;  %v9936_v28 = vsub.s32 %v9754_v63, %v3121_v21  ;;  %v3144_v60 = vsel %vm3143_vm14, 1, %v12491_v13  ;;  %v3157_v4 = vand.u32 65535, %v9925_v6  ;;  %v8316_v63 = vld [vmem:[%s12425_s3 + $0xc] sm:$0xf]  ;;  %vm9968_vm14 = vmand %vm4091_vm11, %vm4055_vm10 }
 0x250   : > { %v3138_v22 = vshrl.u32 %v3133_v49, 16  ;;  %v3146_v15 = vadd.s32 %v3144_v60, %v3142_v43  ;;  %v2484_v10 = vrot.slane %v2482_v58, 2  ;;  %v2487_v62 = vrot.slane %v2485_v36, 3 }
 0x251   : > { %v2936_v46 = vadd.f32 %v2846_v18, %v2700_v20  ;;  %vm4056_vm15 = vcmp.ne.s32.totalorder %v9936_v28, 0  ;;  %vm4092_vm0 = vcmp.lt.s32.totalorder %v9936_v28, 0  ;;  %v3158_v7 = vshrl.u32 %v9925_v6, 16  ;;  %v8335_v20 = vld [vmem:[%s12425_s3 + $0x10] sm:$0xf] }
 0x252   : > { %v5833_v18 = vsel %vm4760_vm6, %v8316_v63, 0  ;;  %v12516_v49 = vrot.slane %v9713_v47, 2  ;;  %v3147_v58 = vadd.s32 %v3146_v15, %v3136_v26  ;;  %vm9960_vm12 = vcmp.lt.s32.totalorder %v4198_v17, 16  ;;  %vm9981_vm10 = vmand %vm4092_vm0, %vm4056_vm15 }
 0x253   : > { %8164 = vmatmul.msk.bf16.gmra.mxu3 %vm508_vm1, %v9781_v35  ;;  %v4273_v57 = vadd.f32 %v9930_v12, %v2936_v46  ;;  %v12515_v35 = vrot.slane %v9785_v27, 2  ;;  %v9973_v36 = vadd.s32 18, %v9936_v28  ;;  %5842 = vmatpush.bf16.msrb.mxu0 %v5833_v18  ;;  %v6045_v47 = vsel %vm4760_vm6, %v8335_v20, 0 }
 0x254   : > { %v2243_v21 = vpop.f32.mrf.mxu2  ;;  %v3160_v26 = vmul.u32 14564, %v3157_v4  ;;  %v3161_v43 = vmul.u32 58254, %v3157_v4  ;;  %6054 = vmatpush.bf16.msrb.mxu1 %v6045_v47  ;;  %v9986_v18 = vadd.s32 48, %v9635_v23  ;;  %v9988_v20 = vor.u32 %v2487_v62, %v2484_v10 }
 0x255   : > { %v9958_v0 = vsel %vm1776_vm3, %v12516_v49, %v12515_v35  ;;  %v4309_v17 = vmax.f32 %v4273_v57, 0.0  ;;  %v2332_v60 = vadd.f32 %v2243_v21, %v9358_v16  ;;  %v3148_v49 = vadd.s32 %v3147_v58, %v3138_v22 }
 0x256   : > { %v2851_v15 = vpop.f32.mrf.mxu0  ;;  %v2615_v63 = vpop.f32.mrf.mxu3  ;;  %v3162_v4 = vmul.u32 14564, %v3158_v7  ;;  %v3163_v57 = vmul.u32 58254, %v3158_v7  ;;  %v3164_v16 = vshll.u32 %v3161_v43, 16  ;;  %v4199_v32 = vsel %vm9968_vm14, %v9933_v31, %v9886_v56 }
 0x257   : > { %v4417_v21 = vsel %vm9914_vm9, %v4309_v17, 0.0  ;;  %v2701_v55 = vadd.f32 %v2612_v2, %v2332_v60  ;;  %v3149_v39 = vshrl.u32 %v3148_v49, 4  ;;  %v4200_v10 = vsel %vm9981_vm10, %v9973_v36, %v9936_v28 }
 0x258   : > { %v4462_v47 = vpack.c.bf16 %v4417_v21, %v4417_v21  ;;  %v3166_v22 = vshll.u32 %v3162_v4, 16  ;;  %vm3168_vm11 = vc.u32 %v3160_v26, %v3164_v16  ;;  %v3170_v56 = vadd.s32 %v3164_v16, %v3160_v26 }
 0x259   : > { %8183 = vmatmul.msk.bf16.gmra.mxu0 %vm508_vm1, %v9863_v41  ;;  %v2937_v33 = vadd.f32 %v2848_v54, %v2701_v55  ;;  %8145 = vmatmul.msk.bf16.gmra.mxu2 %vm508_vm1, %v9883_v29  ;;  %v3150_v2 = vmul.u32 18, %v3149_v39  ;;  %v3169_v62 = vsel %vm3168_vm11, 1, %v12491_v13  ;;  %v10009_v41 = vsel %vm2373_vm7, %v9855_v42, %v9988_v20 }
 0x25a   : > { %4498 = vst.msk [vmem:[#allocation2 + $0x10] sm:$0xf] %vm4453_vm13, %v4462_v47  ;;  %v3165_v31 = vshrl.u32 %v3161_v43, 16  ;;  %v3171_v7 = vadd.s32 %v3169_v62, %v3163_v57  ;;  %v3186_v28 = vand.u32 65535, %v9986_v18  ;;  %vm4705_vm9 = vcmask 64512  }
 0x25b   : > { %v4274_v55 = vadd.f32 %v9930_v12, %v2937_v33  ;;  %v10014_v29 = vsub.s32 %v9840_v9, %v3150_v2  ;;  %vm3172_vm15 = vc.u32 %v3170_v56, %v3166_v22  ;;  %v3187_v39 = vshrl.u32 %v9986_v18, 16 }
 0x25c   : > { %v2246_v54 = vpop.f32.mrf.mxu2  ;;  %vm10017_vm0 = vcmp.lt.s32.totalorder %v4199_v32, 16  ;;  %v3167_v42 = vshrl.u32 %v3162_v4, 16  ;;  %v3173_v46 = vsel %vm3172_vm15, 1, %v12491_v13  ;;  %v2766_v36 = vrot.slane %v9899_v24, 3  ;;  %v10028_v4 = vld [vmem:[%s9014_s8 + $0x78] sm:$0xff] }
 0x25d   : > { %v3190_v26 = vmul.u32 58254, %v3186_v28  ;;  %v4310_v43 = vmax.f32 %v4274_v55, 0.0  ;;  %v2333_v17 = vadd.f32 %v2246_v54, %v9366_v8  ;;  %v2161_v35 = vrot.slane %v9899_v24, 2 }
 0x25e   : > { %v2853_v9 = vpop.f32.mrf.mxu0  ;;  %v2617_v60 = vpop.f32.mrf.mxu3  ;;  %v3189_v49 = vmul.u32 14564, %v3186_v28  ;;  %vm4057_vm14 = vcmp.ne.s32.totalorder %v10014_v29, 0  ;;  %vm4093_vm10 = vcmp.lt.s32.totalorder %v10014_v29, 0  ;;  %v3175_v32 = vadd.s32 %v3173_v46, %v3171_v7 }
 0x25f   : > { %v3191_v57 = vmul.u32 14564, %v3187_v39  ;;  %v4418_v16 = vsel %vm9960_vm12, %v4310_v43, 0.0  ;;  %v2702_v21 = vadd.f32 %v2615_v63, %v2333_v17  ;;  %v3192_v47 = vmul.u32 58254, %v3187_v39  ;;  %vm10051_vm15 = vmand %vm4093_vm10, %vm4057_vm14 }
 0x260   : > { %v3193_v22 = vshll.u32 %v3190_v26, 16  ;;  %v4463_v8 = vpack.c.bf16 %v4418_v16, %v4418_v16  ;;  %v4165_v33 = vadd.s32 18, %v10014_v29  ;;  %v3176_v2 = vadd.s32 %v3175_v32, %v3165_v31 }
 0x261   : > { %v3195_v62 = vshll.u32 %v3191_v57, 16  ;;  %v2938_v56 = vadd.f32 %v2851_v15, %v2702_v21  ;;  %v10033_v28 = vld [vmem:[#allocation2 + $0xc] sm:$0xff]  ;;  %v3194_v55 = vshrl.u32 %v3190_v26, 16  ;;  %v3196_v54 = vshrl.u32 %v3191_v57, 16 }
 0x262   : > { %vm3197_vm11 = vc.u32 %v3189_v49, %v3193_v22  ;;  %4499 = vst.msk [vmem:[#allocation2 + $0x14] sm:$0xf] %vm4453_vm13, %v4463_v8  ;;  %v3177_v1 = vadd.s32 %v3176_v2, %v3167_v42  ;;  %v3199_v7 = vadd.s32 %v3193_v22, %v3189_v49  ;;  %v2491_v39 = vshrl.u32 %v10028_v4, 16 }
 0x263   : > { %8165 = vmatmul.msk.bf16.gmra.mxu3 %vm508_vm1, %v9896_v5  ;;  %v3198_v63 = vsel %vm3197_vm11, 1, %v12491_v13  ;;  %v4275_v31 = vadd.f32 %v9930_v12, %v2938_v56  ;;  %v4669_v15 = vrot.slane %v10033_v28, 3  ;;  %v2494_v26 = vshll.u32 %v10028_v4, 16 }
 0x264   : > { %v3200_v46 = vadd.s32 %v3198_v63, %v3192_v47  ;;  %v2248_v43 = vpop.f32.mrf.mxu2  ;;  %vm10043_vm12 = vcmp.lt.s32.totalorder %v4200_v10, 16  ;;  %v3178_v42 = vshrl.u32 %v3177_v1, 4  ;;  %vm3201_vm11 = vc.u32 %v3199_v7, %v3195_v62 }
 0x265   : > { %v2493_v49 = vrot.slane %v2491_v39, 2  ;;  %v10056_v32 = vadd.s32 56, %v9635_v23  ;;  %v4311_v57 = vmax.f32 %v4275_v31, 0.0  ;;  %v2334_v10 = vadd.f32 %v2248_v43, %v9374_v34 }
 0x266   : > { %v2856_v16 = vpop.f32.mrf.mxu0  ;;  %v2620_v21 = vpop.f32.mrf.mxu3  ;;  %v12529_v47 = vrot.slane %v9867_v40, 3  ;;  %v3202_v8 = vsel %vm3201_vm11, 1, %v12491_v13  ;;  %v3179_v2 = vmul.u32 18, %v3178_v42  ;;  %v2496_v56 = vrot.slane %v2494_v26, 3 }
 0x267   : > { %v3204_v62 = vadd.s32 %v3202_v8, %v3200_v46  ;;  %v3215_v1 = vand.u32 65535, %v10056_v32  ;;  %v4419_v34 = vsel %vm10017_vm0, %v4311_v57, 0.0  ;;  %v2703_v63 = vadd.f32 %v2617_v60, %v2334_v10 }
 0x268   : > { %v4670_v22 = vsel %vm2742_vm8, %v12529_v47, %v4669_v15  ;;  %v4201_v7 = vsel %vm10051_vm15, %v4165_v33, %v10014_v29  ;;  %v3216_v39 = vshrl.u32 %v10056_v32, 16  ;;  %v4464_v31 = vpack.c.bf16 %v4419_v34, %v4419_v34 }
 0x269   : > { %8261 = vmatmul.msk.bf16.vlgmr.msra.gmra.mxu1 %vm4705_vm9, %v4670_v22  ;;  %8184 = vmatmul.msk.bf16.gmra.mxu0 %vm508_vm1, %v9912_v53  ;;  %v3180_v43 = vsub.s32 %v9925_v6, %v3179_v2  ;;  %v3205_v46 = vadd.s32 %v3204_v62, %v3194_v55  ;;  %v10076_v26 = vor.u32 %v2496_v56, %v2493_v49  ;;  %v3218_v58 = vmul.u32 14564, %v3215_v1  ;;  %v10122_v6 = vld [vmem:[%s9014_s8 + $0x80] sm:$0xff] }
 0x26a   : > { %v2939_v42 = vadd.f32 %v2853_v9, %v2703_v63  ;;  %8146 = vmatmul.msk.bf16.gmra.mxu2 %vm508_vm1, %v9958_v0  ;;  %v3219_v60 = vmul.u32 58254, %v3215_v1  ;;  %v10080_v57 = vmul.u32 14564, %v3216_v39  ;;  %4500 = vst.msk [vmem:[#allocation2 + $0x18] sm:$0xf] %vm4453_vm13, %v4464_v31  ;;  %v12532_v0 = vrot.slane %v9785_v27, 3 }
 0x26b   : > { %vm4058_vm0 = vcmp.ne.s32.totalorder %v3180_v43, 0  ;;  %vm4094_vm14 = vcmp.lt.s32.totalorder %v3180_v43, 0  ;;  %v4166_v29 = vadd.s32 18, %v3180_v43  ;;  %v3206_v33 = vadd.s32 %v3205_v46, %v3196_v54 }
 0x26c   : > { %v4276_v53 = vadd.f32 %v9930_v12, %v2939_v42  ;;  %vm10084_vm10 = vmand %vm4094_vm14, %vm4058_vm0  ;;  %v10093_v9 = vsel %vm2742_vm8, %v12532_v0, %v2766_v36  ;;  %v12533_v55 = vrot.slane %v9785_v27, 2  ;;  %v3222_v54 = vshll.u32 %v3219_v60, 16  ;;  %v2251_v49 = vpop.f32.mrf.mxu2 }
 0x26d   : > { %vm10102_vm15 = vcmp.lt.s32.totalorder %v4201_v7, 16  ;;  %v3207_v47 = vshrl.u32 %v3206_v33, 4  ;;  %v3221_v22 = vmul.u32 58254, %v3216_v39  ;;  %v3224_v8 = vshll.u32 %v10080_v57, 16 }
 0x26e   : > { %v10100_v5 = vsel %vm1776_vm3, %v12533_v55, %v2161_v35  ;;  %v2768_v2 = vrot.slane %v10028_v4, 3  ;;  %v4312_v62 = vmax.f32 %v4276_v53, 0.0  ;;  %v2335_v56 = vadd.f32 %v2251_v49, %v9382_v45  ;;  %v2858_v1 = vpop.f32.mrf.mxu0  ;;  %v2622_v27 = vpop.f32.mrf.mxu3 }
 0x26f   : > { %v4202_v34 = vsel %vm10084_vm10, %v4166_v29, %v3180_v43  ;;  %v10114_v63 = vsel %vm2373_vm7, %v9988_v20, %v10076_v26  ;;  %v3208_v7 = vmul.u32 18, %v3207_v47  ;;  %v3223_v39 = vshrl.u32 %v3219_v60, 16 }
 0x270   : > { %vm3226_vm11 = vc.u32 %v3218_v58, %v3222_v54  ;;  %v3228_v31 = vadd.s32 %v3222_v54, %v3218_v58  ;;  %v4420_v46 = vsel %vm10043_vm12, %v4312_v62, 0.0  ;;  %v2704_v42 = vadd.f32 %v2620_v21, %v2335_v56 }
 0x271   : > { %v3227_v45 = vsel %vm3226_vm11, 1, %v12491_v13  ;;  %v2163_v33 = vrot.slane %v10028_v4, 2  ;;  %v4465_v53 = vpack.c.bf16 %v4420_v46, %v4420_v46  ;;  %v3209_v43 = vsub.s32 %v9986_v18, %v3208_v7  ;;  %v10124_v0 = vld [vmem:[#allocation2 + $0x14] sm:$0xff] }
 0x272   : > { %v3229_v29 = vadd.s32 %v3227_v45, %v3221_v22  ;;  %vm3230_vm0 = vc.u32 %v3228_v31, %v3224_v8  ;;  %v2940_v20 = vadd.f32 %v2856_v16, %v2704_v42  ;;  %v3225_v58 = vshrl.u32 %v10080_v57, 16 }
 0x273   : > { %v3231_v17 = vsel %vm3230_vm0, 1, %v12491_v13  ;;  %v10129_v21 = vadd.s32 64, %v9635_v23  ;;  %4501 = vst.msk [vmem:[#allocation2 + $0x1c] sm:$0xf] %vm4453_vm13, %v4465_v53  ;;  %8166 = vmatmul.msk.bf16.gmra.mxu3 %vm508_vm1, %v10009_v41  ;;  %vm4059_vm12 = vcmp.ne.s32.totalorder %v3209_v43, 0  ;;  %vm4095_vm14 = vcmp.lt.s32.totalorder %v3209_v43, 0 }
 0x274   : > { %v4167_v18 = vadd.s32 18, %v3209_v43  ;;  %v3233_v60 = vadd.s32 %v3231_v17, %v3229_v29  ;;  %v4277_v16 = vadd.f32 %v9930_v12, %v2940_v20  ;;  %v4671_v55 = vrot.slane %v10124_v0, 3  ;;  %v2253_v49 = vpop.f32.mrf.mxu2  ;;  %vm10142_vm11 = vmand %vm4095_vm14, %vm4059_vm12 }
 0x275   : > { %v3244_v57 = vand.u32 65535, %v10129_v21  ;;  %v3245_v54 = vshrl.u32 %v10129_v21, 16  ;;  %vm10138_vm10 = vcmp.lt.s32.totalorder %v4202_v34, 16  ;;  %v10151_v8 = vsel %vm2742_vm8, %v2766_v36, %v2768_v2 }
 0x276   : > { %v3234_v41 = vadd.s32 %v3233_v60, %v3223_v39  ;;  %v10158_v62 = vsel %vm1776_vm3, %v2161_v35, %v2163_v33  ;;  %v2500_v56 = vshrl.u32 %v10122_v6, 16  ;;  %v4313_v34 = vmax.f32 %v4277_v16, 0.0  ;;  %v2861_v39 = vpop.f32.mrf.mxu0  ;;  %v2625_v31 = vpop.f32.mrf.mxu3 }
 0x277   : > { %v2336_v7 = vadd.f32 %v2253_v49, %v9390_v52  ;;  %v4672_v36 = vsel %vm2742_vm8, %v4669_v15, %v4671_v55  ;;  %v2503_v46 = vshll.u32 %v10122_v6, 16  ;;  %v3247_v35 = vmul.u32 14564, %v3244_v57 }
 0x278   : > { %v3235_v24 = vadd.s32 %v3234_v41, %v3225_v58  ;;  %v3248_v42 = vmul.u32 58254, %v3244_v57  ;;  %v3249_v45 = vmul.u32 14564, %v3245_v54  ;;  %v4421_v53 = vsel %vm10102_vm15, %v4313_v34, 0.0 }
 0x279   : > { %8262 = vmatmul.msk.bf16.gmra.mxu1 %vm4705_vm9, %v4672_v36  ;;  %v2705_v52 = vadd.f32 %v2622_v27, %v2336_v7  ;;  %v4203_v29 = vsel %vm10142_vm11, %v4167_v18, %v3209_v43  ;;  %v2502_v20 = vrot.slane %v2500_v56, 2  ;;  %v4466_v17 = vpack.c.bf16 %v4421_v53, %v4421_v53  ;;  %8185 = vmatmul.msk.bf16.gmra.mxu0 %vm508_vm1, %v10093_v9 }
 0x27a   : > { %v3236_v28 = vshrl.u32 %v3235_v24, 4  ;;  %v3250_v15 = vmul.u32 58254, %v3245_v54  ;;  %v3251_v60 = vshll.u32 %v3248_v42, 16  ;;  %8147 = vmatmul.msk.bf16.gmra.mxu2 %vm508_vm1, %v10100_v5  ;;  %v3252_v58 = vshrl.u32 %v3248_v42, 16 }
 0x27b   : > { %v2941_v16 = vadd.f32 %v2858_v1, %v2705_v52  ;;  %v3253_v57 = vshll.u32 %v3249_v45, 16  ;;  %v2505_v10 = vrot.slane %v2503_v46, 3  ;;  %4502 = vst.msk [vmem:[#allocation2 + $0x20] sm:$0xf] %vm4453_vm13, %v4466_v17  ;;  %v10179_v18 = vadd.s32 72, %v9635_v23 }
 0x27c   : > { %v3237_v27 = vmul.u32 18, %v3236_v28  ;;  %vm3255_vm15 = vc.u32 %v3247_v35, %v3251_v60  ;;  %v3257_v43 = vadd.s32 %v3251_v60, %v3247_v35  ;;  %v3254_v49 = vshrl.u32 %v3249_v45, 16  ;;  %v2256_v22 = vpop.f32.mrf.mxu2 }
 0x27d   : > { %v4278_v9 = vadd.f32 %v9930_v12, %v2941_v16  ;;  %v3256_v54 = vsel %vm3255_vm15, 1, %v12491_v13  ;;  %v10183_v1 = vor.u32 %v2505_v10, %v2502_v20  ;;  %vm10185_vm0 = vcmp.lt.s32.totalorder %v4203_v29, 16 }
 0x27e   : > { %v3238_v41 = vsub.s32 %v10056_v32, %v3237_v27  ;;  %v3258_v56 = vadd.s32 %v3256_v54, %v3250_v15  ;;  %vm3259_vm12 = vc.u32 %v3257_v43, %v3253_v57  ;;  %v3273_v34 = vand.u32 65535, %v10179_v18  ;;  %v2863_v46 = vpop.f32.mrf.mxu0  ;;  %v2627_v24 = vpop.f32.mrf.mxu3 }
 0x27f   : > { %v4314_v7 = vmax.f32 %v4278_v9, 0.0  ;;  %v2337_v36 = vadd.f32 %v2256_v22, %v9398_v11  ;;  %v3260_v35 = vsel %vm3259_vm12, 1, %v12491_v13  ;;  %v2770_v42 = vrot.slane %v10122_v6, 3 }
 0x280   : > { %vm4060_vm14 = vcmp.ne.s32.totalorder %v3238_v41, 0  ;;  %vm4096_vm11 = vcmp.lt.s32.totalorder %v3238_v41, 0  ;;  %v4168_v45 = vadd.s32 18, %v3238_v41  ;;  %v3262_v53 = vadd.s32 %v3260_v35, %v3258_v56 }
 0x281   : > { %v4422_v32 = vsel %vm10138_vm10, %v4314_v7, 0.0  ;;  %v2706_v52 = vadd.f32 %v2625_v31, %v2337_v36  ;;  %vm10196_vm15 = vmand %vm4096_vm11, %vm4060_vm14  ;;  %v10203_v11 = vsel %vm2373_vm7, %v10076_v26, %v10183_v1  ;;  %v3274_v20 = vshrl.u32 %v10179_v18, 16  ;;  %v10228_v7 = vld [vmem:[%s9014_s8 + $0x88] sm:$0xff] }
 0x282   : > { %v4467_v17 = vpack.c.bf16 %v4422_v32, %v4422_v32  ;;  %v3263_v28 = vadd.s32 %v3262_v53, %v3252_v58  ;;  %v3276_v15 = vmul.u32 14564, %v3273_v34  ;;  %v3277_v60 = vmul.u32 58254, %v3273_v34  ;;  %v10208_v31 = vld [vmem:[#allocation2 + $0x1c] sm:$0xff] }
 0x283   : > { %v2942_v16 = vadd.f32 %v2861_v39, %v2706_v52  ;;  %v4204_v47 = vsel %vm10196_vm15, %v4168_v45, %v3238_v41  ;;  %v3278_v57 = vmul.u32 14564, %v3274_v20  ;;  %v3279_v10 = vmul.u32 58254, %v3274_v20  ;;  %8167 = vmatmul.msk.bf16.gmra.mxu3 %vm508_vm1, %v10114_v63 }
 0x284   : > { %4503 = vst.msk [vmem:[#allocation2 + $0x24] sm:$0xf] %vm4453_vm13, %v4467_v17  ;;  %v3264_v26 = vadd.s32 %v3263_v28, %v3254_v49  ;;  %v3280_v27 = vshll.u32 %v3277_v60, 16  ;;  %v3281_v43 = vshrl.u32 %v3277_v60, 16  ;;  %v10218_v39 = vsel %vm2742_vm8, %v2768_v2, %v2770_v42  ;;  %v2258_v41 = vpop.f32.mrf.mxu2 }
 0x285   : > { %v4279_v58 = vadd.f32 %v9930_v12, %v2942_v16  ;;  %v4673_v9 = vrot.slane %v10208_v31, 3  ;;  %v3282_v54 = vshll.u32 %v3278_v57, 16  ;;  %v3283_v22 = vshrl.u32 %v3278_v57, 16 }
 0x286   : > { %vm10222_vm10 = vcmp.lt.s32.totalorder %v4204_v47, 16  ;;  %v3265_v63 = vshrl.u32 %v3264_v26, 4  ;;  %vm3284_vm12 = vc.u32 %v3276_v15, %v3280_v27  ;;  %v3286_v49 = vadd.s32 %v3280_v27, %v3276_v15  ;;  %v2866_v35 = vpop.f32.mrf.mxu0  ;;  %v2630_v45 = vpop.f32.mrf.mxu3 }
 0x287   : > { %v2165_v34 = vrot.slane %v10122_v6, 2  ;;  %v4315_v2 = vmax.f32 %v4279_v58, 0.0  ;;  %v2338_v36 = vadd.f32 %v2258_v41, %v9406_v44  ;;  %v4674_v53 = vsel %vm2742_vm8, %v4671_v55, %v4673_v9 }
 0x288   : > { %v3285_v32 = vsel %vm3284_vm12, 1, %v12491_v13  ;;  %v3266_v52 = vmul.u32 18, %v3265_v63  ;;  %vm3288_vm14 = vc.u32 %v3286_v49, %v3282_v54  ;;  %v10249_v17 = vadd.s32 80, %v9635_v23 }
 0x289   : > { %8263 = vmatmul.msk.bf16.gmra.mxu1 %vm4705_vm9, %v4674_v53  ;;  %v3287_v29 = vadd.s32 %v3285_v32, %v3279_v10  ;;  %v10243_v44 = vsel %vm1776_vm3, %v2163_v33, %v2165_v34  ;;  %v4423_v20 = vsel %vm10185_vm0, %v4315_v2, 0.0  ;;  %v2707_v0 = vadd.f32 %v2627_v24, %v2338_v36  ;;  %8186 = vmatmul.msk.bf16.gmra.mxu0 %vm508_vm1, %v10151_v8 }
 0x28a   : > { %v3289_v55 = vsel %vm3288_vm14, 1, %v12491_v13  ;;  %v4468_v28 = vpack.c.bf16 %v4423_v20, %v4423_v20  ;;  %v3267_v15 = vsub.s32 %v10129_v21, %v3266_v52  ;;  %v2509_v4 = vshrl.u32 %v10228_v7, 16  ;;  %8148 = vmatmul.msk.bf16.gmra.mxu2 %vm508_vm1, %v10158_v62 }
 0x28b   : > { %v3291_v60 = vadd.s32 %v3289_v55, %v3287_v29  ;;  %v2943_v33 = vadd.f32 %v2863_v46, %v2707_v0  ;;  %v3302_v5 = vand.u32 65535, %v10249_v17  ;;  %v3303_v24 = vshrl.u32 %v10249_v17, 16 }
 0x28c   : > { %v2512_v16 = vshll.u32 %v10228_v7, 16  ;;  %4504 = vst.msk [vmem:[#allocation2 + $0x28] sm:$0xf] %vm4453_vm13, %v4468_v28  ;;  %vm4061_vm0 = vcmp.ne.s32.totalorder %v3267_v15, 0  ;;  %vm4097_vm11 = vcmp.lt.s32.totalorder %v3267_v15, 0  ;;  %v4169_v8 = vadd.s32 18, %v3267_v15  ;;  %v2261_v26 = vpop.f32.mrf.mxu2 }
 0x28d   : > { %v3292_v47 = vadd.s32 %v3291_v60, %v3281_v43  ;;  %v4280_v21 = vadd.f32 %v9930_v12, %v2943_v33  ;;  %vm4133_vm15 = vmand %vm4097_vm11, %vm4061_vm0  ;;  %v3305_v57 = vmul.u32 14564, %v3302_v5  ;;  %v3306_v46 = vmul.u32 58254, %v3302_v5 }
 0x28e   : > { %v3307_v10 = vmul.u32 14564, %v3303_v24  ;;  %v4205_v62 = vsel %vm4133_vm15, %v4169_v8, %v3267_v15  ;;  %v3308_v58 = vmul.u32 58254, %v3303_v24  ;;  %v2511_v54 = vrot.slane %v2509_v4, 2  ;;  %v2868_v2 = vpop.f32.mrf.mxu0  ;;  %v2632_v43 = vpop.f32.mrf.mxu3 }
 0x28f   : > { %v3293_v27 = vadd.s32 %v3292_v47, %v3283_v22  ;;  %v4316_v41 = vmax.f32 %v4280_v21, 0.0  ;;  %v2339_v63 = vadd.f32 %v2261_v26, %v9414_v48  ;;  %vm10263_vm12 = vcmp.lt.s32.totalorder %v4205_v62, 16 }
 0x290   : > { %v3309_v36 = vshll.u32 %v3306_v46, 16  ;;  %v3310_v32 = vshrl.u32 %v3306_v46, 16  ;;  %v3311_v52 = vshll.u32 %v3307_v10, 16  ;;  %v3312_v29 = vshrl.u32 %v3307_v10, 16 }
 0x291   : > { %v3294_v53 = vshrl.u32 %v3293_v27, 4  ;;  %v4424_v20 = vsel %vm10222_vm10, %v4316_v41, 0.0  ;;  %v2708_v22 = vadd.f32 %v2630_v45, %v2339_v63  ;;  %v2514_v15 = vrot.slane %v2512_v16, 3 }
 0x292   : > { %vm3313_vm14 = vc.u32 %v3305_v57, %v3309_v36  ;;  %v3315_v0 = vadd.s32 %v3309_v36, %v3305_v57  ;;  %v4469_v55 = vpack.c.bf16 %v4424_v20, %v4424_v20  ;;  %v10273_v5 = vadd.s32 88, %v9635_v23 }
 0x293   : > { %v3295_v28 = vmul.u32 18, %v3294_v53  ;;  %v3314_v48 = vsel %vm3313_vm14, 1, %v12491_v13  ;;  %v2944_v60 = vadd.f32 %v2866_v35, %v2708_v22  ;;  %v10270_v4 = vld [vmem:[#allocation2 + $0x24] sm:$0xff]  ;;  %8168 = vmatmul.msk.bf16.gmra.mxu3 %vm508_vm1, %v10203_v11  ;;  %v10280_v24 = vor.u32 %v2514_v15, %v2511_v54  ;;  %v10308_v22 = vld [vmem:[%s9014_s8 + $0x90] sm:$0xff] }
 0x294   : > { %v3316_v33 = vadd.s32 %v3314_v48, %v3308_v58  ;;  %vm3317_vm0 = vc.u32 %v3315_v0, %v3311_v52  ;;  %4505 = vst.msk [vmem:[#allocation2 + $0x2c] sm:$0xf] %vm4453_vm13, %v4469_v55  ;;  %v2772_v35 = vrot.slane %v10228_v7, 3  ;;  %v4675_v8 = vrot.slane %v10270_v4, 3  ;;  %v2263_v57 = vpop.f32.mrf.mxu2 }
 0x295   : > { %v3296_v56 = vsub.s32 %v10179_v18, %v3295_v28  ;;  %v3318_v45 = vsel %vm3317_vm0, 1, %v12491_v13  ;;  %v4281_v16 = vadd.f32 %v9930_v12, %v2944_v60  ;;  %v3331_v21 = vand.u32 65535, %v10273_v5 }
 0x296   : > { %v3320_v47 = vadd.s32 %v3318_v45, %v3316_v33  ;;  %v10289_v18 = vsel %vm2373_vm7, %v10183_v1, %v10280_v24  ;;  %v2340_v10 = vadd.f32 %v2263_v57, %v9422_v51  ;;  %v2871_v26 = vpop.f32.mrf.mxu0  ;;  %v2635_v62 = vpop.f32.mrf.mxu3  ;;  %v4676_v27 = vsel %vm2742_vm8, %v4673_v9, %v4675_v8 }
 0x297   : > { %vm4062_vm10 = vcmp.ne.s32.totalorder %v3296_v56, 0  ;;  %vm4098_vm11 = vcmp.lt.s32.totalorder %v3296_v56, 0  ;;  %v4170_v46 = vadd.s32 18, %v3296_v56  ;;  %v4317_v11 = vmax.f32 %v4281_v16, 0.0 }
 0x298   : > { %vm4134_vm15 = vmand %vm4098_vm11, %vm4062_vm10  ;;  %v3321_v58 = vadd.s32 %v3320_v47, %v3310_v32  ;;  %v3332_v1 = vshrl.u32 %v10273_v5, 16  ;;  %v3334_v41 = vmul.u32 14564, %v3331_v21  ;;  %v3335_v63 = vmul.u32 58254, %v3331_v21 }
 0x299   : > { %v4206_v54 = vsel %vm4134_vm15, %v4170_v46, %v3296_v56  ;;  %8264 = vmatmul.msk.bf16.gmra.mxu1 %vm4705_vm9, %v4676_v27  ;;  %v4425_v51 = vsel %vm10263_vm12, %v4317_v11, 0.0  ;;  %v2709_v36 = vadd.f32 %v2632_v43, %v2340_v10  ;;  %8187 = vmatmul.msk.bf16.gmra.mxu0 %vm508_vm1, %v10218_v39  ;;  %v2167_v15 = vrot.slane %v10228_v7, 2 }
 0x29a   : > { %vm10301_vm14 = vcmp.lt.s32.totalorder %v4206_v54, 16  ;;  %v3322_v31 = vadd.s32 %v3321_v58, %v3312_v29  ;;  %v4470_v52 = vpack.c.bf16 %v4425_v51, %v4425_v51  ;;  %v3336_v9 = vmul.u32 14564, %v3332_v1  ;;  %8149 = vmatmul.msk.bf16.gmra.mxu2 %vm508_vm1, %v10243_v44 }
 0x29b   : > { %v3337_v32 = vmul.u32 58254, %v3332_v1  ;;  %v3338_v20 = vshll.u32 %v3335_v63, 16  ;;  %v2945_v0 = vadd.f32 %v2868_v2, %v2709_v36  ;;  %v3339_v43 = vshrl.u32 %v3335_v63, 16 }
 0x29c   : > { %v3323_v49 = vshrl.u32 %v3322_v31, 4  ;;  %v10317_v29 = vsel %vm2742_vm8, %v2770_v42, %v2772_v35  ;;  %4506 = vst.msk [vmem:[#allocation2 + $0x30] sm:$0xf] %vm4453_vm13, %v4470_v52  ;;  %v3340_v39 = vshll.u32 %v3336_v9, 16  ;;  %v3341_v55 = vshrl.u32 %v3336_v9, 16  ;;  %v2266_v60 = vpop.f32.mrf.mxu2 }
 0x29d   : > { %vm3342_vm12 = vc.u32 %v3334_v41, %v3338_v20  ;;  %v3344_v28 = vadd.s32 %v3338_v20, %v3334_v41  ;;  %v4282_v2 = vadd.f32 %v9930_v12, %v2945_v0  ;;  %v10324_v56 = vadd.s32 96, %v9635_v23 }
 0x29e   : > { %v3324_v48 = vmul.u32 18, %v3323_v49  ;;  %v3343_v44 = vsel %vm3342_vm12, 1, %v12491_v13  ;;  %v2518_v42 = vshrl.u32 %v10308_v22, 16  ;;  %v2341_v16 = vadd.f32 %v2266_v60, %v9430_v25  ;;  %v2873_v21 = vpop.f32.mrf.mxu0  ;;  %v2637_v57 = vpop.f32.mrf.mxu3 }
 0x29f   : > { %v3345_v33 = vadd.s32 %v3343_v44, %v3337_v32  ;;  %vm3346_vm0 = vc.u32 %v3344_v28, %v3340_v39  ;;  %v4318_v45 = vmax.f32 %v4282_v2, 0.0  ;;  %v2168_v10 = vsel %vm1776_vm3, %v2165_v34, %v2167_v15 }
 0x2a0   : > { %v3325_v47 = vsub.s32 %v10249_v17, %v3324_v48  ;;  %v3347_v46 = vsel %vm3346_vm0, 1, %v12491_v13  ;;  %v3360_v27 = vand.u32 65535, %v10324_v56  ;;  %v3361_v58 = vshrl.u32 %v10324_v56, 16 }
 0x2a1   : > { %v3349_v11 = vadd.s32 %v3347_v46, %v3345_v33  ;;  %v4426_v25 = vsel %vm10301_vm14, %v4318_v45, 0.0  ;;  %v2710_v54 = vadd.f32 %v2635_v62, %v2341_v16  ;;  %v2520_v53 = vrot.slane %v2518_v42, 2 }
 0x2a2   : > { %vm4063_vm10 = vcmp.ne.s32.totalorder %v3325_v47, 0  ;;  %vm4099_vm11 = vcmp.lt.s32.totalorder %v3325_v47, 0  ;;  %v4471_v17 = vpack.c.bf16 %v4426_v25, %v4426_v25  ;;  %v4171_v1 = vadd.s32 18, %v3325_v47 }
 0x2a3   : > { %vm4135_vm15 = vmand %vm4099_vm11, %vm4063_vm10  ;;  %v3350_v41 = vadd.s32 %v3349_v11, %v3339_v43  ;;  %v3363_v63 = vmul.u32 14564, %v3360_v27  ;;  %v2946_v51 = vadd.f32 %v2871_v26, %v2710_v54  ;;  %v10339_v36 = vld [vmem:[#allocation2 + $0x2c] sm:$0xff]  ;;  %v3364_v6 = vmul.u32 58254, %v3360_v27  ;;  %8169 = vmatmul.msk.bf16.gmra.mxu3 %vm508_vm1, %v10289_v18 }
 0x2a4   : > { %v3365_v34 = vmul.u32 14564, %v3361_v58  ;;  %v3366_v31 = vmul.u32 58254, %v3361_v58  ;;  %4507 = vst.msk [vmem:[#allocation2 + $0x34] sm:$0xf] %vm4453_vm13, %v4471_v17  ;;  %v4207_v52 = vsel %vm4135_vm15, %v4171_v1, %v3325_v47  ;;  %v2521_v9 = vshll.u32 %v10308_v22, 16  ;;  %v2268_v49 = vpop.f32.mrf.mxu2 }
 0x2a5   : > { %v3351_v62 = vadd.s32 %v3350_v41, %v3341_v55  ;;  %vm10345_vm14 = vcmp.lt.s32.totalorder %v4207_v52, 16  ;;  %v4283_v26 = vadd.f32 %v9930_v12, %v2946_v51  ;;  %v4677_v20 = vrot.slane %v10339_v36, 3  ;;  %v12552_v52 = vld [vmem:[#allocation6_spill] sm:$0xff] }
 0x2a6   : > { %v3367_v0 = vshll.u32 %v3364_v6, 16  ;;  %v3368_v39 = vshrl.u32 %v3364_v6, 16  ;;  %v3369_v28 = vshll.u32 %v3365_v34, 16  ;;  %v3370_v2 = vshrl.u32 %v3365_v34, 16  ;;  %v2640_v55 = vpop.f32.mrf.mxu3 }
 0x2a7   : > { %v3352_v43 = vshrl.u32 %v3351_v62, 4  ;;  %v4319_v48 = vmax.f32 %v4283_v26, 0.0  ;;  %v2342_v18 = vadd.f32 %v2268_v49, %v9440_v19  ;;  %v4678_v44 = vsel %vm2742_vm8, %v4675_v8, %v4677_v20  ;;  %v2876_v19 = vpop.f32.mrf.mxu0 }
 0x2a8   : > { %vm3371_vm12 = vc.u32 %v3363_v63, %v3367_v0  ;;  %v3373_v42 = vadd.s32 %v3367_v0, %v3363_v63  ;;  %v2523_v45 = vrot.slane %v2521_v9, 3  ;;  %v10362_v11 = vadd.s32 104, %v9635_v23 }
 0x2a9   : > { %v3353_v60 = vmul.u32 18, %v3352_v43  ;;  %8265 = vmatmul.msk.bf16.gmra.mxu1 %vm4705_vm9, %v4678_v44  ;;  %v3372_v33 = vsel %vm3371_vm12, 1, %v12491_v13  ;;  %v4427_v16 = vsel %vm10345_vm14, %v4319_v48, 0.0  ;;  %v2711_v47 = vadd.f32 %v2637_v57, %v2342_v18  ;;  %8188 = vmatmul.msk.bf16.gmra.mxu0 %vm508_vm1, %v10317_v29 }
 0x2aa   : > { %v3374_v46 = vadd.s32 %v3372_v33, %v3366_v31  ;;  %v4472_v4 = vpack.c.bf16 %v4427_v16, %v4427_v16  ;;  %vm3375_vm0 = vc.u32 %v3373_v42, %v3369_v28  ;;  %v10367_v27 = vor.u32 %v2523_v45, %v2520_v53  ;;  %8150 = vmatmul.msk.bf16.gmra.mxu2 %vm508_vm1, %v2168_v10 }
 0x2ab   : > { %v3354_v8 = vsub.s32 %v10273_v5, %v3353_v60  ;;  %v2947_v58 = vadd.f32 %v2873_v21, %v2711_v47  ;;  %v3376_v25 = vsel %vm3375_vm0, 1, %v12491_v13  ;;  %v3389_v57 = vand.u32 65535, %v10362_v11  ;;  %v10382_v60 = vld [vmem:[%s9014_s8 + $0x98] sm:$0xff] }
 0x2ac   : > { %v3390_v54 = vshrl.u32 %v10362_v11, 16  ;;  %4508 = vst.msk [vmem:[#allocation2 + $0x38] sm:$0xf] %vm4453_vm13, %v4472_v4  ;;  %v3378_v17 = vadd.s32 %v3376_v25, %v3374_v46  ;;  %v2525_v21 = vsel %vm2373_vm7, %v10280_v24, %v10367_v27  ;;  %v2271_v63 = vpop.f32.mrf.mxu2  ;;  %v2774_v44 = vrot.slane %v10308_v22, 3 }
 0x2ad   : > { %vm4064_vm10 = vcmp.ne.s32.totalorder %v3354_v8, 0  ;;  %vm4100_vm11 = vcmp.lt.s32.totalorder %v3354_v8, 0  ;;  %v4172_v5 = vadd.s32 18, %v3354_v8  ;;  %v4284_v29 = vadd.f32 %v9930_v12, %v2947_v58 }
 0x2ae   : > { %vm4136_vm15 = vmand %vm4100_vm11, %vm4064_vm10  ;;  %v3392_v10 = vmul.u32 14564, %v3389_v57  ;;  %v3393_v1 = vmul.u32 58254, %v3389_v57  ;;  %v3379_v51 = vadd.s32 %v3378_v17, %v3368_v39  ;;  %v3394_v6 = vmul.u32 14564, %v3390_v54  ;;  %v2642_v24 = vpop.f32.mrf.mxu3 }
 0x2af   : > { %v4208_v41 = vsel %vm4136_vm15, %v4172_v5, %v3354_v8  ;;  %v3395_v34 = vmul.u32 58254, %v3390_v54  ;;  %v4320_v31 = vmax.f32 %v4284_v29, 0.0  ;;  %v2343_v62 = vadd.f32 %v2271_v63, %v12552_v52  ;;  %v2878_v42 = vpop.f32.mrf.mxu0 }
 0x2b0   : > { %vm4244_vm14 = vcmp.lt.s32.totalorder %v4208_v41, 16  ;;  %v3396_v53 = vshll.u32 %v3393_v1, 16  ;;  %v3380_v9 = vadd.s32 %v3379_v51, %v3370_v2  ;;  %v3397_v32 = vshrl.u32 %v3393_v1, 16 }
 0x2b1   : > { %v3398_v26 = vshll.u32 %v3394_v6, 16  ;;  %v3399_v0 = vshrl.u32 %v3394_v6, 16  ;;  %v4428_v49 = vsel %vm4244_vm14, %v4320_v31, 0.0  ;;  %v2712_v43 = vadd.f32 %v2640_v55, %v2343_v62 }
 0x2b2   : > { %vm3400_vm12 = vc.u32 %v3392_v10, %v3396_v53  ;;  %v3402_v28 = vadd.s32 %v3396_v53, %v3392_v10  ;;  %v4473_v48 = vpack.c.bf16 %v4428_v49, %v4428_v49  ;;  %v3381_v18 = vshrl.u32 %v3380_v9, 4  ;;  %v10426_v49 = vld [vmem:[%s12424_s2] ss:$0 sm:$0xff] }
 0x2b3   : > { %v3401_v39 = vsel %vm3400_vm12, 1, %v12491_v13  ;;  %v2948_v33 = vadd.f32 %v2876_v19, %v2712_v43  ;;  %v10384_v2 = vld [vmem:[#allocation2 + $0x34] sm:$0xff]  ;;  %v2169_v16 = vrot.slane %v10308_v22, 2  ;;  %8170 = vmatmul.msk.bf16.gmra.mxu3 %vm508_vm1, %v2525_v21  ;;  %v2775_v19 = vsel %vm2742_vm8, %v2772_v35, %v2774_v44 }
 0x2b4   : > { %v3403_v45 = vadd.s32 %v3401_v39, %v3395_v34  ;;  %vm3404_vm0 = vc.u32 %v3402_v28, %v3398_v26  ;;  %4509 = vst.msk [vmem:[#allocation2 + $0x3c] sm:$0xf] %vm4453_vm13, %v4473_v48  ;;  %v3382_v55 = vmul.u32 18, %v3381_v18  ;;  %v10396_v46 = vadd.s32 112, %v9635_v23  ;;  %v2273_v54 = vpop.f32.mrf.mxu2 }
 0x2b5   : > { %v3405_v47 = vsel %vm3404_vm0, 1, %v12491_v13  ;;  %v4285_v4 = vadd.f32 %v9930_v12, %v2948_v33  ;;  %v4679_v58 = vrot.slane %v10384_v2, 3  ;;  %v2170_v25 = vsel %vm1776_vm3, %v2167_v15, %v2169_v16 }
 0x2b6   : > { %v3407_v8 = vadd.s32 %v3405_v47, %v3403_v45  ;;  %v3383_v57 = vsub.s32 %v10324_v56, %v3382_v55  ;;  %v3418_v5 = vand.u32 65535, %v10396_v46  ;;  %v3419_v35 = vshrl.u32 %v10396_v46, 16  ;;  %v2645_v31 = vpop.f32.mrf.mxu3  ;;  %v12553_v55 = vld [vmem:[#allocation7_spill] sm:$0xff] }
 0x2b7   : > { %v2527_v17 = vshrl.u32 %v10382_v60, 16  ;;  %v4321_v29 = vmax.f32 %v4285_v4, 0.0  ;;  %v2344_v12 = vadd.f32 %v2273_v54, %v9643_v38  ;;  %v4680_v7 = vsel %vm2742_vm8, %v4677_v20, %v4679_v58 }
 0x2b8   : > { %v3408_v21 = vadd.s32 %v3407_v8, %v3397_v32  ;;  %vm4065_vm10 = vcmp.ne.s32.totalorder %v3383_v57, 0  ;;  %vm4101_vm11 = vcmp.lt.s32.totalorder %v3383_v57, 0  ;;  %v4173_v15 = vadd.s32 18, %v3383_v57 }
 0x2b9   : > { %8266 = vmatmul.msk.bf16.gmra.mxu1 %vm4705_vm9, %v4680_v7  ;;  %v3421_v56 = vmul.u32 14564, %v3418_v5  ;;  %vm4137_vm15 = vmand %vm4101_vm11, %vm4065_vm10  ;;  %v2713_v10 = vadd.f32 %v2642_v24, %v2344_v12  ;;  %v3422_v41 = vmul.u32 58254, %v3418_v5  ;;  %v10416_v63 = vmul.u32 14564, %v3419_v35  ;;  %8189 = vmatmul.msk.bf16.gmra.mxu0 %vm508_vm1, %v2775_v19  ;;  %v2881_v24 = vpop.f32.mrf.mxu0 }
 0x2ba   : > { %v3409_v1 = vadd.s32 %v3408_v21, %v3399_v0  ;;  %v4209_v38 = vsel %vm4137_vm15, %v4173_v15, %v3383_v57  ;;  %v3424_v51 = vmul.u32 58254, %v3419_v35  ;;  %v2529_v6 = vrot.slane %v2527_v17, 2  ;;  %8151 = vmatmul.msk.bf16.gmra.mxu2 %vm508_vm1, %v2170_v25 }
 0x2bb   : > { %v2530_v36 = vshll.u32 %v10382_v60, 16  ;;  %vm4245_vm14 = vcmp.lt.s32.totalorder %v4209_v38, 16  ;;  %v2949_v20 = vadd.f32 %v2878_v42, %v2713_v10  ;;  %v3425_v52 = vshll.u32 %v3422_v41, 16 }
 0x2bc   : > { %v3410_v34 = vshrl.u32 %v3409_v1, 4  ;;  %v4429_v62 = vsel %vm4245_vm14, %v4321_v29, 0.0  ;;  %v3426_v53 = vshrl.u32 %v3422_v41, 16  ;;  %v3427_v9 = vshll.u32 %v10416_v63, 16  ;;  %v2276_v28 = vpop.f32.mrf.mxu2 }
 0x2bd   : > { %v3428_v32 = vshrl.u32 %v10416_v63, 16  ;;  %v4474_v26 = vpack.c.bf16 %v4429_v62, %v4429_v62  ;;  %v4286_v43 = vadd.f32 %v10426_v49, %v2949_v20  ;;  %vm3429_vm12 = vc.u32 %v3421_v56, %v3425_v52 }
 0x2be   : > { %v3411_v0 = vmul.u32 18, %v3410_v34  ;;  %v3430_v48 = vsel %vm3429_vm12, 1, %v12491_v13  ;;  %v3431_v18 = vadd.s32 %v3425_v52, %v3421_v56  ;;  %v2532_v39 = vrot.slane %v2530_v36, 3  ;;  %v2647_v63 = vpop.f32.mrf.mxu3 }
 0x2bf   : > { %v10431_v33 = vadd.s32 120, %v9635_v23  ;;  %4510 = vst.msk [vmem:[#allocation2 + $0x40] sm:$0xf] %vm4453_vm13, %v4474_v26  ;;  %v4322_v45 = vmax.f32 %v4286_v43, 0.0  ;;  %v2345_v47 = vadd.f32 %v2276_v28, %v12553_v55  ;;  %v3432_v19 = vadd.s32 %v3430_v48, %v3424_v51 }
 0x2c0   : > { %v3412_v42 = vsub.s32 %v10362_v11, %v3411_v0  ;;  %vm3433_vm0 = vc.u32 %v3431_v18, %v3427_v9  ;;  %v10436_v4 = vor.u32 %v2532_v39, %v2529_v6  ;;  %v10446_v15 = vadd.f32 %v9670_v61, %v9708_v37  ;;  %v2367_v0 = vld [vmem:[%s9014_s8 + $0xa0] sm:$0x7] }
 0x2c1   : > { %v3447_v8 = vand.u32 65535, %v10431_v33  ;;  %v3448_v25 = vshrl.u32 %v10431_v33, 16  ;;  %v2714_v54 = vadd.f32 %v2645_v31, %v2345_v47  ;;  %v3434_v5 = vsel %vm3433_vm0, 1, %v12491_v13  ;;  %v2883_v34 = vpop.f32.mrf.mxu0 }
 0x2c2   : > { %vm4066_vm10 = vcmp.ne.s32.totalorder %v3412_v42, 0  ;;  %vm4102_vm11 = vcmp.lt.s32.totalorder %v3412_v42, 0  ;;  %v4174_v57 = vadd.s32 18, %v3412_v42  ;;  %v2534_v11 = vsel %vm2373_vm7, %v10367_v27, %v10436_v4 }
 0x2c3   : > { %vm4138_vm15 = vmand %vm4102_vm11, %vm4066_vm10  ;;  %v3450_v35 = vmul.u32 14564, %v3447_v8  ;;  %v3451_v17 = vmul.u32 58254, %v3447_v8  ;;  %v2950_v12 = vadd.f32 %v2881_v24, %v2714_v54  ;;  %v3436_v21 = vadd.s32 %v3434_v5, %v3432_v19  ;;  %8171 = vmatmul.msk.bf16.gmra.mxu3 %vm508_vm1, %v2534_v11  ;;  %v10487_v8 = vld [vmem:[%s9014_s8 + $0xa0] sm:$0x3] }
 0x2c4   : > { %v4210_v29 = vsel %vm4138_vm15, %v4174_v57, %v3412_v42  ;;  %v3452_v7 = vmul.u32 14564, %v3448_v25  ;;  %v3453_v56 = vmul.u32 58254, %v3448_v25  ;;  %v2278_v36 = vpop.f32.mrf.mxu2  ;;  %v2776_v9 = vrot.slane %v10382_v60, 3 }
 0x2c5   : > { %vm4246_vm14 = vcmp.lt.s32.totalorder %v4210_v29, 16  ;;  %v3454_v10 = vshll.u32 %v3451_v17, 16  ;;  %v3437_v41 = vadd.s32 %v3436_v21, %v3426_v53  ;;  %v3455_v38 = vshrl.u32 %v3451_v17, 16 }
 0x2c6   : > { %v4430_v1 = vsel %vm4246_vm14, %v4322_v45, 0.0  ;;  %v3456_v27 = vshll.u32 %v3452_v7, 16  ;;  %v10450_v6 = vadd.f32 %v10426_v49, %v2950_v12  ;;  %v10452_v61 = vld [vmem:[#allocation2 + $0x3c] sm:$0xff]  ;;  %v2346_v31 = vadd.f32 %v2278_v36, %v9647_v30  ;;  %v2650_v12 = vpop.f32.mrf.mxu3 }
 0x2c7   : > { %v4475_v51 = vpack.c.bf16 %v4430_v1, %v4430_v1  ;;  %vm3458_vm12 = vc.u32 %v3450_v35, %v3454_v10  ;;  %v3460_v20 = vadd.s32 %v3454_v10, %v3450_v35  ;;  %v3438_v37 = vadd.s32 %v3437_v41, %v3428_v32 }
 0x2c8   : > { %v3457_v52 = vshrl.u32 %v3452_v7, 16  ;;  %v3459_v62 = vsel %vm3458_vm12, 1, %v12491_v13  ;;  %v4681_v26 = vrot.slane %v10452_v61, 3  ;;  %v2715_v24 = vadd.f32 %v2647_v63, %v2346_v31 }
 0x2c9   : > { %4511 = vst.msk [vmem:[#allocation2 + $0x44] sm:$0xf] %vm4453_vm13, %v4475_v51  ;;  %v3461_v53 = vadd.s32 %v3459_v62, %v3453_v56  ;;  %vm3462_vm0 = vc.u32 %v3460_v20, %v3456_v27  ;;  %v3439_v43 = vshrl.u32 %v3438_v37, 4  ;;  %v2171_v32 = vrot.slane %v10382_v60, 2  ;;  %v2886_v63 = vpop.f32.mrf.mxu0 }
 0x2ca   : > { %v3463_v28 = vsel %vm3462_vm0, 1, %v12491_v13  ;;  %v2777_v48 = vsel %vm2742_vm8, %v2774_v44, %v2776_v9  ;;  %v4682_v18 = vsel %vm2742_vm8, %v4679_v58, %v4681_v26  ;;  %v10473_v39 = vadd.s32 128, %v9635_v23 }
 0x2cb   : > { %v3465_v30 = vadd.s32 %v3463_v28, %v3461_v53  ;;  %v3440_v42 = vmul.u32 18, %v3439_v43  ;;  %v2951_v45 = vadd.f32 %v2883_v34, %v2715_v24  ;;  %8190 = vmatmul.msk.bf16.gmra.mxu0 %vm508_vm1, %v2777_v48  ;;  %8267 = vmatmul.msk.bf16.gmra.mxu1 %vm4705_vm9, %v4682_v18  ;;  %v2172_v44 = vsel %vm1776_vm3, %v2169_v16, %v2171_v32 }
 0x2cc   : > { %v2371_v55 = vunpack.c.l.b16 %v2367_v0  ;;  %v4323_v2 = vmax.f32 %v10450_v6, 0.0  ;;  %8152 = vmatmul.msk.bf16.gmra.mxu2 %vm508_vm1, %v2172_v44  ;;  %v3476_v58 = vand.u32 65535, %v10473_v39  ;;  %v3477_v19 = vshrl.u32 %v10473_v39, 16  ;;  %v2281_v5 = vpop.f32.mrf.mxu2 }
 0x2cd   : > { %v3466_v47 = vadd.s32 %v3465_v30, %v3455_v38  ;;  %v3441_v25 = vsub.s32 %v10396_v46, %v3440_v42  ;;  %v4288_v57 = vadd.f32 %v10426_v49, %v2951_v45  ;;  %v10494_v22 = vadd.s32 136, %v9635_v23 }
 0x2ce   : > { %v10491_v54 = vpack.c.b16 %v2371_v55, %v2371_v55  ;;  %v3479_v11 = vmul.u32 14564, %v3476_v58  ;;  %v3480_v35 = vmul.u32 58254, %v3476_v58  ;;  %v3481_v17 = vmul.u32 14564, %v3477_v19  ;;  %v2652_v58 = vpop.f32.mrf.mxu3 }
 0x2cf   : > { %v3467_v16 = vadd.s32 %v3466_v47, %v3457_v52  ;;  %vm4067_vm10 = vcmp.ne.s32.totalorder %v3441_v25, 0  ;;  %vm4103_vm11 = vcmp.lt.s32.totalorder %v3441_v25, 0  ;;  %v4175_v29 = vadd.s32 18, %v3441_v25 }
 0x2d0   : > { %v2118_v21 = vunpack.c.l.b16 %v10487_v8  ;;  %vm4139_vm15 = vmand %vm4103_vm11, %vm4067_vm10  ;;  %v2347_v7 = vadd.f32 %v2281_v5, %v9490_v3  ;;  %v3482_v56 = vmul.u32 58254, %v3477_v19  ;;  %v3483_v10 = vshll.u32 %v3480_v35, 16 }
 0x2d1   : > { %v3468_v46 = vshrl.u32 %v3467_v16, 4  ;;  %v4211_v1 = vsel %vm4139_vm15, %v4175_v29, %v3441_v25  ;;  %v4324_v41 = vmax.f32 %v4288_v57, 0.0  ;;  %v3484_v38 = vshrl.u32 %v3480_v35, 16  ;;  %v2888_v29 = vpop.f32.mrf.mxu0 }
 0x2d2   : > { %v3485_v27 = vshll.u32 %v3481_v17, 16  ;;  %vm4247_vm14 = vcmp.lt.s32.totalorder %v4211_v1, 16  ;;  %v2716_v6 = vadd.f32 %v2650_v12, %v2347_v7  ;;  %vm3487_vm12 = vc.u32 %v3479_v11, %v3483_v10 }
 0x2d3   : > { %v3469_v51 = vmul.u32 18, %v3468_v46  ;;  %v4431_v36 = vsel %vm4247_vm14, %v4323_v2, 0.0  ;;  %v3488_v20 = vsel %vm3487_vm12, 1, %v12491_v13  ;;  %v3489_v37 = vadd.s32 %v3483_v10, %v3479_v11 }
 0x2d4   : > { %v2536_v34 = vshrl.u32 %v10491_v54, 16  ;;  %v4476_v31 = vpack.c.bf16 %v4431_v36, %v4431_v36  ;;  %v2952_v52 = vadd.f32 %v2886_v63, %v2716_v6  ;;  %v3490_v62 = vadd.s32 %v3488_v20, %v3482_v56  ;;  %v2283_v30 = vpop.f32.mrf.mxu2 }
 0x2d5   : > { %v3470_v3 = vsub.s32 %v10431_v33, %v3469_v51  ;;  %vm3491_vm0 = vc.u32 %v3489_v37, %v3485_v27  ;;  %v2539_v0 = vshll.u32 %v10491_v54, 16  ;;  %v3505_v43 = vand.u32 65535, %v10494_v22 }
 0x2d6   : > { %v2538_v53 = vrot.slane %v2536_v34, 2  ;;  %4512 = vst.msk [vmem:[#allocation2 + $0x48] sm:$0xf] %vm4453_vm13, %v4476_v31  ;;  %v3492_v28 = vsel %vm3491_vm0, 1, %v12491_v13  ;;  %v3486_v48 = vshrl.u32 %v3481_v17, 16  ;;  %v2348_v42 = vadd.f32 %v2283_v30, %v9653_v14 }
 0x2d7   : > { %vm4068_vm10 = vcmp.ne.s32.totalorder %v3470_v3, 0  ;;  %vm4104_vm11 = vcmp.lt.s32.totalorder %v3470_v3, 0  ;;  %v4176_v24 = vadd.s32 18, %v3470_v3  ;;  %v3494_v18 = vadd.s32 %v3492_v28, %v3490_v62  ;;  %v2655_v28 = vpop.f32.mrf.mxu3 }
 0x2d8   : > { %vm4140_vm15 = vmand %vm4104_vm11, %vm4068_vm10  ;;  %v2541_v33 = vrot.slane %v2539_v0, 3  ;;  %v10507_v44 = vadd.f32 %v10426_v49, %v2952_v52  ;;  %v3506_v55 = vshrl.u32 %v10494_v22, 16  ;;  %v3509_v2 = vmul.u32 58254, %v3505_v43 }
 0x2d9   : > { %v4212_v45 = vsel %vm4140_vm15, %v4176_v24, %v3470_v3  ;;  %v3495_v47 = vadd.s32 %v3494_v18, %v3484_v38  ;;  %v3508_v25 = vmul.u32 14564, %v3505_v43  ;;  %v2717_v16 = vadd.f32 %v2652_v58, %v2348_v42  ;;  %v10549_v42 = vld [vmem:[#allocation2 + $0xc] sm:$0xff] }
 0x2da   : > { %vm4248_vm14 = vcmp.lt.s32.totalorder %v4212_v45, 16  ;;  %v2542_v19 = vor.u32 %v2541_v33, %v2538_v53  ;;  %v3510_v5 = vmul.u32 14564, %v3506_v55  ;;  %v3511_v11 = vmul.u32 58254, %v3506_v55  ;;  %v2891_v33 = vpop.f32.mrf.mxu0 }
 0x2db   : > { %v4432_v57 = vsel %vm4248_vm14, %v4324_v41, 0.0  ;;  %v3496_v17 = vadd.s32 %v3495_v47, %v3486_v48  ;;  %v3512_v12 = vshll.u32 %v3509_v2, 16  ;;  %v4325_v46 = vmax.f32 %v10507_v44, 0.0 }
 0x2dc   : > { %v4477_v35 = vpack.c.bf16 %v4432_v57, %v4432_v57  ;;  %v2543_v14 = vsel %vm2373_vm7, %v10436_v4, %v2542_v19  ;;  %v2953_v7 = vadd.f32 %v2888_v29, %v2717_v16  ;;  %v3513_v56 = vshrl.u32 %v3509_v2, 16  ;;  %v2286_v6 = vpop.f32.mrf.mxu2 }
 0x2dd   : > { %8172 = vmatmul.msk.bf16.gmra.mxu3 %vm508_vm1, %v2543_v14  ;;  %v3514_v10 = vshll.u32 %v3510_v5, 16  ;;  %v3497_v1 = vshrl.u32 %v3496_v17, 4  ;;  %vm3516_vm12 = vc.u32 %v3508_v25, %v3512_v12  ;;  %v3518_v41 = vadd.s32 %v3512_v12, %v3508_v25  ;;  %v10516_v38 = vld [vmem:[#allocation2 + $0x44] sm:$0xff] }
 0x2de   : > { %4513 = vst.msk [vmem:[#allocation2 + $0x4c] sm:$0xf] %vm4453_vm13, %v4477_v35  ;;  %v2778_v63 = vrot.slane %v10491_v54, 3  ;;  %v3517_v27 = vsel %vm3516_vm12, 1, %v12491_v13  ;;  %v10520_v4 = vadd.f32 %v10426_v49, %v2953_v7  ;;  %v2137_v51 = vpack.c.b16 %v2118_v21, %v2118_v21 }
 0x2df   : > { %v10526_v36 = vadd.s32 144, %v9635_v23  ;;  %v3498_v20 = vmul.u32 18, %v3497_v1  ;;  %v3519_v37 = vadd.s32 %v3517_v27, %v3511_v11  ;;  %vm3520_vm0 = vc.u32 %v3518_v41, %v3514_v10 }
 0x2e0   : > { %v2779_v54 = vsel %vm2742_vm8, %v2776_v9, %v2778_v63  ;;  %v3515_v34 = vshrl.u32 %v3510_v5, 16  ;;  %v3521_v31 = vsel %vm3520_vm0, 1, %v12491_v13  ;;  %v4683_v8 = vrot.slane %v10516_v38, 3 }
 0x2e1   : > { %8191 = vmatmul.msk.bf16.gmra.mxu0 %vm508_vm1, %v2779_v54  ;;  %v2173_v3 = vrot.slane %v2137_v51, 2  ;;  %v3499_v21 = vsub.s32 %v10473_v39, %v3498_v20  ;;  %v3523_v52 = vadd.s32 %v3521_v31, %v3519_v37  ;;  %v2349_v62 = vadd.f32 %v2286_v6, %v9512_v50  ;;  %v8782_v6 = vld [vmem:[#allocation2 + $0xc] sm:$0x8]  ;;  %v8872_v20 = vld [vmem:[#allocation2 + $0xc] sm:$0xf0]   ;;  %v2657_v37 = vpop.f32.mrf.mxu3 }
 0x2e2   : > { %v3534_v53 = vand.u32 65535, %v10526_v36  ;;  %v4326_v0 = vmax.f32 %v10520_v4, 0.0  ;;  %v4684_v9 = vsel %vm2742_vm8, %v4681_v26, %v4683_v8  ;;  %v3535_v24 = vshrl.u32 %v10526_v36, 16 }
 0x2e3   : > { %v2174_v43 = vsel %vm1776_vm3, %v2171_v32, %v2173_v3  ;;  %vm4069_vm10 = vcmp.ne.s32.totalorder %v3499_v21, 0  ;;  %vm4105_vm11 = vcmp.lt.s32.totalorder %v3499_v21, 0  ;;  %v4177_v39 = vadd.s32 18, %v3499_v21  ;;  %8268 = vmatmul.msk.bf16.gmra.mxu1 %vm4705_vm9, %v4684_v9 }
 0x2e4   : > { %v3524_v50 = vadd.s32 %v3523_v52, %v3513_v56  ;;  %8153 = vmatmul.msk.bf16.gmra.mxu2 %vm508_vm1, %v2174_v43  ;;  %vm4141_vm15 = vmand %vm4105_vm11, %vm4069_vm10  ;;  %v2718_v30 = vadd.f32 %v2655_v28, %v2349_v62  ;;  %v3537_v61 = vmul.u32 14564, %v3534_v53  ;;  %v3538_v48 = vmul.u32 58254, %v3534_v53  ;;  %v2288_v14 = vpop.f32.mrf.mxu2  ;;  %v2893_v52 = vpop.f32.mrf.mxu0 }
 0x2e5   : > { %v3539_v26 = vmul.u32 14564, %v3535_v24  ;;  %v4213_v18 = vsel %vm4141_vm15, %v4177_v39, %v3499_v21  ;;  %v3540_v32 = vmul.u32 58254, %v3535_v24  ;;  %v4875_v45 = vshrl.u32 %v10549_v42, 16 }
 0x2e6   : > { %v3525_v60 = vadd.s32 %v3524_v50, %v3515_v34  ;;  %vm4249_vm3 = vcmp.lt.s32.totalorder %v4213_v18, 16  ;;  %v2954_v44 = vadd.f32 %v2891_v33, %v2718_v30  ;;  %v3541_v55 = vshll.u32 %v3538_v48, 16 }
 0x2e7   : > { %v4878_v2 = vshll.u32 %v10549_v42, 16  ;;  %v4433_v47 = vsel %vm4249_vm3, %v4325_v46, 0.0  ;;  %v3542_v19 = vshrl.u32 %v3538_v48, 16  ;;  %v3543_v25 = vshll.u32 %v3539_v26, 16  ;;  %v8874_v48 = vld [vmem:[#allocation2 + $0x14] sm:$0xff]  }
 0x2e8   : > { %v3526_v58 = vshrl.u32 %v3525_v60, 4  ;;  %v4478_v57 = vpack.c.bf16 %v4433_v47, %v4433_v47  ;;  %v3544_v16 = vshrl.u32 %v3539_v26, 16  ;;  %vm3545_vm1 = vc.u32 %v3537_v61, %v3541_v55 }
 0x2e9   : > { %v3547_v5 = vadd.s32 %v3541_v55, %v3537_v61  ;;  %v3546_v35 = vsel %vm3545_vm1, 1, %v12491_v13  ;;  %v10555_v17 = vadd.f32 %v10426_v49, %v2954_v44  ;;  %v5200_v29 = vshrl.u32 %v9867_v40, 16 }
 0x2ea   : > { %v3527_v11 = vmul.u32 18, %v3526_v58  ;;  %4514 = vst.msk [vmem:[#allocation2 + $0x50] sm:$0xf] %vm4453_vm13, %v4478_v57  ;;  %v3548_v12 = vadd.s32 %v3546_v35, %v3540_v32  ;;  %vm5198_vm12 = vsmask.f32 4352  ;;  %v5203_v46 = vshll.u32 %v9867_v40, 16 }
 0x2eb   : > { %vm3549_vm14 = vc.u32 %v3547_v5, %v3543_v25  ;;  %v5202_v10 = vrot.slane %v5200_v29, 3  ;;  %v5207_v1 = vrot.slane %v4875_v45, 3  ;;  %v5208_v27 = vrot.slane %v4878_v2, 4  ;;  %v4534_v29 = vld [vmem:[#allocation2 + $0x4] sm:$0xc] }
 0x2ec   : > { %v3528_v7 = vsub.s32 %v10494_v22, %v3527_v11  ;;  %v3550_v56 = vsel %vm3549_vm14, 1, %v12491_v13  ;;  %v5205_v63 = vrot.slane %v5203_v46, 4  ;;  %v2350_v51 = vadd.f32 %v2288_v14, %v9657_v59  ;;  %v2896_v42 = vpop.f32.mrf.mxu0 }
 0x2ed   : > { %v3552_v41 = vadd.s32 %v3550_v56, %v3548_v12  ;;  %v10568_v22 = vadd.s32 152, %v9635_v23  ;;  %v10570_v31 = vor.u32 %v5208_v27, %v5207_v1  ;;  %v8783_v53 = vor.u32 %v8872_v20, %v8782_v6  ;;  %v10595_v56 = vpop.f32.mrf.mxu1  ;;  %v12554_v6 = vld [vmem:[#allocation8_spill] sm:$0xff] }
 0x2ee   : > { %vm4070_vm0 = vcmp.ne.s32.totalorder %v3528_v7, 0  ;;  %vm4106_vm10 = vcmp.lt.s32.totalorder %v3528_v7, 0  ;;  %v4178_v40 = vadd.s32 18, %v3528_v7  ;;  %v5206_v34 = vor.u32 %v5205_v63, %v5202_v10 }
 0x2ef   : > { %vm4142_vm11 = vmand %vm4106_vm10, %vm4070_vm0  ;;  %v3553_v54 = vadd.s32 %v3552_v41, %v3542_v19  ;;  %v2719_v3 = vadd.f32 %v2657_v37, %v2350_v51  ;;  %v3563_v62 = vand.u32 65535, %v10568_v22  ;;  %v3564_v59 = vshrl.u32 %v10568_v22, 16  ;;  %v2660_v37 = vpop.f32.mrf.mxu3 }
 0x2f0   : > { %v4214_v21 = vsel %vm4142_vm11, %v4178_v40, %v3528_v7  ;;  %v5210_v43 = vsel %vm5198_vm12, %v5206_v34, %v10570_v31  ;;  %v4327_v60 = vmax.f32 %v10555_v17, 0.0  ;;  %v5609_v19 = vshrl.u32 %v8783_v53, 16  ;;  %v2291_v7 = vpop.f32.mrf.mxu2  ;;  %v12555_v34 = vld [vmem:[#allocation4_spill] sm:$0xff] }
 0x2f1   : > { %vm4250_vm15 = vcmp.lt.s32.totalorder %v4214_v21, 16  ;;  %v3554_v9 = vadd.s32 %v3553_v54, %v3544_v16  ;;  %v2955_v24 = vadd.f32 %v2893_v52, %v2719_v3  ;;  %8298 = vmatmul.msk.bf16.vlgmr.msrb.gmra.mxu3 %vm4705_vm9, %v5210_v43  ;;  %v3566_v50 = vmul.u32 14564, %v3563_v62  ;;  %v10579_v61 = vld [vmem:[#allocation2 + $0x4c] sm:$0xff] }
 0x2f2   : > { %v4434_v39 = vsel %vm4250_vm15, %v4326_v0, 0.0  ;;  %v3567_v28 = vmul.u32 58254, %v3563_v62  ;;  %v3568_v30 = vmul.u32 14564, %v3564_v59  ;;  %v3569_v33 = vmul.u32 58254, %v3564_v59 }
 0x2f3   : > { %v4479_v26 = vpack.c.bf16 %v4434_v39, %v4434_v39  ;;  %v3555_v18 = vshrl.u32 %v3554_v9, 4  ;;  %v10583_v47 = vadd.f32 %v10426_v49, %v2955_v24  ;;  %v4685_v58 = vrot.slane %v10579_v61, 3 }
 0x2f4   : > { %v3570_v32 = vshll.u32 %v3567_v28, 16  ;;  %v3571_v44 = vshrl.u32 %v3567_v28, 16  ;;  %v3572_v55 = vshll.u32 %v3568_v30, 16  ;;  %v3573_v0 = vshrl.u32 %v3568_v30, 16 }
 0x2f5   : > { %4515 = vst.msk [vmem:[#allocation2 + $0x54] sm:$0xf] %vm4453_vm13, %v4479_v26  ;;  %v3556_v4 = vmul.u32 18, %v3555_v18  ;;  %v5612_v57 = vshll.u32 %v8783_v53, 16  ;;  %v5617_v16 = vshrl.u32 %v8874_v48, 16  ;;  %v4686_v35 = vsel %vm2742_vm8, %v4683_v8, %v4685_v58  ;;  %v10617_v18 = vld [vmem:[#allocation2 + $0x14] sm:$0xff] }
 0x2f6   : > { %vm3574_vm3 = vc.u32 %v3566_v50, %v3570_v32  ;;  %v3576_v25 = vadd.s32 %v3570_v32, %v3566_v50  ;;  %v5611_v17 = vrot.slane %v5609_v19, 3  ;;  %8269 = vmatmul.msk.bf16.gmra.mxu1 %vm4705_vm9, %v4686_v35  ;;  %v5620_v8 = vshll.u32 %v8874_v48, 16 }
 0x2f7   : > { %v3557_v5 = vsub.s32 %v10526_v36, %v3556_v4  ;;  %v3575_v11 = vsel %vm3574_vm3, 1, %v12491_v13  ;;  %v5614_v12 = vrot.slane %v5612_v57, 4  ;;  %v5619_v46 = vrot.slane %v5617_v16, 3 }
 0x2f8   : > { %v3577_v14 = vadd.s32 %v3575_v11, %v3569_v33  ;;  %vm3578_vm1 = vc.u32 %v3576_v25, %v3572_v55  ;;  %v4864_v41 = vunpack.c.l.b16 %v4534_v29  ;;  %v4877_v27 = vrot.slane %v4875_v45, 2  ;;  %v10620_v33 = vpop.f32.mrf.mxu1 }
 0x2f9   : > { %vm4071_vm14 = vcmp.ne.s32.totalorder %v3557_v5, 0  ;;  %vm4107_vm0 = vcmp.lt.s32.totalorder %v3557_v5, 0  ;;  %v4179_v36 = vadd.s32 18, %v3557_v5  ;;  %v3579_v10 = vsel %vm3578_vm1, 1, %v12491_v13 }
 0x2fa   : > { %vm4143_vm10 = vmand %vm4107_vm0, %vm4071_vm14  ;;  %v3581_v38 = vadd.s32 %v3579_v10, %v3577_v14  ;;  %v5615_v1 = vor.u32 %v5614_v12, %v5611_v17  ;;  %v4880_v51 = vrot.slane %v4878_v2, 3  ;;  %v2351_v20 = vadd.f32 %v2291_v7, %v12554_v6  ;;  %v2293_v17 = vpop.f32.mrf.mxu2  ;;  %v8876_v7 = vld [vmem:[#allocation2 + $0x1c] sm:$0xff]  }
 0x2fb   : > { %v4215_v63 = vsel %vm4143_vm10, %v4179_v36, %v3557_v5  ;;  %v5622_v54 = vrot.slane %v5620_v8, 4  ;;  %v12556_v3 = vunpack.c.l.b16 %v12555_v34  ;;  %v10608_v53 = vadd.s32 160, %v9635_v23  ;;  %v2662_v8 = vpop.f32.mrf.mxu3  ;;  %v2898_v34 = vpop.f32.mrf.mxu0 }
 0x2fc   : > { %vm4251_vm11 = vcmp.lt.s32.totalorder %v4215_v63, 16  ;;  %v3582_v40 = vadd.s32 %v3581_v38, %v3571_v44  ;;  %v10605_v62 = vor.u32 %v4880_v51, %v4877_v27  ;;  %v2720_v59 = vadd.f32 %v2660_v37, %v2351_v20  ;;  %v12557_v63 = vld [vmem:[#allocation13_spill] sm:$0xff] }
 0x2fd   : > { %v4865_v21 = vpack.c.b16 %v12556_v3, %v4864_v41  ;;  %v4435_v52 = vsel %vm4251_vm11, %v4327_v60, 0.0  ;;  %v10610_v2 = vor.u32 %v5622_v54, %v5619_v46  ;;  %v3592_v50 = vand.u32 65535, %v10608_v53 }
 0x2fe   : > { %v4480_v45 = vpack.c.bf16 %v4435_v52, %v4435_v52  ;;  %v3583_v9 = vadd.s32 %v3582_v40, %v3573_v0  ;;  %v2956_v39 = vadd.f32 %v2896_v42, %v2720_v59  ;;  %v3593_v28 = vshrl.u32 %v10608_v53, 16 }
 0x2ff   : > { %v4867_v43 = vshrl.u32 %v4865_v21, 16  ;;  %v4870_v24 = vshll.u32 %v4865_v21, 16  ;;  %v5624_v48 = vsel %vm5198_vm12, %v5615_v1, %v10610_v2  ;;  %v4884_v60 = vshrl.u32 %v10617_v18, 16 }
 0x300   : > { %4516 = vst.msk [vmem:[#allocation2 + $0x58] sm:$0xf] %vm4453_vm13, %v4480_v45  ;;  %v3584_v30 = vshrl.u32 %v3583_v9, 4  ;;  %8317 = vmatmul.msk.bf16.vlgmr.msrb.gmra.mxu0 %vm4705_vm9, %v5624_v48  ;;  %v3595_v44 = vmul.u32 14564, %v3592_v50  ;;  %v3596_v55 = vmul.u32 58254, %v3592_v50  ;;  %v3597_v4 = vmul.u32 14564, %v3593_v28 }
 0x301   : > { %v4869_v26 = vrot.slane %v4867_v43, 2  ;;  %v4872_v32 = vrot.slane %v4870_v24, 3  ;;  %v4328_v19 = vmax.f32 %v10583_v47, 0.0  ;;  %v3598_v25 = vmul.u32 58254, %v3593_v28 }
 0x302   : > { %v3585_v0 = vmul.u32 18, %v3584_v30  ;;  %v4887_v57 = vshll.u32 %v10617_v18, 16  ;;  %v3599_v5 = vshll.u32 %v3596_v55, 16  ;;  %v3601_v11 = vshll.u32 %v3597_v4, 16 }
 0x303   : > { %v4873_v16 = vor.u32 %v4872_v32, %v4869_v26  ;;  %v10626_v35 = vadd.f32 %v10426_v49, %v2956_v39  ;;  %v3600_v14 = vshrl.u32 %v3596_v55, 16  ;;  %v3602_v12 = vshrl.u32 %v3597_v4, 16  ;;  %v10654_v39 = vpop.f32.mrf.mxu1  ;;  %v2296_v4 = vpop.f32.mrf.mxu2 }
 0x304   : > { %v3586_v29 = vsub.s32 %v10568_v22, %v3585_v0  ;;  %v5211_v46 = vrot.slane %v4884_v60, 3  ;;  %vm3603_vm15 = vc.u32 %v3595_v44, %v3599_v5  ;;  %v3605_v36 = vadd.s32 %v3599_v5, %v3595_v44 }
 0x305   : > { %v4882_v47 = vsel %vm2373_vm7, %v4873_v16, %v10605_v62  ;;  %v5212_v10 = vrot.slane %v4887_v57, 4  ;;  %v3604_v22 = vsel %vm3603_vm15, 1, %v12491_v13  ;;  %v2352_v27 = vadd.f32 %v2293_v17, %v12557_v63 }
 0x306   : > { %vm4072_vm3 = vcmp.ne.s32.totalorder %v3586_v29, 0  ;;  %vm4108_vm1 = vcmp.lt.s32.totalorder %v3586_v29, 0  ;;  %v4180_v38 = vadd.s32 18, %v3586_v29  ;;  %8279 = vmatmul.msk.bf16.vlgmr.msrb.gmra.mxu2 %vm4705_vm9, %v4882_v47  ;;  %v3606_v1 = vadd.s32 %v3604_v22, %v3598_v25  ;;  %v2665_v47 = vpop.f32.mrf.mxu3 }
 0x307   : > { %vm4144_vm14 = vmand %vm4108_vm1, %vm4072_vm3  ;;  %vm3607_vm0 = vc.u32 %v3605_v36, %v3601_v11  ;;  %v10637_v41 = vor.u32 %v5212_v10, %v5211_v46  ;;  %v10640_v51 = vld [vmem:[#allocation2 + $0x54] sm:$0xff]  ;;  %v10644_v40 = vadd.s32 168, %v9635_v23  ;;  %v5626_v37 = vshrl.u32 %v8876_v7, 16 }
 0x308   : > { %v4216_v6 = vsel %vm4144_vm14, %v4180_v38, %v3586_v29  ;;  %v3608_v20 = vsel %vm3607_vm0, 1, %v12491_v13  ;;  %v2721_v21 = vadd.f32 %v2662_v8, %v2352_v27  ;;  %v4687_v9 = vrot.slane %v10640_v51, 3 }
 0x309   : > { %vm4252_vm10 = vcmp.lt.s32.totalorder %v4216_v6, 16  ;;  %v3610_v54 = vadd.s32 %v3608_v20, %v3606_v1  ;;  %v5214_v3 = vsel %vm5198_vm12, %v10570_v31, %v10637_v41  ;;  %v3621_v59 = vand.u32 65535, %v10644_v40 }
 0x30a   : > { %v4436_v52 = vsel %vm4252_vm10, %v4328_v19, 0.0  ;;  %8299 = vmatmul.msk.bf16.gmra.mxu3 %vm4705_vm9, %v5214_v3  ;;  %v3622_v45 = vshrl.u32 %v10644_v40, 16  ;;  %v4329_v24 = vmax.f32 %v10626_v35, 0.0  ;;  %v2957_v50 = vadd.f32 %v2898_v34, %v2721_v21 }
 0x30b   : > { %v4481_v42 = vpack.c.bf16 %v4436_v52, %v4436_v52  ;;  %v3611_v43 = vadd.s32 %v3610_v54, %v3600_v14  ;;  %v3624_v28 = vmul.u32 14564, %v3621_v59  ;;  %v3625_v30 = vmul.u32 58254, %v3621_v59  ;;  %v12558_v14 = vld [vmem:[#allocation9_spill] sm:$0xff]  ;;  %v10688_v54 = vpop.f32.mrf.mxu1 }
 0x30c   : > { %v3626_v31 = vmul.u32 14564, %v3622_v45  ;;  %v5628_v48 = vrot.slane %v5626_v37, 3  ;;  %v3627_v32 = vmul.u32 58254, %v3622_v45  ;;  %v4688_v44 = vsel %vm2742_vm8, %v4685_v58, %v4687_v9 }
 0x30d   : > { %4517 = vst.msk [vmem:[#allocation2 + $0x5c] sm:$0xf] %vm4453_vm13, %v4481_v42  ;;  %v3612_v26 = vadd.s32 %v3611_v43, %v3602_v12  ;;  %v5629_v55 = vshll.u32 %v8876_v7, 16  ;;  %v3628_v0 = vshll.u32 %v3625_v30, 16  ;;  %v3629_v19 = vshrl.u32 %v3625_v30, 16  ;;  %8270 = vmatmul.msk.bf16.gmra.mxu1 %vm4705_vm9, %v4688_v44  ;;  %v10694_v42 = vld [vmem:[#allocation2 + $0x1c] sm:$0xff] }
 0x30e   : > { %v3630_v25 = vshll.u32 %v3626_v31, 16  ;;  %v10663_v16 = vadd.f32 %v10426_v49, %v2957_v50  ;;  %v3631_v11 = vshrl.u32 %v3626_v31, 16  ;;  %v4886_v29 = vrot.slane %v4884_v60, 2  ;;  %v2298_v31 = vpop.f32.mrf.mxu2 }
 0x30f   : > { %v3613_v5 = vshrl.u32 %v3612_v26, 4  ;;  %v5631_v17 = vrot.slane %v5629_v55, 4  ;;  %vm3632_vm11 = vc.u32 %v3624_v28, %v3628_v0  ;;  %v3634_v61 = vadd.s32 %v3628_v0, %v3624_v28  ;;  %v8878_v55 = vld [vmem:[#allocation2 + $0x24] sm:$0xff]  }
 0x310   : > { %v4889_v58 = vrot.slane %v4887_v57, 3  ;;  %v2353_v12 = vadd.f32 %v2296_v4, %v12558_v14  ;;  %v3633_v7 = vsel %vm3632_vm11, 1, %v12491_v13  ;;  %v10675_v10 = vadd.s32 176, %v9635_v23  ;;  %v2901_v57 = vpop.f32.mrf.mxu0 }
 0x311   : > { %v3614_v46 = vmul.u32 18, %v3613_v5  ;;  %v10672_v36 = vor.u32 %v5631_v17, %v5628_v48  ;;  %v3635_v38 = vadd.s32 %v3633_v7, %v3627_v32  ;;  %vm3636_vm15 = vc.u32 %v3634_v61, %v3630_v25  ;;  %v12559_v17 = vld [vmem:[#allocation14_spill] sm:$0xff]  ;;  %v2667_v61 = vpop.f32.mrf.mxu3 }
 0x312   : > { %v10677_v22 = vor.u32 %v4889_v58, %v4886_v29  ;;  %v2722_v60 = vadd.f32 %v2665_v47, %v2353_v12  ;;  %v3637_v18 = vsel %vm3636_vm15, 1, %v12491_v13  ;;  %v3650_v63 = vand.u32 65535, %v10675_v10 }
 0x313   : > { %v3615_v1 = vsub.s32 %v10608_v53, %v3614_v46  ;;  %v5633_v8 = vsel %vm5198_vm12, %v10610_v2, %v10672_v36  ;;  %v3639_v27 = vadd.s32 %v3637_v18, %v3635_v38  ;;  %v4330_v6 = vmax.f32 %v10663_v16, 0.0 }
 0x314   : > { %8318 = vmatmul.msk.bf16.gmra.mxu0 %vm4705_vm9, %v5633_v8  ;;  %v2958_v20 = vadd.f32 %v2901_v57, %v2722_v60  ;;  %v3651_v37 = vshrl.u32 %v10675_v10, 16  ;;  %v4891_v34 = vsel %vm2373_vm7, %v10605_v62, %v10677_v22  ;;  %v3653_v3 = vmul.u32 14564, %v3650_v63  ;;  %v10720_v8 = vpop.f32.mrf.mxu1 }
 0x315   : > { %vm4073_vm3 = vcmp.ne.s32.totalorder %v3615_v1, 0  ;;  %vm4109_vm1 = vcmp.lt.s32.totalorder %v3615_v1, 0  ;;  %v4181_v53 = vadd.s32 18, %v3615_v1  ;;  %v3640_v2 = vadd.s32 %v3639_v27, %v3629_v19 }
 0x316   : > { %vm4145_vm14 = vmand %vm4109_vm1, %vm4073_vm3  ;;  %8280 = vmatmul.msk.bf16.gmra.mxu2 %vm4705_vm9, %v4891_v34  ;;  %v3654_v21 = vmul.u32 58254, %v3650_v63  ;;  %v3655_v52 = vmul.u32 14564, %v3651_v37  ;;  %v3656_v45 = vmul.u32 58254, %v3651_v37  ;;  %v4893_v43 = vshrl.u32 %v10694_v42, 16 }
 0x317   : > { %v4217_v59 = vsel %vm4145_vm14, %v4181_v53, %v3615_v1  ;;  %v4896_v50 = vshll.u32 %v10694_v42, 16  ;;  %v3641_v28 = vadd.s32 %v3640_v2, %v3631_v11  ;;  %v10699_v62 = vadd.f32 %v10426_v49, %v2958_v20  ;;  %v10762_v42 = vld [vmem:[#allocation2 + $0x24] sm:$0xff] }
 0x318   : > { %vm4253_vm0 = vcmp.lt.s32.totalorder %v4217_v59, 16  ;;  %v3657_v30 = vshll.u32 %v3654_v21, 16  ;;  %v3658_v26 = vshrl.u32 %v3654_v21, 16  ;;  %v3659_v32 = vshll.u32 %v3655_v52, 16  ;;  %v2903_v60 = vpop.f32.mrf.mxu0 }
 0x319   : > { %v4437_v48 = vsel %vm4253_vm0, %v4329_v24, 0.0  ;;  %v3660_v44 = vshrl.u32 %v3655_v52, 16  ;;  %v3642_v0 = vshrl.u32 %v3641_v28, 4  ;;  %v5215_v5 = vrot.slane %v4893_v43, 3 }
 0x31a   : > { %v4482_v4 = vpack.c.bf16 %v4437_v48, %v4437_v48  ;;  %vm3661_vm10 = vc.u32 %v3653_v3, %v3657_v30  ;;  %v3663_v19 = vadd.s32 %v3657_v30, %v3653_v3  ;;  %v5216_v11 = vrot.slane %v4896_v50, 4 }
 0x31b   : > { %v3662_v25 = vsel %vm3661_vm10, 1, %v12491_v13  ;;  %v2354_v29 = vadd.f32 %v2298_v31, %v12559_v17  ;;  %v3643_v35 = vmul.u32 18, %v3642_v0  ;;  %v10711_v58 = vadd.s32 184, %v9635_v23 }
 0x31c   : > { %4518 = vst.msk [vmem:[#allocation2 + $0x60] sm:$0xf] %vm4453_vm13, %v4482_v4  ;;  %v3664_v24 = vadd.s32 %v3662_v25, %v3656_v45  ;;  %vm3665_vm11 = vc.u32 %v3663_v19, %v3659_v32  ;;  %v10714_v12 = vor.u32 %v5216_v11, %v5215_v5  ;;  %v5635_v7 = vshrl.u32 %v8878_v55, 16  ;;  %v2301_v4 = vpop.f32.mrf.mxu2 }
 0x31d   : > { %v3666_v14 = vsel %vm3665_vm11, 1, %v12491_v13  ;;  %v2723_v46 = vadd.f32 %v2667_v61, %v2354_v29  ;;  %v3644_v47 = vsub.s32 %v10644_v40, %v3643_v35  ;;  %v3679_v1 = vand.u32 65535, %v10711_v58  ;;  %v12560_v61 = vld [vmem:[#allocation10_spill] sm:$0xff] }
 0x31e   : > { %v3668_v38 = vadd.s32 %v3666_v14, %v3664_v24  ;;  %v3680_v18 = vshrl.u32 %v10711_v58, 16  ;;  %v4331_v57 = vmax.f32 %v10699_v62, 0.0  ;;  %v5218_v63 = vsel %vm5198_vm12, %v10637_v41, %v10714_v12  ;;  %v2670_v24 = vpop.f32.mrf.mxu3 }
 0x31f   : > { %v2959_v27 = vadd.f32 %v2903_v60, %v2723_v46  ;;  %v5638_v20 = vshll.u32 %v8878_v55, 16  ;;  %vm4074_vm15 = vcmp.ne.s32.totalorder %v3644_v47, 0  ;;  %vm4110_vm3 = vcmp.lt.s32.totalorder %v3644_v47, 0  ;;  %8300 = vmatmul.msk.bf16.gmra.mxu3 %vm4705_vm9, %v5218_v63 }
 0x320   : > { %v4182_v37 = vadd.s32 18, %v3644_v47  ;;  %v3669_v40 = vadd.s32 %v3668_v38, %v3658_v26  ;;  %vm4146_vm1 = vmand %vm4110_vm3, %vm4074_vm15  ;;  %v3682_v53 = vmul.u32 14564, %v3679_v1  ;;  %v3683_v34 = vmul.u32 58254, %v3679_v1  ;;  %v2906_v51 = vpop.f32.mrf.mxu0 }
 0x321   : > { %v3684_v2 = vmul.u32 14564, %v3680_v18  ;;  %v5637_v3 = vrot.slane %v5635_v7, 3  ;;  %v3685_v59 = vmul.u32 58254, %v3680_v18  ;;  %v5640_v45 = vrot.slane %v5638_v20, 4  ;;  %v10754_v7 = vpop.f32.mrf.mxu1 }
 0x322   : > { %v4218_v21 = vsel %vm4146_vm1, %v4182_v37, %v3644_v47  ;;  %v3670_v52 = vadd.s32 %v3669_v40, %v3660_v44  ;;  %v3686_v28 = vshll.u32 %v3683_v34, 16  ;;  %v10727_v30 = vadd.f32 %v10426_v49, %v2959_v27 }
 0x323   : > { %vm4254_vm14 = vcmp.lt.s32.totalorder %v4218_v21, 16  ;;  %v3688_v41 = vshll.u32 %v3684_v2, 16  ;;  %v10729_v31 = vld [vmem:[#allocation2 + $0x5c] sm:$0xff]  ;;  %v3687_v32 = vshrl.u32 %v3683_v34, 16  ;;  %v3689_v55 = vshrl.u32 %v3684_v2, 16 }
 0x324   : > { %v4438_v48 = vsel %vm4254_vm14, %v4330_v6, 0.0  ;;  %v3671_v26 = vshrl.u32 %v3670_v52, 4  ;;  %vm3690_vm0 = vc.u32 %v3682_v53, %v3686_v28  ;;  %v3692_v44 = vadd.s32 %v3686_v28, %v3682_v53  ;;  %v2303_v52 = vpop.f32.mrf.mxu2 }
 0x325   : > { %v4483_v0 = vpack.c.bf16 %v4438_v48, %v4438_v48  ;;  %v4689_v19 = vrot.slane %v10729_v31, 3  ;;  %v3691_v5 = vsel %vm3690_vm0, 1, %v12491_v13  ;;  %v10735_v11 = vor.u32 %v5640_v45, %v5637_v3  ;;  %v10782_v48 = vld [vmem:[%s12424_s2] ss:$0 sm:$0xff] }
 0x326   : > { %v3672_v25 = vmul.u32 18, %v3671_v26  ;;  %v4895_v49 = vrot.slane %v4893_v43, 2  ;;  %v3693_v16 = vadd.s32 %v3691_v5, %v3685_v59  ;;  %vm3694_vm10 = vc.u32 %v3692_v44, %v3688_v41  ;;  %v10777_v59 = vld [vmem:[#allocation2 + $0x2c] sm:$0xff]   ;;  %v12561_v44 = vld [vmem:[#allocation16_spill] sm:$0xff] }
 0x327   : > { %4519 = vst.msk [vmem:[#allocation2 + $0x64] sm:$0xf] %vm4453_vm13, %v4483_v0  ;;  %v4690_v6 = vsel %vm2742_vm8, %v4687_v9, %v4689_v19  ;;  %v4898_v17 = vrot.slane %v4896_v50, 3  ;;  %v3695_v35 = vsel %vm3694_vm10, 1, %v12491_v13  ;;  %v5642_v43 = vsel %vm5198_vm12, %v10672_v36, %v10735_v11 }
 0x328   : > { %v3673_v29 = vsub.s32 %v10675_v10, %v3672_v25  ;;  %8271 = vmatmul.msk.bf16.gmra.mxu1 %vm4705_vm9, %v4690_v6  ;;  %v2355_v14 = vadd.f32 %v2301_v4, %v12560_v61  ;;  %v3697_v46 = vadd.s32 %v3695_v35, %v3693_v16  ;;  %8319 = vmatmul.msk.bf16.gmra.mxu0 %vm4705_vm9, %v5642_v43  ;;  %v10760_v10 = vadd.s32 192, %v9635_v23 }
 0x329   : > { %v10757_v9 = vor.u32 %v4898_v17, %v4895_v49  ;;  %v4902_v50 = vshrl.u32 %v10762_v42, 16  ;;  %v4332_v27 = vmax.f32 %v10727_v30, 0.0  ;;  %v4905_v37 = vshll.u32 %v10762_v42, 16  ;;  %v2672_v49 = vpop.f32.mrf.mxu3  ;;  %v10799_v43 = vpop.f32.mrf.mxu1 }
 0x32a   : > { %vm4075_vm11 = vcmp.ne.s32.totalorder %v3673_v29, 0  ;;  %vm4111_vm15 = vcmp.lt.s32.totalorder %v3673_v29, 0  ;;  %v4183_v36 = vadd.s32 18, %v3673_v29  ;;  %v2724_v47 = vadd.f32 %v2670_v24, %v2355_v14  ;;  %v2908_v24 = vpop.f32.mrf.mxu0 }
 0x32b   : > { %vm4147_vm3 = vmand %vm4111_vm15, %vm4075_vm11  ;;  %v3698_v38 = vadd.s32 %v3697_v46, %v3687_v32  ;;  %v4900_v60 = vsel %vm2373_vm7, %v10677_v22, %v10757_v9  ;;  %v3708_v1 = vand.u32 65535, %v10760_v10  ;;  %v3709_v18 = vshrl.u32 %v10760_v10, 16 }
 0x32c   : > { %v4219_v63 = vsel %vm4147_vm3, %v4183_v36, %v3673_v29  ;;  %8281 = vmatmul.msk.bf16.gmra.mxu2 %vm4705_vm9, %v4900_v60  ;;  %v2960_v20 = vadd.f32 %v2906_v51, %v2724_v47  ;;  %v5219_v21 = vrot.slane %v4902_v50, 3  ;;  %v2356_v25 = vadd.f32 %v2303_v52, %v12561_v44 }
 0x32d   : > { %vm4255_vm1 = vcmp.lt.s32.totalorder %v4219_v63, 16  ;;  %v3699_v40 = vadd.s32 %v3698_v38, %v3689_v55  ;;  %v3711_v53 = vmul.u32 14564, %v3708_v1  ;;  %v3712_v34 = vmul.u32 58254, %v3708_v1 }
 0x32e   : > { %v4439_v2 = vsel %vm4255_vm1, %v4331_v57, 0.0  ;;  %v3713_v22 = vmul.u32 14564, %v3709_v18  ;;  %v3714_v3 = vmul.u32 58254, %v3709_v18  ;;  %v10785_v26 = vadd.f32 %v10782_v48, %v2960_v20 }
 0x32f   : > { %v4484_v45 = vpack.c.bf16 %v4439_v2, %v4439_v2  ;;  %v3700_v28 = vshrl.u32 %v3699_v40, 4  ;;  %v3715_v41 = vshll.u32 %v3712_v34, 16  ;;  %v3716_v62 = vshrl.u32 %v3712_v34, 16 }
 0x330   : > { %v3717_v57 = vshll.u32 %v3713_v22, 16  ;;  %v3718_v32 = vshrl.u32 %v3713_v22, 16  ;;  %v5220_v55 = vrot.slane %v4905_v37, 4  ;;  %v10795_v6 = vadd.s32 200, %v9635_v23 }
 0x331   : > { %4520 = vst.msk [vmem:[#allocation2 + $0x68] sm:$0xf] %vm4453_vm13, %v4484_v45  ;;  %v3701_v4 = vmul.u32 18, %v3700_v28  ;;  %vm3719_vm14 = vc.u32 %v3711_v53, %v3715_v41  ;;  %v3721_v0 = vadd.s32 %v3715_v41, %v3711_v53  ;;  %v5644_v17 = vshrl.u32 %v10777_v59, 16 }
 0x332   : > { %v3720_v5 = vsel %vm3719_vm14, 1, %v12491_v13  ;;  %v10792_v16 = vor.u32 %v5220_v55, %v5219_v21  ;;  %v2725_v61 = vadd.f32 %v2672_v49, %v2356_v25  ;;  %v3737_v51 = vand.u32 65535, %v10795_v6  ;;  %v2911_v49 = vpop.f32.mrf.mxu0 }
 0x333   : > { %v3702_v29 = vsub.s32 %v10711_v58, %v3701_v4  ;;  %v3722_v35 = vadd.s32 %v3720_v5, %v3714_v3  ;;  %vm3723_vm0 = vc.u32 %v3721_v0, %v3717_v57  ;;  %v3738_v36 = vshrl.u32 %v10795_v6, 16  ;;  %v2306_v3 = vpop.f32.mrf.mxu2 }
 0x334   : > { %v3724_v14 = vsel %vm3723_vm0, 1, %v12491_v13  ;;  %v5222_v46 = vsel %vm5198_vm12, %v10714_v12, %v10792_v16  ;;  %v2961_v38 = vadd.f32 %v2908_v24, %v2725_v61  ;;  %v3740_v60 = vmul.u32 14564, %v3737_v51  ;;  %v2675_v24 = vpop.f32.mrf.mxu3 }
 0x335   : > { %vm4076_vm10 = vcmp.ne.s32.totalorder %v3702_v29, 0  ;;  %vm4112_vm11 = vcmp.lt.s32.totalorder %v3702_v29, 0  ;;  %v4184_v47 = vadd.s32 18, %v3702_v29  ;;  %v3726_v58 = vadd.s32 %v3724_v14, %v3722_v35  ;;  %8301 = vmatmul.msk.bf16.gmra.mxu3 %vm4705_vm9, %v5222_v46 }
 0x336   : > { %vm4148_vm15 = vmand %vm4112_vm11, %vm4076_vm10  ;;  %v3741_v1 = vmul.u32 58254, %v3737_v51  ;;  %v3742_v18 = vmul.u32 14564, %v3738_v36  ;;  %v4333_v40 = vmax.f32 %v10785_v26, 0.0  ;;  %v3743_v12 = vmul.u32 58254, %v3738_v36  ;;  %v10843_v36 = vld [vmem:[#allocation2 + $0x2c] sm:$0xff] }
 0x337   : > { %v4220_v63 = vsel %vm4148_vm15, %v4184_v47, %v3702_v29  ;;  %v3727_v20 = vadd.s32 %v3726_v58, %v3716_v62  ;;  %v5646_v22 = vrot.slane %v5644_v17, 3  ;;  %v10814_v28 = vadd.f32 %v10782_v48, %v2961_v38  ;;  %v10828_v17 = vpop.f32.mrf.mxu1 }
 0x338   : > { %vm4256_vm3 = vcmp.lt.s32.totalorder %v4220_v63, 16  ;;  %v3744_v53 = vshll.u32 %v3741_v1, 16  ;;  %v3746_v34 = vshll.u32 %v3742_v18, 16  ;;  %v10809_v2 = vld [vmem:[#allocation2 + $0x64] sm:$0xff]  ;;  %v3745_v45 = vshrl.u32 %v3741_v1, 16 }
 0x339   : > { %v4440_v21 = vsel %vm4256_vm3, %v4332_v27, 0.0  ;;  %v3728_v52 = vadd.s32 %v3727_v20, %v3718_v32  ;;  %v4691_v57 = vrot.slane %v10809_v2, 3  ;;  %v3747_v4 = vshrl.u32 %v3742_v18, 16 }
 0x33a   : > { %v4485_v41 = vpack.c.bf16 %v4440_v21, %v4440_v21  ;;  %vm3748_vm1 = vc.u32 %v3740_v60, %v3744_v53  ;;  %v3750_v62 = vadd.s32 %v3744_v53, %v3740_v60  ;;  %v5647_v44 = vshll.u32 %v10777_v59, 16 }
 0x33b   : > { %v3729_v55 = vshrl.u32 %v3728_v52, 4  ;;  %v3749_v0 = vsel %vm3748_vm1, 1, %v12491_v13  ;;  %v4692_v27 = vsel %vm2742_vm8, %v4689_v19, %v4691_v57  ;;  %v4904_v32 = vrot.slane %v4902_v50, 2  ;;  %v12562_v19 = vld [vmem:[#allocation11_spill] sm:$0xff] }
 0x33c   : > { %4521 = vst.msk [vmem:[#allocation2 + $0x6c] sm:$0xf] %vm4453_vm13, %v4485_v41  ;;  %v3751_v30 = vadd.s32 %v3749_v0, %v3743_v12  ;;  %vm3752_vm14 = vc.u32 %v3750_v62, %v3746_v34  ;;  %8272 = vmatmul.msk.bf16.gmra.mxu1 %vm4705_vm9, %v4692_v27  ;;  %v5649_v59 = vrot.slane %v5647_v44, 4  ;;  %v4907_v29 = vrot.slane %v4905_v37, 3  ;;  %v2308_v12 = vpop.f32.mrf.mxu2 }
 0x33d   : > { %v3730_v25 = vmul.u32 18, %v3729_v55  ;;  %v3753_v5 = vsel %vm3752_vm14, 1, %v12491_v13  ;;  %v4334_v31 = vmax.f32 %v10814_v28, 0.0  ;;  %v2357_v61 = vadd.f32 %v2306_v3, %v12562_v19 }
 0x33e   : > { %v3755_v35 = vadd.s32 %v3753_v5, %v3751_v30  ;;  %v10836_v50 = vadd.s32 208, %v9635_v23  ;;  %v10839_v46 = vor.u32 %v5649_v59, %v5646_v22  ;;  %v10841_v51 = vor.u32 %v4907_v29, %v4904_v32  ;;  %v2913_v32 = vpop.f32.mrf.mxu0  ;;  %v2677_v29 = vpop.f32.mrf.mxu3 }
 0x33f   : > { %v3731_v14 = vsub.s32 %v10760_v10, %v3730_v25  ;;  %v4911_v42 = vshrl.u32 %v10843_v36, 16  ;;  %v2726_v47 = vadd.f32 %v2675_v24, %v2357_v61  ;;  %v4914_v20 = vshll.u32 %v10843_v36, 16  ;;  %v10864_v25 = vpop.f32.mrf.mxu1  ;;  %v12565_v36 = vld [vmem:[#allocation12_spill] sm:$0xff] }
 0x340   : > { %v3756_v37 = vadd.s32 %v3755_v35, %v3745_v45  ;;  %v3766_v58 = vand.u32 65535, %v10836_v50  ;;  %v3767_v38 = vshrl.u32 %v10836_v50, 16  ;;  %v5651_v10 = vsel %vm5198_vm12, %v10735_v11, %v10839_v46  ;;  %v8882_v45 = vld [vmem:[#allocation2 + $0x34] sm:$0xff]   ;;  %12563 = vst [vmem:[#allocation6_spill] sm:$0xff] %v10864_v25 }
 0x341   : > { %vm4077_vm0 = vcmp.ne.s32.totalorder %v3731_v14, 0  ;;  %vm4113_vm10 = vcmp.lt.s32.totalorder %v3731_v14, 0  ;;  %v4185_v60 = vadd.s32 18, %v3731_v14  ;;  %8320 = vmatmul.msk.bf16.gmra.mxu0 %vm4705_vm9, %v5651_v10  ;;  %v4909_v18 = vsel %vm2373_vm7, %v10757_v9, %v10841_v51 }
 0x342   : > { %vm4149_vm11 = vmand %vm4113_vm10, %vm4077_vm0  ;;  %v3757_v1 = vadd.s32 %v3756_v37, %v3747_v4  ;;  %v2962_v63 = vadd.f32 %v2911_v49, %v2726_v47  ;;  %8282 = vmatmul.msk.bf16.gmra.mxu2 %vm4705_vm9, %v4909_v18  ;;  %v3769_v34 = vmul.u32 14564, %v3766_v58  ;;  %v3770_v22 = vmul.u32 58254, %v3766_v58  ;;  %v12564_v49 = vld [vmem:[#allocation17_spill] sm:$0xff] }
 0x343   : > { %v4221_v53 = vsel %vm4149_vm11, %v4185_v60, %v3731_v14  ;;  %v3771_v3 = vmul.u32 14564, %v3767_v38  ;;  %v3772_v21 = vmul.u32 58254, %v3767_v38  ;;  %v5223_v55 = vrot.slane %v4911_v42, 3 }
 0x344   : > { %vm4257_vm15 = vcmp.lt.s32.totalorder %v4221_v53, 16  ;;  %v3758_v11 = vshrl.u32 %v3757_v1, 4  ;;  %v10858_v52 = vadd.f32 %v10782_v48, %v2962_v63  ;;  %v3773_v41 = vshll.u32 %v3770_v22, 16 }
 0x345   : > { %v4441_v9 = vsel %vm4257_vm15, %v4333_v40, 0.0  ;;  %v3775_v62 = vshll.u32 %v3771_v3, 16  ;;  %v3774_v44 = vshrl.u32 %v3770_v22, 16  ;;  %v3776_v30 = vshrl.u32 %v3771_v3, 16 }
 0x346   : > { %v4486_v4 = vpack.c.bf16 %v4441_v9, %v4441_v9  ;;  %v3759_v0 = vmul.u32 18, %v3758_v11  ;;  %vm3777_vm3 = vc.u32 %v3769_v34, %v3773_v41  ;;  %v3779_v27 = vadd.s32 %v3773_v41, %v3769_v34 }
 0x347   : > { %v5224_v5 = vrot.slane %v4914_v20, 4  ;;  %v2358_v26 = vadd.f32 %v2308_v12, %v12564_v49  ;;  %v3778_v59 = vsel %vm3777_vm3, 1, %v12491_v13  ;;  %v10873_v35 = vadd.s32 216, %v9635_v23  ;;  %v2311_v12 = vpop.f32.mrf.mxu2 }
 0x348   : > { %4522 = vst.msk [vmem:[#allocation2 + $0x70] sm:$0xf] %vm4453_vm13, %v4486_v4  ;;  %v3760_v40 = vsub.s32 %v10795_v6, %v3759_v0  ;;  %v5653_v24 = vshrl.u32 %v8882_v45, 16  ;;  %v3780_v19 = vadd.s32 %v3778_v59, %v3772_v21  ;;  %vm3781_vm1 = vc.u32 %v3779_v27, %v3775_v62 }
 0x349   : > { %v10875_v61 = vor.u32 %v5224_v5, %v5223_v55  ;;  %v2727_v14 = vadd.f32 %v2677_v29, %v2358_v26  ;;  %v3782_v47 = vsel %vm3781_vm1, 1, %v12491_v13  ;;  %v3795_v60 = vand.u32 65535, %v10873_v35  ;;  %v10893_v5 = vpop.f32.mrf.mxu1  ;;  %v2680_v26 = vpop.f32.mrf.mxu3 }
 0x34a   : > { %vm4078_vm14 = vcmp.ne.s32.totalorder %v3760_v40, 0  ;;  %vm4114_vm0 = vcmp.lt.s32.totalorder %v3760_v40, 0  ;;  %v4186_v37 = vadd.s32 18, %v3760_v40  ;;  %v3784_v58 = vadd.s32 %v3782_v47, %v3780_v19 }
 0x34b   : > { %vm4150_vm10 = vmand %vm4114_vm0, %vm4078_vm14  ;;  %v5226_v6 = vsel %vm5198_vm12, %v10792_v16, %v10875_v61  ;;  %v2963_v38 = vadd.f32 %v2913_v32, %v2727_v14  ;;  %v4335_v1 = vmax.f32 %v10858_v52, 0.0  ;;  %v3796_v18 = vshrl.u32 %v10873_v35, 16 }
 0x34c   : > { %v4222_v10 = vsel %vm4150_vm10, %v4186_v37, %v3760_v40  ;;  %8302 = vmatmul.msk.bf16.gmra.mxu3 %vm4705_vm9, %v5226_v6  ;;  %v5656_v63 = vshll.u32 %v8882_v45, 16  ;;  %v3785_v53 = vadd.s32 %v3784_v58, %v3774_v44  ;;  %v3798_v34 = vmul.u32 14564, %v3795_v60 }
 0x34d   : > { %vm4258_vm11 = vcmp.lt.s32.totalorder %v4222_v10, 16  ;;  %v3799_v22 = vmul.u32 58254, %v3795_v60  ;;  %v3800_v16 = vmul.u32 14564, %v3796_v18  ;;  %v3801_v11 = vmul.u32 58254, %v3796_v18 }
 0x34e   : > { %v4442_v3 = vsel %vm4258_vm11, %v4334_v31, 0.0  ;;  %v5655_v21 = vrot.slane %v5653_v24, 3  ;;  %v3786_v41 = vadd.s32 %v3785_v53, %v3776_v30  ;;  %v10888_v55 = vadd.f32 %v10782_v48, %v2963_v38  ;;  %v2916_v31 = vpop.f32.mrf.mxu0 }
 0x34f   : > { %v4487_v9 = vpack.c.bf16 %v4442_v3, %v4442_v3  ;;  %v3802_v62 = vshll.u32 %v3799_v22, 16  ;;  %v10890_v4 = vld [vmem:[#allocation2 + $0x6c] sm:$0xff]  ;;  %v3803_v45 = vshrl.u32 %v3799_v22, 16  ;;  %v3804_v0 = vshll.u32 %v3800_v16, 16  ;;  %v2313_v18 = vpop.f32.mrf.mxu2 }
 0x350   : > { %v3805_v27 = vshrl.u32 %v3800_v16, 16  ;;  %v5658_v44 = vrot.slane %v5656_v63, 4  ;;  %v3787_v32 = vshrl.u32 %v3786_v41, 4  ;;  %v4693_v30 = vrot.slane %v10890_v4, 3 }
 0x351   : > { %4523 = vst.msk [vmem:[#allocation2 + $0x74] sm:$0xf] %vm4453_vm13, %v4487_v9  ;;  %vm3806_vm15 = vc.u32 %v3798_v34, %v3802_v62  ;;  %v3808_v28 = vadd.s32 %v3802_v62, %v3798_v34  ;;  %v4913_v59 = vrot.slane %v4911_v42, 2  ;;  %v4916_v29 = vrot.slane %v4914_v20, 3 }
 0x352   : > { %v3807_v49 = vsel %vm3806_vm15, 1, %v12491_v13  ;;  %v10897_v40 = vor.u32 %v5658_v44, %v5655_v21  ;;  %v3788_v24 = vmul.u32 18, %v3787_v32  ;;  %v4694_v14 = vsel %vm2742_vm8, %v4691_v57, %v4693_v30  ;;  %v10921_v57 = vld [vmem:[#allocation2 + $0x34] sm:$0xff] }
 0x353   : > { %v3809_v19 = vadd.s32 %v3807_v49, %v3801_v11  ;;  %vm3810_vm3 = vc.u32 %v3808_v28, %v3804_v0  ;;  %8273 = vmatmul.msk.bf16.gmra.mxu1 %vm4705_vm9, %v4694_v14  ;;  %v10913_v47 = vor.u32 %v4916_v29, %v4913_v59  ;;  %v2359_v20 = vadd.f32 %v2311_v12, %v12565_v36  ;;  %v12566_v21 = vld [vmem:[#allocation19_spill] sm:$0xff]  ;;  %v10942_v49 = vpop.f32.mrf.mxu1 }
 0x354   : > { %v3811_v37 = vsel %vm3810_vm3, 1, %v12491_v13  ;;  %v5660_v42 = vsel %vm5198_vm12, %v10839_v46, %v10897_v40  ;;  %v3789_v58 = vsub.s32 %v10836_v50, %v3788_v24  ;;  %v10919_v2 = vadd.s32 224, %v9635_v23  ;;  %12567 = vst [vmem:[#allocation7_spill] sm:$0xff] %v10942_v49  ;;  %v2682_v24 = vpop.f32.mrf.mxu3 }
 0x355   : > { %v3813_v6 = vadd.s32 %v3811_v37, %v3809_v19  ;;  %8321 = vmatmul.msk.bf16.gmra.mxu0 %vm4705_vm9, %v5660_v42  ;;  %v4920_v38 = vshrl.u32 %v10921_v57, 16  ;;  %v4918_v46 = vsel %vm2373_vm7, %v10841_v51, %v10913_v47  ;;  %v2728_v60 = vadd.f32 %v2680_v26, %v2359_v20 }
 0x356   : > { %v4923_v10 = vshll.u32 %v10921_v57, 16  ;;  %v10929_v50 = vadd.s32 232, %v9635_v23  ;;  %vm4079_vm1 = vcmp.ne.s32.totalorder %v3789_v58, 0  ;;  %vm4115_vm14 = vcmp.lt.s32.totalorder %v3789_v58, 0  ;;  %8283 = vmatmul.msk.bf16.gmra.mxu2 %vm4705_vm9, %v4918_v46  ;;  %v8884_v46 = vld [vmem:[#allocation2 + $0x3c] sm:$0xff]  }
 0x357   : > { %v4187_v63 = vadd.s32 18, %v3789_v58  ;;  %v3814_v12 = vadd.s32 %v3813_v6, %v3803_v45  ;;  %vm4151_vm0 = vmand %vm4115_vm14, %vm4079_vm1  ;;  %v2964_v53 = vadd.f32 %v2916_v31, %v2728_v60  ;;  %v3824_v34 = vand.u32 65535, %v10919_v2  ;;  %v2918_v31 = vpop.f32.mrf.mxu0 }
 0x358   : > { %v3825_v22 = vshrl.u32 %v10919_v2, 16  ;;  %v5227_v51 = vrot.slane %v4920_v38, 3  ;;  %v5228_v11 = vrot.slane %v4923_v10, 4  ;;  %v2360_v9 = vadd.f32 %v2313_v18, %v12566_v21 }
 0x359   : > { %v4223_v3 = vsel %vm4151_vm0, %v4187_v63, %v3789_v58  ;;  %v3815_v16 = vadd.s32 %v3814_v12, %v3805_v27  ;;  %v3827_v41 = vmul.u32 14564, %v3824_v34  ;;  %v3828_v62 = vmul.u32 58254, %v3824_v34 }
 0x35a   : > { %vm4259_vm10 = vcmp.lt.s32.totalorder %v4223_v3, 16  ;;  %v3829_v45 = vmul.u32 14564, %v3825_v22  ;;  %v4336_v32 = vmax.f32 %v10888_v55, 0.0  ;;  %v3830_v28 = vmul.u32 58254, %v3825_v22 }
 0x35b   : > { %v4443_v0 = vsel %vm4259_vm10, %v4335_v1, 0.0  ;;  %v3816_v44 = vshrl.u32 %v3815_v16, 4  ;;  %v3831_v26 = vshll.u32 %v3828_v62, 16  ;;  %v10945_v29 = vadd.f32 %v10782_v48, %v2964_v53 }
 0x35c   : > { %v4488_v27 = vpack.c.bf16 %v4443_v0, %v4443_v0  ;;  %v3833_v59 = vshll.u32 %v3829_v45, 16  ;;  %v3832_v14 = vshrl.u32 %v3828_v62, 16  ;;  %v3834_v37 = vshrl.u32 %v3829_v45, 16 }
 0x35d   : > { %v3817_v19 = vmul.u32 18, %v3816_v44  ;;  %v10947_v42 = vor.u32 %v5228_v11, %v5227_v51  ;;  %vm3835_vm11 = vc.u32 %v3827_v41, %v3831_v26  ;;  %v3837_v52 = vadd.s32 %v3831_v26, %v3827_v41 }
 0x35e   : > { %4524 = vst.msk [vmem:[#allocation2 + $0x78] sm:$0xf] %vm4453_vm13, %v4488_v27  ;;  %v2729_v1 = vadd.f32 %v2682_v24, %v2360_v9  ;;  %v3853_v55 = vand.u32 65535, %v10929_v50  ;;  %v3836_v20 = vsel %vm3835_vm11, 1, %v12491_v13  ;;  %v3854_v6 = vshrl.u32 %v10929_v50, 16 }
 0x35f   : > { %v3818_v36 = vsub.s32 %v10873_v35, %v3817_v19  ;;  %v5230_v58 = vsel %vm5198_vm12, %v10875_v61, %v10947_v42  ;;  %v3838_v60 = vadd.s32 %v3836_v20, %v3830_v28  ;;  %vm3839_vm15 = vc.u32 %v3837_v52, %v3833_v59  ;;  %v2921_v28 = vpop.f32.mrf.mxu0  ;;  %v2685_v19 = vpop.f32.mrf.mxu3 }
 0x360   : > { %v4337_v18 = vmax.f32 %v10945_v29, 0.0  ;;  %8303 = vmatmul.msk.bf16.gmra.mxu3 %vm4705_vm9, %v5230_v58  ;;  %v2965_v63 = vadd.f32 %v2918_v31, %v2729_v1  ;;  %v3840_v35 = vsel %vm3839_vm15, 1, %v12491_v13  ;;  %v3856_v34 = vmul.u32 14564, %v3853_v55  ;;  %v10963_v31 = vpop.f32.mrf.mxu1  ;;  %v2316_v52 = vpop.f32.mrf.mxu2 }
 0x361   : > { %vm4080_vm3 = vcmp.ne.s32.totalorder %v3818_v36, 0  ;;  %vm4116_vm1 = vcmp.lt.s32.totalorder %v3818_v36, 0  ;;  %v4188_v12 = vadd.s32 18, %v3818_v36  ;;  %v3842_v53 = vadd.s32 %v3840_v35, %v3838_v60  ;;  %v12568_v35 = vld [vmem:[#allocation15_spill] sm:$0xff] }
 0x362   : > { %vm4152_vm14 = vmand %vm4116_vm1, %vm4080_vm3  ;;  %v3857_v22 = vmul.u32 58254, %v3853_v55  ;;  %v3858_v61 = vmul.u32 14564, %v3854_v6  ;;  %v3859_v3 = vmul.u32 58254, %v3854_v6  ;;  %v5662_v16 = vshrl.u32 %v8884_v46, 16 }
 0x363   : > { %v4224_v51 = vsel %vm4152_vm14, %v4188_v12, %v3818_v36  ;;  %v5665_v11 = vshll.u32 %v8884_v46, 16  ;;  %v3843_v21 = vadd.s32 %v3842_v53, %v3832_v14  ;;  %v10961_v41 = vadd.f32 %v10782_v48, %v2965_v63 }
 0x364   : > { %vm4260_vm0 = vcmp.lt.s32.totalorder %v4224_v51, 16  ;;  %v3860_v9 = vshll.u32 %v3857_v22, 16  ;;  %v3861_v45 = vshrl.u32 %v3857_v22, 16  ;;  %v3862_v0 = vshll.u32 %v3858_v61, 16 }
 0x365   : > { %v4444_v62 = vsel %vm4260_vm0, %v4336_v32, 0.0  ;;  %v3863_v44 = vshrl.u32 %v3858_v61, 16  ;;  %v10965_v27 = vld [vmem:[#allocation2 + $0x74] sm:$0xff]  ;;  %v3844_v59 = vadd.s32 %v3843_v21, %v3834_v37  ;;  %v5664_v55 = vrot.slane %v5662_v16, 3 }
 0x366   : > { %v4489_v26 = vpack.c.bf16 %v4444_v62, %v4444_v62  ;;  %vm3864_vm10 = vc.u32 %v3856_v34, %v3860_v9  ;;  %v3866_v24 = vadd.s32 %v3860_v9, %v3856_v34  ;;  %v4695_v1 = vrot.slane %v10965_v27, 3 }
 0x367   : > { %v3865_v14 = vsel %vm3864_vm10, 1, %v12491_v13  ;;  %v5667_v32 = vrot.slane %v5665_v11, 4  ;;  %v3845_v36 = vshrl.u32 %v3844_v59, 4  ;;  %v4922_v58 = vrot.slane %v4920_v38, 2 }
 0x368   : > { %4525 = vst.msk [vmem:[#allocation2 + $0x7c] sm:$0xf] %vm4453_vm13, %v4489_v26  ;;  %v3867_v20 = vadd.s32 %v3865_v14, %v3859_v3  ;;  %vm3868_vm11 = vc.u32 %v3866_v24, %v3862_v0  ;;  %v4696_v6 = vsel %vm2742_vm8, %v4693_v30, %v4695_v1  ;;  %v4925_v60 = vrot.slane %v4923_v10, 3  ;;  %v10992_v30 = vld [vmem:[#allocation2 + $0x3c] sm:$0xff]  ;;  %v2923_v26 = vpop.f32.mrf.mxu0  ;;  %v11009_v59 = vpop.f32.mrf.mxu1 }
 0x369   : > { %v3869_v37 = vsel %vm3868_vm11, 1, %v12491_v13  ;;  %v10978_v46 = vor.u32 %v5667_v32, %v5664_v55  ;;  %v3846_v63 = vmul.u32 18, %v3845_v36  ;;  %8274 = vmatmul.msk.bf16.gmra.mxu1 %vm4705_vm9, %v4696_v6  ;;  %v2361_v53 = vadd.f32 %v2316_v52, %v12568_v35  ;;  %12569 = vst [vmem:[#allocation8_spill] sm:$0xff] %v11009_v59  ;;  %v2687_v14 = vpop.f32.mrf.mxu3  ;;  %v2318_v32 = vpop.f32.mrf.mxu2 }
 0x36a   : > { %v3871_v12 = vadd.s32 %v3869_v37, %v3867_v20  ;;  %v10985_v38 = vadd.s32 240, %v9635_v23  ;;  %v10990_v34 = vor.u32 %v4925_v60, %v4922_v58  ;;  %v4929_v57 = vshrl.u32 %v10992_v30, 16  ;;  %v8886_v58 = vld [vmem:[#allocation2 + $0x44] sm:$0xff]  }
 0x36b   : > { %v5669_v4 = vsel %vm5198_vm12, %v10897_v40, %v10978_v46  ;;  %v4932_v10 = vshll.u32 %v10992_v30, 16  ;;  %v3847_v22 = vsub.s32 %v10919_v2, %v3846_v63  ;;  %v2730_v51 = vadd.f32 %v2685_v19, %v2361_v53 }
 0x36c   : > { %v3872_v61 = vadd.s32 %v3871_v12, %v3861_v45  ;;  %8322 = vmatmul.msk.bf16.gmra.mxu0 %vm4705_vm9, %v5669_v4  ;;  %v3882_v3 = vand.u32 65535, %v10985_v38  ;;  %v4927_v40 = vsel %vm2373_vm7, %v10913_v47, %v10990_v34  ;;  %v3883_v16 = vshrl.u32 %v10985_v38, 16 }
 0x36d   : > { %v5231_v11 = vrot.slane %v4929_v57, 3  ;;  %v5232_v21 = vrot.slane %v4932_v10, 4  ;;  %vm4081_vm15 = vcmp.ne.s32.totalorder %v3847_v22, 0  ;;  %vm4117_vm3 = vcmp.lt.s32.totalorder %v3847_v22, 0  ;;  %8284 = vmatmul.msk.bf16.gmra.mxu2 %vm4705_vm9, %v4927_v40 }
 0x36e   : > { %v4189_v2 = vadd.s32 18, %v3847_v22  ;;  %v3873_v9 = vadd.s32 %v3872_v61, %v3863_v44  ;;  %vm4153_vm1 = vmand %vm4117_vm3, %vm4081_vm15  ;;  %v4338_v62 = vmax.f32 %v10961_v41, 0.0  ;;  %v3885_v45 = vmul.u32 14564, %v3882_v3 }
 0x36f   : > { %v3886_v0 = vmul.u32 58254, %v3882_v3  ;;  %v3887_v47 = vmul.u32 14564, %v3883_v16  ;;  %v2966_v52 = vadd.f32 %v2921_v28, %v2730_v51  ;;  %v11011_v55 = vor.u32 %v5232_v21, %v5231_v11 }
 0x370   : > { %v4225_v24 = vsel %vm4153_vm1, %v4189_v2, %v3847_v22  ;;  %v3874_v19 = vshrl.u32 %v3873_v9, 4  ;;  %v3888_v44 = vmul.u32 58254, %v3883_v16  ;;  %v2362_v29 = vadd.f32 %v2318_v32, %v10446_v15 }
 0x371   : > { %vm4261_vm14 = vcmp.lt.s32.totalorder %v4225_v24, 16  ;;  %v3889_v36 = vshll.u32 %v3886_v0, 16  ;;  %v3891_v20 = vshll.u32 %v3887_v47, 16  ;;  %v3890_v6 = vshrl.u32 %v3886_v0, 16  ;;  %v2926_v0 = vpop.f32.mrf.mxu0 }
 0x372   : > { %v4445_v41 = vsel %vm4261_vm14, %v4337_v18, 0.0  ;;  %v3875_v37 = vmul.u32 18, %v3874_v19  ;;  %v3892_v60 = vshrl.u32 %v3887_v47, 16  ;;  %v5234_v28 = vsel %vm5198_vm12, %v10947_v42, %v11011_v55  ;;  %v11033_v47 = vpop.f32.mrf.mxu1 }
 0x373   : > { %v4490_v63 = vpack.c.bf16 %v4445_v41, %v4445_v41  ;;  %vm3893_vm0 = vc.u32 %v3885_v45, %v3889_v36  ;;  %v3895_v12 = vadd.s32 %v3889_v36, %v3885_v45  ;;  %v11021_v4 = vadd.f32 %v10782_v48, %v2966_v52  ;;  %8304 = vmatmul.msk.bf16.gmra.mxu3 %vm4705_vm9, %v5234_v28  ;;  %v2321_v36 = vpop.f32.mrf.mxu2 }
 0x374   : > { %v3876_v35 = vsub.s32 %v10929_v50, %v3875_v37  ;;  %v3894_v53 = vsel %vm3893_vm0, 1, %v12491_v13  ;;  %v11027_v22 = vadd.s32 248, %v9635_v23  ;;  %v5671_v61 = vshrl.u32 %v8886_v58, 16 }
 0x375   : > { %4526 = vst.msk [vmem:[#allocation2 + $0x80] sm:$0xf] %vm4453_vm13, %v4490_v63  ;;  %v3896_v18 = vadd.s32 %v3894_v53, %v3888_v44  ;;  %vm3897_vm10 = vc.u32 %v3895_v12, %v3891_v20  ;;  %v2731_v3 = vadd.f32 %v2687_v14, %v2362_v29  ;;  %v4339_v11 = vmax.f32 %v11021_v4, 0.0  ;;  %v2690_v44 = vpop.f32.mrf.mxu3 }
 0x376   : > { %vm4082_vm11 = vcmp.ne.s32.totalorder %v3876_v35, 0  ;;  %vm4118_vm15 = vcmp.lt.s32.totalorder %v3876_v35, 0  ;;  %v4190_v50 = vadd.s32 18, %v3876_v35  ;;  %v3898_v42 = vsel %vm3897_vm10, 1, %v12491_v13 }
 0x377   : > { %vm4154_vm3 = vmand %vm4118_vm15, %vm4082_vm11  ;;  %v3900_v51 = vadd.s32 %v3898_v42, %v3896_v18  ;;  %v3911_v40 = vand.u32 65535, %v11027_v22  ;;  %v3912_v15 = vshrl.u32 %v11027_v22, 16  ;;  %v5673_v21 = vrot.slane %v5671_v61, 3  ;;  %v12570_v18 = vld [vmem:[#allocation18_spill] sm:$0xff] }
 0x378   : > { %v4226_v16 = vsel %vm4154_vm3, %v4190_v50, %v3876_v35  ;;  %v5674_v2 = vshll.u32 %v8886_v58, 16  ;;  %v2967_v45 = vadd.f32 %v2923_v26, %v2731_v3  ;;  %v4931_v24 = vrot.slane %v4929_v57, 2 }
 0x379   : > { %vm4262_vm1 = vcmp.lt.s32.totalorder %v4226_v16, 16  ;;  %v3901_v9 = vadd.s32 %v3900_v51, %v3890_v6  ;;  %v3914_v52 = vmul.u32 14564, %v3911_v40  ;;  %v3915_v14 = vmul.u32 58254, %v3911_v40 }
 0x37a   : > { %v4446_v19 = vsel %vm4262_vm1, %v4338_v62, 0.0  ;;  %v3916_v32 = vmul.u32 14564, %v3912_v15  ;;  %v3917_v37 = vmul.u32 58254, %v3912_v15  ;;  %v5676_v63 = vrot.slane %v5674_v2, 4 }
 0x37b   : > { %v4491_v20 = vpack.c.bf16 %v4446_v19, %v4446_v19  ;;  %v3902_v41 = vadd.s32 %v3901_v9, %v3892_v60  ;;  %v3918_v58 = vshll.u32 %v3915_v14, 16  ;;  %v3919_v12 = vshrl.u32 %v3915_v14, 16  ;;  %v2928_v19 = vpop.f32.mrf.mxu0  ;;  %v12573_v14 = vld [vmem:[#allocation3_spill] sm:$0xff] }
 0x37c   : > { %v3920_v6 = vshll.u32 %v3916_v32, 16  ;;  %v11038_v26 = vadd.f32 %v10782_v48, %v2967_v45  ;;  %v11040_v28 = vld [vmem:[#allocation2 + $0x7c] sm:$0xff]  ;;  %v3921_v62 = vshrl.u32 %v3916_v32, 16  ;;  %v11043_v35 = vor.u32 %v5676_v63, %v5673_v21 }
 0x37d   : > { %4527 = vst.msk [vmem:[#allocation2 + $0x84] sm:$0xf] %vm4453_vm13, %v4491_v20  ;;  %v3903_v57 = vshrl.u32 %v3902_v41, 4  ;;  %v4934_v53 = vrot.slane %v4932_v10, 3  ;;  %vm3922_vm14 = vc.u32 %v3914_v52, %v3918_v58  ;;  %v3924_v60 = vadd.s32 %v3918_v58, %v3914_v52  ;;  %v12572_v52 = vld [vmem:[#allocation20_spill] sm:$0xff]  ;;  %v2323_v41 = vpop.f32.mrf.mxu2 }
 0x37e   : > { %v4697_v29 = vrot.slane %v11040_v28, 3  ;;  %v2363_v61 = vadd.f32 %v2321_v36, %v12570_v18  ;;  %v3923_v42 = vsel %vm3922_vm14, 1, %v12491_v13  ;;  %v5678_v51 = vsel %vm5198_vm12, %v10978_v46, %v11043_v35  ;;  %v2692_v36 = vpop.f32.mrf.mxu3  ;;  %v8888_v18 = vld [vmem:[#allocation2 + $0x4c] sm:$0xff]  }
 0x37f   : > { %v3904_v50 = vmul.u32 18, %v3903_v57  ;;  %v11053_v3 = vor.u32 %v4934_v53, %v4931_v24  ;;  %v3925_v40 = vadd.s32 %v3923_v42, %v3917_v37  ;;  %vm3926_vm0 = vc.u32 %v3924_v60, %v3920_v6  ;;  %8323 = vmatmul.msk.bf16.gmra.mxu0 %vm4705_vm9, %v5678_v51 }
 0x380   : > { %v4698_v30 = vsel %vm2742_vm8, %v4695_v1, %v4697_v29  ;;  %v2732_v10 = vadd.f32 %v2690_v44, %v2363_v61  ;;  %v3927_v16 = vsel %vm3926_vm0, 1, %v12491_v13  ;;  %v11068_v21 = vadd.s32 256, %v9635_v23  ;;  %v11071_v1 = vld [vmem:[#allocation2 + $0x44] sm:$0xff] }
 0x381   : > { %v3905_v15 = vsub.s32 %v10985_v38, %v3904_v50  ;;  %8275 = vmatmul.msk.bf16.gmra.mxu1 %vm4705_vm9, %v4698_v30  ;;  %v4936_v46 = vsel %vm2373_vm7, %v10990_v34, %v11053_v3  ;;  %v3929_v2 = vadd.s32 %v3927_v16, %v3925_v40  ;;  %v4938_v9 = vshrl.u32 %v11071_v1, 16  ;;  %v11076_v34 = vpop.f32.mrf.mxu1 }
 0x382   : > { %8285 = vmatmul.msk.bf16.gmra.mxu2 %vm4705_vm9, %v4936_v46  ;;  %v2968_v27 = vadd.f32 %v2926_v0, %v2732_v10  ;;  %v4941_v38 = vshll.u32 %v11071_v1, 16  ;;  %v3940_v24 = vand.u32 65535, %v11068_v21  ;;  %12571 = vst [vmem:[#allocation4_spill] sm:$0xff] %v11076_v34  ;;  %v2003_v32 = vadd.f32 %v12573_v14, %v12572_v52 }
 0x383   : > { %vm4083_vm10 = vcmp.ne.s32.totalorder %v3905_v15, 0  ;;  %vm4119_vm11 = vcmp.lt.s32.totalorder %v3905_v15, 0  ;;  %v4191_v45 = vadd.s32 18, %v3905_v15  ;;  %v3930_v44 = vadd.s32 %v3929_v2, %v3919_v12 }
 0x384   : > { %vm4155_vm15 = vmand %vm4119_vm11, %vm4083_vm10  ;;  %v3941_v0 = vshrl.u32 %v11068_v21, 16  ;;  %v5235_v20 = vrot.slane %v4938_v9, 3  ;;  %v3943_v63 = vmul.u32 14564, %v3940_v24  ;;  %v3944_v58 = vmul.u32 58254, %v3940_v24 }
 0x385   : > { %v4227_v37 = vsel %vm4155_vm15, %v4191_v45, %v3905_v15  ;;  %v5236_v6 = vrot.slane %v4941_v38, 4  ;;  %v3931_v57 = vadd.s32 %v3930_v44, %v3921_v62  ;;  %v4340_v53 = vmax.f32 %v11038_v26, 0.0 }
 0x386   : > { %vm4263_vm3 = vcmp.lt.s32.totalorder %v4227_v37, 16  ;;  %v3945_v60 = vmul.u32 14564, %v3941_v0  ;;  %v3946_v61 = vmul.u32 58254, %v3941_v0  ;;  %v3947_v50 = vshll.u32 %v3944_v58, 16 }
 0x387   : > { %v4447_v12 = vsel %vm4263_vm3, %v4339_v11, 0.0  ;;  %v11089_v42 = vadd.f32 %v10782_v48, %v2968_v27  ;;  %v3932_v40 = vshrl.u32 %v3931_v57, 4  ;;  %v3948_v30 = vshrl.u32 %v3944_v58, 16  ;;  %v2326_v58 = vpop.f32.mrf.mxu2 }
 0x388   : > { %v4492_v51 = vpack.c.bf16 %v4447_v12, %v4447_v12  ;;  %v3949_v10 = vshll.u32 %v3945_v60, 16  ;;  %vm3951_vm1 = vc.u32 %v3943_v63, %v3947_v50  ;;  %v3953_v15 = vadd.s32 %v3947_v50, %v3943_v63  ;;  %v2695_v63 = vpop.f32.mrf.mxu3 }
 0x389   : > { %v11091_v16 = vor.u32 %v5236_v6, %v5235_v20  ;;  %v2364_v62 = vadd.f32 %v2323_v41, %v2003_v32  ;;  %v3933_v26 = vmul.u32 18, %v3932_v40  ;;  %v3952_v4 = vsel %vm3951_vm1, 1, %v12491_v13  ;;  %v11107_v41 = vpop.f32.mrf.mxu0  ;;  %v11109_v37 = vpop.f32.mrf.mxu1 }
 0x38a   : > { %4528 = vst.msk [vmem:[#allocation2 + $0x88] sm:$0xf] %vm4453_vm13, %v4492_v51  ;;  %v11096_v11 = vadd.s32 264, %v9635_v23  ;;  %v5680_v46 = vshrl.u32 %v8888_v18, 16  ;;  %v3954_v2 = vadd.s32 %v3952_v4, %v3946_v61  ;;  %vm3955_vm14 = vc.u32 %v3953_v15, %v3949_v10 }
 0x38b   : > { %v5238_v27 = vsel %vm5198_vm12, %v11011_v55, %v11091_v16  ;;  %v2733_v45 = vadd.f32 %v2692_v36, %v2364_v62  ;;  %v3934_v24 = vsub.s32 %v11027_v22, %v3933_v26  ;;  %v3956_v52 = vsel %vm3955_vm14, 1, %v12491_v13 }
 0x38c   : > { %8305 = vmatmul.msk.bf16.gmra.mxu3 %vm4705_vm9, %v5238_v27  ;;  %v3969_v14 = vand.u32 65535, %v11096_v11  ;;  %v3970_v32 = vshrl.u32 %v11096_v11, 16  ;;  %v3950_v44 = vshrl.u32 %v3945_v60, 16  ;;  %v3958_v0 = vadd.s32 %v3956_v52, %v3954_v2 }
 0x38d   : > { %v4341_v20 = vmax.f32 %v11089_v42, 0.0  ;;  %v5683_v55 = vshll.u32 %v8888_v18, 16  ;;  %vm4084_vm0 = vcmp.ne.s32.totalorder %v3934_v24, 0  ;;  %vm4120_vm10 = vcmp.lt.s32.totalorder %v3934_v24, 0  ;;  %v11182_v42 = vld [vmem:[%s12424_s2] ss:$0 sm:$0xff] }
 0x38e   : > { %v4192_v22 = vadd.s32 18, %v3934_v24  ;;  %v2969_v36 = vadd.f32 %v2928_v19, %v2733_v45  ;;  %vm4156_vm11 = vmand %vm4120_vm10, %vm4084_vm0  ;;  %v3959_v6 = vadd.s32 %v3958_v0, %v3948_v30  ;;  %v3972_v57 = vmul.u32 14564, %v3969_v14 }
 0x38f   : > { %v3973_v12 = vmul.u32 58254, %v3969_v14  ;;  %v3974_v61 = vmul.u32 14564, %v3970_v32  ;;  %v3975_v50 = vmul.u32 58254, %v3970_v32  ;;  %v5682_v51 = vrot.slane %v5680_v46, 3  ;;  %v12574_v32 = vld [vmem:[#allocation21_spill] sm:$0xff] }
 0x390   : > { %v4228_v60 = vsel %vm4156_vm11, %v4192_v22, %v3934_v24  ;;  %v5685_v40 = vrot.slane %v5683_v55, 4  ;;  %v3960_v10 = vadd.s32 %v3959_v6, %v3950_v44  ;;  %v4940_v18 = vrot.slane %v4938_v9, 2 }
 0x391   : > { %vm4264_vm15 = vcmp.lt.s32.totalorder %v4228_v60, 16  ;;  %v3976_v15 = vshll.u32 %v3973_v12, 16  ;;  %v11111_v62 = vld [vmem:[#allocation2 + $0x84] sm:$0xff]  ;;  %v3977_v26 = vshrl.u32 %v3973_v12, 16  ;;  %v3978_v4 = vshll.u32 %v3974_v61, 16  ;;  %v11140_v12 = vpop.f32.mrf.mxu0  ;;  %v11152_v60 = vld [vmem:[#allocation2 + $0x4c] sm:$0xff] }
 0x392   : > { %v4448_v19 = vsel %vm4264_vm15, %v4340_v53, 0.0  ;;  %v3979_v2 = vshrl.u32 %v3974_v61, 16  ;;  %v3961_v27 = vshrl.u32 %v3960_v10, 4  ;;  %v4699_v46 = vrot.slane %v11111_v62, 3 }
 0x393   : > { %v4493_v30 = vpack.c.bf16 %v4448_v19, %v4448_v19  ;;  %vm3980_vm3 = vc.u32 %v3972_v57, %v3976_v15  ;;  %v3982_v45 = vadd.s32 %v3976_v15, %v3972_v57  ;;  %v11117_v52 = vor.u32 %v5685_v40, %v5682_v51  ;;  %v2328_v51 = vpop.f32.mrf.mxu2 }
 0x394   : > { %v3981_v24 = vsel %vm3980_vm3, 1, %v12491_v13  ;;  %v4943_v14 = vrot.slane %v4941_v38, 3  ;;  %v3962_v9 = vmul.u32 18, %v3961_v27  ;;  %v2365_v44 = vadd.f32 %v2326_v58, %v12574_v32 }
 0x395   : > { %4529 = vst.msk [vmem:[#allocation2 + $0x8c] sm:$0xf] %vm4453_vm13, %v4493_v30  ;;  %v3983_v53 = vadd.s32 %v3981_v24, %v3975_v50  ;;  %vm3984_vm1 = vc.u32 %v3982_v45, %v3978_v4  ;;  %v4700_v55 = vsel %vm2742_vm8, %v4697_v29, %v4699_v46  ;;  %v5687_v1 = vsel %vm5198_vm12, %v11043_v35, %v11117_v52  ;;  %v11142_v29 = vpop.f32.mrf.mxu1 }
 0x396   : > { %v3985_v0 = vsel %vm3984_vm1, 1, %v12491_v13  ;;  %v11132_v38 = vor.u32 %v4943_v14, %v4940_v18  ;;  %v3963_v22 = vsub.s32 %v11068_v21, %v3962_v9  ;;  %8276 = vmatmul.msk.bf16.gmra.mxu1 %vm4705_vm9, %v4700_v55  ;;  %8324 = vmatmul.msk.bf16.gmra.mxu0 %vm4705_vm9, %v5687_v1  ;;  %v2734_v58 = vadd.f32 %v2695_v63, %v2365_v44  ;;  %v11150_v21 = vpop.f32.mrf.mxu3 }
 0x397   : > { %v3987_v6 = vadd.s32 %v3985_v0, %v3983_v53  ;;  %v11138_v57 = vadd.s32 272, %v9635_v23  ;;  %v11145_v61 = vadd.f32 %v10782_v48, %v2969_v36  ;;  %v4947_v63 = vshrl.u32 %v11152_v60, 16 }
 0x398   : > { %v4945_v35 = vsel %vm2373_vm7, %v11053_v3, %v11132_v38  ;;  %v4950_v50 = vshll.u32 %v11152_v60, 16  ;;  %vm4085_vm14 = vcmp.ne.s32.totalorder %v3963_v22, 0  ;;  %vm4121_vm0 = vcmp.lt.s32.totalorder %v3963_v22, 0 }
 0x399   : > { %v4193_v40 = vadd.s32 18, %v3963_v22  ;;  %v3988_v10 = vadd.s32 %v3987_v6, %v3977_v26  ;;  %8286 = vmatmul.msk.bf16.gmra.mxu2 %vm4705_vm9, %v4945_v35  ;;  %vm4157_vm10 = vmand %vm4121_vm0, %vm4085_vm14  ;;  %v2970_v48 = vadd.f32 %v11107_v41, %v2734_v58  ;;  %v3998_v3 = vand.u32 65535, %v11138_v57  ;;  %v12575_v41 = vld [vmem:[#allocation5_spill] sm:$0xff]  ;;  %v11176_v6 = vpop.f32.mrf.mxu0 }
 0x39a   : > { %v3999_v36 = vshrl.u32 %v11138_v57, 16  ;;  %v11161_v15 = vadd.s32 280, %v9635_v23  ;;  %v5239_v4 = vrot.slane %v4947_v63, 3  ;;  %v5240_v26 = vrot.slane %v4950_v50, 4 }
 0x39b   : > { %v4229_v18 = vsel %vm4157_vm10, %v4193_v40, %v3963_v22  ;;  %v3989_v19 = vadd.s32 %v3988_v10, %v3979_v2  ;;  %v4001_v30 = vmul.u32 14564, %v3998_v3  ;;  %v4002_v27 = vmul.u32 58254, %v3998_v3  ;;  %v5102_v35 = vpop.f32.mrf.mxu2 }
 0x39c   : > { %vm4265_vm11 = vcmp.lt.s32.totalorder %v4229_v18, 16  ;;  %v4003_v45 = vmul.u32 14564, %v3999_v36  ;;  %v2005_v24 = vadd.f32 %v10595_v56, %v12575_v41  ;;  %v4004_v53 = vmul.u32 58254, %v3999_v36  ;;  %v8890_v36 = vld [vmem:[#allocation2 + $0x54] sm:$0xff]  }
 0x39d   : > { %v4449_v14 = vsel %vm4265_vm11, %v4341_v20, 0.0  ;;  %v3990_v23 = vshrl.u32 %v3989_v19, 4  ;;  %v4005_v2 = vshll.u32 %v4002_v27, 16  ;;  %v4342_v0 = vmax.f32 %v11145_v61, 0.0  ;;  %v11174_v22 = vpop.f32.mrf.mxu1 }
 0x39e   : > { %v4494_v9 = vpack.c.bf16 %v4449_v14, %v4449_v14  ;;  %v4007_v32 = vshll.u32 %v4003_v45, 16  ;;  %v11172_v55 = vor.u32 %v5240_v26, %v5239_v4  ;;  %v2366_v1 = vadd.f32 %v2328_v51, %v2005_v24  ;;  %v11188_v61 = vpop.f32.mrf.mxu3 }
 0x39f   : > { %v3991_v44 = vmul.u32 18, %v3990_v23  ;;  %vm4009_vm15 = vc.u32 %v4001_v30, %v4005_v2  ;;  %v4011_v56 = vadd.s32 %v4005_v2, %v4001_v30  ;;  %v11185_v20 = vadd.f32 %v11182_v42, %v2970_v48 }
 0x3a0   : > { %4530 = vst.msk [vmem:[#allocation2 + $0x90] sm:$0xf] %vm4453_vm13, %v4494_v9  ;;  %v4027_v58 = vand.u32 65535, %v11161_v15  ;;  %v4010_v40 = vsel %vm4009_vm15, 1, %v12491_v13  ;;  %v5242_v10 = vsel %vm5198_vm12, %v11091_v16, %v11172_v55  ;;  %v4028_v3 = vshrl.u32 %v11161_v15, 16 }
 0x3a1   : > { %v3992_v51 = vsub.s32 %v11096_v11, %v3991_v44  ;;  %v4006_v18 = vshrl.u32 %v4002_v27, 16  ;;  %v4008_v19 = vshrl.u32 %v4003_v45, 16  ;;  %v4012_v48 = vadd.s32 %v4010_v40, %v4004_v53  ;;  %8306 = vmatmul.msk.bf16.gmra.mxu3 %vm4705_vm9, %v5242_v10 }
 0x3a2   : > { %vm4013_vm3 = vc.u32 %v4011_v56, %v4007_v32  ;;  %v4030_v30 = vmul.u32 14564, %v4027_v58  ;;  %v4031_v41 = vmul.u32 58254, %v4027_v58  ;;  %v4032_v24 = vmul.u32 14564, %v4028_v3 }
 0x3a3   : > { %vm4086_vm1 = vcmp.ne.s32.totalorder %v3992_v51, 0  ;;  %vm4122_vm14 = vcmp.lt.s32.totalorder %v3992_v51, 0  ;;  %v4194_v4 = vadd.s32 18, %v3992_v51  ;;  %v4014_v11 = vsel %vm4013_vm3, 1, %v12491_v13 }
 0x3a4   : > { %vm4158_vm0 = vmand %vm4122_vm14, %vm4086_vm1  ;;  %v4016_v26 = vadd.s32 %v4014_v11, %v4012_v48  ;;  %v2735_v14 = vadd.f32 %v11150_v21, %v2366_v1  ;;  %v5689_v23 = vshrl.u32 %v8890_v36, 16  ;;  %v5692_v27 = vshll.u32 %v8890_v36, 16  ;;  %v11203_v48 = vpop.f32.mrf.mxu0  ;;  %v11207_v36 = vpop.f32.mrf.mxu2 }
 0x3a5   : > { %v4230_v16 = vsel %vm4158_vm0, %v4194_v4, %v3992_v51  ;;  %v4033_v9 = vmul.u32 58254, %v4028_v3  ;;  %v4034_v53 = vshll.u32 %v4031_v41, 16  ;;  %v4035_v32 = vshrl.u32 %v4031_v41, 16  ;;  %v11201_v10 = vpop.f32.mrf.mxu1 }
 0x3a6   : > { %vm4266_vm10 = vcmp.lt.s32.totalorder %v4230_v16, 16  ;;  %v4017_v45 = vadd.s32 %v4016_v26, %v4006_v18  ;;  %v4036_v44 = vshll.u32 %v4032_v24, 16  ;;  %v4037_v56 = vshrl.u32 %v4032_v24, 16  ;;  %v11205_v1 = vpop.f32.mrf.mxu3 }
 0x3a7   : > { %v4450_v2 = vsel %vm4266_vm10, %v4342_v0, 0.0  ;;  %v11199_v40 = vld [vmem:[#allocation2 + $0x8c] sm:$0xff]  ;;  %vm4038_vm11 = vc.u32 %v4030_v30, %v4034_v53  ;;  %v4040_v21 = vadd.s32 %v4034_v53, %v4030_v30  ;;  %v5691_v18 = vrot.slane %v5689_v23, 3  ;;  %v8892_v23 = vld [vmem:[#allocation2 + $0x5c] sm:$0xff]  }
 0x3a8   : > { %v4495_v58 = vpack.c.bf16 %v4450_v2, %v4450_v2  ;;  %v4018_v51 = vadd.s32 %v4017_v45, %v4008_v19  ;;  %v4039_v3 = vsel %vm4038_vm11, 1, %v12491_v13  ;;  %v4701_v0 = vrot.slane %v11199_v40, 3 }
 0x3a9   : > { %v5694_v4 = vrot.slane %v5692_v27, 4  ;;  %v4041_v26 = vadd.s32 %v4039_v3, %v4033_v9  ;;  %vm4042_vm15 = vc.u32 %v4040_v21, %v4036_v44  ;;  %v4949_v19 = vrot.slane %v4947_v63, 2  ;;  %v8936_v9 = vld [vmem:[#allocation2 + $0x54] sm:$0xff] }
 0x3aa   : > { %4531 = vst.msk [vmem:[#allocation2 + $0x94] sm:$0xf] %vm4453_vm13, %v4495_v58  ;;  %v4019_v11 = vshrl.u32 %v4018_v51, 4  ;;  %v4043_v30 = vsel %vm4042_vm15, 1, %v12491_v13  ;;  %v4702_v41 = vsel %vm2742_vm8, %v4699_v46, %v4701_v0  ;;  %v4952_v16 = vrot.slane %v4950_v50, 3 }
 0x3ab   : > { %v11220_v24 = vor.u32 %v5694_v4, %v5691_v18  ;;  %v4045_v45 = vadd.s32 %v4043_v30, %v4041_v26  ;;  %8277 = vmatmul.msk.bf16.gmra.mxu1 %vm4705_vm9, %v4702_v41  ;;  %v5103_v63 = vadd.f32 %v5102_v35, %v10620_v33  ;;  %v4956_v13 = vshrl.u32 %v8936_v9, 16 }
 0x3ac   : > { %v4020_v27 = vmul.u32 18, %v4019_v11  ;;  %v4343_v53 = vmax.f32 %v11185_v20, 0.0  ;;  %v11230_v2 = vor.u32 %v4952_v16, %v4949_v19  ;;  %v4959_v44 = vshll.u32 %v8936_v9, 16  ;;  %v11243_v21 = vpop.f32.mrf.mxu0  ;;  %v8532_v9 = vld [vmem:[%s12425_s3 + $0x1c] sm:$0xf] }
 0x3ad   : > { %v5696_v46 = vsel %vm5198_vm12, %v11117_v52, %v11220_v24  ;;  %v4046_v50 = vadd.s32 %v4045_v45, %v4035_v32  ;;  %v11235_v58 = vadd.f32 %v11188_v61, %v5103_v63  ;;  %v5243_v33 = vrot.slane %v4956_v13, 3  ;;  %v11241_v52 = vpop.f32.mrf.mxu1 }
 0x3ae   : > { %v4021_v60 = vsub.s32 %v11138_v57, %v4020_v27  ;;  %8325 = vmatmul.msk.bf16.gmra.mxu0 %vm4705_vm9, %v5696_v46  ;;  %v2971_v35 = vadd.f32 %v11140_v12, %v2735_v14  ;;  %v4954_v20 = vsel %vm2373_vm7, %v11132_v38, %v11230_v2  ;;  %v5244_v51 = vrot.slane %v4959_v44, 4  ;;  %v5355_v61 = vpop.f32.mrf.mxu3  ;;  %v8354_v12 = vld [vmem:[%s12425_s3 + $0x14] sm:$0xf]  ;;  %v5107_v14 = vpop.f32.mrf.mxu2 }
 0x3af   : > { %v5698_v3 = vshrl.u32 %v8892_v23, 16  ;;  %v4047_v32 = vadd.s32 %v4046_v50, %v4037_v56  ;;  %8287 = vmatmul.msk.bf16.gmra.mxu2 %vm4705_vm9, %v4954_v20  ;;  %v5701_v4 = vshll.u32 %v8892_v23, 16  ;;  %v8445_v56 = vld [vmem:[%s12425_s3 + $0x18] sm:$0xf]  ;;  %v6517_v16 = vsel %vm4760_vm6, %v8354_v12, 0 }
 0x3b0   : > { %vm4087_vm3 = vcmp.ne.s32.totalorder %v4021_v60, 0  ;;  %vm4123_vm1 = vcmp.lt.s32.totalorder %v4021_v60, 0  ;;  %v4195_v57 = vadd.s32 18, %v4021_v60  ;;  %v11249_v38 = vor.u32 %v5244_v51, %v5243_v33  ;;  %6526 = vmatpush.bf16.msra.mxu2 %v6517_v16  ;;  %v8551_v20 = vld [vmem:[%s12425_s3 + $0x20] sm:$0xf] }
 0x3b1   : > { %vm4159_vm14 = vmand %vm4123_vm1, %vm4087_vm3  ;;  %v4570_v18 = vld [vmem:[#allocation2 + $0x94] sm:$0x7]  ;;  %v4048_v26 = vshrl.u32 %v4047_v32, 4  ;;  %v4308_v30 = vadd.f32 %v11182_v42, %v2971_v35  ;;  %v5700_v63 = vrot.slane %v5698_v3, 3  ;;  %v5703_v42 = vrot.slane %v5701_v4, 4 }
 0x3b2   : > { %v4231_v11 = vsel %vm4159_vm14, %v4195_v57, %v4021_v60  ;;  %v4648_v19 = vunpack.c.l.b16 %v4570_v18  ;;  %v5246_v41 = vsel %vm5198_vm12, %v11172_v55, %v11249_v38  ;;  %v5108_v60 = vadd.f32 %v5107_v14, %v10688_v54  ;;  %v8937_v57 = vld [vmem:[#allocation2 + $0x5c] sm:$0xff] }
 0x3b3   : > { %vm4267_vm0 = vcmp.lt.s32.totalorder %v4231_v11, 16  ;;  %v4049_v45 = vmul.u32 18, %v4048_v26  ;;  %8307 = vmatmul.msk.bf16.gmra.mxu3 %vm4705_vm9, %v5246_v41  ;;  %v6989_v55 = vsel %vm4760_vm6, %v8445_v56, 0  ;;  %v4958_v33 = vrot.slane %v4956_v13, 2 }
 0x3b4   : > { %v4451_v27 = vsel %vm4267_vm0, %v4343_v53, 0.0  ;;  %v11260_v23 = vpack.c.b16 %v4648_v19, %v4648_v19  ;;  %v4961_v35 = vrot.slane %v4959_v44, 3  ;;  %6998 = vmatpush.bf16.msra.mxu3 %v6989_v55  ;;  %v11275_v3 = vadd.f32 %v5355_v61, %v5108_v60  ;;  %v11277_v54 = vpop.f32.mrf.mxu0 }
 0x3b5   : > { %v4496_v46 = vpack.c.bf16 %v4451_v27, %v4451_v27  ;;  %v4050_v50 = vsub.s32 %v11161_v15, %v4049_v45  ;;  %v11273_v51 = vpop.f32.mrf.mxu1  ;;  %v4965_v32 = vshrl.u32 %v8937_v57, 16  ;;  %v4968_v15 = vshll.u32 %v8937_v57, 16  ;;  %v8894_v45 = vld [vmem:[#allocation2 + $0x64] sm:$0xff]  }
 0x3b6   : > { %v4703_v53 = vrot.slane %v11260_v23, 3  ;;  %v7224_v12 = vsel %vm4760_vm6, %v8532_v9, 0  ;;  %v4344_v44 = vmax.f32 %v4308_v30, 0.0  ;;  %v11280_v14 = vpop.f32.mrf.mxu3  ;;  %v11282_v18 = vpop.f32.mrf.mxu2  ;;  %v5704_v4 = vor.u32 %v5703_v42, %v5700_v63 }
 0x3b7   : > { %4532 = vst.msk [vmem:[#allocation2 + $0x98] sm:$0xf] %vm4453_vm13, %v4496_v46  ;;  %vm4088_vm10 = vcmp.ne.s32.totalorder %v4050_v50, 0  ;;  %vm4124_vm11 = vcmp.lt.s32.totalorder %v4050_v50, 0  ;;  %v4196_v13 = vadd.s32 18, %v4050_v50  ;;  %7233 = vmatpush.bf16.msra.mxu0 %v7224_v12  ;;  %v4962_v11 = vor.u32 %v4961_v35, %v4958_v33 }
 0x3b8   : > { %vm4160_vm15 = vmand %vm4124_vm11, %vm4088_vm10  ;;  %v7507_v26 = vsel %vm4760_vm6, %v8551_v20, 0  ;;  %v4704_v19 = vsel %vm2742_vm8, %v4701_v0, %v4703_v53  ;;  %v5247_v56 = vrot.slane %v4965_v32, 3  ;;  %v5248_v41 = vrot.slane %v4968_v15, 4 }
 0x3b9   : > { %v4232_v61 = vsel %vm4160_vm15, %v4196_v13, %v4050_v50  ;;  %7516 = vmatpush.bf16.msra.mxu1 %v7507_v26  ;;  %v5705_v27 = vsel %vm5198_vm12, %v11220_v24, %v5704_v4  ;;  %v4963_v63 = vsel %vm2373_vm7, %v11230_v2, %v4962_v11  ;;  %v5707_v55 = vshrl.u32 %v8894_v45, 16  ;;  %v11306_v2 = vld [vmem:[#allocation2 + $0x20] sm:$0xff]  ;;  %v8777_v13 = vld [vmem:[#allocation2 + $0x18] sm:$0xf0] }
 0x3ba   : > { %vm4268_vm3 = vcmp.lt.s32.totalorder %v4232_v61, 16  ;;  %v5249_v9 = vor.u32 %v5248_v41, %v5247_v56  ;;  %v5710_v50 = vshll.u32 %v8894_v45, 16  ;;  %v4967_v57 = vrot.slane %v4965_v32, 2  ;;  %v8938_v26 = vld [vmem:[#allocation2 + $0x64] sm:$0xff]  ;;  %v8778_v41 = vld [vmem:[#allocation2 + $0x18] sm:$0xe] }
 0x3bb   : > { %v4452_v30 = vsel %vm4268_vm3, %v4344_v44, 0.0  ;;  %8278 = vmatmul.msk.bf16.gmra.mxu1 %vm4705_vm9, %v4704_v19  ;;  %v5709_v35 = vrot.slane %v5707_v55, 3  ;;  %v4970_v12 = vrot.slane %v4968_v15, 3  ;;  %v4977_v19 = vshll.u32 %v8938_v26, 16  ;;  %v8758_v45 = vld [vmem:[#allocation2 + $0x10] sm:$0xff]  }
 0x3bc   : > { %v4497_v16 = vpack.c.bf16 %v4452_v30, %v4452_v30  ;;  %v11297_v46 = vpop.f32.mrf.mxu0  ;;  %v5250_v53 = vsel %vm5198_vm12, %v11249_v38, %v5249_v9  ;;  %v5712_v20 = vrot.slane %v5710_v50, 4  ;;  %v12438_v30 = vshrl.u32 %v11306_v2, 16  ;;  %v8896_v50 = vld [vmem:[#allocation2 + $0x6c] sm:$0xff]  }
 0x3bd   : > { %v11295_v0 = vpop.f32.mrf.mxu1  ;;  %v11318_v32 = vor.u32 %v8778_v41, %v8777_v13  ;;  %v4971_v15 = vor.u32 %v4970_v12, %v4967_v57  ;;  %v5716_v34 = vshrl.u32 %v8896_v50, 16  ;;  %v5719_v59 = vshll.u32 %v8896_v50, 16 }
 0x3be   : > { %8326 = vmatmul.msk.bf16.gmra.mxu0 %vm4705_vm9, %v5705_v27  ;;  %4533 = vst.msk [vmem:[#allocation2 + $0x9c] sm:$0xf] %vm4453_vm13, %v4497_v16  ;;  %v5360_v42 = vpop.f32.mrf.mxu3  ;;  %v5112_v60 = vpop.f32.mrf.mxu2  ;;  %v5713_v16 = vor.u32 %v5712_v20, %v5709_v35  ;;  %v12439_v27 = vshll.u32 %v11306_v2, 16 }
 0x3bf   : > { %8288 = vmatmul.msk.bf16.gmra.mxu2 %vm4705_vm9, %v4963_v63  ;;  %v5113_v24 = vadd.f32 %v5112_v60, %v10754_v7  ;;  %v4974_v7 = vshrl.u32 %v8938_v26, 16  ;;  %v7375_v60 = vrot.slane %v12438_v30, 1  ;;  %v4972_v20 = vsel %vm2373_vm7, %v4962_v11, %v4971_v15 }
 0x3c0   : > { %v5714_v55 = vsel %vm5198_vm12, %v5704_v4, %v5713_v16  ;;  %v7376_v35 = vrot.slane %v12439_v27, 2 }
 0x3c1   : > { %v11303_v33 = vadd.f32 %v5360_v42, %v5113_v24  ;;  %v5251_v63 = vrot.slane %v4974_v7, 3  ;;  %v5252_v42 = vrot.slane %v4977_v19, 4  ;;  %v7368_v24 = vshrl.u32 %v11318_v32, 16 }
 0x3c2   : > { %v7377_v4 = vor.u32 %v7376_v35, %v7375_v60  ;;  %v5718_v60 = vrot.slane %v5716_v34, 3  ;;  %v4976_v35 = vrot.slane %v4974_v7, 2 }
 0x3c3   : > { %8308 = vmatmul.msk.bf16.gmra.mxu3 %vm4705_vm9, %v5250_v53  ;;  %v7371_v53 = vshll.u32 %v11318_v32, 16  ;;  %v5253_v57 = vor.u32 %v5252_v42, %v5251_v63  ;;  %v7370_v26 = vrot.slane %v7368_v24, 1  ;;  %v11339_v63 = vld [vmem:[#allocation2 + $0x28] sm:$0xff]  ;;  %v5721_v24 = vrot.slane %v5719_v59, 4 }
 0x3c4   : > { %v11310_v61 = vpop.f32.mrf.mxu0  ;;  %v12440_v50 = vshrl.u32 %v11339_v63, 16 }
 0x3c5   : > { %v11308_v44 = vpop.f32.mrf.mxu1  ;;  %v7373_v41 = vrot.slane %v7371_v53, 2  ;;  %v12441_v53 = vshll.u32 %v11339_v63, 16 }
 0x3c6   : > { %v11312_v56 = vpop.f32.mrf.mxu3  ;;  %v11314_v38 = vpop.f32.mrf.mxu2 }
 0x3c7   : > { %v7374_v49 = vor.u32 %v7373_v41, %v7370_v26  ;;  %v7380_v59 = vrot.slane %v12441_v53, 2 }
 0x3c9   : > { %v11342_v42 = vsel %vm1407_vm5, %v7374_v49, %v7377_v4  ;;  %v7379_v49 = vrot.slane %v12440_v50, 1 }
 0x3ca   : > { %12578 = vst [vmem:[#allocation14_spill] sm:$0xff] %v11342_v42 }
 0x3cb   : > { %8336 = vmatmul.msk.bf16.vlgmr.msrb.gmra.mxu1 %vm4705_vm9, %v8758_v45  ;;  %v7381_v7 = vor.u32 %v7380_v59, %v7379_v49 }
 0x3cc   : > { %v11332_v13 = vpop.f32.mrf.mxu0 }
 0x3cd   : > { %v11330_v12 = vpop.f32.mrf.mxu1  ;;  %12576 = vst [vmem:[#allocation13_spill] sm:$0xff] %v11332_v13 }
 0x3ce   : > { %8327 = vmatmul.msk.bf16.gmra.mxu0 %vm4705_vm9, %v5714_v55  ;;  %v5365_v45 = vpop.f32.mrf.mxu3  ;;  %v5117_v30 = vpop.f32.mrf.mxu2  ;;  %v5254_v55 = vsel %vm5198_vm12, %v5249_v9, %v5253_v57 }
 0x3cf   : > { %8289 = vmatmul.msk.bf16.gmra.mxu2 %vm4705_vm9, %v4972_v20  ;;  %v5118_v27 = vadd.f32 %v5117_v30, %v10828_v17  ;;  %v4979_v17 = vrot.slane %v4977_v19, 3  ;;  %v11359_v19 = vld [vmem:[#allocation2 + $0x18] sm:$0xff]  }
 0x3d1   : > { %v11337_v11 = vadd.f32 %v5365_v45, %v5118_v27  ;;  %v8939_v27 = vld [vmem:[#allocation2 + $0x6c] sm:$0xff]  ;;  %v5722_v45 = vor.u32 %v5721_v24, %v5718_v60 }
 0x3d2   : > { %v4983_v20 = vshrl.u32 %v8939_v27, 16  ;;  %v4986_v26 = vshll.u32 %v8939_v27, 16  ;;  %v11364_v27 = vsel %vm1407_vm5, %v7377_v4, %v7381_v7 }
 0x3d3   : > { %12577 = vst [vmem:[#allocation9_spill] sm:$0xff] %v11337_v11  ;;  %8309 = vmatmul.msk.bf16.gmra.mxu3 %vm4705_vm9, %v5254_v55  ;;  %v4980_v55 = vor.u32 %v4979_v17, %v4976_v35  ;;  %v5723_v50 = vsel %vm5198_vm12, %v5713_v16, %v5722_v45 }
 0x3d4   : > { %v11349_v9 = vpop.f32.mrf.mxu0  ;;  %v5255_v42 = vrot.slane %v4983_v20, 3  ;;  %12582 = vst [vmem:[#allocation17_spill] sm:$0xff] %v11364_v27  ;;  %v4988_v11 = vrot.slane %v4986_v26, 3 }
 0x3d5   : > { %v11347_v30 = vpop.f32.mrf.mxu1  ;;  %12579 = vst [vmem:[#allocation10_spill] sm:$0xff] %v11349_v9  ;;  %v5256_v9 = vrot.slane %v4986_v26, 4  ;;  %v4981_v53 = vsel %vm2373_vm7, %v4971_v15, %v4980_v55  ;;  %v8760_v26 = vld [vmem:[#allocation2 + $0x20] sm:$0xff]  }
 0x3d6   : > { %v11353_v41 = vpop.f32.mrf.mxu3  ;;  %v11355_v34 = vpop.f32.mrf.mxu2 }
 0x3d7   : > { %12580 = vst [vmem:[#allocation16_spill] sm:$0xff] %v11353_v41  ;;  %v8898_v41 = vld [vmem:[#allocation2 + $0x74] sm:$0xff]   ;;  %v5257_v60 = vor.u32 %v5256_v9, %v5255_v42 }
 0x3d8   : > { %12581 = vst [vmem:[#allocation11_spill] sm:$0xff] %v11355_v34  ;;  %v5725_v59 = vshrl.u32 %v8898_v41, 16  ;;  %v5728_v13 = vshll.u32 %v8898_v41, 16 }
 0x3d9   : > { %v5258_v16 = vsel %vm5198_vm12, %v5253_v57, %v5257_v60 }
 0x3da   : > { %v5727_v15 = vrot.slane %v5725_v59, 3  ;;  %v5730_v42 = vrot.slane %v5728_v13, 4 }
 0x3db   : > { %8337 = vmatmul.msk.bf16.gmra.mxu1 %vm4705_vm9, %v11359_v19 }
 0x3dc   : > { %v11371_v49 = vpop.f32.mrf.mxu0 }
 0x3dd   : > { %v11369_v24 = vpop.f32.mrf.mxu1  ;;  %12583 = vst [vmem:[#allocation12_spill] sm:$0xff] %v11371_v49  ;;  %v4985_v49 = vrot.slane %v4983_v20, 2 }
 0x3de   : > { %8328 = vmatmul.msk.bf16.gmra.mxu0 %vm4705_vm9, %v5723_v50  ;;  %v5370_v35 = vpop.f32.mrf.mxu3  ;;  %v5122_v17 = vpop.f32.mrf.mxu2  ;;  %v11378_v50 = vld [vmem:[#allocation2 + $0x30] sm:$0xff] }
 0x3df   : > { %8290 = vmatmul.msk.bf16.gmra.mxu2 %vm4705_vm9, %v4981_v53  ;;  %v5123_v4 = vadd.f32 %v5122_v17, %v10893_v5  ;;  %v12443_v9 = vshll.u32 %v11378_v50, 16  ;;  %v12442_v53 = vshrl.u32 %v11378_v50, 16  ;;  %v8940_v5 = vld [vmem:[#allocation2 + $0x74] sm:$0xff] }
 0x3e0   : > { %v4992_v57 = vshrl.u32 %v8940_v5, 16 }
 0x3e1   : > { %v11376_v27 = vadd.f32 %v5370_v35, %v5123_v4  ;;  %v4995_v35 = vshll.u32 %v8940_v5, 16  ;;  %v7383_v17 = vrot.slane %v12442_v53, 1  ;;  %v7384_v13 = vrot.slane %v12443_v9, 2 }
 0x3e3   : > { %12584 = vst [vmem:[#allocation19_spill] sm:$0xff] %v11376_v27  ;;  %8310 = vmatmul.msk.bf16.gmra.mxu3 %vm4705_vm9, %v5258_v16  ;;  %v5731_v16 = vor.u32 %v5730_v42, %v5727_v15  ;;  %v7385_v20 = vor.u32 %v7384_v13, %v7383_v17  ;;  %v4989_v27 = vor.u32 %v4988_v11, %v4985_v49  ;;  %v5260_v25 = vrot.slane %v4995_v35, 4  ;;  %v11409_v13 = vld [vmem:[#allocation2 + $0x38] sm:$0xff] }
 0x3e4   : > { %v11385_v41 = vpop.f32.mrf.mxu0 }
 0x3e5   : > { %v11383_v34 = vpop.f32.mrf.mxu1  ;;  %12586 = vst [vmem:[#allocation18_spill] sm:$0xff] %v11385_v41  ;;  %v11397_v5 = vsel %vm1407_vm5, %v7381_v7, %v7385_v20  ;;  %v5732_v53 = vsel %vm5198_vm12, %v5722_v45, %v5731_v16  ;;  %v8900_v41 = vld [vmem:[#allocation2 + $0x7c] sm:$0xff]  }
 0x3e6   : > { %12585 = vst [vmem:[#allocation15_spill] sm:$0xff] %v11383_v34  ;;  %v11389_v4 = vpop.f32.mrf.mxu3  ;;  %v11391_v59 = vpop.f32.mrf.mxu2  ;;  %v5259_v34 = vrot.slane %v4992_v57, 3  ;;  %v5734_v49 = vshrl.u32 %v8900_v41, 16  ;;  %v5737_v42 = vshll.u32 %v8900_v41, 16 }
 0x3e7   : > { %12587 = vst [vmem:[#allocation20_spill] sm:$0xff] %v11389_v4  ;;  %v4990_v4 = vsel %vm2373_vm7, %v4980_v55, %v4989_v27 }
 0x3e8   : > { %12588 = vst [vmem:[#allocation3_spill] sm:$0xff] %v11391_v59  ;;  %v5261_v59 = vor.u32 %v5260_v25, %v5259_v34  ;;  %v5736_v25 = vrot.slane %v5734_v49, 3  ;;  %v5739_v34 = vrot.slane %v5737_v42, 4 }
 0x3e9   : > { %12589 = vst [vmem:[#allocation21_spill] sm:$0xff] %v11397_v5  ;;  %v4997_v5 = vrot.slane %v4995_v35, 3 }
 0x3ea   : > { %v5262_v45 = vsel %vm5198_vm12, %v5257_v60, %v5261_v59  ;;  %v5004_v60 = vshll.u32 %v11040_v28, 16  ;;  %v5740_v49 = vor.u32 %v5739_v34, %v5736_v25 }
 0x3eb   : > { %8338 = vmatmul.msk.bf16.gmra.mxu1 %vm4705_vm9, %v8760_v26  ;;  %v4994_v26 = vrot.slane %v4992_v57, 2  ;;  %v8761_v57 = vld [vmem:[#allocation2 + $0x28] sm:$0xff]  }
 0x3ec   : > { %v11404_v15 = vpop.f32.mrf.mxu0 }
 0x3ed   : > { %v11402_v9 = vpop.f32.mrf.mxu1  ;;  %12591 = vst [vmem:[#allocation22_spill] sm:$0xff] %v11404_v15  ;;  %v4998_v35 = vor.u32 %v4997_v5, %v4994_v26 }
 0x3ee   : > { %8329 = vmatmul.msk.bf16.gmra.mxu0 %vm4705_vm9, %v5732_v53  ;;  %12590 = vst [vmem:[#allocation5_spill] sm:$0xff] %v11402_v9  ;;  %v5375_v11 = vpop.f32.mrf.mxu3  ;;  %v12445_v53 = vshll.u32 %v11409_v13, 16 }
 0x3ef   : > { %8291 = vmatmul.msk.bf16.gmra.mxu2 %vm4705_vm9, %v4990_v4  ;;  %v12444_v4 = vshrl.u32 %v11409_v13, 16  ;;  %v4999_v25 = vsel %vm2373_vm7, %v4989_v27, %v4998_v35 }
 0x3f0   : > { %v5127_v17 = vpop.f32.mrf.mxu2 }
 0x3f1   : > { %v5128_v7 = vadd.f32 %v5127_v17, %v10963_v31  ;;  %v5001_v31 = vshrl.u32 %v11040_v28, 16  ;;  %v7387_v17 = vrot.slane %v12444_v4, 1  ;;  %v5741_v4 = vsel %vm5198_vm12, %v5731_v16, %v5740_v49 }
 0x3f3   : > { %8311 = vmatmul.msk.bf16.gmra.mxu3 %vm4705_vm9, %v5262_v45  ;;  %v11412_v55 = vadd.f32 %v5375_v11, %v5128_v7  ;;  %v7388_v11 = vrot.slane %v12445_v53, 2  ;;  %v5263_v15 = vrot.slane %v5001_v31, 3 }
 0x3f4   : > { %v11426_v42 = vpop.f32.mrf.mxu0 }
 0x3f5   : > { %12592 = vst [vmem:[#allocation23_spill] sm:$0xff] %v11412_v55  ;;  %v11416_v41 = vpop.f32.mrf.mxu1  ;;  %v7389_v7 = vor.u32 %v7388_v11, %v7387_v17  ;;  %v5264_v55 = vrot.slane %v5004_v60, 4 }
 0x3f6   : > { %12593 = vst [vmem:[#allocation24_spill] sm:$0xff] %v11416_v41  ;;  %v11422_v45 = vpop.f32.mrf.mxu3 }
 0x3f7   : > { %12594 = vst [vmem:[#allocation25_spill] sm:$0xff] %v11422_v45  ;;  %v11432_v28 = vsel %vm1407_vm5, %v7385_v20, %v7389_v7  ;;  %v8902_v45 = vld [vmem:[#allocation2 + $0x84] sm:$0xff]   ;;  %v5265_v34 = vor.u32 %v5264_v55, %v5263_v15  ;;  %v5003_v55 = vrot.slane %v5001_v31, 2  ;;  %v8762_v31 = vld [vmem:[#allocation2 + $0x30] sm:$0xff]  }
 0x3f8   : > { %12595 = vst [vmem:[#allocation26_spill] sm:$0xff] %v11426_v42  ;;  %v11428_v41 = vpop.f32.mrf.mxu2  ;;  %v5743_v17 = vshrl.u32 %v8902_v45, 16  ;;  %v5746_v11 = vshll.u32 %v8902_v45, 16  ;;  %v11443_v20 = vld [vmem:[#allocation2 + $0x40] sm:$0xff]  ;;  %v5006_v42 = vrot.slane %v5004_v60, 3  ;;  %v5010_v45 = vshrl.u32 %v11111_v62, 16 }
 0x3f9   : > { %12596 = vst [vmem:[#allocation27_spill] sm:$0xff] %v11428_v41  ;;  %v12447_v27 = vshll.u32 %v11443_v20, 16  ;;  %v12446_v15 = vshrl.u32 %v11443_v20, 16 }
 0x3fa   : > { %12597 = vst [vmem:[#allocation28_spill] sm:$0xff] %v11432_v28  ;;  %v5745_v16 = vrot.slane %v5743_v17, 3  ;;  %v5007_v9 = vor.u32 %v5006_v42, %v5003_v55  ;;  %v5267_v60 = vrot.slane %v5010_v45, 3 }
 0x3fb   : > { %8339 = vmatmul.msk.bf16.gmra.mxu1 %vm4705_vm9, %v8761_v57  ;;  %v5266_v57 = vsel %vm5198_vm12, %v5261_v59, %v5265_v34  ;;  %v5013_v59 = vshll.u32 %v11111_v62, 16 }
 0x3fc   : > { %v11441_v53 = vpop.f32.mrf.mxu0 }
 0x3fd   : > { %12599 = vst [vmem:[#allocation30_spill] sm:$0xff] %v11441_v53  ;;  %v7391_v53 = vrot.slane %v12446_v15, 1  ;;  %v8904_v15 = vld [vmem:[#allocation2 + $0x8c] sm:$0xff]  }
 0x3fe   : > { %8330 = vmatmul.msk.bf16.gmra.mxu0 %vm4705_vm9, %v5741_v4  ;;  %v5380_v5 = vpop.f32.mrf.mxu3  ;;  %v11438_v26 = vpop.f32.mrf.mxu1  ;;  %v5748_v4 = vrot.slane %v5746_v11, 4  ;;  %v7392_v11 = vrot.slane %v12447_v27, 2  ;;  %v5755_v55 = vshll.u32 %v8904_v15, 16 }
 0x3ff   : > { %8292 = vmatmul.msk.bf16.gmra.mxu2 %vm4705_vm9, %v4999_v25  ;;  %12598 = vst [vmem:[#allocation29_spill] sm:$0xff] %v11438_v26 }
 0x400   : > { %v7393_v26 = vor.u32 %v7392_v11, %v7391_v53  ;;  %v5008_v53 = vsel %vm2373_vm7, %v4998_v35, %v5007_v9 }
 0x402   : > { %v11463_v62 = vsel %vm1407_vm5, %v7389_v7, %v7393_v26 }
 0x403   : > { %8312 = vmatmul.msk.bf16.gmra.mxu3 %vm4705_vm9, %v5266_v57  ;;  %v5749_v57 = vor.u32 %v5748_v4, %v5745_v16  ;;  %12603 = vst [vmem:[#allocation34_spill] sm:$0xff] %v11463_v62  ;;  %v5752_v4 = vshrl.u32 %v8904_v15, 16  ;;  %v5015_v15 = vrot.slane %v5013_v59, 3  ;;  %v5019_v62 = vshrl.u32 %v11199_v40, 16 }
 0x405   : > { %v5132_v28 = vpop.f32.mrf.mxu2  ;;  %v5754_v27 = vrot.slane %v5752_v4, 3 }
 0x406   : > { %v5133_v25 = vadd.f32 %v5132_v28, %v11033_v47  ;;  %v11455_v17 = vpop.f32.mrf.mxu3  ;;  %v11459_v47 = vpop.f32.mrf.mxu1  ;;  %v5268_v28 = vrot.slane %v5013_v59, 4  ;;  %v5192_v59 = vld [vmem:[#allocation2 + $0x94] sm:$0xf] }
 0x407   : > { %12601 = vst [vmem:[#allocation32_spill] sm:$0xff] %v11455_v17  ;;  %v8763_v17 = vld [vmem:[#allocation2 + $0x38] sm:$0xff]  }
 0x408   : > { %v11453_v41 = vadd.f32 %v5380_v5, %v5133_v25  ;;  %12602 = vst [vmem:[#allocation33_spill] sm:$0xff] %v11459_v47  ;;  %v5750_v5 = vsel %vm5198_vm12, %v5740_v49, %v5749_v57  ;;  %v11466_v25 = vpop.f32.mrf.mxu0  ;;  %v5269_v16 = vor.u32 %v5268_v28, %v5267_v60 }
 0x409   : > { %12604 = vst [vmem:[#allocation35_spill] sm:$0xff] %v11466_v25 }
 0x40a   : > { %12600 = vst [vmem:[#allocation31_spill] sm:$0xff] %v11453_v41  ;;  %v5270_v7 = vsel %vm5198_vm12, %v5265_v34, %v5269_v16  ;;  %v5022_v34 = vshll.u32 %v11199_v40, 16 }
 0x40b   : > { %8340 = vmatmul.msk.bf16.gmra.mxu1 %vm4705_vm9, %v8762_v31  ;;  %v11474_v31 = vld [vmem:[#allocation2 + $0x48] sm:$0xff] }
 0x40c   : > { %12606 = vst [vmem:[#allocation37_spill] sm:$0xff] %v11474_v31  ;;  %v12451_v35 = vshll.u32 %v11474_v31, 16  ;;  %v12448_v60 = vshrl.u32 %v11474_v31, 16  ;;  %v5272_v47 = vrot.slane %v5022_v34, 4  ;;  %v8905_v31 = vld [vmem:[#allocation2 + $0x94] sm:$0xff]  }
 0x40d   : > { %v11471_v11 = vpop.f32.mrf.mxu2 }
 0x40e   : > { %8331 = vmatmul.msk.bf16.gmra.mxu0 %vm4705_vm9, %v5750_v5  ;;  %12605 = vst [vmem:[#allocation36_spill] sm:$0xff] %v11471_v11  ;;  %v5757_v5 = vrot.slane %v5755_v55, 4  ;;  %v7395_v25 = vrot.slane %v12448_v60, 1 }
 0x40f   : > { %8293 = vmatmul.msk.bf16.gmra.mxu2 %vm4705_vm9, %v5008_v53  ;;  %v5385_v42 = vpop.f32.mrf.mxu3  ;;  %v5012_v53 = vrot.slane %v5010_v45, 2 }
 0x410   : > { %v5758_v4 = vor.u32 %v5757_v5, %v5754_v27 }
 0x411   : > { %v5016_v41 = vor.u32 %v5015_v15, %v5012_v53 }
 0x412   : > { %v5759_v40 = vsel %vm5198_vm12, %v5749_v57, %v5758_v4 }
 0x413   : > { %8313 = vmatmul.msk.bf16.gmra.mxu3 %vm4705_vm9, %v5270_v7  ;;  %v11477_v49 = vpop.f32.mrf.mxu1  ;;  %v11481_v28 = vpop.f32.mrf.mxu0  ;;  %v7396_v7 = vrot.slane %v12451_v35, 2  ;;  %v5017_v27 = vsel %vm2373_vm7, %v5007_v9, %v5016_v41  ;;  %v11510_v35 = vld [vmem:[#allocation2 + $0x98] sm:$0xff]  }
 0x414   : > { %12607 = vst [vmem:[#allocation38_spill] sm:$0xff] %v11477_v49  ;;  %v5271_v49 = vrot.slane %v5019_v62, 3 }
 0x415   : > { %12608 = vst [vmem:[#allocation39_spill] sm:$0xff] %v11481_v28  ;;  %v7397_v55 = vor.u32 %v7396_v7, %v7395_v25  ;;  %v5764_v7 = vshll.u32 %v8905_v31, 16 }
 0x416   : > { %v5273_v53 = vor.u32 %v5272_v47, %v5271_v49  ;;  %12612 = vst [vmem:[#allocation43_spill] sm:$0xff] %v11510_v35 }
 0x417   : > { %v5387_v11 = vpop.f32.mrf.mxu3  ;;  %v11491_v28 = vsel %vm1407_vm5, %v7393_v26, %v7397_v55  ;;  %v5761_v26 = vshrl.u32 %v8905_v31, 16  ;;  %v5766_v47 = vrot.slane %v5764_v7, 4 }
 0x418   : > { %12609 = vst [vmem:[#allocation40_spill] sm:$0xff] %v11491_v28  ;;  %v5274_v57 = vsel %vm5198_vm12, %v5269_v16, %v5273_v53 }
 0x41b   : > { %8341 = vmatmul.msk.bf16.gmra.mxu1 %vm4705_vm9, %v8763_v17  ;;  %v11497_v25 = vpop.f32.mrf.mxu1  ;;  %v5196_v17 = vunpack.c.l.b16 %v5192_v59  ;;  %v11502_v15 = vpop.f32.mrf.mxu0  ;;  %v5021_v59 = vrot.slane %v5019_v62, 2  ;;  %v8750_v62 = vunpack.c.h.b16 %v11510_v35  ;;  %v8765_v35 = vld [vmem:[#allocation2 + $0x48] sm:$0xff]  }
 0x41c   : > { %v5137_v45 = vpop.f32.mrf.mxu2  ;;  %12611 = vst [vmem:[#allocation42_spill] sm:$0xff] %v11502_v15  ;;  %v8764_v15 = vld [vmem:[#allocation2 + $0x40] sm:$0xff]  }
 0x41d   : > { %v5138_v60 = vadd.f32 %v5137_v45, %v11109_v37  ;;  %v5197_v37 = vpack.c.b16 %v5196_v17, %v5196_v17  ;;  %v11505_v45 = vld [vmem:[#allocation2 + $0x50] sm:$0xff] }
 0x41e   : > { %8332 = vmatmul.msk.bf16.gmra.mxu0 %vm4705_vm9, %v5759_v40  ;;  %v12452_v49 = vshll.u32 %v11505_v45, 16  ;;  %v12453_v31 = vshrl.u32 %v11505_v45, 16 }
 0x41f   : > { %v11499_v5 = vadd.f32 %v5385_v42, %v5138_v60  ;;  %8294 = vmatmul.msk.bf16.gmra.mxu2 %vm4705_vm9, %v5017_v27  ;;  %v5763_v60 = vrot.slane %v5761_v26, 3  ;;  %v5024_v27 = vrot.slane %v5022_v34, 3  ;;  %v5276_v17 = vshrl.u32 %v5197_v37, 16 }
 0x420   : > { %v5279_v28 = vshll.u32 %v5197_v37, 16 }
 0x421   : > { %12610 = vst [vmem:[#allocation41_spill] sm:$0xff] %v11499_v5  ;;  %v5767_v7 = vor.u32 %v5766_v47, %v5763_v60  ;;  %v5025_v5 = vor.u32 %v5024_v27, %v5021_v59 }
 0x423   : > { %8314 = vmatmul.msk.bf16.gmra.mxu3 %vm4705_vm9, %v5274_v57  ;;  %v7400_v57 = vrot.slane %v12452_v49, 2  ;;  %v5768_v49 = vsel %vm5198_vm12, %v5758_v4, %v5767_v7  ;;  %v5026_v60 = vsel %vm2373_vm7, %v5016_v41, %v5025_v5  ;;  %v5028_v4 = vshrl.u32 %v11260_v23, 16 }
 0x424   : > { %v5139_v9 = vpop.f32.mrf.mxu2  ;;  %v5390_v42 = vpop.f32.mrf.mxu3 }
 0x425   : > { %v5140_v40 = vadd.f32 %v5139_v9, %v11142_v29  ;;  %v7399_v29 = vrot.slane %v12453_v31, 1 }
 0x427   : > { %v11513_v16 = vadd.f32 %v5387_v11, %v5140_v40  ;;  %v7401_v34 = vor.u32 %v7400_v57, %v7399_v29  ;;  %v5278_v11 = vrot.slane %v5276_v17, 3  ;;  %v5281_v40 = vrot.slane %v5279_v28, 4  ;;  %v11539_v29 = vld [vmem:[#allocation2 + $0x58] sm:$0xff] }
 0x428   : > { %v11519_v26 = vpop.f32.mrf.mxu1  ;;  %v5031_v17 = vshll.u32 %v11260_v23, 16 }
 0x429   : > { %12613 = vst [vmem:[#allocation44_spill] sm:$0xff] %v11513_v16  ;;  %v11526_v37 = vsel %vm1407_vm5, %v7397_v55, %v7401_v34  ;;  %v5607_v16 = vpack.c.b16 %v8750_v62, %v8750_v62  ;;  %v5282_v47 = vor.u32 %v5281_v40, %v5278_v11  ;;  %v12456_v11 = vshll.u32 %v11539_v29, 16 }
 0x42a   : > { %12614 = vst [vmem:[#allocation45_spill] sm:$0xff] %v11526_v37 }
 0x42b   : > { %v11522_v9 = vpop.f32.mrf.mxu0  ;;  %8342 = vmatmul.msk.bf16.gmra.mxu1 %vm4705_vm9, %v8764_v15  ;;  %v5770_v59 = vshrl.u32 %v5607_v16, 16  ;;  %v5773_v28 = vshll.u32 %v5607_v16, 16  ;;  %v5283_v55 = vsel %vm5198_vm12, %v5273_v53, %v5282_v47  ;;  %v12455_v16 = vshrl.u32 %v11539_v29, 16 }
 0x42c   : > { %v5392_v31 = vpop.f32.mrf.mxu3  ;;  %v5030_v53 = vrot.slane %v5028_v4, 2  ;;  %v5033_v47 = vrot.slane %v5031_v17, 3  ;;  %v7404_v37 = vrot.slane %v12456_v11, 2 }
 0x42d   : > { %v5775_v62 = vrot.slane %v5773_v28, 4  ;;  %v7403_v23 = vrot.slane %v12455_v16, 1 }
 0x42e   : > { %8333 = vmatmul.msk.bf16.gmra.mxu0 %vm4705_vm9, %v5768_v49  ;;  %v5772_v49 = vrot.slane %v5770_v59, 3  ;;  %v6789_v59 = vshll.u32 %v11359_v19, 16 }
 0x42f   : > { %8295 = vmatmul.msk.bf16.gmra.mxu2 %vm4705_vm9, %v5026_v60  ;;  %v7405_v28 = vor.u32 %v7404_v37, %v7403_v23  ;;  %v11573_v23 = vld [vmem:[#allocation2 + $0x18] sm:$0xff] }
 0x430   : > { %v11532_v57 = vpop.f32.mrf.mxu1  ;;  %v6791_v16 = vrot.slane %v6789_v59, 1 }
 0x431   : > { %v11559_v4 = vsel %vm1407_vm5, %v7401_v34, %v7405_v28 }
 0x432   : > { %v5142_v27 = vpop.f32.mrf.mxu2  ;;  %12617 = vst [vmem:[#allocation48_spill] sm:$0xff] %v11559_v4 }
 0x433   : > { %v11534_v15 = vpop.f32.mrf.mxu0  ;;  %v5143_v41 = vadd.f32 %v5142_v27, %v11174_v22  ;;  %8315 = vmatmul.msk.bf16.gmra.mxu3 %vm4705_vm9, %v5283_v55  ;;  %v5776_v27 = vor.u32 %v5775_v62, %v5772_v49  ;;  %v6787_v62 = vshrl.u32 %v11359_v19, 16 }
 0x434   : > { %12615 = vst [vmem:[#allocation46_spill] sm:$0xff] %v11534_v15  ;;  %v5034_v15 = vor.u32 %v5033_v47, %v5030_v53  ;;  %v8640_v47 = vld [vmem:[#allocation2 + $0x10] sm:$0xff] }
 0x435   : > { %v11545_v40 = vadd.f32 %v5390_v42, %v5143_v41  ;;  %v5777_v17 = vsel %vm5198_vm12, %v5767_v7, %v5776_v27  ;;  %v6792_v34 = vor.u32 %v6791_v16, %v6787_v62  ;;  %v11575_v27 = vld [vmem:[#allocation2 + $0x60] sm:$0xff]  ;;  %v6317_v19 = vshll.u32 %v8640_v47, 16 }
 0x436   : > { %v5395_v60 = vpop.f32.mrf.mxu3  ;;  %v5035_v37 = vsel %vm2373_vm7, %v5025_v5, %v5034_v15  ;;  %v12463_v15 = vshll.u32 %v11575_v27, 16  ;;  %v12457_v59 = vshrl.u32 %v11575_v27, 16  ;;  %v5934_v62 = vadd.f32 %v11176_v6, %v11235_v58 }
 0x438   : > { %v11551_v22 = vpop.f32.mrf.mxu1 }
 0x43a   : > { %v5144_v55 = vpop.f32.mrf.mxu2 }
 0x43b   : > { %v5145_v42 = vadd.f32 %v5144_v55, %v11201_v10  ;;  %v11555_v41 = vpop.f32.mrf.mxu0  ;;  %8343 = vmatmul.msk.bf16.gmra.mxu1 %vm4705_vm9, %v8765_v35  ;;  %v12618_v10 = vshll.u32 %v11306_v2, 16 }
 0x43c   : > { %12616 = vst [vmem:[#allocation47_spill] sm:$0xff] %v11555_v41  ;;  %v6315_v41 = vshrl.u32 %v8640_v47, 16 }
 0x43d   : > { %v11562_v11 = vadd.f32 %v5392_v31, %v5145_v42  ;;  %v6796_v53 = vrot.slane %v12618_v10, 1  ;;  %v7408_v10 = vrot.slane %v12463_v15, 2 }
 0x43e   : > { %8334 = vmatmul.msk.bf16.gmra.mxu0 %vm4705_vm9, %v5777_v17  ;;  %v5397_v49 = vpop.f32.mrf.mxu3  ;;  %v6322_v17 = vshll.u32 %v11573_v23, 16 }
 0x43f   : > { %8296 = vmatmul.msk.bf16.gmra.mxu2 %vm4705_vm9, %v5035_v37  ;;  %v6797_v31 = vsel %vm359_vm2, %v6792_v34, %v6796_v53  ;;  %v7407_v37 = vrot.slane %v12457_v59, 1  ;;  %v7132_v59 = vrot.slane %v11318_v32, 1 }
 0x440   : > { %v11570_v35 = vpop.f32.mrf.mxu1 }
 0x442   : > { %v5147_v7 = vpop.f32.mrf.mxu2 }
 0x443   : > { %v5148_v5 = vadd.f32 %v5147_v7, %v11241_v52  ;;  %8514 = vmatmul.msk.bf16.vlgmr.msra.gmra.mxu3 %vm4705_vm9, %v6797_v31  ;;  %v11583_v16 = vpop.f32.mrf.mxu0  ;;  %v5105_v52 = vadd.f32 %v11207_v36, %v10654_v39  ;;  %v6319_v7 = vrot.slane %v6317_v19, 1 }
 0x444   : > { %12620 = vst [vmem:[#allocation50_spill] sm:$0xff] %v11583_v16  ;;  %v8766_v16 = vld [vmem:[#allocation2 + $0x50] sm:$0xff]  }
 0x445   : > { %v11581_v55 = vadd.f32 %v5395_v60, %v5148_v5  ;;  %v7133_v60 = vrot.slane %v11306_v2, 1  ;;  %v7409_v5 = vor.u32 %v7408_v10, %v7407_v37  ;;  %v5441_v39 = vadd.f32 %v11205_v1, %v5105_v52  ;;  %v11620_v52 = vld [vmem:[#allocation2 + $0x20] sm:$0xff]  ;;  %v11622_v10 = vld [vmem:[#allocation2 + $0x68] sm:$0xff] }
 0x446   : > { %v5400_v42 = vpop.f32.mrf.mxu3  ;;  %v6320_v19 = vor.u32 %v6319_v7, %v6315_v41  ;;  %v12462_v7 = vshll.u32 %v11622_v10, 16 }
 0x447   : > { %12619 = vst [vmem:[#allocation49_spill] sm:$0xff] %v11581_v55  ;;  %v6324_v55 = vrot.slane %v6322_v17, 1  ;;  %v11602_v36 = vsel %vm1407_vm5, %v7405_v28, %v7409_v5  ;;  %v7134_v58 = vsel %vm810_vm4, %v7132_v59, %v7133_v60  ;;  %v12622_v17 = vshll.u32 %v11339_v63, 16 }
 0x448   : > { %v6056_v34 = vpop.f32.mrf.mxu1  ;;  %12621 = vst [vmem:[#allocation51_spill] sm:$0xff] %v11602_v36 }
 0x449   : > { %v11595_v31 = vadd.f32 %v6056_v34, %v5934_v62  ;;  %v6325_v32 = vsel %vm359_vm2, %v6320_v19, %v6324_v55  ;;  %v6804_v1 = vrot.slane %v12622_v17, 1  ;;  %v7412_v19 = vrot.slane %v12462_v7, 2  ;;  %v12635_v7 = vld [vmem:[#allocation15_spill] sm:$0xff] }
 0x44a   : > { %v5149_v4 = vpop.f32.mrf.mxu2  ;;  %v7135_v17 = vrot.slane %v11339_v63, 1 }
 0x44b   : > { %v5150_v6 = vadd.f32 %v5149_v4, %v11273_v51  ;;  %8344 = vmatmul.msk.bf16.gmra.mxu1 %vm4705_vm9, %v8766_v16  ;;  %v11611_v37 = vpop.f32.mrf.mxu0  ;;  %v5935_v51 = vadd.f32 %v11203_v48, %v5441_v39  ;;  %v12623_v4 = vshrl.u32 %v11306_v2, 16  ;;  %v12459_v48 = vshrl.u32 %v11622_v10, 16 }
 0x44d   : > { %v11605_v62 = vadd.f32 %v5397_v49, %v5150_v6  ;;  %v6800_v41 = vor.u32 %v12623_v4, %v6796_v53  ;;  %v6330_v53 = vshll.u32 %v11620_v52, 16  ;;  %v7411_v6 = vrot.slane %v12459_v48, 1  ;;  %v8769_v48 = vld [vmem:[#allocation2 + $0x68] sm:$0xff]  }
 0x44e   : > { %8533 = vmatmul.msk.bf16.vlgmr.msra.gmra.mxu0 %vm4705_vm9, %v7134_v58  ;;  %v5402_v47 = vpop.f32.mrf.mxu3  ;;  %v5110_v58 = vadd.f32 %v11282_v18, %v10720_v8  ;;  %v7136_v18 = vsel %vm810_vm4, %v7133_v60, %v7135_v17 }
 0x44f   : > { %8427 = vmatmul.msk.bf16.vlgmr.msra.gmra.mxu2 %vm4705_vm9, %v6325_v32  ;;  %v6805_v16 = vsel %vm359_vm2, %v6800_v41, %v6804_v1  ;;  %v8767_v41 = vld [vmem:[#allocation2 + $0x58] sm:$0xff]  }
 0x450   : > { %v6058_v28 = vpop.f32.mrf.mxu1  ;;  %v5443_v8 = vadd.f32 %v11280_v14, %v5110_v58 }
 0x451   : > { %v11617_v49 = vadd.f32 %v6058_v28, %v5935_v51  ;;  %v7413_v28 = vor.u32 %v7412_v19, %v7411_v6 }
 0x452   : > { %v5152_v59 = vpop.f32.mrf.mxu2 }
 0x453   : > { %v5153_v34 = vadd.f32 %v5152_v59, %v11295_v0  ;;  %8515 = vmatmul.msk.bf16.gmra.mxu3 %vm4705_vm9, %v6805_v16  ;;  %v5936_v0 = vadd.f32 %v11243_v21, %v11275_v3  ;;  %v6326_v59 = vshrl.u32 %v11573_v23, 16  ;;  %v6332_v16 = vrot.slane %v6330_v53, 1 }
 0x454   : > { %v11649_v3 = vsel %vm1407_vm5, %v7409_v5, %v7413_v28  ;;  %v12625_v53 = vshll.u32 %v11378_v50, 16  ;;  %v12626_v5 = vshrl.u32 %v11339_v63, 16 }
 0x455   : > { %v11628_v39 = vadd.f32 %v5400_v42, %v5153_v34  ;;  %v11640_v42 = vpop.f32.mrf.mxu0  ;;  %12624 = vst [vmem:[#allocation52_spill] sm:$0xff] %v11649_v3  ;;  %v6328_v34 = vor.u32 %v6326_v59, %v6324_v55  ;;  %v8770_v3 = vld [vmem:[#allocation2 + $0x70] sm:$0xff]  }
 0x456   : > { %v5405_v2 = vpop.f32.mrf.mxu3  ;;  %v6812_v14 = vrot.slane %v12625_v53, 1  ;;  %v6808_v19 = vor.u32 %v12626_v5, %v6804_v1 }
 0x457   : > { %v6333_v6 = vsel %vm359_vm2, %v6328_v34, %v6332_v16  ;;  %v5115_v34 = vadd.f32 %v11314_v38, %v10799_v43 }
 0x458   : > { %v6061_v32 = vpop.f32.mrf.mxu1 }
 0x459   : > { %v11642_v51 = vadd.f32 %v6061_v32, %v5936_v0  ;;  %v11665_v32 = vld [vmem:[#allocation2 + $0x28] sm:$0xff] }
 0x45a   : > { %v5154_v4 = vpop.f32.mrf.mxu2 }
 0x45b   : > { %v5155_v21 = vadd.f32 %v5154_v4, %v11308_v44  ;;  %8345 = vmatmul.msk.bf16.gmra.mxu1 %vm4705_vm9, %v8767_v41  ;;  %v5937_v44 = vadd.f32 %v11277_v54, %v5443_v8  ;;  %v11667_v4 = vld [vmem:[#allocation2 + $0x70] sm:$0xff] }
 0x45c   : > { %v12461_v54 = vshll.u32 %v11667_v4, 16  ;;  %v12458_v63 = vshrl.u32 %v11667_v4, 16 }
 0x45d   : > { %v11652_v0 = vadd.f32 %v5402_v47, %v5155_v21  ;;  %v6813_v47 = vsel %vm359_vm2, %v6808_v19, %v6812_v14  ;;  %v11669_v41 = vpop.f32.mrf.mxu0  ;;  %v6338_v21 = vshll.u32 %v11665_v32, 16  ;;  %v8768_v19 = vld [vmem:[#allocation2 + $0x60] sm:$0xff]  }
 0x45e   : > { %8534 = vmatmul.msk.bf16.gmra.mxu0 %vm4705_vm9, %v7136_v18  ;;  %v5407_v23 = vpop.f32.mrf.mxu3  ;;  %v7415_v18 = vrot.slane %v12458_v63, 1 }
 0x45f   : > { %8428 = vmatmul.msk.bf16.gmra.mxu2 %vm4705_vm9, %v6333_v6  ;;  %v7416_v6 = vrot.slane %v12461_v54, 2 }
 0x460   : > { %v6063_v58 = vpop.f32.mrf.mxu1 }
 0x461   : > { %v11662_v60 = vadd.f32 %v6063_v58, %v5937_v44  ;;  %v7137_v44 = vrot.slane %v11378_v50, 1  ;;  %v7417_v58 = vor.u32 %v7416_v6, %v7415_v18 }
 0x462   : > { %v5157_v55 = vpop.f32.mrf.mxu2 }
 0x463   : > { %v5158_v59 = vadd.f32 %v5157_v55, %v11330_v12  ;;  %8516 = vmatmul.msk.bf16.gmra.mxu3 %vm4705_vm9, %v6813_v47  ;;  %v5938_v12 = vadd.f32 %v11297_v46, %v11303_v33  ;;  %v6334_v55 = vshrl.u32 %v11620_v52, 16  ;;  %v6340_v47 = vrot.slane %v6338_v21, 1 }
 0x464   : > { %v11694_v46 = vsel %vm1407_vm5, %v7413_v28, %v7417_v58  ;;  %v7138_v33 = vsel %vm810_vm4, %v7135_v17, %v7137_v44  ;;  %v12629_v17 = vshrl.u32 %v11378_v50, 16 }
 0x465   : > { %v11675_v1 = vadd.f32 %v5405_v2, %v5158_v59  ;;  %v5445_v59 = vadd.f32 %v11312_v56, %v5115_v34  ;;  %12627 = vst [vmem:[#allocation53_spill] sm:$0xff] %v11694_v46  ;;  %v6336_v38 = vor.u32 %v6334_v55, %v6332_v16  ;;  %v12628_v56 = vshll.u32 %v11409_v13, 16 }
 0x466   : > { %v5410_v8 = vpop.f32.mrf.mxu3  ;;  %v6816_v16 = vor.u32 %v12629_v17, %v6812_v14 }
 0x467   : > { %v6341_v52 = vsel %vm359_vm2, %v6336_v38, %v6340_v47  ;;  %v5939_v28 = vadd.f32 %v11310_v61, %v5445_v59  ;;  %v12630_v38 = vld [vmem:[#allocation6_spill] sm:$0xff] }
 0x468   : > { %v6066_v53 = vpop.f32.mrf.mxu1 }
 0x469   : > { %v11687_v2 = vadd.f32 %v6066_v53, %v5938_v12  ;;  %v11697_v12 = vpop.f32.mrf.mxu0 }
 0x46a   : > { %v5159_v5 = vpop.f32.mrf.mxu2 }
 0x46b   : > { %v5160_v43 = vadd.f32 %v5159_v5, %v11347_v30  ;;  %8346 = vmatmul.msk.bf16.gmra.mxu1 %vm4705_vm9, %v8768_v19  ;;  %v6820_v30 = vrot.slane %v12628_v56, 1  ;;  %v11712_v5 = vld [vmem:[#allocation2 + $0x30] sm:$0xff]  ;;  %v11714_v19 = vld [vmem:[#allocation2 + $0x78] sm:$0xff] }
 0x46c   : > { %v12460_v61 = vshrl.u32 %v11714_v19, 16  ;;  %v6346_v14 = vshll.u32 %v11712_v5, 16  ;;  %v6350_v36 = vshrl.u32 %v11712_v5, 16 }
 0x46d   : > { %v11699_v18 = vadd.f32 %v5407_v23, %v5160_v43  ;;  %v6821_v53 = vsel %vm359_vm2, %v6816_v16, %v6820_v30  ;;  %v12464_v43 = vshll.u32 %v11714_v19, 16 }
 0x46e   : > { %8535 = vmatmul.msk.bf16.gmra.mxu0 %vm4705_vm9, %v7138_v33  ;;  %v5412_v21 = vpop.f32.mrf.mxu3  ;;  %v7419_v33 = vrot.slane %v12460_v61, 1  ;;  %v6342_v61 = vshrl.u32 %v11665_v32, 16  ;;  %v6348_v54 = vrot.slane %v6346_v14, 1  ;;  %v12638_v14 = vshll.u32 %v11443_v20, 16 }
 0x46f   : > { %8429 = vmatmul.msk.bf16.gmra.mxu2 %vm4705_vm9, %v6341_v52  ;;  %v12631_v52 = vld [vmem:[#allocation11_spill] sm:$0xff]  ;;  %v7420_v16 = vrot.slane %v12464_v43, 2 }
 0x470   : > { %v6068_v34 = vpop.f32.mrf.mxu1  ;;  %v5120_v56 = vadd.f32 %v12631_v52, %v12630_v38  ;;  %v12634_v38 = vld [vmem:[#allocation16_spill] sm:$0xff]  ;;  %v6344_v43 = vor.u32 %v6342_v61, %v6340_v47  ;;  %v11761_v61 = vld [vmem:[#allocation2 + $0x80] sm:$0xff] }
 0x471   : > { %v11709_v6 = vadd.f32 %v6068_v34, %v5939_v28  ;;  %v11727_v28 = vpop.f32.mrf.mxu0  ;;  %v12633_v34 = vld [vmem:[#allocation13_spill] sm:$0xff] }
 0x472   : > { %v5162_v23 = vpop.f32.mrf.mxu2  ;;  %v5447_v52 = vadd.f32 %v12634_v38, %v5120_v56  ;;  %v6828_v56 = vrot.slane %v12638_v14, 1 }
 0x473   : > { %v5163_v55 = vadd.f32 %v5162_v23, %v11369_v24  ;;  %8517 = vmatmul.msk.bf16.gmra.mxu3 %vm4705_vm9, %v6821_v53  ;;  %v12632_v24 = vld [vmem:[#allocation9_spill] sm:$0xff] }
 0x474   : > { %v5940_v17 = vadd.f32 %v12633_v34, %v12632_v24 }
 0x475   : > { %v11720_v59 = vadd.f32 %v5410_v8, %v5163_v55  ;;  %v7139_v8 = vrot.slane %v11409_v13, 1  ;;  %v7421_v55 = vor.u32 %v7420_v16, %v7419_v33  ;;  %v6349_v33 = vsel %vm359_vm2, %v6344_v43, %v6348_v54  ;;  %v11759_v43 = vld [vmem:[#allocation2 + $0x38] sm:$0xff] }
 0x476   : > { %v5415_v50 = vpop.f32.mrf.mxu3 }
 0x477   : > { %v11741_v24 = vsel %vm1407_vm5, %v7417_v58, %v7421_v55  ;;  %v7140_v34 = vsel %vm810_vm4, %v7137_v44, %v7139_v8  ;;  %v12640_v58 = vshrl.u32 %v11409_v13, 16  ;;  %v12465_v13 = vshrl.u32 %v11761_v61, 16 }
 0x478   : > { %v6071_v23 = vpop.f32.mrf.mxu1  ;;  %12636 = vst [vmem:[#allocation6_spill] sm:$0xff] %v11741_v24  ;;  %v7141_v24 = vrot.slane %v11443_v20, 1 }
 0x479   : > { %v11734_v53 = vadd.f32 %v6071_v23, %v5940_v17  ;;  %v6824_v16 = vor.u32 %v12640_v58, %v6820_v30  ;;  %v11754_v44 = vpop.f32.mrf.mxu0  ;;  %v12642_v23 = vld [vmem:[#allocation5_spill] sm:$0xff]  ;;  %v7423_v14 = vrot.slane %v12465_v13, 1  ;;  %v12646_v58 = vld [vmem:[#allocation19_spill] sm:$0xff] }
 0x47a   : > { %v5164_v63 = vpop.f32.mrf.mxu2  ;;  %12641 = vst [vmem:[#allocation9_spill] sm:$0xff] %v11754_v44 }
 0x47b   : > { %v5165_v15 = vadd.f32 %v5164_v63, %v12635_v7  ;;  %8347 = vmatmul.msk.bf16.gmra.mxu1 %vm4705_vm9, %v8769_v48  ;;  %v12639_v7 = vld [vmem:[#allocation10_spill] sm:$0xff] }
 0x47c   : > { %v5941_v48 = vadd.f32 %v12639_v7, %v5447_v52  ;;  %v12466_v52 = vshll.u32 %v11761_v61, 16  ;;  %v12644_v7 = vld [vmem:[#allocation7_spill] sm:$0xff] }
 0x47d   : > { %v11744_v17 = vadd.f32 %v5412_v21, %v5165_v15  ;;  %v6829_v21 = vsel %vm359_vm2, %v6824_v16, %v6828_v56  ;;  %v12647_v16 = vld [vmem:[#allocation12_spill] sm:$0xff] }
 0x47e   : > { %8536 = vmatmul.msk.bf16.gmra.mxu0 %vm4705_vm9, %v7140_v34  ;;  %v5417_v32 = vpop.f32.mrf.mxu3 }
 0x47f   : > { %12637 = vst [vmem:[#allocation11_spill] sm:$0xff] %v11744_v17  ;;  %8430 = vmatmul.msk.bf16.gmra.mxu2 %vm4705_vm9, %v6349_v33  ;;  %v6354_v33 = vshll.u32 %v11759_v43, 16 }
 0x480   : > { %v6073_v63 = vpop.f32.mrf.mxu1 }
 0x481   : > { %v11756_v15 = vadd.f32 %v6073_v63, %v5941_v48  ;;  %v12645_v48 = vld [vmem:[#allocation3_spill] sm:$0xff]  ;;  %v6356_v13 = vrot.slane %v6354_v33, 1 }
 0x482   : > { %v5167_v47 = vpop.f32.mrf.mxu2  ;;  %v5125_v63 = vadd.f32 %v12645_v48, %v12644_v7  ;;  %v11783_v7 = vpop.f32.mrf.mxu0  ;;  %v12651_v48 = vld [vmem:[#allocation24_spill] sm:$0xff] }
 0x483   : > { %v5168_v38 = vadd.f32 %v5167_v47, %v12642_v23  ;;  %8518 = vmatmul.msk.bf16.gmra.mxu3 %vm4705_vm9, %v6829_v21  ;;  %v5942_v47 = vadd.f32 %v12647_v16, %v12646_v58  ;;  %v7424_v21 = vrot.slane %v12466_v52, 2  ;;  %12650 = vst [vmem:[#allocation15_spill] sm:$0xff] %v11783_v7  ;;  %v6358_v7 = vshrl.u32 %v11759_v43, 16 }
 0x485   : > { %v11767_v30 = vadd.f32 %v5415_v50, %v5168_v38  ;;  %v7425_v38 = vor.u32 %v7424_v21, %v7423_v14 }
 0x486   : > { %v5420_v34 = vpop.f32.mrf.mxu3 }
 0x487   : > { %12643 = vst [vmem:[#allocation13_spill] sm:$0xff] %v11767_v30  ;;  %v12649_v30 = vld [vmem:[#allocation20_spill] sm:$0xff]  ;;  %v11788_v16 = vsel %vm1407_vm5, %v7421_v55, %v7425_v38  ;;  %v12657_v55 = vshrl.u32 %v11443_v20, 16 }
 0x488   : > { %v6076_v23 = vpop.f32.mrf.mxu1  ;;  %v5449_v44 = vadd.f32 %v12649_v30, %v5125_v63  ;;  %12652 = vst [vmem:[#allocation10_spill] sm:$0xff] %v11788_v16  ;;  %v12654_v30 = vld [vmem:[#allocation37_spill] sm:$0xff] }
 0x489   : > { %v11779_v50 = vadd.f32 %v6076_v23, %v5942_v47  ;;  %v7142_v47 = vsel %vm810_vm4, %v7139_v8, %v7141_v24  ;;  %v6352_v23 = vor.u32 %v6350_v36, %v6348_v54  ;;  %v12655_v63 = vshll.u32 %v12654_v30, 16 }
 0x48a   : > { %v5169_v46 = vpop.f32.mrf.mxu2  ;;  %v6832_v52 = vor.u32 %v12657_v55, %v6828_v56 }
 0x48b   : > { %12648 = vst [vmem:[#allocation16_spill] sm:$0xff] %v11779_v50  ;;  %v5170_v58 = vadd.f32 %v5169_v46, %v12651_v48  ;;  %8348 = vmatmul.msk.bf16.gmra.mxu1 %vm4705_vm9, %v8770_v3  ;;  %v6357_v5 = vsel %vm359_vm2, %v6352_v23, %v6356_v13  ;;  %v6836_v21 = vrot.slane %v12655_v63, 1  ;;  %v12656_v46 = vld [vmem:[#allocation18_spill] sm:$0xff]  ;;  %v11812_v63 = vpop.f32.mrf.mxu0  ;;  %v12666_v50 = vld [vmem:[#allocation25_spill] sm:$0xff] }
 0x48c   : > { %v5943_v3 = vadd.f32 %v12656_v46, %v5449_v44  ;;  %12660 = vst [vmem:[#allocation3_spill] sm:$0xff] %v11812_v63  ;;  %v7143_v63 = vrot.slane %v12654_v30, 1 }
 0x48d   : > { %v11791_v14 = vadd.f32 %v5417_v32, %v5170_v58  ;;  %v6837_v54 = vsel %vm359_vm2, %v6832_v52, %v6836_v21  ;;  %v11804_v32 = vld [vmem:[#allocation2 + $0x40] sm:$0xff]  ;;  %v11806_v58 = vld [vmem:[#allocation2 + $0x88] sm:$0xff] }
 0x48e   : > { %8537 = vmatmul.msk.bf16.gmra.mxu0 %vm4705_vm9, %v7142_v47  ;;  %v5422_v33 = vpop.f32.mrf.mxu3  ;;  %v12659_v47 = vld [vmem:[#allocation29_spill] sm:$0xff]  ;;  %v12467_v44 = vshrl.u32 %v11806_v58, 16  ;;  %v6362_v46 = vshll.u32 %v11804_v32, 16 }
 0x48f   : > { %12653 = vst [vmem:[#allocation5_spill] sm:$0xff] %v11791_v14  ;;  %8431 = vmatmul.msk.bf16.gmra.mxu2 %vm4705_vm9, %v6357_v5  ;;  %v12468_v5 = vshll.u32 %v11806_v58, 16 }
 0x490   : > { %v6078_v48 = vpop.f32.mrf.mxu1  ;;  %v7427_v52 = vrot.slane %v12467_v44, 1  ;;  %v6364_v44 = vrot.slane %v6362_v46, 1  ;;  %v12670_v46 = vshll.u32 %v11505_v45, 16 }
 0x491   : > { %v11801_v8 = vadd.f32 %v6078_v48, %v5943_v3  ;;  %v12662_v3 = vld [vmem:[#allocation8_spill] sm:$0xff]  ;;  %v12663_v48 = vld [vmem:[#allocation27_spill] sm:$0xff]  ;;  %v7428_v16 = vrot.slane %v12468_v5, 2  ;;  %v6360_v5 = vor.u32 %v6358_v7, %v6356_v13 }
 0x492   : > { %v5172_v36 = vpop.f32.mrf.mxu2  ;;  %v5130_v55 = vadd.f32 %v12663_v48, %v12662_v3  ;;  %v12667_v3 = vld [vmem:[#allocation33_spill] sm:$0xff] }
 0x493   : > { %12658 = vst [vmem:[#allocation7_spill] sm:$0xff] %v11801_v8  ;;  %v5173_v23 = vadd.f32 %v5172_v36, %v12659_v47  ;;  %8519 = vmatmul.msk.bf16.gmra.mxu3 %vm4705_vm9, %v6837_v54  ;;  %v12664_v36 = vld [vmem:[#allocation23_spill] sm:$0xff]  ;;  %v12665_v47 = vld [vmem:[#allocation22_spill] sm:$0xff]  ;;  %v8771_v8 = vld [vmem:[#allocation2 + $0x78] sm:$0xff]  }
 0x494   : > { %v5944_v54 = vadd.f32 %v12665_v47, %v12664_v36  ;;  %v5451_v17 = vadd.f32 %v12666_v50, %v5130_v55  ;;  %v7144_v47 = vsel %vm810_vm4, %v7141_v24, %v7143_v63  ;;  %v6844_v50 = vrot.slane %v12670_v46, 1 }
 0x495   : > { %v11814_v20 = vadd.f32 %v5420_v34, %v5173_v23  ;;  %v7429_v23 = vor.u32 %v7428_v16, %v7427_v52  ;;  %v6365_v16 = vsel %vm359_vm2, %v6360_v5, %v6364_v44  ;;  %v11842_v52 = vpop.f32.mrf.mxu0  ;;  %v12673_v24 = vshrl.u32 %v12654_v30, 16  ;;  %v11851_v5 = vld [vmem:[#allocation2 + $0x48] sm:$0xff] }
 0x496   : > { %v5425_v56 = vpop.f32.mrf.mxu3  ;;  %12671 = vst [vmem:[#allocation24_spill] sm:$0xff] %v11842_v52 }
 0x497   : > { %12661 = vst [vmem:[#allocation19_spill] sm:$0xff] %v11814_v20  ;;  %v11833_v36 = vsel %vm1407_vm5, %v7425_v38, %v7429_v23  ;;  %v6840_v13 = vor.u32 %v12673_v24, %v6836_v21  ;;  %v6370_v21 = vshll.u32 %v11851_v5, 16  ;;  %v12679_v24 = vld [vmem:[#allocation31_spill] sm:$0xff] }
 0x498   : > { %v6081_v14 = vpop.f32.mrf.mxu1  ;;  %12668 = vst [vmem:[#allocation12_spill] sm:$0xff] %v11833_v36  ;;  %v7145_v36 = vrot.slane %v11505_v45, 1 }
 0x499   : > { %v11826_v34 = vadd.f32 %v6081_v14, %v5944_v54  ;;  %v6845_v55 = vsel %vm359_vm2, %v6840_v13, %v6844_v50  ;;  %v11853_v54 = vld [vmem:[#allocation2 + $0x90] sm:$0xff]  ;;  %v12680_v13 = vld [vmem:[#allocation30_spill] sm:$0xff]  ;;  %v6372_v52 = vrot.slane %v6370_v21, 1  ;;  %v12685_v21 = vshll.u32 %v11539_v29, 16 }
 0x49a   : > { %v5174_v20 = vpop.f32.mrf.mxu2 }
 0x49b   : > { %v5175_v48 = vadd.f32 %v5174_v20, %v12667_v3  ;;  %8349 = vmatmul.msk.bf16.gmra.mxu1 %vm4705_vm9, %v8771_v8  ;;  %v12672_v8 = vld [vmem:[#allocation26_spill] sm:$0xff] }
 0x49c   : > { %v5945_v38 = vadd.f32 %v12672_v8, %v5451_v17  ;;  %v12675_v3 = vld [vmem:[#allocation38_spill] sm:$0xff]  ;;  %v12469_v17 = vshrl.u32 %v11853_v54, 16  ;;  %v12677_v8 = vld [vmem:[#allocation4_spill] sm:$0xff] }
 0x49d   : > { %v11836_v14 = vadd.f32 %v5422_v33, %v5175_v48 }
 0x49e   : > { %8538 = vmatmul.msk.bf16.gmra.mxu0 %vm4705_vm9, %v7144_v47  ;;  %v5427_v43 = vpop.f32.mrf.mxu3  ;;  %v12470_v47 = vshll.u32 %v11853_v54, 16  ;;  %v7431_v46 = vrot.slane %v12469_v17, 1  ;;  %v6366_v17 = vshrl.u32 %v11804_v32, 16 }
 0x49f   : > { %12669 = vst [vmem:[#allocation20_spill] sm:$0xff] %v11836_v14  ;;  %8432 = vmatmul.msk.bf16.gmra.mxu2 %vm4705_vm9, %v6365_v16 }
 0x4a0   : > { %v6083_v20 = vpop.f32.mrf.mxu1 }
 0x4a1   : > { %v11848_v7 = vadd.f32 %v6083_v20, %v5945_v38  ;;  %v12678_v38 = vld [vmem:[#allocation36_spill] sm:$0xff] }
 0x4a2   : > { %v5177_v33 = vpop.f32.mrf.mxu2  ;;  %v5135_v20 = vadd.f32 %v12678_v38, %v12677_v8  ;;  %v12683_v8 = vld [vmem:[#allocation32_spill] sm:$0xff] }
 0x4a3   : > { %12674 = vst [vmem:[#allocation37_spill] sm:$0xff] %v11848_v7  ;;  %v5178_v48 = vadd.f32 %v5177_v33, %v12675_v3  ;;  %8520 = vmatmul.msk.bf16.gmra.mxu3 %vm4705_vm9, %v6845_v55  ;;  %v5946_v33 = vadd.f32 %v12680_v13, %v12679_v24  ;;  %v7432_v55 = vrot.slane %v12470_v47, 2  ;;  %v8772_v7 = vld [vmem:[#allocation2 + $0x80] sm:$0xff]   ;;  %v7146_v47 = vsel %vm810_vm4, %v7143_v63, %v7145_v36 }
 0x4a4   : > { %v5453_v38 = vadd.f32 %v12683_v8, %v5135_v20  ;;  %v6852_v20 = vrot.slane %v12685_v21, 1  ;;  %v6374_v21 = vshrl.u32 %v11851_v5, 16 }
 0x4a5   : > { %v11859_v16 = vadd.f32 %v5425_v56, %v5178_v48  ;;  %v11871_v56 = vpop.f32.mrf.mxu0 }
 0x4a6   : > { %v5430_v30 = vpop.f32.mrf.mxu3  ;;  %12681 = vst [vmem:[#allocation29_spill] sm:$0xff] %v11871_v56  ;;  %v6368_v56 = vor.u32 %v6366_v17, %v6364_v44  ;;  %v11898_v17 = vld [vmem:[#allocation2 + $0x98] sm:$0xff] }
 0x4a7   : > { %12676 = vst [vmem:[#allocation18_spill] sm:$0xff] %v11859_v16  ;;  %v7433_v16 = vor.u32 %v7432_v55, %v7431_v46 }
 0x4a8   : > { %v6086_v3 = vpop.f32.mrf.mxu1  ;;  %v6373_v46 = vsel %vm359_vm2, %v6368_v56, %v6372_v52 }
 0x4a9   : > { %v11873_v48 = vadd.f32 %v6086_v3, %v5946_v33  ;;  %v11880_v13 = vsel %vm1407_vm5, %v7429_v23, %v7433_v16  ;;  %v12687_v23 = vshrl.u32 %v11505_v45, 16  ;;  %v11900_v3 = vld [vmem:[#allocation2 + $0xa0] sm:$0xff]  ;;  %v12471_v45 = vshrl.u32 %v11898_v17, 16 }
 0x4aa   : > { %v5179_v14 = vpop.f32.mrf.mxu2  ;;  %12684 = vst [vmem:[#allocation27_spill] sm:$0xff] %v11880_v13  ;;  %v8773_v13 = vld [vmem:[#allocation2 + $0x88] sm:$0xff]  }
 0x4ab   : > { %12682 = vst [vmem:[#allocation8_spill] sm:$0xff] %v11873_v48  ;;  %v5180_v24 = vadd.f32 %v5179_v14, %v11497_v25  ;;  %8350 = vmatmul.msk.bf16.gmra.mxu1 %vm4705_vm9, %v8772_v7  ;;  %v12686_v25 = vld [vmem:[#allocation35_spill] sm:$0xff]  ;;  %v6848_v55 = vor.u32 %v12687_v23, %v6844_v50  ;;  %v12473_v23 = vshrl.u32 %v11900_v3, 16 }
 0x4ac   : > { %v5947_v14 = vadd.f32 %v12686_v25, %v5453_v38  ;;  %v12472_v38 = vshll.u32 %v11898_v17, 16  ;;  %v12690_v25 = vld [vmem:[#allocation41_spill] sm:$0xff] }
 0x4ad   : > { %v11883_v33 = vadd.f32 %v5427_v43, %v5180_v24  ;;  %v6853_v43 = vsel %vm359_vm2, %v6848_v55, %v6852_v20  ;;  %v11902_v56 = vpop.f32.mrf.mxu0 }
 0x4ae   : > { %8539 = vmatmul.msk.bf16.gmra.mxu0 %vm4705_vm9, %v7146_v47  ;;  %v5432_v32 = vpop.f32.mrf.mxu3  ;;  %v11896_v47 = vld [vmem:[#allocation2 + $0x50] sm:$0xff] }
 0x4af   : > { %8433 = vmatmul.msk.bf16.gmra.mxu2 %vm4705_vm9, %v6373_v46  ;;  %v6378_v46 = vshll.u32 %v11896_v47, 16 }
 0x4b0   : > { %v6088_v7 = vpop.f32.mrf.mxu1 }
 0x4b1   : > { %v11893_v63 = vadd.f32 %v6088_v7, %v5947_v14  ;;  %v12691_v14 = vld [vmem:[#allocation39_spill] sm:$0xff] }
 0x4b2   : > { %v5182_v44 = vpop.f32.mrf.mxu2  ;;  %v5948_v7 = vadd.f32 %v12691_v14, %v12690_v25  ;;  %v7439_v25 = vrot.slane %v12473_v23, 1  ;;  %v12693_v14 = vshll.u32 %v11900_v3, 16 }
 0x4b3   : > { %12688 = vst [vmem:[#allocation23_spill] sm:$0xff] %v11893_v63  ;;  %v5183_v8 = vadd.f32 %v5182_v44, %v11519_v26  ;;  %8521 = vmatmul.msk.bf16.gmra.mxu3 %vm4705_vm9, %v6853_v43  ;;  %v7435_v26 = vrot.slane %v12471_v45, 1  ;;  %v7147_v44 = vrot.slane %v11539_v29, 1  ;;  %v7436_v43 = vrot.slane %v12472_v38, 2 }
 0x4b4   : > { %v6380_v63 = vrot.slane %v6378_v46, 1  ;;  %v7440_v48 = vrot.slane %v12693_v14, 2 }
 0x4b5   : > { %v11907_v50 = vadd.f32 %v5430_v30, %v5183_v8 }
 0x4b6   : > { %v5435_v24 = vpop.f32.mrf.mxu3  ;;  %v11930_v38 = vor.u32 %v7440_v48, %v7439_v25  ;;  %v12697_v48 = vld [vmem:[#allocation42_spill] sm:$0xff]  ;;  %v8649_v25 = vld [vmem:[#allocation2 + $0x58] sm:$0xff] }
 0x4b7   : > { %12689 = vst [vmem:[#allocation22_spill] sm:$0xff] %v11907_v50  ;;  %v11932_v50 = vpop.f32.mrf.mxu0 }
 0x4b8   : > { %v6091_v55 = vpop.f32.mrf.mxu1  ;;  %12694 = vst [vmem:[#allocation33_spill] sm:$0xff] %v11930_v38 }
 0x4b9   : > { %v11918_v30 = vadd.f32 %v6091_v55, %v5948_v7  ;;  %v7437_v7 = vor.u32 %v7436_v43, %v7435_v26  ;;  %v7148_v55 = vsel %vm810_vm4, %v7145_v36, %v7147_v44 }
 0x4ba   : > { %v5184_v8 = vpop.f32.mrf.mxu2 }
 0x4bb   : > { %12692 = vst [vmem:[#allocation25_spill] sm:$0xff] %v11918_v30  ;;  %v5185_v45 = vadd.f32 %v5184_v8, %v11532_v57  ;;  %8351 = vmatmul.msk.bf16.gmra.mxu1 %vm4705_vm9, %v8773_v13  ;;  %v6376_v30 = vor.u32 %v6374_v21, %v6372_v52  ;;  %v11938_v46 = vsel %vm1407_vm5, %v7433_v16, %v7437_v7  ;;  %v12695_v13 = vshll.u32 %v11575_v27, 16  ;;  %v12696_v52 = vld [vmem:[#allocation44_spill] sm:$0xff] }
 0x4bc   : > { %v11945_v36 = vsel %vm1407_vm5, %v7437_v7, %v11930_v38  ;;  %v12698_v21 = vshrl.u32 %v11539_v29, 16  ;;  %v5950_v29 = vadd.f32 %v11522_v9, %v11545_v40 }
 0x4bd   : > { %v11934_v5 = vadd.f32 %v5432_v32, %v5185_v45  ;;  %v6381_v14 = vsel %vm359_vm2, %v6376_v30, %v6380_v63  ;;  %v6860_v26 = vrot.slane %v12695_v13, 1  ;;  %v5949_v32 = vadd.f32 %v12697_v48, %v12696_v52 }
 0x4be   : > { %8540 = vmatmul.msk.bf16.gmra.mxu0 %vm4705_vm9, %v7148_v55  ;;  %v5437_v57 = vpop.f32.mrf.mxu3  ;;  %v6856_v16 = vor.u32 %v12698_v21, %v6852_v20  ;;  %v6386_v13 = vshll.u32 %v8649_v25, 16  ;;  %v7149_v52 = vrot.slane %v11575_v27, 1 }
 0x4bf   : > { %8434 = vmatmul.msk.bf16.gmra.mxu2 %vm4705_vm9, %v6381_v14  ;;  %v11959_v23 = vpop.f32.mrf.mxu0 }
 0x4c0   : > { %v6093_v45 = vpop.f32.mrf.mxu1  ;;  %v6861_v8 = vsel %vm359_vm2, %v6856_v16, %v6860_v26  ;;  %v6388_v21 = vrot.slane %v6386_v13, 1  ;;  %v7150_v16 = vsel %vm810_vm4, %v7147_v44, %v7149_v52 }
 0x4c1   : > { %v11952_v43 = vadd.f32 %v6093_v45, %v5949_v32  ;;  %v8774_v45 = vld [vmem:[#allocation2 + $0x90] sm:$0xff]  }
 0x4c2   : > { %v5187_v30 = vpop.f32.mrf.mxu2 }
 0x4c3   : > { %v5188_v55 = vadd.f32 %v5187_v30, %v11551_v22  ;;  %8522 = vmatmul.msk.bf16.gmra.mxu3 %vm4705_vm9, %v6861_v8  ;;  %v6382_v22 = vshrl.u32 %v11896_v47, 16  ;;  %v12700_v47 = vld [vmem:[#allocation46_spill] sm:$0xff] }
 0x4c5   : > { %v11957_v7 = vadd.f32 %v5435_v24, %v5188_v55  ;;  %v6384_v30 = vor.u32 %v6382_v22, %v6380_v63  ;;  %v12699_v55 = vshll.u32 %v11622_v10, 16  ;;  %v8650_v22 = vld [vmem:[#allocation2 + $0x60] sm:$0xff] }
 0x4c6   : > { %v7000_v14 = vpop.f32.mrf.mxu3 }
 0x4c7   : > { %v6389_v9 = vsel %vm359_vm2, %v6384_v30, %v6388_v21  ;;  %v11981_v63 = vpop.f32.mrf.mxu0 }
 0x4c8   : > { %v6096_v20 = vpop.f32.mrf.mxu1 }
 0x4c9   : > { %v11964_v48 = vadd.f32 %v6096_v20, %v5950_v29  ;;  %v6868_v29 = vrot.slane %v12699_v55, 1  ;;  %v12701_v20 = vshrl.u32 %v11575_v27, 16  ;;  %v12703_v55 = vld [vmem:[#allocation47_spill] sm:$0xff] }
 0x4ca   : > { %v5189_v32 = vpop.f32.mrf.mxu2 }
 0x4cb   : > { %v5190_v24 = vadd.f32 %v5189_v32, %v11570_v35  ;;  %8352 = vmatmul.msk.bf16.gmra.mxu1 %vm4705_vm9, %v8774_v45  ;;  %v5951_v35 = vadd.f32 %v12700_v47, %v11562_v11  ;;  %v6864_v44 = vor.u32 %v12701_v20, %v6860_v26  ;;  %v6394_v11 = vshll.u32 %v8650_v22, 16 }
 0x4cc   : > { %v7151_v47 = vrot.slane %v11622_v10, 1  ;;  %v6390_v20 = vshrl.u32 %v8649_v25, 16  ;;  %v12705_v25 = vshll.u32 %v11667_v4, 16 }
 0x4cd   : > { %v11970_v8 = vadd.f32 %v5437_v57, %v5190_v24  ;;  %v6869_v45 = vsel %vm359_vm2, %v6864_v44, %v6868_v29  ;;  %v6396_v44 = vrot.slane %v6394_v11, 1 }
 0x4ce   : > { %8541 = vmatmul.msk.bf16.gmra.mxu0 %vm4705_vm9, %v7150_v16  ;;  %v7002_v40 = vpop.f32.mrf.mxu3  ;;  %v6876_v11 = vrot.slane %v12705_v25, 1  ;;  %v7153_v25 = vrot.slane %v11667_v4, 1 }
 0x4cf   : > { %8435 = vmatmul.msk.bf16.gmra.mxu2 %vm4705_vm9, %v6389_v9  ;;  %v12702_v9 = vld [vmem:[#allocation49_spill] sm:$0xff]  ;;  %v11995_v38 = vpop.f32.mrf.mxu0 }
 0x4d0   : > { %v6098_v13 = vpop.f32.mrf.mxu1  ;;  %v5952_v27 = vadd.f32 %v12703_v55, %v12702_v9 }
 0x4d1   : > { %v11983_v57 = vadd.f32 %v6098_v13, %v5951_v35 }
 0x4d2   : > { %v6528_v32 = vpop.f32.mrf.mxu2 }
 0x4d3   : > { %v6618_v24 = vadd.f32 %v6528_v32, %v11595_v31  ;;  %8523 = vmatmul.msk.bf16.gmra.mxu3 %vm4705_vm9, %v6869_v45  ;;  %v12704_v32 = vld [vmem:[#allocation43_spill] sm:$0xff]  ;;  %v6392_v45 = vor.u32 %v6390_v20, %v6388_v21 }
 0x4d5   : > { %v11988_v16 = vadd.f32 %v7000_v14, %v6618_v24  ;;  %v7152_v14 = vsel %vm810_vm4, %v7149_v52, %v7151_v47  ;;  %v6397_v9 = vsel %vm359_vm2, %v6392_v45, %v6396_v44 }
 0x4d6   : > { %v7005_v30 = vpop.f32.mrf.mxu3 }
 0x4d8   : > { %v6101_v26 = vpop.f32.mrf.mxu1 }
 0x4d9   : > { %v11993_v35 = vadd.f32 %v6101_v26, %v5952_v27 }
 0x4da   : > { %v6530_v13 = vpop.f32.mrf.mxu2 }
 0x4db   : > { %v6619_v31 = vadd.f32 %v6530_v13, %v11617_v49  ;;  %8353 = vmatmul.msk.bf16.gmra.mxu1 %vm4705_vm9, %v12704_v32  ;;  %v12706_v49 = vld [vmem:[#allocation50_spill] sm:$0xff]  ;;  %v12707_v13 = vshrl.u32 %v11622_v10, 16  ;;  %v5954_v10 = vadd.f32 %v11611_v37, %v11628_v39  ;;  %v12709_v39 = vshll.u32 %v11714_v19, 16 }
 0x4dc   : > { %v5953_v27 = vadd.f32 %v12706_v49, %v11605_v62 }
 0x4dd   : > { %v12001_v24 = vadd.f32 %v7002_v40, %v6619_v31  ;;  %v6872_v52 = vor.u32 %v12707_v13, %v6868_v29  ;;  %v8651_v31 = vld [vmem:[#allocation2 + $0x68] sm:$0xff] }
 0x4de   : > { %8542 = vmatmul.msk.bf16.gmra.mxu0 %vm4705_vm9, %v7152_v14  ;;  %v7007_v55 = vpop.f32.mrf.mxu3  ;;  %v12017_v14 = vpop.f32.mrf.mxu0  ;;  %v6402_v62 = vshll.u32 %v8651_v31, 16 }
 0x4df   : > { %8436 = vmatmul.msk.bf16.gmra.mxu2 %vm4705_vm9, %v6397_v9  ;;  %v6877_v20 = vsel %vm359_vm2, %v6872_v52, %v6876_v11  ;;  %v12708_v52 = vld [vmem:[#allocation14_spill] sm:$0xff] }
 0x4e0   : > { %v6103_v26 = vpop.f32.mrf.mxu1  ;;  %v6404_v13 = vrot.slane %v6402_v62, 1 }
 0x4e1   : > { %v12012_v21 = vadd.f32 %v6103_v26, %v5953_v27  ;;  %v6398_v26 = vshrl.u32 %v8650_v22, 16 }
 0x4e2   : > { %v6533_v40 = vpop.f32.mrf.mxu2 }
 0x4e3   : > { %v6620_v32 = vadd.f32 %v6533_v40, %v11642_v51  ;;  %8524 = vmatmul.msk.bf16.gmra.mxu3 %vm4705_vm9, %v6877_v20  ;;  %v6400_v40 = vor.u32 %v6398_v26, %v6396_v44  ;;  %v8652_v26 = vld [vmem:[#allocation2 + $0x70] sm:$0xff] }
 0x4e5   : > { %v12019_v45 = vadd.f32 %v7005_v30, %v6620_v32  ;;  %v7154_v30 = vsel %vm810_vm4, %v7151_v47, %v7153_v25  ;;  %v6405_v37 = vsel %vm359_vm2, %v6400_v40, %v6404_v13  ;;  %v6884_v32 = vrot.slane %v12709_v39, 1 }
 0x4e6   : > { %v7010_v9 = vpop.f32.mrf.mxu3  ;;  %v12710_v47 = vshrl.u32 %v11667_v4, 16  ;;  %v7155_v4 = vrot.slane %v11714_v19, 1 }
 0x4e8   : > { %v6106_v29 = vpop.f32.mrf.mxu1  ;;  %v6880_v44 = vor.u32 %v12710_v47, %v6876_v11  ;;  %v12711_v47 = vld [vmem:[#allocation17_spill] sm:$0xff] }
 0x4e9   : > { %v12024_v49 = vadd.f32 %v6106_v29, %v5954_v10  ;;  %v12036_v10 = vpop.f32.mrf.mxu0 }
 0x4ea   : > { %v6535_v27 = vpop.f32.mrf.mxu2 }
 0x4eb   : > { %v6621_v51 = vadd.f32 %v6535_v27, %v11662_v60  ;;  %8552 = vmatmul.msk.bf16.vlgmr.msra.gmra.mxu1 %vm4705_vm9, %v12708_v52  ;;  %v5955_v60 = vadd.f32 %v11640_v42, %v11652_v0  ;;  %v6885_v27 = vsel %vm359_vm2, %v6880_v44, %v6884_v32  ;;  %v5956_v42 = vadd.f32 %v11669_v41, %v11675_v1 }
 0x4ed   : > { %v12030_v20 = vadd.f32 %v7007_v55, %v6621_v51 }
 0x4ee   : > { %8543 = vmatmul.msk.bf16.gmra.mxu0 %vm4705_vm9, %v7154_v30  ;;  %v7012_v62 = vpop.f32.mrf.mxu3  ;;  %v6410_v30 = vshll.u32 %v8652_v26, 16 }
 0x4ef   : > { %8437 = vmatmul.msk.bf16.gmra.mxu2 %vm4705_vm9, %v6405_v37 }
 0x4f0   : > { %v6108_v22 = vpop.f32.mrf.mxu1 }
 0x4f1   : > { %v12043_v55 = vadd.f32 %v6108_v22, %v5955_v60  ;;  %v12053_v11 = vpop.f32.mrf.mxu0  ;;  %v6406_v60 = vshrl.u32 %v8651_v31, 16  ;;  %v6412_v22 = vrot.slane %v6410_v30, 1 }
 0x4f2   : > { %v6538_v29 = vpop.f32.mrf.mxu2 }
 0x4f3   : > { %v6622_v51 = vadd.f32 %v6538_v29, %v11687_v2  ;;  %8525 = vmatmul.msk.bf16.gmra.mxu3 %vm4705_vm9, %v6885_v27  ;;  %v6408_v44 = vor.u32 %v6406_v60, %v6404_v13  ;;  %v12712_v29 = vshll.u32 %v11761_v61, 16 }
 0x4f5   : > { %v12048_v52 = vadd.f32 %v7010_v9, %v6622_v51  ;;  %v7156_v9 = vsel %vm810_vm4, %v7153_v25, %v7155_v4  ;;  %v6413_v1 = vsel %vm359_vm2, %v6408_v44, %v6412_v22  ;;  %v6892_v27 = vrot.slane %v12712_v29, 1 }
 0x4f6   : > { %v7015_v39 = vpop.f32.mrf.mxu3  ;;  %v12713_v51 = vshrl.u32 %v11714_v19, 16  ;;  %v6414_v44 = vshrl.u32 %v8652_v26, 16  ;;  %v12715_v26 = vshll.u32 %v11806_v58, 16 }
 0x4f8   : > { %v6111_v0 = vpop.f32.mrf.mxu1  ;;  %v6888_v30 = vor.u32 %v12713_v51, %v6884_v32  ;;  %v7157_v32 = vrot.slane %v11761_v61, 1 }
 0x4f9   : > { %v12055_v40 = vadd.f32 %v6111_v0, %v5956_v42  ;;  %v8653_v42 = vld [vmem:[#allocation2 + $0x78] sm:$0xff]  ;;  %v12075_v0 = vpop.f32.mrf.mxu0 }
 0x4fa   : > { %v6540_v37 = vpop.f32.mrf.mxu2 }
 0x4fb   : > { %v6623_v2 = vadd.f32 %v6540_v37, %v11709_v6  ;;  %8553 = vmatmul.msk.bf16.gmra.mxu1 %vm4705_vm9, %v12711_v47  ;;  %v5957_v6 = vadd.f32 %v11697_v12, %v11699_v18  ;;  %v6418_v12 = vshll.u32 %v8653_v42, 16  ;;  %v5958_v18 = vadd.f32 %v11727_v28, %v11720_v59 }
 0x4fd   : > { %v12061_v41 = vadd.f32 %v7012_v62, %v6623_v2  ;;  %v6893_v62 = vsel %vm359_vm2, %v6888_v30, %v6892_v27  ;;  %v6900_v30 = vrot.slane %v12715_v26, 1 }
 0x4fe   : > { %8544 = vmatmul.msk.bf16.gmra.mxu0 %vm4705_vm9, %v7156_v9  ;;  %v7017_v60 = vpop.f32.mrf.mxu3 }
 0x4ff   : > { %8438 = vmatmul.msk.bf16.gmra.mxu2 %vm4705_vm9, %v6413_v1  ;;  %v6420_v1 = vrot.slane %v6418_v12, 1 }
 0x500   : > { %v6113_v31 = vpop.f32.mrf.mxu1 }
 0x501   : > { %v12072_v25 = vadd.f32 %v6113_v31, %v5957_v6  ;;  %v6416_v6 = vor.u32 %v6414_v44, %v6412_v22  ;;  %v12090_v31 = vpop.f32.mrf.mxu0 }
 0x502   : > { %v6543_v13 = vpop.f32.mrf.mxu2 }
 0x503   : > { %v6624_v37 = vadd.f32 %v6543_v13, %v11734_v53  ;;  %8526 = vmatmul.msk.bf16.gmra.mxu3 %vm4705_vm9, %v6893_v62  ;;  %v12714_v53 = vld [vmem:[#allocation21_spill] sm:$0xff]  ;;  %v6421_v28 = vsel %vm359_vm2, %v6416_v6, %v6420_v1 }
 0x504   : > { %v12717_v13 = vld [vmem:[#allocation9_spill] sm:$0xff] }
 0x505   : > { %v12079_v2 = vadd.f32 %v7015_v39, %v6624_v37  ;;  %v7158_v39 = vsel %vm810_vm4, %v7155_v4, %v7157_v32  ;;  %v12718_v4 = vshrl.u32 %v11761_v61, 16  ;;  %v12721_v6 = vld [vmem:[#allocation13_spill] sm:$0xff] }
 0x506   : > { %v7020_v59 = vpop.f32.mrf.mxu3 }
 0x507   : > { %v6896_v22 = vor.u32 %v12718_v4, %v6892_v27 }
 0x508   : > { %v6116_v19 = vpop.f32.mrf.mxu1 }
 0x509   : > { %v12084_v47 = vadd.f32 %v6116_v19, %v5958_v18  ;;  %v6901_v18 = vsel %vm359_vm2, %v6896_v22, %v6900_v30  ;;  %v8654_v19 = vld [vmem:[#allocation2 + $0x80] sm:$0xff]  ;;  %v12724_v22 = vld [vmem:[#allocation7_spill] sm:$0xff] }
 0x50a   : > { %v6545_v9 = vpop.f32.mrf.mxu2 }
 0x50b   : > { %v6625_v29 = vadd.f32 %v6545_v9, %v11756_v15  ;;  %8554 = vmatmul.msk.bf16.gmra.mxu1 %vm4705_vm9, %v12714_v53  ;;  %v12716_v15 = vld [vmem:[#allocation11_spill] sm:$0xff]  ;;  %v12720_v9 = vld [vmem:[#allocation16_spill] sm:$0xff]  ;;  %v6426_v53 = vshll.u32 %v8654_v19, 16 }
 0x50c   : > { %v5959_v62 = vadd.f32 %v12717_v13, %v12716_v15  ;;  %v7159_v15 = vrot.slane %v11806_v58, 1 }
 0x50d   : > { %v12092_v51 = vadd.f32 %v7017_v60, %v6625_v29  ;;  %v6428_v4 = vrot.slane %v6426_v53, 1  ;;  %v12728_v53 = vld [vmem:[#allocation3_spill] sm:$0xff] }
 0x50e   : > { %8545 = vmatmul.msk.bf16.gmra.mxu0 %vm4705_vm9, %v7158_v39  ;;  %v12110_v39 = vpop.f32.mrf.mxu0  ;;  %v7022_v61 = vpop.f32.mrf.mxu3 }
 0x50f   : > { %8439 = vmatmul.msk.bf16.gmra.mxu2 %vm4705_vm9, %v6421_v28  ;;  %v12722_v28 = vld [vmem:[#allocation15_spill] sm:$0xff] }
 0x510   : > { %v6118_v37 = vpop.f32.mrf.mxu1  ;;  %v5960_v26 = vadd.f32 %v12722_v28, %v12721_v6  ;;  %v12726_v28 = vshll.u32 %v11853_v54, 16 }
 0x511   : > { %v12103_v12 = vadd.f32 %v6118_v37, %v5959_v62  ;;  %v6422_v37 = vshrl.u32 %v8653_v42, 16  ;;  %v12727_v42 = vld [vmem:[#allocation5_spill] sm:$0xff] }
 0x512   : > { %v6548_v60 = vpop.f32.mrf.mxu2 }
 0x513   : > { %12719 = vst [vmem:[#allocation26_spill] sm:$0xff] %v12103_v12  ;;  %v6626_v44 = vadd.f32 %v6548_v60, %v12720_v9  ;;  %8527 = vmatmul.msk.bf16.gmra.mxu3 %vm4705_vm9, %v6901_v18  ;;  %v12725_v18 = vld [vmem:[#allocation28_spill] sm:$0xff]  ;;  %v6424_v9 = vor.u32 %v6422_v37, %v6420_v1  ;;  %v12734_v12 = vld [vmem:[#allocation37_spill] sm:$0xff] }
 0x515   : > { %v12108_v29 = vadd.f32 %v7020_v59, %v6626_v44  ;;  %v7160_v59 = vsel %vm810_vm4, %v7157_v32, %v7159_v15  ;;  %v6429_v6 = vsel %vm359_vm2, %v6424_v9, %v6428_v4 }
 0x516   : > { %v12132_v32 = vpop.f32.mrf.mxu0 }
 0x518   : > { %v6121_v27 = vpop.f32.mrf.mxu1 }
 0x519   : > { %v12115_v13 = vadd.f32 %v6121_v27, %v5960_v26  ;;  %v6908_v26 = vrot.slane %v12726_v28, 1  ;;  %v5961_v27 = vadd.f32 %v12728_v53, %v12727_v42  ;;  %v12731_v42 = vld [vmem:[#allocation19_spill] sm:$0xff]  ;;  %v12732_v53 = vld [vmem:[#allocation24_spill] sm:$0xff] }
 0x51a   : > { %v6550_v62 = vpop.f32.mrf.mxu2 }
 0x51b   : > { %12723 = vst [vmem:[#allocation38_spill] sm:$0xff] %v12115_v13  ;;  %v6627_v60 = vadd.f32 %v6550_v62, %v12724_v22  ;;  %8555 = vmatmul.msk.bf16.gmra.mxu1 %vm4705_vm9, %v12725_v18  ;;  %v12729_v22 = vshrl.u32 %v11806_v58, 16  ;;  %v5962_v58 = vadd.f32 %v12732_v53, %v12731_v42 }
 0x51d   : > { %v12121_v44 = vadd.f32 %v7022_v61, %v6627_v60  ;;  %v6904_v18 = vor.u32 %v12729_v22, %v6900_v30  ;;  %v7025_v61 = vpop.f32.mrf.mxu3  ;;  %v7161_v22 = vrot.slane %v11853_v54, 1 }
 0x51e   : > { %8546 = vmatmul.msk.bf16.gmra.mxu0 %vm4705_vm9, %v7160_v59  ;;  %v8655_v59 = vld [vmem:[#allocation2 + $0x88] sm:$0xff] }
 0x51f   : > { %8440 = vmatmul.msk.bf16.gmra.mxu2 %vm4705_vm9, %v6429_v6  ;;  %v6909_v60 = vsel %vm359_vm2, %v6904_v18, %v6908_v26  ;;  %v6434_v28 = vshll.u32 %v8655_v59, 16  ;;  %v12146_v18 = vpop.f32.mrf.mxu0 }
 0x520   : > { %v6123_v62 = vpop.f32.mrf.mxu1 }
 0x521   : > { %v12134_v1 = vadd.f32 %v6123_v62, %v5961_v27  ;;  %v6436_v13 = vrot.slane %v6434_v28, 1 }
 0x522   : > { %v6553_v37 = vpop.f32.mrf.mxu2 }
 0x523   : > { %12730 = vst [vmem:[#allocation4_spill] sm:$0xff] %v12134_v1  ;;  %v6628_v9 = vadd.f32 %v6553_v37, %v11826_v34  ;;  %8528 = vmatmul.msk.bf16.gmra.mxu3 %vm4705_vm9, %v6909_v60  ;;  %v6430_v1 = vshrl.u32 %v8654_v19, 16  ;;  %v12735_v37 = vld [vmem:[#allocation34_spill] sm:$0xff]  ;;  %v7162_v60 = vsel %vm810_vm4, %v7159_v15, %v7161_v22  ;;  %v12736_v19 = vshll.u32 %v11898_v17, 16 }
 0x525   : > { %v12139_v6 = vadd.f32 %v7025_v61, %v6628_v9  ;;  %v7027_v61 = vpop.f32.mrf.mxu3  ;;  %v6432_v9 = vor.u32 %v6430_v1, %v6428_v4  ;;  %v6916_v28 = vrot.slane %v12736_v19, 1  ;;  %v8656_v1 = vld [vmem:[#allocation2 + $0x90] sm:$0xff]  ;;  %v7163_v19 = vrot.slane %v11898_v17, 1 }
 0x527   : > { %v6437_v53 = vsel %vm359_vm2, %v6432_v9, %v6436_v13 }
 0x528   : > { %v6126_v30 = vpop.f32.mrf.mxu1 }
 0x529   : > { %v12144_v27 = vadd.f32 %v6126_v30, %v5962_v58  ;;  %v12737_v58 = vld [vmem:[#allocation20_spill] sm:$0xff] }
 0x52a   : > { %v6555_v62 = vpop.f32.mrf.mxu2 }
 0x52b   : > { %12733 = vst [vmem:[#allocation36_spill] sm:$0xff] %v12144_v27  ;;  %v6629_v34 = vadd.f32 %v6555_v62, %v12734_v12  ;;  %8556 = vmatmul.msk.bf16.gmra.mxu1 %vm4705_vm9, %v12735_v37  ;;  %v12738_v12 = vld [vmem:[#allocation29_spill] sm:$0xff]  ;;  %v12739_v37 = vshrl.u32 %v11853_v54, 16  ;;  %v6438_v54 = vshrl.u32 %v8655_v59, 16  ;;  %v5965_v59 = vadd.f32 %v11932_v50, %v11883_v33 }
 0x52c   : > { %v5963_v30 = vadd.f32 %v12738_v12, %v12737_v58  ;;  %v12743_v12 = vld [vmem:[#allocation40_spill] sm:$0xff] }
 0x52d   : > { %v12152_v42 = vadd.f32 %v7027_v61, %v6629_v34  ;;  %v6912_v27 = vor.u32 %v12739_v37, %v6908_v26  ;;  %v12167_v34 = vpop.f32.mrf.mxu0  ;;  %v6442_v61 = vshll.u32 %v8656_v1, 16  ;;  %v12744_v37 = vshrl.u32 %v11898_v17, 16 }
 0x52e   : > { %8547 = vmatmul.msk.bf16.gmra.mxu0 %vm4705_vm9, %v7162_v60  ;;  %v12741_v60 = vld [vmem:[#allocation18_spill] sm:$0xff] }
 0x52f   : > { %8441 = vmatmul.msk.bf16.gmra.mxu2 %vm4705_vm9, %v6437_v53  ;;  %v6917_v4 = vsel %vm359_vm2, %v6912_v27, %v6916_v28  ;;  %v5964_v9 = vadd.f32 %v11902_v56, %v12741_v60  ;;  %v6444_v26 = vrot.slane %v6442_v61, 1  ;;  %v7164_v27 = vsel %vm810_vm4, %v7161_v22, %v7163_v19  ;;  %v6690_v61 = vld [vmem:[#allocation2 + $0xa8] sm:$0x1] }
 0x530   : > { %v6128_v62 = vpop.f32.mrf.mxu1  ;;  %v6920_v56 = vor.u32 %v12744_v37, %v6916_v28 }
 0x531   : > { %v12163_v15 = vadd.f32 %v6128_v62, %v5963_v30  ;;  %v6440_v30 = vor.u32 %v6438_v54, %v6436_v13  ;;  %v6766_v13 = vunpack.c.l.b16 %v6690_v61 }
 0x533   : > { %12740 = vst [vmem:[#allocation31_spill] sm:$0xff] %v12163_v15  ;;  %8529 = vmatmul.msk.bf16.gmra.mxu3 %vm4705_vm9, %v6917_v4  ;;  %v6445_v62 = vsel %vm359_vm2, %v6440_v30, %v6444_v26  ;;  %v12745_v4 = vshll.u32 %v11900_v3, 16  ;;  %v6785_v17 = vpack.c.b16 %v6766_v13, %v6766_v13 }
 0x535   : > { %v6924_v60 = vrot.slane %v12745_v4, 1  ;;  %v6930_v4 = vshll.u32 %v6785_v17, 16 }
 0x537   : > { %v6925_v54 = vsel %vm359_vm2, %v6920_v56, %v6924_v60  ;;  %v6218_v56 = vld [vmem:[#allocation2 + $0xa0] sm:$0x1] }
 0x538   : > { %v6131_v53 = vpop.f32.mrf.mxu1  ;;  %v6294_v15 = vunpack.c.l.b16 %v6218_v56  ;;  %v12750_v56 = vld [vmem:[#allocation48_spill] sm:$0xff] }
 0x539   : > { %v12172_v58 = vadd.f32 %v6131_v53, %v5964_v9  ;;  %v12183_v9 = vpop.f32.mrf.mxu0 }
 0x53b   : > { %12742 = vst [vmem:[#allocation30_spill] sm:$0xff] %v12172_v58  ;;  %8557 = vmatmul.msk.bf16.gmra.mxu1 %vm4705_vm9, %v12743_v12  ;;  %v8657_v12 = vld [vmem:[#allocation2 + $0x98] sm:$0xff] }
 0x53c   : > { %v6450_v28 = vshll.u32 %v8657_v12, 16 }
 0x53e   : > { %8548 = vmatmul.msk.bf16.gmra.mxu0 %vm4705_vm9, %v7164_v27  ;;  %v12747_v27 = vld [vmem:[#allocation22_spill] sm:$0xff]  ;;  %v6452_v61 = vrot.slane %v6450_v28, 1 }
 0x53f   : > { %8442 = vmatmul.msk.bf16.gmra.mxu2 %vm4705_vm9, %v6445_v62  ;;  %v5966_v30 = vadd.f32 %v11959_v23, %v12747_v27  ;;  %v7165_v62 = vrot.slane %v11900_v3, 1  ;;  %v6932_v27 = vrot.slane %v6930_v4, 1 }
 0x540   : > { %v6133_v22 = vpop.f32.mrf.mxu1 }
 0x541   : > { %v12188_v53 = vadd.f32 %v6133_v22, %v5965_v59  ;;  %v12195_v33 = vpop.f32.mrf.mxu0  ;;  %v6446_v59 = vshrl.u32 %v8656_v1, 16  ;;  %v12748_v22 = vld [vmem:[#allocation45_spill] sm:$0xff]  ;;  %v7166_v13 = vsel %vm810_vm4, %v7163_v19, %v7165_v62  ;;  %v5967_v1 = vadd.f32 %v11981_v63, %v11934_v5 }
 0x542   : > { %v6313_v19 = vpack.c.b16 %v6294_v15, %v6294_v15 }
 0x543   : > { %12746 = vst [vmem:[#allocation32_spill] sm:$0xff] %v12188_v53  ;;  %8530 = vmatmul.msk.bf16.gmra.mxu3 %vm4705_vm9, %v6925_v54  ;;  %v6448_v54 = vor.u32 %v6446_v59, %v6444_v26  ;;  %v12749_v53 = vshrl.u32 %v11900_v3, 16 }
 0x544   : > { %v6458_v3 = vshll.u32 %v6313_v19, 16 }
 0x545   : > { %v6928_v23 = vor.u32 %v12749_v53, %v6924_v60  ;;  %v6453_v58 = vsel %vm359_vm2, %v6448_v54, %v6452_v61  ;;  %v7167_v60 = vrot.slane %v6785_v17, 1  ;;  %v5968_v53 = vadd.f32 %v11995_v38, %v11957_v7 }
 0x546   : > { %v6460_v63 = vrot.slane %v6458_v3, 1  ;;  %v5969_v38 = vadd.f32 %v12017_v14, %v11970_v8 }
 0x548   : > { %v6136_v37 = vpop.f32.mrf.mxu1 }
 0x549   : > { %v12197_v50 = vadd.f32 %v6136_v37, %v5966_v30  ;;  %v6933_v30 = vsel %vm359_vm2, %v6928_v23, %v6932_v27  ;;  %v12212_v26 = vpop.f32.mrf.mxu0  ;;  %v12751_v27 = vld [vmem:[#allocation51_spill] sm:$0xff] }
 0x54b   : > { %8558 = vmatmul.msk.bf16.gmra.mxu1 %vm4705_vm9, %v12748_v22  ;;  %v7168_v22 = vsel %vm810_vm4, %v7165_v62, %v7167_v60  ;;  %v7325_v62 = vadd.f32 %v12036_v10, %v11988_v16  ;;  %v7326_v16 = vadd.f32 %v12053_v11, %v12001_v24  ;;  %v7328_v11 = vadd.f32 %v12090_v31, %v12030_v20  ;;  %v6558_v20 = vpop.f32.mrf.mxu2 }
 0x54c   : > { %v7330_v31 = vadd.f32 %v12132_v32, %v12061_v41  ;;  %v12754_v41 = vld [vmem:[#allocation6_spill] sm:$0xff] }
 0x54e   : > { %8549 = vmatmul.msk.bf16.gmra.mxu0 %vm4705_vm9, %v7166_v13 }
 0x54f   : > { %8443 = vmatmul.msk.bf16.gmra.mxu2 %vm4705_vm9, %v6453_v58  ;;  %v6454_v58 = vshrl.u32 %v8657_v12, 16 }
 0x550   : > { %v6138_v28 = vpop.f32.mrf.mxu1 }
 0x551   : > { %v12210_v37 = vadd.f32 %v6138_v28, %v5967_v1  ;;  %v6456_v5 = vor.u32 %v6454_v58, %v6452_v61  ;;  %v12222_v15 = vpop.f32.mrf.mxu0  ;;  %v12236_v61 = vld [vmem:[%s12426_s4] ss:$0 sm:$0xff] }
 0x553   : > { %8531 = vmatmul.msk.bf16.gmra.mxu3 %vm4705_vm9, %v6933_v30  ;;  %v6461_v17 = vsel %vm359_vm2, %v6456_v5, %v6460_v63  ;;  %v7327_v30 = vadd.f32 %v12075_v0, %v12019_v45  ;;  %v7329_v45 = vadd.f32 %v12110_v39, %v12048_v52  ;;  %v7030_v52 = vpop.f32.mrf.mxu3 }
 0x558   : > { %v6141_v4 = vpop.f32.mrf.mxu1 }
 0x559   : > { %v12217_v59 = vadd.f32 %v6141_v4, %v5968_v53  ;;  %v12752_v53 = vld [vmem:[#allocation52_spill] sm:$0xff] }
 0x55b   : > { %8559 = vmatmul.msk.bf16.gmra.mxu1 %vm4705_vm9, %v12750_v56 }
 0x55e   : > { %8550 = vmatmul.msk.bf16.gmra.mxu0 %vm4705_vm9, %v7168_v22 }
 0x55f   : > { %8444 = vmatmul.msk.bf16.gmra.mxu2 %vm4705_vm9, %v6461_v17  ;;  %v12753_v17 = vld [vmem:[#allocation53_spill] sm:$0xff] }
 0x560   : > { %v6143_v7 = vpop.f32.mrf.mxu1 }
 0x561   : > { %v12229_v12 = vadd.f32 %v6143_v7, %v5969_v38 }
 0x568   : > { %v7518_v13 = vpop.f32.mrf.mxu1 }
 0x569   : > { %v7608_v54 = vadd.f32 %v7518_v13, %v7325_v62 }
 0x56b   : > { %v7648_v23 = vadd.f32 %v12236_v61, %v7608_v54  ;;  %8560 = vmatmul.msk.bf16.gmra.mxu1 %vm4705_vm9, %v12751_v27  ;;  %v7265_v54 = vpop.f32.mrf.mxu0  ;;  %v6560_v27 = vpop.f32.mrf.mxu2 }
 0x56d   : > { %v7684_v8 = vmax.f32 %v7648_v23, 0.0  ;;  %v7331_v23 = vadd.f32 %v12146_v18, %v12079_v2 }
 0x56f   : > { %7720 = vst.msk [vmem:[%s12245_s27] sm:$0xff] %vm4705_vm9, %v7684_v8 }
 0x570   : > { %v7520_v14 = vpop.f32.mrf.mxu1 }
 0x571   : > { %v7609_v10 = vadd.f32 %v7520_v14, %v7326_v16 }
 0x573   : > { %v7649_v1 = vadd.f32 %v12236_v61, %v7609_v10  ;;  %v7032_v10 = vpop.f32.mrf.mxu3  ;;  %v6563_v18 = vpop.f32.mrf.mxu2 }
 0x575   : > { %v7685_v28 = vmax.f32 %v7649_v1, 0.0  ;;  %v7332_v1 = vadd.f32 %v12167_v34, %v12092_v51  ;;  %v12755_v34 = vld [vmem:[#allocation10_spill] sm:$0xff] }
 0x577   : > { %7721 = vst.msk [vmem:[%s12245_s27 + $0x8] sm:$0xff] %vm4705_vm9, %v7685_v28 }
 0x578   : > { %v7523_v19 = vpop.f32.mrf.mxu1 }
 0x579   : > { %v7610_v3 = vadd.f32 %v7523_v19, %v7327_v30  ;;  %v7267_v30 = vpop.f32.mrf.mxu0 }
 0x57b   : > { %v7650_v60 = vadd.f32 %v12236_v61, %v7610_v3  ;;  %8561 = vmatmul.msk.bf16.gmra.mxu1 %vm4705_vm9, %v12752_v53  ;;  %v7035_v53 = vpop.f32.mrf.mxu3 }
 0x57d   : > { %v7686_v24 = vmax.f32 %v7650_v60, 0.0  ;;  %v7333_v60 = vadd.f32 %v12183_v9, %v12108_v29 }
 0x57f   : > { %7722 = vst.msk [vmem:[%s12245_s27 + $0x10] sm:$0xff] %vm4705_vm9, %v7686_v24 }
 0x580   : > { %v7525_v4 = vpop.f32.mrf.mxu1 }
 0x581   : > { %v7611_v58 = vadd.f32 %v7525_v4, %v7328_v11  ;;  %v7270_v4 = vpop.f32.mrf.mxu0 }
 0x583   : > { %v7651_v5 = vadd.f32 %v12236_v61, %v7611_v58  ;;  %v6565_v58 = vpop.f32.mrf.mxu2  ;;  %v7037_v29 = vpop.f32.mrf.mxu3 }
 0x585   : > { %v7687_v63 = vmax.f32 %v7651_v5, 0.0 }
 0x587   : > { %7723 = vst.msk [vmem:[%s12245_s27 + $0x18] sm:$0xff] %vm4705_vm9, %v7687_v63  ;;  %v7334_v63 = vadd.f32 %v12195_v33, %v12121_v44 }
 0x588   : > { %v7528_v0 = vpop.f32.mrf.mxu1 }
 0x589   : > { %v7612_v22 = vadd.f32 %v7528_v0, %v7329_v45 }
 0x58b   : > { %v7652_v56 = vadd.f32 %v12236_v61, %v7612_v22  ;;  %8562 = vmatmul.msk.bf16.gmra.mxu1 %vm4705_vm9, %v12753_v17  ;;  %v7272_v22 = vpop.f32.mrf.mxu0  ;;  %v6568_v17 = vpop.f32.mrf.mxu2 }
 0x58c   : > { %v7040_v44 = vpop.f32.mrf.mxu3 }
 0x58d   : > { %v7688_v38 = vmax.f32 %v7652_v56, 0.0 }
 0x58f   : > { %7724 = vst.msk [vmem:[%s12245_s27 + $0x20] sm:$0xff] %vm4705_vm9, %v7688_v38  ;;  %v7335_v38 = vadd.f32 %v12212_v26, %v12139_v6 }
 0x590   : > { %v7530_v7 = vpop.f32.mrf.mxu1 }
 0x591   : > { %v7613_v62 = vadd.f32 %v7530_v7, %v7330_v31 }
 0x593   : > { %v7653_v13 = vadd.f32 %v12236_v61, %v7613_v62 }
 0x595   : > { %v7689_v39 = vmax.f32 %v7653_v13, 0.0  ;;  %v12756_v13 = vld [vmem:[#allocation12_spill] sm:$0xff] }
 0x597   : > { %7725 = vst.msk [vmem:[%s12245_s27 + $0x28] sm:$0xff] %vm4705_vm9, %v7689_v39  ;;  %v12757_v39 = vld [vmem:[#allocation8_spill] sm:$0xff] }
 0x598   : > { %v7533_v8 = vpop.f32.mrf.mxu1 }
 0x599   : > { %v7614_v16 = vadd.f32 %v7533_v8, %v7331_v23  ;;  %v6630_v23 = vadd.f32 %v6558_v20, %v12757_v39  ;;  %v7275_v8 = vpop.f32.mrf.mxu0 }
 0x59b   : > { %v7654_v14 = vadd.f32 %v12236_v61, %v7614_v16  ;;  %8563 = vmatmul.msk.bf16.gmra.mxu1 %vm4705_vm9, %v12754_v41  ;;  %v7336_v16 = vadd.f32 %v12222_v15, %v12152_v42  ;;  %v7102_v41 = vadd.f32 %v7030_v52, %v6630_v23  ;;  %v12759_v15 = vld [vmem:[#allocation27_spill] sm:$0xff] }
 0x59d   : > { %v7690_v32 = vmax.f32 %v7654_v14, 0.0  ;;  %v6570_v14 = vpop.f32.mrf.mxu2  ;;  %v7337_v20 = vadd.f32 %v7265_v54, %v7102_v41 }
 0x59f   : > { %7726 = vst.msk [vmem:[%s12245_s27 + $0x30] sm:$0xff] %vm4705_vm9, %v7690_v32 }
 0x5a0   : > { %v7535_v28 = vpop.f32.mrf.mxu1 }
 0x5a1   : > { %v7615_v2 = vadd.f32 %v7535_v28, %v7332_v1  ;;  %v7042_v28 = vpop.f32.mrf.mxu3 }
 0x5a3   : > { %v7655_v19 = vadd.f32 %v12236_v61, %v7615_v2  ;;  %v12758_v2 = vld [vmem:[#allocation23_spill] sm:$0xff] }
 0x5a5   : > { %v7691_v3 = vmax.f32 %v7655_v19, 0.0  ;;  %v6631_v19 = vadd.f32 %v6560_v27, %v12758_v2 }
 0x5a7   : > { %7727 = vst.msk [vmem:[%s12245_s27 + $0x38] sm:$0xff] %vm4705_vm9, %v7691_v3 }
 0x5a8   : > { %v7538_v24 = vpop.f32.mrf.mxu1 }
 0x5a9   : > { %v7616_v11 = vadd.f32 %v7538_v24, %v7333_v60  ;;  %v7277_v60 = vpop.f32.mrf.mxu0 }
 0x5ab   : > { %v7656_v51 = vadd.f32 %v12236_v61, %v7616_v11  ;;  %8564 = vmatmul.msk.bf16.gmra.mxu1 %vm4705_vm9, %v12755_v34  ;;  %v6573_v11 = vpop.f32.mrf.mxu2  ;;  %v12760_v34 = vld [vmem:[#allocation25_spill] sm:$0xff] }
 0x5ad   : > { %v7692_v5 = vmax.f32 %v7656_v51, 0.0  ;;  %v7103_v51 = vadd.f32 %v7032_v10, %v6631_v19 }
 0x5af   : > { %7728 = vst.msk [vmem:[%s12245_s27 + $0x40] sm:$0xff] %vm4705_vm9, %v7692_v5  ;;  %v6632_v5 = vadd.f32 %v6563_v18, %v12760_v34  ;;  %v7338_v27 = vadd.f32 %v7267_v30, %v7103_v51 }
 0x5b0   : > { %v7540_v45 = vpop.f32.mrf.mxu1 }
 0x5b1   : > { %v7617_v0 = vadd.f32 %v7540_v45, %v7334_v63  ;;  %v7045_v63 = vpop.f32.mrf.mxu3 }
 0x5b3   : > { %v7657_v9 = vadd.f32 %v12236_v61, %v7617_v0  ;;  %v7104_v0 = vadd.f32 %v7035_v53, %v6632_v5  ;;  %v6575_v10 = vpop.f32.mrf.mxu2 }
 0x5b5   : > { %v7693_v56 = vmax.f32 %v7657_v9, 0.0  ;;  %v7280_v9 = vpop.f32.mrf.mxu0 }
 0x5b7   : > { %7729 = vst.msk [vmem:[%s12245_s27 + $0x48] sm:$0xff] %vm4705_vm9, %v7693_v56 }
 0x5b8   : > { %v7543_v31 = vpop.f32.mrf.mxu1 }
 0x5b9   : > { %v7618_v7 = vadd.f32 %v7543_v31, %v7335_v38  ;;  %v6633_v31 = vadd.f32 %v6565_v58, %v11952_v43 }
 0x5bb   : > { %v7658_v62 = vadd.f32 %v12236_v61, %v7618_v7  ;;  %8565 = vmatmul.msk.bf16.gmra.mxu1 %vm4705_vm9, %v12756_v13  ;;  %v7339_v7 = vadd.f32 %v7270_v4, %v7104_v0  ;;  %v7047_v13 = vpop.f32.mrf.mxu3  ;;  %v6578_v23 = vpop.f32.mrf.mxu2 }
 0x5bd   : > { %v7694_v33 = vmax.f32 %v7658_v62, 0.0  ;;  %v7282_v53 = vpop.f32.mrf.mxu0 }
 0x5bf   : > { %7730 = vst.msk [vmem:[%s12245_s27 + $0x50] sm:$0xff] %vm4705_vm9, %v7694_v33  ;;  %v7105_v33 = vadd.f32 %v7037_v29, %v6633_v31 }
 0x5c0   : > { %v7545_v6 = vpop.f32.mrf.mxu1 }
 0x5c1   : > { %v7619_v26 = vadd.f32 %v7545_v6, %v7336_v16  ;;  %v6634_v16 = vadd.f32 %v6568_v17, %v11964_v48  ;;  %v7340_v43 = vadd.f32 %v7272_v22, %v7105_v33  ;;  %v7361_v6 = vld [vmem:[#allocation2 + $0xa8] sm:$0x3] }
 0x5c3   : > { %v7659_v32 = vadd.f32 %v12236_v61, %v7619_v26  ;;  %v7106_v26 = vadd.f32 %v7040_v44, %v6634_v16  ;;  %v7050_v41 = vpop.f32.mrf.mxu3  ;;  %v6580_v48 = vpop.f32.mrf.mxu2 }
 0x5c5   : > { %v7695_v1 = vmax.f32 %v7659_v32, 0.0  ;;  %v7365_v32 = vunpack.c.l.b16 %v7361_v6  ;;  %v7285_v2 = vpop.f32.mrf.mxu0  ;;  %v7341_v19 = vadd.f32 %v7275_v8, %v7106_v26  ;;  %v6639_v26 = vadd.f32 %v6580_v48, %v12043_v55 }
 0x5c7   : > { %7731 = vst.msk [vmem:[%s12245_s27 + $0x58] sm:$0xff] %vm4705_vm9, %v7695_v1 }
 0x5c8   : > { %v7548_v3 = vpop.f32.mrf.mxu1 }
 0x5c9   : > { %v7620_v24 = vadd.f32 %v7548_v3, %v7337_v20  ;;  %v7366_v20 = vpack.c.b16 %v7365_v32, %v7365_v32 }
 0x5cb   : > { %v7660_v42 = vadd.f32 %v12236_v61, %v7620_v24  ;;  %8566 = vmatmul.msk.bf16.gmra.mxu1 %vm4705_vm9, %v12759_v15  ;;  %v7444_v44 = vshrl.u32 %v7366_v20, 16  ;;  %v7447_v51 = vshll.u32 %v7366_v20, 16 }
 0x5cd   : > { %v7696_v52 = vmax.f32 %v7660_v42, 0.0  ;;  %v7449_v34 = vrot.slane %v7447_v51, 2  ;;  %v7287_v5 = vpop.f32.mrf.mxu0 }
 0x5cf   : > { %7732 = vst.msk [vmem:[%s12245_s27 + $0x60] sm:$0xff] %vm4705_vm9, %v7696_v52  ;;  %v7446_v52 = vrot.slane %v7444_v44, 1 }
 0x5d0   : > { %v7550_v45 = vpop.f32.mrf.mxu1 }
 0x5d1   : > { %v7621_v54 = vadd.f32 %v7550_v45, %v7338_v27  ;;  %v6583_v27 = vpop.f32.mrf.mxu2 }
 0x5d3   : > { %v7661_v56 = vadd.f32 %v12236_v61, %v7621_v54 }
 0x5d5   : > { %v7697_v38 = vmax.f32 %v7661_v56, 0.0  ;;  %v6637_v56 = vadd.f32 %v6575_v10, %v12012_v21  ;;  %v6638_v21 = vadd.f32 %v6578_v23, %v12024_v49 }
 0x5d7   : > { %7733 = vst.msk [vmem:[%s12245_s27 + $0x68] sm:$0xff] %vm4705_vm9, %v7697_v38 }
 0x5d8   : > { %v7553_v62 = vpop.f32.mrf.mxu1 }
 0x5d9   : > { %v7622_v18 = vadd.f32 %v7553_v62, %v7339_v7  ;;  %v7109_v62 = vadd.f32 %v7047_v13, %v6637_v56  ;;  %v6585_v33 = vpop.f32.mrf.mxu2 }
 0x5da   : > { %v6641_v44 = vadd.f32 %v6585_v33, %v12072_v25 }
 0x5db   : > { %v7662_v30 = vadd.f32 %v12236_v61, %v7622_v18  ;;  %8567 = vmatmul.msk.bf16.gmra.mxu1 %vm4705_vm9, %v11938_v46  ;;  %v6635_v46 = vadd.f32 %v6570_v14, %v11983_v57  ;;  %v7052_v57 = vpop.f32.mrf.mxu3  ;;  %v6636_v14 = vadd.f32 %v6573_v11, %v11993_v35  ;;  %v7290_v18 = vpop.f32.mrf.mxu0 }
 0x5dc   : > { %v7111_v23 = vadd.f32 %v7052_v57, %v6639_v26 }
 0x5dd   : > { %v7698_v39 = vmax.f32 %v7662_v30, 0.0  ;;  %v7107_v3 = vadd.f32 %v7042_v28, %v6635_v46  ;;  %v7108_v45 = vadd.f32 %v7045_v63, %v6636_v14 }
 0x5df   : > { %7734 = vst.msk [vmem:[%s12245_s27 + $0x70] sm:$0xff] %vm4705_vm9, %v7698_v39  ;;  %v7342_v8 = vadd.f32 %v7277_v60, %v7107_v3  ;;  %v7343_v35 = vadd.f32 %v7280_v9, %v7108_v45  ;;  %v12761_v60 = vld [vmem:[#allocation33_spill] sm:$0xff]  ;;  %v7344_v9 = vadd.f32 %v7282_v53, %v7109_v62 }
 0x5e0   : > { %v7555_v58 = vpop.f32.mrf.mxu1 }
 0x5e1   : > { %v7623_v4 = vadd.f32 %v7555_v58, %v7340_v43  ;;  %v7110_v43 = vadd.f32 %v7050_v41, %v6638_v21  ;;  %v6588_v6 = vpop.f32.mrf.mxu2  ;;  %v6640_v41 = vadd.f32 %v6583_v27, %v12055_v40 }
 0x5e3   : > { %v7663_v29 = vadd.f32 %v12236_v61, %v7623_v4  ;;  %v7055_v11 = vpop.f32.mrf.mxu3  ;;  %v7292_v58 = vpop.f32.mrf.mxu0 }
 0x5e4   : > { %v7112_v48 = vadd.f32 %v7055_v11, %v6640_v41 }
 0x5e5   : > { %v7699_v1 = vmax.f32 %v7663_v29, 0.0  ;;  %v7345_v29 = vadd.f32 %v7285_v2, %v7110_v43 }
 0x5e6   : > { %v7347_v51 = vadd.f32 %v7290_v18, %v7112_v48 }
 0x5e7   : > { %7735 = vst.msk [vmem:[%s12245_s27 + $0x78] sm:$0xff] %vm4705_vm9, %v7699_v1 }
 0x5e8   : > { %v7558_v17 = vpop.f32.mrf.mxu1 }
 0x5e9   : > { %v7624_v22 = vadd.f32 %v7558_v17, %v7341_v19  ;;  %v7346_v17 = vadd.f32 %v7287_v5, %v7111_v23  ;;  %v6590_v20 = vpop.f32.mrf.mxu2 }
 0x5eb   : > { %v7664_v24 = vadd.f32 %v12236_v61, %v7624_v22  ;;  %8568 = vmatmul.msk.bf16.gmra.mxu1 %vm4705_vm9, %v11945_v36  ;;  %v7450_v36 = vor.u32 %v7449_v34, %v7446_v52  ;;  %v7057_v16 = vpop.f32.mrf.mxu3  ;;  %v7295_v19 = vpop.f32.mrf.mxu0  ;;  %v6642_v34 = vadd.f32 %v6588_v6, %v12084_v47 }
 0x5ed   : > { %v7700_v42 = vmax.f32 %v7664_v24, 0.0  ;;  %v7451_v31 = vsel %vm1407_vm5, %v12761_v60, %v7450_v36 }
 0x5ef   : > { %7736 = vst.msk [vmem:[%s12245_s27 + $0x80] sm:$0xff] %vm4705_vm9, %v7700_v42 }
 0x5f0   : > { %v7560_v15 = vpop.f32.mrf.mxu1 }
 0x5f1   : > { %v7625_v28 = vadd.f32 %v7560_v15, %v7342_v8  ;;  %v6593_v14 = vpop.f32.mrf.mxu2  ;;  %v7113_v8 = vadd.f32 %v7057_v16, %v6641_v44 }
 0x5f3   : > { %v7665_v54 = vadd.f32 %v12236_v61, %v7625_v28  ;;  %v7060_v1 = vpop.f32.mrf.mxu3  ;;  %v7297_v40 = vpop.f32.mrf.mxu0  ;;  %v7348_v5 = vadd.f32 %v7292_v58, %v7113_v8 }
 0x5f4   : > { %v7114_v45 = vadd.f32 %v7060_v1, %v6642_v34 }
 0x5f5   : > { %v7701_v0 = vmax.f32 %v7665_v54, 0.0 }
 0x5f7   : > { %7737 = vst.msk [vmem:[%s12245_s27 + $0x88] sm:$0xff] %vm4705_vm9, %v7701_v0 }
 0x5f8   : > { %v7563_v38 = vpop.f32.mrf.mxu1 }
 0x5f9   : > { %v7626_v7 = vadd.f32 %v7563_v38, %v7343_v35  ;;  %v6595_v0 = vpop.f32.mrf.mxu2  ;;  %v12762_v35 = vld [vmem:[#allocation26_spill] sm:$0xff]  ;;  %v7349_v38 = vadd.f32 %v7295_v19, %v7114_v45  ;;  %v12765_v19 = vld [vmem:[#allocation36_spill] sm:$0xff] }
 0x5fa   : > { %v6643_v11 = vadd.f32 %v6590_v20, %v12762_v35 }
 0x5fb   : > { %v7666_v63 = vadd.f32 %v12236_v61, %v7626_v7  ;;  %8569 = vmatmul.msk.bf16.gmra.mxu1 %vm4705_vm9, %v7451_v31  ;;  %v7062_v24 = vpop.f32.mrf.mxu3  ;;  %v7300_v54 = vpop.f32.mrf.mxu0 }
 0x5fc   : > { %v7115_v7 = vadd.f32 %v7062_v24, %v6643_v11 }
 0x5fd   : > { %v7702_v30 = vmax.f32 %v7666_v63, 0.0 }
 0x5ff   : > { %7738 = vst.msk [vmem:[%s12245_s27 + $0x90] sm:$0xff] %vm4705_vm9, %v7702_v30  ;;  %v12763_v30 = vld [vmem:[#allocation38_spill] sm:$0xff] }
 0x600   : > { %v7565_v10 = vpop.f32.mrf.mxu1  ;;  %v6644_v21 = vadd.f32 %v6593_v14, %v12763_v30 }
 0x601   : > { %v7627_v39 = vadd.f32 %v7565_v10, %v7344_v9  ;;  %v6598_v33 = vpop.f32.mrf.mxu2  ;;  %v7350_v9 = vadd.f32 %v7297_v40, %v7115_v7 }
 0x603   : > { %v7667_v13 = vadd.f32 %v12236_v61, %v7627_v39  ;;  %v7065_v28 = vpop.f32.mrf.mxu3  ;;  %v7302_v18 = vpop.f32.mrf.mxu0 }
 0x604   : > { %v7116_v16 = vadd.f32 %v7065_v28, %v6644_v21 }
 0x605   : > { %v7703_v4 = vmax.f32 %v7667_v13, 0.0 }
 0x607   : > { %7739 = vst.msk [vmem:[%s12245_s27 + $0x98] sm:$0xff] %vm4705_vm9, %v7703_v4  ;;  %v12764_v4 = vld [vmem:[#allocation4_spill] sm:$0xff] }
 0x608   : > { %v7568_v32 = vpop.f32.mrf.mxu1  ;;  %v6645_v6 = vadd.f32 %v6595_v0, %v12764_v4 }
 0x609   : > { %v7628_v49 = vadd.f32 %v7568_v32, %v7345_v29  ;;  %v7351_v29 = vadd.f32 %v7300_v54, %v7116_v16  ;;  %v6600_v32 = vpop.f32.mrf.mxu2 }
 0x60b   : > { %v7668_v53 = vadd.f32 %v12236_v61, %v7628_v49  ;;  %v7067_v31 = vpop.f32.mrf.mxu3  ;;  %v7305_v26 = vpop.f32.mrf.mxu0 }
 0x60d   : > { %v7704_v46 = vmax.f32 %v7668_v53, 0.0  ;;  %v7117_v53 = vadd.f32 %v7067_v31, %v6645_v6 }
 0x60f   : > { %7740 = vst.msk [vmem:[%s12245_s27 + $0xa0] sm:$0xff] %vm4705_vm9, %v7704_v46  ;;  %v7352_v20 = vadd.f32 %v7302_v18, %v7117_v53 }
 0x610   : > { %v7570_v22 = vpop.f32.mrf.mxu1 }
 0x611   : > { %v7629_v55 = vadd.f32 %v7570_v22, %v7346_v17  ;;  %v6646_v17 = vadd.f32 %v6598_v33, %v12765_v19 }
 0x613   : > { %v7669_v2 = vadd.f32 %v12236_v61, %v7629_v55  ;;  %v7070_v13 = vpop.f32.mrf.mxu3  ;;  %v7307_v55 = vpop.f32.mrf.mxu0 }
 0x615   : > { %v7705_v3 = vmax.f32 %v7669_v2, 0.0  ;;  %v6603_v2 = vpop.f32.mrf.mxu2 }
 0x617   : > { %7741 = vst.msk [vmem:[%s12245_s27 + $0xa8] sm:$0xff] %vm4705_vm9, %v7705_v3  ;;  %v7118_v3 = vadd.f32 %v7070_v13, %v6646_v17 }
 0x618   : > { %v7573_v42 = vpop.f32.mrf.mxu1 }
 0x619   : > { %v7630_v57 = vadd.f32 %v7573_v42, %v7347_v51  ;;  %v12766_v51 = vld [vmem:[#allocation31_spill] sm:$0xff]  ;;  %v7353_v40 = vadd.f32 %v7305_v26, %v7118_v3 }
 0x61a   : > { %v6647_v42 = vadd.f32 %v6600_v32, %v12766_v51 }
 0x61b   : > { %v7670_v15 = vadd.f32 %v12236_v61, %v7630_v57  ;;  %v7072_v41 = vpop.f32.mrf.mxu3 }
 0x61d   : > { %v7706_v52 = vmax.f32 %v7670_v15, 0.0  ;;  %v7119_v15 = vadd.f32 %v7072_v41, %v6647_v42 }
 0x61f   : > { %7742 = vst.msk [vmem:[%s12245_s27 + $0xb0] sm:$0xff] %vm4705_vm9, %v7706_v52  ;;  %v7310_v52 = vpop.f32.mrf.mxu0  ;;  %v7354_v45 = vadd.f32 %v7307_v55, %v7119_v15 }
 0x620   : > { %v7575_v27 = vpop.f32.mrf.mxu1 }
 0x621   : > { %v7631_v25 = vadd.f32 %v7575_v27, %v7348_v5  ;;  %v6605_v5 = vpop.f32.mrf.mxu2  ;;  %v12767_v27 = vld [vmem:[#allocation30_spill] sm:$0xff] }
 0x623   : > { %v7671_v36 = vadd.f32 %v12236_v61, %v7631_v25  ;;  %v7075_v57 = vpop.f32.mrf.mxu3  ;;  %v6648_v25 = vadd.f32 %v6603_v2, %v12767_v27 }
 0x625   : > { %v7707_v56 = vmax.f32 %v7671_v36, 0.0 }
 0x627   : > { %7743 = vst.msk [vmem:[%s12245_s27 + $0xb8] sm:$0xff] %vm4705_vm9, %v7707_v56  ;;  %v7120_v56 = vadd.f32 %v7075_v57, %v6648_v25  ;;  %v7312_v11 = vpop.f32.mrf.mxu0 }
 0x628   : > { %v7578_v60 = vpop.f32.mrf.mxu1 }
 0x629   : > { %v7632_v47 = vadd.f32 %v7578_v60, %v7349_v38  ;;  %v6608_v60 = vpop.f32.mrf.mxu2  ;;  %v7355_v7 = vadd.f32 %v7310_v52, %v7120_v56 }
 0x62b   : > { %v7672_v62 = vadd.f32 %v12236_v61, %v7632_v47  ;;  %v7077_v0 = vpop.f32.mrf.mxu3  ;;  %v12768_v47 = vld [vmem:[#allocation32_spill] sm:$0xff] }
 0x62c   : > { %v6649_v31 = vadd.f32 %v6605_v5, %v12768_v47 }
 0x62d   : > { %v7708_v63 = vmax.f32 %v7672_v62, 0.0 }
 0x62f   : > { %7744 = vst.msk [vmem:[%s12245_s27 + $0xc0] sm:$0xff] %vm4705_vm9, %v7708_v63  ;;  %v7121_v63 = vadd.f32 %v7077_v0, %v6649_v31 }
 0x630   : > { %v7580_v10 = vpop.f32.mrf.mxu1 }
 0x631   : > { %v7633_v39 = vadd.f32 %v7580_v10, %v7350_v9  ;;  %v7315_v9 = vpop.f32.mrf.mxu0  ;;  %v6650_v10 = vadd.f32 %v6608_v60, %v12197_v50  ;;  %v6610_v16 = vpop.f32.mrf.mxu2 }
 0x633   : > { %v7673_v43 = vadd.f32 %v12236_v61, %v7633_v39  ;;  %v7080_v30 = vpop.f32.mrf.mxu3  ;;  %v7356_v39 = vadd.f32 %v7312_v11, %v7121_v63 }
 0x635   : > { %v7709_v58 = vmax.f32 %v7673_v43, 0.0 }
 0x637   : > { %7745 = vst.msk [vmem:[%s12245_s27 + $0xc8] sm:$0xff] %vm4705_vm9, %v7709_v58  ;;  %v7122_v58 = vadd.f32 %v7080_v30, %v6650_v10 }
 0x638   : > { %v7583_v49 = vpop.f32.mrf.mxu1 }
 0x639   : > { %v7634_v23 = vadd.f32 %v7583_v49, %v7351_v29  ;;  %v6651_v29 = vadd.f32 %v6610_v16, %v12210_v37  ;;  %v7357_v32 = vadd.f32 %v7315_v9, %v7122_v58  ;;  %v7317_v50 = vpop.f32.mrf.mxu0  ;;  %v6613_v53 = vpop.f32.mrf.mxu2 }
 0x63a   : > { %v6652_v17 = vadd.f32 %v6613_v53, %v12217_v59 }
 0x63b   : > { %v7674_v1 = vadd.f32 %v12236_v61, %v7634_v23  ;;  %v7082_v26 = vpop.f32.mrf.mxu3 }
 0x63d   : > { %v7710_v46 = vmax.f32 %v7674_v1, 0.0  ;;  %v7123_v1 = vadd.f32 %v7082_v26, %v6651_v29 }
 0x63f   : > { %7746 = vst.msk [vmem:[%s12245_s27 + $0xd0] sm:$0xff] %vm4705_vm9, %v7710_v46 }
 0x640   : > { %v7585_v22 = vpop.f32.mrf.mxu1 }
 0x641   : > { %v7635_v48 = vadd.f32 %v7585_v22, %v7352_v20  ;;  %v7358_v20 = vadd.f32 %v7317_v50, %v7123_v1  ;;  %v7320_v55 = vpop.f32.mrf.mxu0  ;;  %v6615_v3 = vpop.f32.mrf.mxu2 }
 0x642   : > { %v6653_v51 = vadd.f32 %v6615_v3, %v12229_v12 }
 0x643   : > { %v7675_v24 = vadd.f32 %v12236_v61, %v7635_v48  ;;  %v7085_v19 = vpop.f32.mrf.mxu3 }
 0x644   : > { %v7124_v48 = vadd.f32 %v7085_v19, %v6652_v17 }
 0x645   : > { %v7711_v44 = vmax.f32 %v7675_v24, 0.0 }
 0x647   : > { %7747 = vst.msk [vmem:[%s12245_s27 + $0xd8] sm:$0xff] %vm4705_vm9, %v7711_v44  ;;  %v7359_v44 = vadd.f32 %v7320_v55, %v7124_v48 }
 0x648   : > { %v7588_v14 = vpop.f32.mrf.mxu1 }
 0x649   : > { %v7636_v8 = vadd.f32 %v7588_v14, %v7353_v40 }
 0x64b   : > { %v7676_v34 = vadd.f32 %v12236_v61, %v7636_v8  ;;  %v7087_v42 = vpop.f32.mrf.mxu3  ;;  %v7322_v8 = vpop.f32.mrf.mxu0 }
 0x64c   : > { %v7125_v57 = vadd.f32 %v7087_v42, %v6653_v51 }
 0x64d   : > { %v7712_v28 = vmax.f32 %v7676_v34, 0.0 }
 0x64e   : > { %v7360_v52 = vadd.f32 %v7322_v8, %v7125_v57 }
 0x64f   : > { %7748 = vst.msk [vmem:[%s12245_s27 + $0xe0] sm:$0xff] %vm4705_vm9, %v7712_v28 }
 0x650   : > { %v7590_v54 = vpop.f32.mrf.mxu1 }
 0x651   : > { %v7637_v36 = vadd.f32 %v7590_v54, %v7354_v45 }
 0x653   : > { %v7677_v35 = vadd.f32 %v12236_v61, %v7637_v36 }
 0x655   : > { %v7713_v38 = vmax.f32 %v7677_v35, 0.0 }
 0x657   : > { %7749 = vst.msk [vmem:[%s12245_s27 + $0xe8] sm:$0xff] %vm4705_vm9, %v7713_v38 }
 0x658   : > { %v7593_v62 = vpop.f32.mrf.mxu1 }
 0x659   : > { %v7638_v18 = vadd.f32 %v7593_v62, %v7355_v7 }
 0x65b   : > { %v7678_v33 = vadd.f32 %v12236_v61, %v7638_v18 }
 0x65d   : > { %v7714_v21 = vmax.f32 %v7678_v33, 0.0 }
 0x65f   : > { %7750 = vst.msk [vmem:[%s12245_s27 + $0xf0] sm:$0xff] %vm4705_vm9, %v7714_v21 }
 0x660   : > { %v7595_v43 = vpop.f32.mrf.mxu1 }
 0x661   : > { %v7639_v13 = vadd.f32 %v7595_v43, %v7356_v39 }
 0x663   : > { %v7679_v4 = vadd.f32 %v12236_v61, %v7639_v13 }
 0x665   : > { %v7715_v6 = vmax.f32 %v7679_v4, 0.0 }
 0x667   : > { %7751 = vst.msk [vmem:[%s12245_s27 + $0xf8] sm:$0xff] %vm4705_vm9, %v7715_v6 }
 0x668   : > { %v7598_v49 = vpop.f32.mrf.mxu1 }
 0x669   : > { %v7640_v23 = vadd.f32 %v7598_v49, %v7357_v32 }
 0x66b   : > { %v7680_v46 = vadd.f32 %v12236_v61, %v7640_v23 }
 0x66d   : > { %v7716_v41 = vmax.f32 %v7680_v46, 0.0 }
 0x66f   : > { %7752 = vst.msk [vmem:[%s12245_s27 + $0x100] sm:$0xff] %vm4705_vm9, %v7716_v41 }
 0x670   : > { %v7600_v22 = vpop.f32.mrf.mxu1 }
 0x671   : > { %v7641_v37 = vadd.f32 %v7600_v22, %v7358_v20 }
 0x673   : > { %v7681_v2 = vadd.f32 %v12236_v61, %v7641_v37 }
 0x675   : > { %v7717_v24 = vmax.f32 %v7681_v2, 0.0 }
 0x677   : > { %7753 = vst.msk [vmem:[%s12245_s27 + $0x108] sm:$0xff] %vm4705_vm9, %v7717_v24 }
 0x678   : > { %v7603_v59 = vpop.f32.mrf.mxu1 }
 0x679   : > { %v7642_v40 = vadd.f32 %v7603_v59, %v7359_v44 }
 0x67b   : > { %v7682_v14 = vadd.f32 %v12236_v61, %v7642_v40 }
 0x67d   : > { %v7718_v15 = vmax.f32 %v7682_v14, 0.0 }
 0x67f   : > { %7754 = vst.msk [vmem:[%s12245_s27 + $0x110] sm:$0xff] %vm4705_vm9, %v7718_v15 }
 0x680   : > { %v7605_v34 = vpop.f32.mrf.mxu1 }
 0x681   : > { %v7643_v5 = vadd.f32 %v7605_v34, %v7360_v52 }
 0x683   : > { %v7683_v28 = vadd.f32 %v12236_v61, %v7643_v5 }
 0x685   : > { %v7719_v27 = vmax.f32 %v7683_v28, 0.0 }
 0x687   : > { %7755 = vst.msk [vmem:[%s12245_s27 + $0x118] sm:$0xff] %vm4705_vm9, %v7719_v27 }
 0x688 PF: > { %s15_s18 = sadd.s32 1, %s8947_s18  }
 0x689   : > { %p12_p4 = scmp.ge.s32.totalorder %s15_s18, 4  }
 0x68b   :  { %14 = sbr.rel (!%p12_p4) target bundleno = 1 (0x1), region = 86 }

</bundles_post_ra>
